<compile_context>
chip_gen: v7x
topology: tpu7x:2x2x1
jax: 0.10.0
libtpu: 0.0.40
codegen_flags: <defaults>
</compile_context>

<pallas_src>
import functools

import jax
import jax.numpy as jnp
from jax.experimental import pallas as pl
from jax.experimental.pallas import tpu as pltpu


CPAD = 8  # block-1 input channels padded 3 -> 8 (zero pad, exact)


def _unpack_weights(ref, cin, cout):
    """Per-block packed weight slab rows: [ws(cin); wr(cin); wt[k](cout), k=0..2]."""
    ws = ref[pl.ds(0, cin), :]
    wr = ref[pl.ds(cin, cin), :]
    base = 2 * cin
    taps = tuple(ref[pl.ds(base + k * cout, cout), :] for k in range(3))
    return ws, wr, taps


# --------------------------------------------------------------------------
# Single fused kernel: 3 STGCN blocks + (T,N) mean pool + 2-layer MLP head.
# Activations are a 2-D (T*N*B, C) slab; row index r = t*(N*B) + n*B + b.
# --------------------------------------------------------------------------
def _fused_kernel(x_ref, aexp_ref, pool_ref,
                  wb1_ref, bb1_ref,
                  wb2_hbm, bb2_ref,
                  wb3_hbm, bb3_ref,
                  w1_hbm, b1_ref, w2_ref, b2_ref,
                  o_ref,
                  wb2_v, wb3_v, w1_v, ts1, ts2, ts3, sems,
                  *, nb):
    R = x_ref.shape[0]            # R = T * N * B rows
    f32 = jnp.float32

    # Prefetch block-2/3 + head weights HBM -> VMEM; overlaps block-1/2 compute.
    cp2 = pltpu.make_async_copy(wb2_hbm, wb2_v, sems.at[0])
    cp3 = pltpu.make_async_copy(wb3_hbm, wb3_v, sems.at[1])
    cph = pltpu.make_async_copy(w1_hbm, w1_v, sems.at[2])
    cp2.start()
    cp3.start()
    cph.start()

    aexp = aexp_ref[...]          # (R, R) = I_T ⊗ adj^T ⊗ I_B (node aggregation)

    def block(h, ws, wr, taps, bb_ref, ts_ref):
        cout = ws.shape[1]
        bs = bb_ref[pl.ds(0, 1), :]
        bt = bb_ref[pl.ds(1, 1), :]
        br = bb_ref[pl.ds(2, 1), :]

        # residual 1x1 conv (no relu)
        res = jnp.dot(h, wr, preferred_element_type=f32) + br

        # spatial graph conv: node aggregation first (PyTorch order), then
        # 1x1 conv + bias + relu
        agg = jnp.dot(aexp, h, preferred_element_type=f32)
        s = jnp.maximum(jnp.dot(agg, ws, preferred_element_type=f32) + bs, 0.0)

        # temporal (3,1) conv, 'same' padding along T: write s once into a
        # zero-bordered scratch, then three accumulating dots from row-shifted
        # views (no im2col concatenate, no lane relayout).
        ts_ref[pl.ds(0, nb), :] = jnp.zeros((nb, cout), f32)
        ts_ref[pl.ds(nb + R, nb), :] = jnp.zeros((nb, cout), f32)
        ts_ref[pl.ds(nb, R), :] = s
        tmp = (jnp.dot(ts_ref[pl.ds(0, R), :], taps[0],        # value at t-1
                       preferred_element_type=f32)
               + jnp.dot(s, taps[1], preferred_element_type=f32)        # t
               + jnp.dot(ts_ref[pl.ds(2 * nb, R), :], taps[2],  # value at t+1
                         preferred_element_type=f32)
               + bt)
        return jnp.maximum(tmp, 0.0) + res

    # block 1 — weights came on the auto VMEM path; runs under the prefetch DMAs
    c1 = wb1_ref.shape[1]
    ws1, wr1, taps1 = _unpack_weights(wb1_ref, CPAD, c1)
    h = block(x_ref[...], ws1, wr1, taps1, bb1_ref, ts1)

    # block 2
    cp2.wait()
    c2 = wb2_v.shape[1]
    ws2, wr2, taps2 = _unpack_weights(wb2_v, c1, c2)
    h = block(h, ws2, wr2, taps2, bb2_ref, ts2)

    # block 3
    cp3.wait()
    c3 = wb3_v.shape[1]
    ws3, wr3, taps3 = _unpack_weights(wb3_v, c2, c3)
    h = block(h, ws3, wr3, taps3, bb3_ref, ts3)

    # head: (T,N) mean pool as one matmul with the precomputed pooling matrix,
    # then Linear(256,128) + ReLU + Linear(128,num_classes).
    # TODO(synk): nn.Dropout(0.5) is identity in eval mode; not applied here.
    pooled = jnp.dot(pool_ref[...], h, preferred_element_type=f32)
    cph.wait()
    hid = jnp.maximum(
        jnp.dot(pooled, w1_v[...], preferred_element_type=f32) + b1_ref[...], 0.0)
    o_ref[...] = jnp.dot(hid, w2_ref[...], preferred_element_type=f32) + b2_ref[...]


# --------------------------------------------------------------------------
# One-time, x-independent preprocessing (hoisted out of the jitted forward)
# --------------------------------------------------------------------------
def prepare_params(params, batch, time, nodes):
    f32 = jnp.float32
    adj = params["adj"].astype(f32)

    prep = {
        # kron-expanded adjacency: one (R,R) matmul == per-(t,b) node aggregation
        "aexp": jnp.kron(jnp.eye(time, dtype=f32),
                         jnp.kron(adj.T, jnp.eye(batch, dtype=f32))),
        # mean over (T, N) per batch element, as one matmul
        "pool": jnp.kron(jnp.ones((1, time), f32),
                         jnp.kron(jnp.ones((1, nodes), f32),
                                  jnp.eye(batch, dtype=f32))) / (nodes * time),
    }

    def pack_block(p, cin_pad=None):
        ws, wr = p["ws"].astype(f32), p["wr"].astype(f32)
        if cin_pad is not None and ws.shape[0] < cin_pad:
            pad = cin_pad - ws.shape[0]
            ws = jnp.pad(ws, ((0, pad), (0, 0)))
            wr = jnp.pad(wr, ((0, pad), (0, 0)))
        K, ci, co = p["wt"].shape
        wt = p["wt"].astype(f32).reshape(K * ci, co)      # rows: [tap0; tap1; tap2]
        w = jnp.concatenate([ws, wr, wt], axis=0)         # packed weight slab
        b = jnp.concatenate([p["bs"].astype(f32), p["bt"].astype(f32),
                             p["br"].astype(f32)], axis=0)  # rows: [bs; bt; br]
        return w, b

    prep["wb1"], prep["bb1"] = pack_block(params["block1"], cin_pad=CPAD)
    prep["wb2"], prep["bb2"] = pack_block(params["block2"])
    prep["wb3"], prep["bb3"] = pack_block(params["block3"])

    f = params["fc"]
    prep["w1"], prep["b1"] = f["w1"].astype(f32), f["b1"].astype(f32)
    prep["w2"], prep["b2"] = f["w2"].astype(f32), f["b2"].astype(f32)
    return prep


# --------------------------------------------------------------------------
# Wrapper: x layout plumbing + single pallas_call
# --------------------------------------------------------------------------
def action_recognition_net(x, prep):
    B, T, N, Cin = x.shape
    f32 = jnp.float32
    nb = N * B
    R = T * nb

    # pad input channels 3 -> 8 and lay rows out t-major: r = t*(N*B) + n*B + b
    xp = jnp.pad(x.astype(f32), ((0, 0), (0, 0), (0, 0), (0, CPAD - Cin)))
    x2d = jnp.transpose(xp, (1, 2, 0, 3)).reshape(R, CPAD)

    num_classes = prep["w2"].shape[1]
    c1 = prep["wb1"].shape[1]
    c2 = prep["wb2"].shape[1]
    c3 = prep["wb3"].shape[1]

    vmem = pl.BlockSpec(memory_space=pltpu.MemorySpace.VMEM)
    hbm = pl.BlockSpec(memory_space=pl.ANY)   # prefetched manually inside kernel

    kernel = functools.partial(_fused_kernel, nb=nb)
    return pl.pallas_call(
        kernel,
        out_shape=jax.ShapeDtypeStruct((B, num_classes), f32),
        in_specs=[
            vmem,   # x2d
            vmem,   # aexp
            vmem,   # pool
            vmem,   # wb1 (block-1 packed weights, auto path: needed first)
            vmem,   # bb1
            hbm,    # wb2 (block-2 packed weights, in-kernel prefetch)
            vmem,   # bb2
            hbm,    # wb3 (block-3 packed weights, in-kernel prefetch)
            vmem,   # bb3
            hbm,    # w1  (head weight, in-kernel prefetch)
            vmem,   # b1
            vmem,   # w2
            vmem,   # b2
        ],
        out_specs=vmem,
        scratch_shapes=[
            pltpu.VMEM(prep["wb2"].shape, f32),          # prefetch landing bufs
            pltpu.VMEM(prep["wb3"].shape, f32),
            pltpu.VMEM(prep["w1"].shape, f32),
            pltpu.VMEM((R + 2 * nb, c1), f32),           # zero-bordered temporal
            pltpu.VMEM((R + 2 * nb, c2), f32),           # scratch per block
            pltpu.VMEM((R + 2 * nb, c3), f32),
            pltpu.SemaphoreType.DMA((3,)),
        ],
        # Everything (weights + activations, a few MB) is VMEM resident in a
        # single grid-less launch; 32 MiB leaves headroom on all generations.
        compiler_params=pltpu.CompilerParams(vmem_limit_bytes=32 * 1024 * 1024),
    )(x2d, prep["aexp"], prep["pool"],
      prep["wb1"], prep["bb1"],
      prep["wb2"], prep["bb2"],
      prep["wb3"], prep["bb3"],
      prep["w1"], prep["b1"], prep["w2"], prep["b2"])


# --------------------------------------------------------------------------
# Deterministic parameter init (synthetic; mirrors the PyTorch module shapes)
# --------------------------------------------------------------------------
def init_params(key, n_nodes, num_classes=20):
    dims = [3, 64, 128, 256]
    hidden = 128

    # deterministic normalized ring graph with self loops
    eye = jnp.eye(n_nodes, dtype=jnp.float32)
    ring = jnp.roll(eye, 1, axis=1) + jnp.roll(eye, -1, axis=1)
    adj = eye + ring
    adj = adj / jnp.sum(adj, axis=1, keepdims=True)

    keys = iter(jax.random.split(key, 32))
    params = {"adj": adj}
    for i in range(3):
        cin, cout = dims[i], dims[i + 1]
        params[f"block{i + 1}"] = {
            "ws": jax.random.normal(next(keys), (cin, cout), jnp.float32) / jnp.sqrt(cin),
            "bs": jax.random.normal(next(keys), (1, cout), jnp.float32) * 0.01,
            "wt": jax.random.normal(next(keys), (3, cout, cout), jnp.float32) / jnp.sqrt(3.0 * cout),
            "bt": jax.random.normal(next(keys), (1, cout), jnp.float32) * 0.01,
            "wr": jax.random.normal(next(keys), (cin, cout), jnp.float32) / jnp.sqrt(cin),
            "br": jax.random.normal(next(keys), (1, cout), jnp.float32) * 0.01,
        }
    params["fc"] = {
        "w1": jax.random.normal(next(keys), (dims[-1], hidden), jnp.float32) / jnp.sqrt(dims[-1]),
        "b1": jax.random.normal(next(keys), (1, hidden), jnp.float32) * 0.01,
        "w2": jax.random.normal(next(keys), (hidden, num_classes), jnp.float32) / jnp.sqrt(hidden),
        "b2": jax.random.normal(next(keys), (1, num_classes), jnp.float32) * 0.01,
    }
    return params


# --------------------------------------------------------------------------
# Pure-JAX reference (follows PyTorch op ordering exactly)
# --------------------------------------------------------------------------
def ref_forward(x, params):
    adj = params["adj"]
    h = x
    for name in ("block1", "block2", "block3"):
        p = params[name]
        res = jnp.einsum("btnc,co->btno", h, p["wr"]) + p["br"][0]
        s = jnp.einsum("btnc,nm->btmc", h, adj)
        s = jax.nn.relu(jnp.einsum("btmc,co->btmo", s, p["ws"]) + p["bs"][0])
        K = p["wt"].shape[0]
        T = h.shape[1]
        pad = jnp.pad(s, ((0, 0), (K // 2, K // 2), (0, 0), (0, 0)))
        out = jnp.zeros(s.shape[:-1] + (p["wt"].shape[-1],), jnp.float32) + p["bt"][0]
        for k in range(K):
            out = out + jnp.einsum("btnc,co->btno", pad[:, k:k + T], p["wt"][k])
        h = jax.nn.relu(out) + res
    pooled = jnp.mean(h, axis=(1, 2))
    f = params["fc"]
    hh = jax.nn.relu(pooled @ f["w1"] + f["b1"][0])
    return hh @ f["w2"] + f["b2"][0]


if __name__ == "__main__":
    B, T, N, C = 2, 8, 16, 3     # batch, time, graph nodes, input channels (module fixes C=3)
    key = jax.random.PRNGKey(0)
    kx, kp = jax.random.split(key)
    x = jax.random.normal(kx, (B, T, N, C), jnp.float32)
    params = init_params(kp, N)

    # one-time, x-independent preprocessing (hoisted out of the forward path)
    prep = prepare_params(params, B, T, N)

    net = jax.jit(action_recognition_net)
    out = jax.block_until_ready(net(x, prep))

    # reference at full f32 matmul precision so the check isn't limited by the
    # reference's own MXU truncation
    with jax.default_matmul_precision("highest"):
        ref = jax.block_until_ready(ref_forward(x, params))

    assert out.shape == (B, 20), out.shape
    rel_err = float(jnp.max(jnp.abs(out - ref)) / (jnp.max(jnp.abs(ref)) + 1e-6))
    assert rel_err < 1e-3, f"mismatch vs reference, rel_err={rel_err}"
    print("KERNEL_OK")
</pallas_src>

<mosaic_0001>
module attributes {stable_mosaic.version = 11 : i64} {
  func.func @_fused_kernel(%arg0: memref<256x8xf32, #tpu.memory_space<vmem>>, %arg1: memref<256x256xf32, #tpu.memory_space<vmem>>, %arg2: memref<2x256xf32, #tpu.memory_space<vmem>>, %arg3: memref<208x64xf32, #tpu.memory_space<vmem>>, %arg4: memref<3x64xf32, #tpu.memory_space<vmem>>, %arg5: memref<512x128xf32, #tpu.memory_space<any>>, %arg6: memref<3x128xf32, #tpu.memory_space<vmem>>, %arg7: memref<1024x256xf32, #tpu.memory_space<any>>, %arg8: memref<3x256xf32, #tpu.memory_space<vmem>>, %arg9: memref<256x128xf32, #tpu.memory_space<any>>, %arg10: memref<1x128xf32, #tpu.memory_space<vmem>>, %arg11: memref<128x20xf32, #tpu.memory_space<vmem>>, %arg12: memref<1x20xf32, #tpu.memory_space<vmem>>, %arg13: memref<2x20xf32, #tpu.memory_space<vmem>>, %arg14: memref<512x128xf32, #tpu.memory_space<vmem>>, %arg15: memref<1024x256xf32, #tpu.memory_space<vmem>>, %arg16: memref<256x128xf32, #tpu.memory_space<vmem>>, %arg17: memref<320x64xf32, #tpu.memory_space<vmem>>, %arg18: memref<320x128xf32, #tpu.memory_space<vmem>>, %arg19: memref<320x256xf32, #tpu.memory_space<vmem>>, %arg20: memref<3x!tpu.dma_semaphore, #tpu.memory_space<semaphore_mem>>) attributes {dimension_semantics = [], scalar_prefetch = 0 : i64, scratch_operands = 7 : i64, tpu.core_type = #tpu.core_type<tc>} {
    %c0_i32 = arith.constant 0 : i32
    %0 = tpu.memref_slice %arg20[%c0_i32] : memref<3x!tpu.dma_semaphore, #tpu.memory_space<semaphore_mem>> -> memref<1x!tpu.dma_semaphore, #tpu.memory_space<semaphore_mem>>
    %1 = tpu.memref_squeeze %0 : memref<1x!tpu.dma_semaphore, #tpu.memory_space<semaphore_mem>> -> memref<!tpu.dma_semaphore, #tpu.memory_space<semaphore_mem>>
    tpu.enqueue_dma source(%arg5 : memref<512x128xf32, #tpu.memory_space<any>>) target(%arg14 : memref<512x128xf32, #tpu.memory_space<vmem>>) target_semaphore(%1 : memref<!tpu.dma_semaphore, #tpu.memory_space<semaphore_mem>>)
    %c1_i32 = arith.constant 1 : i32
    %2 = tpu.memref_slice %arg20[%c1_i32] : memref<3x!tpu.dma_semaphore, #tpu.memory_space<semaphore_mem>> -> memref<1x!tpu.dma_semaphore, #tpu.memory_space<semaphore_mem>>
    %3 = tpu.memref_squeeze %2 : memref<1x!tpu.dma_semaphore, #tpu.memory_space<semaphore_mem>> -> memref<!tpu.dma_semaphore, #tpu.memory_space<semaphore_mem>>
    tpu.enqueue_dma source(%arg7 : memref<1024x256xf32, #tpu.memory_space<any>>) target(%arg15 : memref<1024x256xf32, #tpu.memory_space<vmem>>) target_semaphore(%3 : memref<!tpu.dma_semaphore, #tpu.memory_space<semaphore_mem>>)
    %c2_i32 = arith.constant 2 : i32
    %4 = tpu.memref_slice %arg20[%c2_i32] : memref<3x!tpu.dma_semaphore, #tpu.memory_space<semaphore_mem>> -> memref<1x!tpu.dma_semaphore, #tpu.memory_space<semaphore_mem>>
    %5 = tpu.memref_squeeze %4 : memref<1x!tpu.dma_semaphore, #tpu.memory_space<semaphore_mem>> -> memref<!tpu.dma_semaphore, #tpu.memory_space<semaphore_mem>>
    tpu.enqueue_dma source(%arg9 : memref<256x128xf32, #tpu.memory_space<any>>) target(%arg16 : memref<256x128xf32, #tpu.memory_space<vmem>>) target_semaphore(%5 : memref<!tpu.dma_semaphore, #tpu.memory_space<semaphore_mem>>)
    %c0 = arith.constant 0 : index
    %c0_0 = arith.constant 0 : index
    %6 = vector.load %arg1[%c0, %c0_0] : memref<256x256xf32, #tpu.memory_space<vmem>>, vector<256x256xf32>
    %c0_1 = arith.constant 0 : index
    %c0_2 = arith.constant 0 : index
    %7 = vector.load %arg3[%c0_1, %c0_2] : memref<208x64xf32, #tpu.memory_space<vmem>>, vector<8x64xf32>
    %c8 = arith.constant 8 : index
    %c0_3 = arith.constant 0 : index
    %8 = vector.load %arg3[%c8, %c0_3] : memref<208x64xf32, #tpu.memory_space<vmem>>, vector<8x64xf32>
    %c16 = arith.constant 16 : index
    %c0_4 = arith.constant 0 : index
    %9 = vector.load %arg3[%c16, %c0_4] : memref<208x64xf32, #tpu.memory_space<vmem>>, vector<64x64xf32>
    %c80 = arith.constant 80 : index
    %c0_5 = arith.constant 0 : index
    %10 = vector.load %arg3[%c80, %c0_5] : memref<208x64xf32, #tpu.memory_space<vmem>>, vector<64x64xf32>
    %c144 = arith.constant 144 : index
    %c0_6 = arith.constant 0 : index
    %11 = vector.load %arg3[%c144, %c0_6] : memref<208x64xf32, #tpu.memory_space<vmem>>, vector<64x64xf32>
    %c0_7 = arith.constant 0 : index
    %c0_8 = arith.constant 0 : index
    %12 = vector.load %arg0[%c0_7, %c0_8] : memref<256x8xf32, #tpu.memory_space<vmem>>, vector<256x8xf32>
    %c0_9 = arith.constant 0 : index
    %c0_10 = arith.constant 0 : index
    %13 = vector.load %arg4[%c0_9, %c0_10] : memref<3x64xf32, #tpu.memory_space<vmem>>, vector<1x64xf32>
    %c1 = arith.constant 1 : index
    %c0_11 = arith.constant 0 : index
    %14 = vector.load %arg4[%c1, %c0_11] : memref<3x64xf32, #tpu.memory_space<vmem>>, vector<1x64xf32>
    %c2 = arith.constant 2 : index
    %c0_12 = arith.constant 0 : index
    %15 = vector.load %arg4[%c2, %c0_12] : memref<3x64xf32, #tpu.memory_space<vmem>>, vector<1x64xf32>
    %cst = arith.constant dense<0.000000e+00> : vector<256x64xf32>
    %16 = tpu.matmul %12, %8, %cst {dimension_numbers = #tpu.dot_dimension_numbers<[1], [0], [0], [1], [0, 0, 1, 1], [], []>} : vector<256x8xf32>, vector<8x64xf32>, vector<256x64xf32> -> vector<256x64xf32>
    %17 = vector.broadcast %15 : vector<1x64xf32> to vector<256x64xf32>
    %18 = arith.addf %16, %17 : vector<256x64xf32>
    %cst_13 = arith.constant dense<0.000000e+00> : vector<256x8xf32>
    %19 = tpu.matmul %6, %12, %cst_13 {dimension_numbers = #tpu.dot_dimension_numbers<[1], [0], [0], [1], [0, 0, 1, 1], [], []>} : vector<256x256xf32>, vector<256x8xf32>, vector<256x8xf32> -> vector<256x8xf32>
    %cst_14 = arith.constant dense<0.000000e+00> : vector<256x64xf32>
    %20 = tpu.matmul %19, %7, %cst_14 {dimension_numbers = #tpu.dot_dimension_numbers<[1], [0], [0], [1], [0, 0, 1, 1], [], []>} : vector<256x8xf32>, vector<8x64xf32>, vector<256x64xf32> -> vector<256x64xf32>
    %21 = vector.broadcast %13 : vector<1x64xf32> to vector<256x64xf32>
    %22 = arith.addf %20, %21 : vector<256x64xf32>
    %cst_15 = arith.constant 0.000000e+00 : f32
    %23 = vector.broadcast %cst_15 : f32 to vector<256x64xf32>
    %24 = arith.maximumf %22, %23 : vector<256x64xf32>
    %cst_16 = arith.constant 0.000000e+00 : f32
    %25 = vector.broadcast %cst_16 : f32 to vector<32x64xf32>
    %c0_17 = arith.constant 0 : index
    %c0_18 = arith.constant 0 : index
    %26 = vector.load %arg17[%c0_17, %c0_18] : memref<320x64xf32, #tpu.memory_space<vmem>>, vector<32x64xf32>
    tpu.vector_store %arg17[%c0_17, %c0_18], %25 {strides = array<i32>} : memref<320x64xf32, #tpu.memory_space<vmem>>, vector<32x64xf32>,
    %cst_19 = arith.constant 0.000000e+00 : f32
    %27 = vector.broadcast %cst_19 : f32 to vector<32x64xf32>
    %c288 = arith.constant 288 : index
    %c0_20 = arith.constant 0 : index
    %28 = vector.load %arg17[%c288, %c0_20] : memref<320x64xf32, #tpu.memory_space<vmem>>, vector<32x64xf32>
    tpu.vector_store %arg17[%c288, %c0_20], %27 {strides = array<i32>} : memref<320x64xf32, #tpu.memory_space<vmem>>, vector<32x64xf32>,
    %c32 = arith.constant 32 : index
    %c0_21 = arith.constant 0 : index
    %29 = vector.load %arg17[%c32, %c0_21] : memref<320x64xf32, #tpu.memory_space<vmem>>, vector<256x64xf32>
    tpu.vector_store %arg17[%c32, %c0_21], %24 {strides = array<i32>} : memref<320x64xf32, #tpu.memory_space<vmem>>, vector<256x64xf32>,
    %c0_22 = arith.constant 0 : index
    %c0_23 = arith.constant 0 : index
    %30 = vector.load %arg17[%c0_22, %c0_23] : memref<320x64xf32, #tpu.memory_space<vmem>>, vector<256x64xf32>
    %cst_24 = arith.constant dense<0.000000e+00> : vector<256x64xf32>
    %31 = tpu.matmul %30, %9, %cst_24 {dimension_numbers = #tpu.dot_dimension_numbers<[1], [0], [0], [1], [0, 0, 1, 1], [], []>} : vector<256x64xf32>, vector<64x64xf32>, vector<256x64xf32> -> vector<256x64xf32>
    %cst_25 = arith.constant dense<0.000000e+00> : vector<256x64xf32>
    %32 = tpu.matmul %24, %10, %cst_25 {dimension_numbers = #tpu.dot_dimension_numbers<[1], [0], [0], [1], [0, 0, 1, 1], [], []>} : vector<256x64xf32>, vector<64x64xf32>, vector<256x64xf32> -> vector<256x64xf32>
    %33 = arith.addf %31, %32 : vector<256x64xf32>
    %c64 = arith.constant 64 : index
    %c0_26 = arith.constant 0 : index
    %34 = vector.load %arg17[%c64, %c0_26] : memref<320x64xf32, #tpu.memory_space<vmem>>, vector<256x64xf32>
    %cst_27 = arith.constant dense<0.000000e+00> : vector<256x64xf32>
    %35 = tpu.matmul %34, %11, %cst_27 {dimension_numbers = #tpu.dot_dimension_numbers<[1], [0], [0], [1], [0, 0, 1, 1], [], []>} : vector<256x64xf32>, vector<64x64xf32>, vector<256x64xf32> -> vector<256x64xf32>
    %36 = arith.addf %33, %35 : vector<256x64xf32>
    %37 = vector.broadcast %14 : vector<1x64xf32> to vector<256x64xf32>
    %38 = arith.addf %36, %37 : vector<256x64xf32>
    %cst_28 = arith.constant 0.000000e+00 : f32
    %39 = vector.broadcast %cst_28 : f32 to vector<256x64xf32>
    %40 = arith.maximumf %38, %39 : vector<256x64xf32>
    %41 = arith.addf %40, %18 : vector<256x64xf32>
    %c0_i32_29 = arith.constant 0 : i32
    %42 = tpu.memref_slice %arg20[%c0_i32_29] : memref<3x!tpu.dma_semaphore, #tpu.memory_space<semaphore_mem>> -> memref<1x!tpu.dma_semaphore, #tpu.memory_space<semaphore_mem>>
    %43 = tpu.memref_squeeze %42 : memref<1x!tpu.dma_semaphore, #tpu.memory_space<semaphore_mem>> -> memref<!tpu.dma_semaphore, #tpu.memory_space<semaphore_mem>>
    tpu.wait_dma2 semaphore(%43 : memref<!tpu.dma_semaphore, #tpu.memory_space<semaphore_mem>>) src(%arg5 : memref<512x128xf32, #tpu.memory_space<any>>) dst(%arg14 : memref<512x128xf32, #tpu.memory_space<vmem>>)
    %c0_30 = arith.constant 0 : index
    %c0_31 = arith.constant 0 : index
    %44 = vector.load %arg14[%c0_30, %c0_31] : memref<512x128xf32, #tpu.memory_space<vmem>>, vector<64x128xf32>
    %c64_32 = arith.constant 64 : index
    %c0_33 = arith.constant 0 : index
    %45 = vector.load %arg14[%c64_32, %c0_33] : memref<512x128xf32, #tpu.memory_space<vmem>>, vector<64x128xf32>
    %c128 = arith.constant 128 : index
    %c0_34 = arith.constant 0 : index
    %46 = vector.load %arg14[%c128, %c0_34] : memref<512x128xf32, #tpu.memory_space<vmem>>, vector<128x128xf32>
    %c256 = arith.constant 256 : index
    %c0_35 = arith.constant 0 : index
    %47 = vector.load %arg14[%c256, %c0_35] : memref<512x128xf32, #tpu.memory_space<vmem>>, vector<128x128xf32>
    %c384 = arith.constant 384 : index
    %c0_36 = arith.constant 0 : index
    %48 = vector.load %arg14[%c384, %c0_36] : memref<512x128xf32, #tpu.memory_space<vmem>>, vector<128x128xf32>
    %c0_37 = arith.constant 0 : index
    %c0_38 = arith.constant 0 : index
    %49 = vector.load %arg6[%c0_37, %c0_38] : memref<3x128xf32, #tpu.memory_space<vmem>>, vector<1x128xf32>
    %c1_39 = arith.constant 1 : index
    %c0_40 = arith.constant 0 : index
    %50 = vector.load %arg6[%c1_39, %c0_40] : memref<3x128xf32, #tpu.memory_space<vmem>>, vector<1x128xf32>
    %c2_41 = arith.constant 2 : index
    %c0_42 = arith.constant 0 : index
    %51 = vector.load %arg6[%c2_41, %c0_42] : memref<3x128xf32, #tpu.memory_space<vmem>>, vector<1x128xf32>
    %cst_43 = arith.constant dense<0.000000e+00> : vector<256x128xf32>
    %52 = tpu.matmul %41, %45, %cst_43 {dimension_numbers = #tpu.dot_dimension_numbers<[1], [0], [0], [1], [0, 0, 1, 1], [], []>} : vector<256x64xf32>, vector<64x128xf32>, vector<256x128xf32> -> vector<256x128xf32>
    %53 = vector.broadcast %51 : vector<1x128xf32> to vector<256x128xf32>
    %54 = arith.addf %52, %53 : vector<256x128xf32>
    %cst_44 = arith.constant dense<0.000000e+00> : vector<256x64xf32>
    %55 = tpu.matmul %6, %41, %cst_44 {dimension_numbers = #tpu.dot_dimension_numbers<[1], [0], [0], [1], [0, 0, 1, 1], [], []>} : vector<256x256xf32>, vector<256x64xf32>, vector<256x64xf32> -> vector<256x64xf32>
    %cst_45 = arith.constant dense<0.000000e+00> : vector<256x128xf32>
    %56 = tpu.matmul %55, %44, %cst_45 {dimension_numbers = #tpu.dot_dimension_numbers<[1], [0], [0], [1], [0, 0, 1, 1], [], []>} : vector<256x64xf32>, vector<64x128xf32>, vector<256x128xf32> -> vector<256x128xf32>
    %57 = vector.broadcast %49 : vector<1x128xf32> to vector<256x128xf32>
    %58 = arith.addf %56, %57 : vector<256x128xf32>
    %cst_46 = arith.constant 0.000000e+00 : f32
    %59 = vector.broadcast %cst_46 : f32 to vector<256x128xf32>
    %60 = arith.maximumf %58, %59 : vector<256x128xf32>
    %cst_47 = arith.constant 0.000000e+00 : f32
    %61 = vector.broadcast %cst_47 : f32 to vector<32x128xf32>
    %c0_48 = arith.constant 0 : index
    %c0_49 = arith.constant 0 : index
    %62 = vector.load %arg18[%c0_48, %c0_49] : memref<320x128xf32, #tpu.memory_space<vmem>>, vector<32x128xf32>
    tpu.vector_store %arg18[%c0_48, %c0_49], %61 {strides = array<i32>} : memref<320x128xf32, #tpu.memory_space<vmem>>, vector<32x128xf32>,
    %cst_50 = arith.constant 0.000000e+00 : f32
    %63 = vector.broadcast %cst_50 : f32 to vector<32x128xf32>
    %c288_51 = arith.constant 288 : index
    %c0_52 = arith.constant 0 : index
    %64 = vector.load %arg18[%c288_51, %c0_52] : memref<320x128xf32, #tpu.memory_space<vmem>>, vector<32x128xf32>
    tpu.vector_store %arg18[%c288_51, %c0_52], %63 {strides = array<i32>} : memref<320x128xf32, #tpu.memory_space<vmem>>, vector<32x128xf32>,
    %c32_53 = arith.constant 32 : index
    %c0_54 = arith.constant 0 : index
    %65 = vector.load %arg18[%c32_53, %c0_54] : memref<320x128xf32, #tpu.memory_space<vmem>>, vector<256x128xf32>
    tpu.vector_store %arg18[%c32_53, %c0_54], %60 {strides = array<i32>} : memref<320x128xf32, #tpu.memory_space<vmem>>, vector<256x128xf32>,
    %c0_55 = arith.constant 0 : index
    %c0_56 = arith.constant 0 : index
    %66 = vector.load %arg18[%c0_55, %c0_56] : memref<320x128xf32, #tpu.memory_space<vmem>>, vector<256x128xf32>
    %cst_57 = arith.constant dense<0.000000e+00> : vector<256x128xf32>
    %67 = tpu.matmul %66, %46, %cst_57 {dimension_numbers = #tpu.dot_dimension_numbers<[1], [0], [0], [1], [0, 0, 1, 1], [], []>} : vector<256x128xf32>, vector<128x128xf32>, vector<256x128xf32> -> vector<256x128xf32>
    %cst_58 = arith.constant dense<0.000000e+00> : vector<256x128xf32>
    %68 = tpu.matmul %60, %47, %cst_58 {dimension_numbers = #tpu.dot_dimension_numbers<[1], [0], [0], [1], [0, 0, 1, 1], [], []>} : vector<256x128xf32>, vector<128x128xf32>, vector<256x128xf32> -> vector<256x128xf32>
    %69 = arith.addf %67, %68 : vector<256x128xf32>
    %c64_59 = arith.constant 64 : index
    %c0_60 = arith.constant 0 : index
    %70 = vector.load %arg18[%c64_59, %c0_60] : memref<320x128xf32, #tpu.memory_space<vmem>>, vector<256x128xf32>
    %cst_61 = arith.constant dense<0.000000e+00> : vector<256x128xf32>
    %71 = tpu.matmul %70, %48, %cst_61 {dimension_numbers = #tpu.dot_dimension_numbers<[1], [0], [0], [1], [0, 0, 1, 1], [], []>} : vector<256x128xf32>, vector<128x128xf32>, vector<256x128xf32> -> vector<256x128xf32>
    %72 = arith.addf %69, %71 : vector<256x128xf32>
    %73 = vector.broadcast %50 : vector<1x128xf32> to vector<256x128xf32>
    %74 = arith.addf %72, %73 : vector<256x128xf32>
    %cst_62 = arith.constant 0.000000e+00 : f32
    %75 = vector.broadcast %cst_62 : f32 to vector<256x128xf32>
    %76 = arith.maximumf %74, %75 : vector<256x128xf32>
    %77 = arith.addf %76, %54 : vector<256x128xf32>
    %c1_i32_63 = arith.constant 1 : i32
    %78 = tpu.memref_slice %arg20[%c1_i32_63] : memref<3x!tpu.dma_semaphore, #tpu.memory_space<semaphore_mem>> -> memref<1x!tpu.dma_semaphore, #tpu.memory_space<semaphore_mem>>
    %79 = tpu.memref_squeeze %78 : memref<1x!tpu.dma_semaphore, #tpu.memory_space<semaphore_mem>> -> memref<!tpu.dma_semaphore, #tpu.memory_space<semaphore_mem>>
    tpu.wait_dma2 semaphore(%79 : memref<!tpu.dma_semaphore, #tpu.memory_space<semaphore_mem>>) src(%arg7 : memref<1024x256xf32, #tpu.memory_space<any>>) dst(%arg15 : memref<1024x256xf32, #tpu.memory_space<vmem>>)
    %c0_64 = arith.constant 0 : index
    %c0_65 = arith.constant 0 : index
    %80 = vector.load %arg15[%c0_64, %c0_65] : memref<1024x256xf32, #tpu.memory_space<vmem>>, vector<128x256xf32>
    %c128_66 = arith.constant 128 : index
    %c0_67 = arith.constant 0 : index
    %81 = vector.load %arg15[%c128_66, %c0_67] : memref<1024x256xf32, #tpu.memory_space<vmem>>, vector<128x256xf32>
    %c256_68 = arith.constant 256 : index
    %c0_69 = arith.constant 0 : index
    %82 = vector.load %arg15[%c256_68, %c0_69] : memref<1024x256xf32, #tpu.memory_space<vmem>>, vector<256x256xf32>
    %c512 = arith.constant 512 : index
    %c0_70 = arith.constant 0 : index
    %83 = vector.load %arg15[%c512, %c0_70] : memref<1024x256xf32, #tpu.memory_space<vmem>>, vector<256x256xf32>
    %c768 = arith.constant 768 : index
    %c0_71 = arith.constant 0 : index
    %84 = vector.load %arg15[%c768, %c0_71] : memref<1024x256xf32, #tpu.memory_space<vmem>>, vector<256x256xf32>
    %c0_72 = arith.constant 0 : index
    %c0_73 = arith.constant 0 : index
    %85 = vector.load %arg8[%c0_72, %c0_73] : memref<3x256xf32, #tpu.memory_space<vmem>>, vector<1x256xf32>
    %c1_74 = arith.constant 1 : index
    %c0_75 = arith.constant 0 : index
    %86 = vector.load %arg8[%c1_74, %c0_75] : memref<3x256xf32, #tpu.memory_space<vmem>>, vector<1x256xf32>
    %c2_76 = arith.constant 2 : index
    %c0_77 = arith.constant 0 : index
    %87 = vector.load %arg8[%c2_76, %c0_77] : memref<3x256xf32, #tpu.memory_space<vmem>>, vector<1x256xf32>
    %cst_78 = arith.constant dense<0.000000e+00> : vector<256x256xf32>
    %88 = tpu.matmul %77, %81, %cst_78 {dimension_numbers = #tpu.dot_dimension_numbers<[1], [0], [0], [1], [0, 0, 1, 1], [], []>} : vector<256x128xf32>, vector<128x256xf32>, vector<256x256xf32> -> vector<256x256xf32>
    %89 = vector.broadcast %87 : vector<1x256xf32> to vector<256x256xf32>
    %90 = arith.addf %88, %89 : vector<256x256xf32>
    %cst_79 = arith.constant dense<0.000000e+00> : vector<256x128xf32>
    %91 = tpu.matmul %6, %77, %cst_79 {dimension_numbers = #tpu.dot_dimension_numbers<[1], [0], [0], [1], [0, 0, 1, 1], [], []>} : vector<256x256xf32>, vector<256x128xf32>, vector<256x128xf32> -> vector<256x128xf32>
    %cst_80 = arith.constant dense<0.000000e+00> : vector<256x256xf32>
    %92 = tpu.matmul %91, %80, %cst_80 {dimension_numbers = #tpu.dot_dimension_numbers<[1], [0], [0], [1], [0, 0, 1, 1], [], []>} : vector<256x128xf32>, vector<128x256xf32>, vector<256x256xf32> -> vector<256x256xf32>
    %93 = vector.broadcast %85 : vector<1x256xf32> to vector<256x256xf32>
    %94 = arith.addf %92, %93 : vector<256x256xf32>
    %cst_81 = arith.constant 0.000000e+00 : f32
    %95 = vector.broadcast %cst_81 : f32 to vector<256x256xf32>
    %96 = arith.maximumf %94, %95 : vector<256x256xf32>
    %cst_82 = arith.constant 0.000000e+00 : f32
    %97 = vector.broadcast %cst_82 : f32 to vector<32x256xf32>
    %c0_83 = arith.constant 0 : index
    %c0_84 = arith.constant 0 : index
    %98 = vector.load %arg19[%c0_83, %c0_84] : memref<320x256xf32, #tpu.memory_space<vmem>>, vector<32x256xf32>
    tpu.vector_store %arg19[%c0_83, %c0_84], %97 {strides = array<i32>} : memref<320x256xf32, #tpu.memory_space<vmem>>, vector<32x256xf32>,
    %cst_85 = arith.constant 0.000000e+00 : f32
    %99 = vector.broadcast %cst_85 : f32 to vector<32x256xf32>
    %c288_86 = arith.constant 288 : index
    %c0_87 = arith.constant 0 : index
    %100 = vector.load %arg19[%c288_86, %c0_87] : memref<320x256xf32, #tpu.memory_space<vmem>>, vector<32x256xf32>
    tpu.vector_store %arg19[%c288_86, %c0_87], %99 {strides = array<i32>} : memref<320x256xf32, #tpu.memory_space<vmem>>, vector<32x256xf32>,
    %c32_88 = arith.constant 32 : index
    %c0_89 = arith.constant 0 : index
    %101 = vector.load %arg19[%c32_88, %c0_89] : memref<320x256xf32, #tpu.memory_space<vmem>>, vector<256x256xf32>
    tpu.vector_store %arg19[%c32_88, %c0_89], %96 {strides = array<i32>} : memref<320x256xf32, #tpu.memory_space<vmem>>, vector<256x256xf32>,
    %c0_90 = arith.constant 0 : index
    %c0_91 = arith.constant 0 : index
    %102 = vector.load %arg19[%c0_90, %c0_91] : memref<320x256xf32, #tpu.memory_space<vmem>>, vector<256x256xf32>
    %cst_92 = arith.constant dense<0.000000e+00> : vector<256x256xf32>
    %103 = tpu.matmul %102, %82, %cst_92 {dimension_numbers = #tpu.dot_dimension_numbers<[1], [0], [0], [1], [0, 0, 1, 1], [], []>} : vector<256x256xf32>, vector<256x256xf32>, vector<256x256xf32> -> vector<256x256xf32>
    %cst_93 = arith.constant dense<0.000000e+00> : vector<256x256xf32>
    %104 = tpu.matmul %96, %83, %cst_93 {dimension_numbers = #tpu.dot_dimension_numbers<[1], [0], [0], [1], [0, 0, 1, 1], [], []>} : vector<256x256xf32>, vector<256x256xf32>, vector<256x256xf32> -> vector<256x256xf32>
    %105 = arith.addf %103, %104 : vector<256x256xf32>
    %c64_94 = arith.constant 64 : index
    %c0_95 = arith.constant 0 : index
    %106 = vector.load %arg19[%c64_94, %c0_95] : memref<320x256xf32, #tpu.memory_space<vmem>>, vector<256x256xf32>
    %cst_96 = arith.constant dense<0.000000e+00> : vector<256x256xf32>
    %107 = tpu.matmul %106, %84, %cst_96 {dimension_numbers = #tpu.dot_dimension_numbers<[1], [0], [0], [1], [0, 0, 1, 1], [], []>} : vector<256x256xf32>, vector<256x256xf32>, vector<256x256xf32> -> vector<256x256xf32>
    %108 = arith.addf %105, %107 : vector<256x256xf32>
    %109 = vector.broadcast %86 : vector<1x256xf32> to vector<256x256xf32>
    %110 = arith.addf %108, %109 : vector<256x256xf32>
    %cst_97 = arith.constant 0.000000e+00 : f32
    %111 = vector.broadcast %cst_97 : f32 to vector<256x256xf32>
    %112 = arith.maximumf %110, %111 : vector<256x256xf32>
    %113 = arith.addf %112, %90 : vector<256x256xf32>
    %c0_98 = arith.constant 0 : index
    %c0_99 = arith.constant 0 : index
    %114 = vector.load %arg2[%c0_98, %c0_99] : memref<2x256xf32, #tpu.memory_space<vmem>>, vector<2x256xf32>
    %cst_100 = arith.constant dense<0.000000e+00> : vector<2x256xf32>
    %115 = tpu.matmul %114, %113, %cst_100 {dimension_numbers = #tpu.dot_dimension_numbers<[1], [0], [0], [1], [0, 0, 1, 1], [], []>} : vector<2x256xf32>, vector<256x256xf32>, vector<2x256xf32> -> vector<2x256xf32>
    %c2_i32_101 = arith.constant 2 : i32
    %116 = tpu.memref_slice %arg20[%c2_i32_101] : memref<3x!tpu.dma_semaphore, #tpu.memory_space<semaphore_mem>> -> memref<1x!tpu.dma_semaphore, #tpu.memory_space<semaphore_mem>>
    %117 = tpu.memref_squeeze %116 : memref<1x!tpu.dma_semaphore, #tpu.memory_space<semaphore_mem>> -> memref<!tpu.dma_semaphore, #tpu.memory_space<semaphore_mem>>
    tpu.wait_dma2 semaphore(%117 : memref<!tpu.dma_semaphore, #tpu.memory_space<semaphore_mem>>) src(%arg9 : memref<256x128xf32, #tpu.memory_space<any>>) dst(%arg16 : memref<256x128xf32, #tpu.memory_space<vmem>>)
    %c0_102 = arith.constant 0 : index
    %c0_103 = arith.constant 0 : index
    %118 = vector.load %arg16[%c0_102, %c0_103] : memref<256x128xf32, #tpu.memory_space<vmem>>, vector<256x128xf32>
    %cst_104 = arith.constant dense<0.000000e+00> : vector<2x128xf32>
    %119 = tpu.matmul %115, %118, %cst_104 {dimension_numbers = #tpu.dot_dimension_numbers<[1], [0], [0], [1], [0, 0, 1, 1], [], []>} : vector<2x256xf32>, vector<256x128xf32>, vector<2x128xf32> -> vector<2x128xf32>
    %c0_105 = arith.constant 0 : index
    %c0_106 = arith.constant 0 : index
    %120 = vector.load %arg10[%c0_105, %c0_106] : memref<1x128xf32, #tpu.memory_space<vmem>>, vector<1x128xf32>
    %121 = vector.broadcast %120 : vector<1x128xf32> to vector<2x128xf32>
    %122 = arith.addf %119, %121 : vector<2x128xf32>
    %cst_107 = arith.constant 0.000000e+00 : f32
    %123 = vector.broadcast %cst_107 : f32 to vector<2x128xf32>
    %124 = arith.maximumf %122, %123 : vector<2x128xf32>
    %c0_108 = arith.constant 0 : index
    %c0_109 = arith.constant 0 : index
    %125 = vector.load %arg11[%c0_108, %c0_109] : memref<128x20xf32, #tpu.memory_space<vmem>>, vector<128x20xf32>
    %cst_110 = arith.constant dense<0.000000e+00> : vector<2x20xf32>
    %126 = tpu.matmul %124, %125, %cst_110 {dimension_numbers = #tpu.dot_dimension_numbers<[1], [0], [0], [1], [0, 0, 1, 1], [], []>} : vector<2x128xf32>, vector<128x20xf32>, vector<2x20xf32> -> vector<2x20xf32>
    %c0_111 = arith.constant 0 : index
    %c0_112 = arith.constant 0 : index
    %127 = vector.load %arg12[%c0_111, %c0_112] : memref<1x20xf32, #tpu.memory_space<vmem>>, vector<1x20xf32>
    %128 = vector.broadcast %127 : vector<1x20xf32> to vector<2x20xf32>
    %129 = arith.addf %126, %128 : vector<2x20xf32>
    %c0_113 = arith.constant 0 : index
    %c0_114 = arith.constant 0 : index
    %130 = vector.load %arg13[%c0_113, %c0_114] : memref<2x20xf32, #tpu.memory_space<vmem>>, vector<2x20xf32>
    tpu.vector_store %arg13[%c0_113, %c0_114], %129 {strides = array<i32>} : memref<2x20xf32, #tpu.memory_space<vmem>>, vector<2x20xf32>,
    return
  }
}

</mosaic_0001>

<bundles_post_ra>
// kernel: action_recognition_net.1
= control target key start
LH: loop header
LB: loop body
LE: loop exit
PB: predicated region body
PF: predicated region fallthrough
CT: control target
= control target key end

     0   :  { %18 = vsyncpa [#allocation10], 0  ;;  %s12945_s0 = inlined_call_operand.vmem [shape: f32[256,8], index: 0, kind: input, shape index: {}]   ;;  %s12946_s1 = inlined_call_operand.vmem [shape: f32[256,256], index: 1, kind: input, shape index: {}]   ;;  %s12947_s2 = inlined_call_operand.vmem [shape: f32[2,256], index: 2, kind: input, shape index: {}]   ;;  %s12948_s3 = inlined_call_operand.vmem [shape: f32[208,64], index: 3, kind: input, shape index: {}]   ;;  %s12949_s4 = inlined_call_operand.hbm [shape: f32[3,64], index: 4, kind: input, shape index: {}]   ;;  %s12950_s5 = inlined_call_operand.vmem [shape: f32[512,128], index: 5, kind: input, shape index: {}]   ;;  %s12951_s6 = inlined_call_operand.hbm [shape: f32[3,128], index: 6, kind: input, shape index: {}]   ;;  %s12952_s7 = inlined_call_operand.hbm [shape: f32[1024,256], index: 7, kind: input, shape index: {}]   ;;  %s12953_s8 = inlined_call_operand.vmem [shape: f32[3,256], index: 8, kind: input, shape index: {}]   ;;  %s12954_s9 = inlined_call_operand.hbm [shape: f32[256,128], index: 9, kind: input, shape index: {}]   ;;  %s12955_s10 = inlined_call_operand.vmem [shape: f32[1,128], index: 10, kind: input, shape index: {}]   ;;  %s12956_s11 = inlined_call_operand.vmem [shape: f32[128,20], index: 11, kind: input, shape index: {}]   ;;  %s12957_s12 = inlined_call_operand.vmem [shape: f32[1,20], index: 12, kind: input, shape index: {}]   ;;  %s12958_s13 = inlined_call_operand.hbm [shape: f32[2,20], index: 13, kind: output, shape index: {}]  }
   0x1   :  { %19 = vsyncpa [#allocation13], 0 }
   0x2   :  { %20 = vsyncpa [#allocation11], 0  ;;  %s9524_s25 = smov [#allocation9]   ;;  %s9525_s27 = smov [#allocation12]  }
   0x3   :  { %s35_s26 = sshll.u32 %s9524_s25, 4  ;;  %s45_s28 = sshll.u32 %s9525_s27, 4  ;;  %s36_s26 = int_to_ptr.vmem [resolvable:$true] %s35_s26  ;;  %s46_s28 = int_to_ptr.vmem [resolvable:$true] %s45_s28 }
   0x4   :  { %s9402_s14 = scalar_lea.hbm %s12949_s4, 64 }
   0x5   :  { %p9403_p0 = scmp.ne.s32.totalorder %s12949_s4, %s9402_s14  ;;  %p9406_p1 = scmp.lt.u32.totalorder %s9402_s14, %s12949_s4 }
   0x7   :  { %p9408_p2 = pnand %p9406_p1, %p9403_p0 }
   0x9   :  { %9411 = shalt.err (!%p9408_p2)
}
   0xa   :  { %s9412_s19 = scalar_lea.vmem %s36_s26, 64  ;;  %p9417_p4 = scmp.lt.s32.totalorder %s36_s26, %s36_s26 }
   0xb   :  { %p9413_p3 = scmp.ne.s32.totalorder %s36_s26, %s9412_s19  ;;  %p9418_p5 = scmp.lt.s32.totalorder %s9412_s19, %s9412_s19 }
   0xd   :  { %p9419_p6 = por %p9418_p5, %p9417_p4 }
   0xf   :  { %p9420_p7 = pnand %p9419_p6, %p9413_p3 }
  0x11   :  { %9423 = shalt.err (!%p9420_p7)
}
  0x12   :  { %38 = dma.hbm_to_vmem [thread:$0]  %s12949_s4, 64, %s36_s26, [#allocation10]  }
  0x13   :  { %s9424_s24 = scalar_lea.hbm %s12951_s6, 64 }
  0x14   :  { %p9425_p8 = scmp.ne.s32.totalorder %s12951_s6, %s9424_s24  ;;  %p9428_p9 = scmp.lt.u32.totalorder %s9424_s24, %s12951_s6 }
  0x16   :  { %p9430_p10 = pnand %p9428_p9, %p9425_p8 }
  0x18   :  { %9433 = shalt.err (!%p9430_p10)
}
  0x19   :  { %s9434_s14 = scalar_lea.vmem %s46_s28, 64  ;;  %p9439_p12 = scmp.lt.s32.totalorder %s46_s28, %s46_s28 }
  0x1a   :  { %p9435_p11 = scmp.ne.s32.totalorder %s46_s28, %s9434_s14  ;;  %p9440_p13 = scmp.lt.s32.totalorder %s9434_s14, %s9434_s14 }
  0x1c   :  { %p9441_p0 = por %p9440_p13, %p9439_p12 }
  0x1e   :  { %p9442_p1 = pnand %p9441_p0, %p9435_p11 }
  0x20   :  { %9445 = shalt.err (!%p9442_p1)
}
  0x21   :  { %48 = dma.hbm_to_vmem [thread:$0]  %s12951_s6, 64, %s46_s28, [#allocation13]  }
  0x22   :  { %9512 = dma.done.wait [#allocation10], 64  }
  0x23   :  { %9513 = vsyncadd [#allocation10], 4294967232 }
  0x24   :  { %9514 = dma.done.wait [#allocation13], 64  }
  0x25   :  { %9515 = vsyncadd [#allocation13], 4294967232  ;;  %v9629_v0 = vld [vmem:[%s12950_s5] sm:$0xff]  ;;  %v9634_v1 = vld [vmem:[%s12950_s5 + $0x8] sm:$0xff] }
  0x26   :  { %13151 = vst [vmem:[#allocation28_spill] sm:$0xff] %v9629_v0  ;;  %13152 = vst [vmem:[#allocation29_spill] sm:$0xff] %v9634_v1  ;;  %v9639_v2 = vld [vmem:[%s12950_s5 + $0x10] sm:$0xff]  ;;  %v9644_v3 = vld [vmem:[%s12950_s5 + $0x18] sm:$0xff] }
  0x27   :  { %13153 = vst [vmem:[#allocation30_spill] sm:$0xff] %v9639_v2  ;;  %13154 = vst [vmem:[#allocation31_spill] sm:$0xff] %v9644_v3  ;;  %v9649_v4 = vld [vmem:[%s12950_s5 + $0x20] sm:$0xff]  ;;  %v9654_v5 = vld [vmem:[%s12950_s5 + $0x28] sm:$0xff] }
  0x28   :  { %13155 = vst [vmem:[#allocation32_spill] sm:$0xff] %v9649_v4  ;;  %13156 = vst [vmem:[#allocation33_spill] sm:$0xff] %v9654_v5  ;;  %v9659_v6 = vld [vmem:[%s12950_s5 + $0x30] sm:$0xff]  ;;  %v9664_v7 = vld [vmem:[%s12950_s5 + $0x38] sm:$0xff] }
  0x29   :  { %13157 = vst [vmem:[#allocation34_spill] sm:$0xff] %v9659_v6  ;;  %13158 = vst [vmem:[#allocation35_spill] sm:$0xff] %v9664_v7  ;;  %v9669_v8 = vld [vmem:[%s12950_s5 + $0x40] sm:$0xff]  ;;  %v9674_v9 = vld [vmem:[%s12950_s5 + $0x48] sm:$0xff] }
  0x2a   :  { %v9679_v10 = vld [vmem:[%s12950_s5 + $0x50] sm:$0xff]  ;;  %v9684_v11 = vld [vmem:[%s12950_s5 + $0x58] sm:$0xff]  ;;  %v9689_v12 = vld [vmem:[%s12950_s5 + $0x60] sm:$0xff] }
  0x2b   :  { %v9694_v13 = vld [vmem:[%s12950_s5 + $0x68] sm:$0xff]  ;;  %v9699_v14 = vld [vmem:[%s12950_s5 + $0x70] sm:$0xff]  ;;  %v9704_v15 = vld [vmem:[%s12950_s5 + $0x78] sm:$0xff] }
  0x2c   :  { %v9709_v16 = vld [vmem:[%s12950_s5 + $0x80] sm:$0xff]  ;;  %v9714_v17 = vld [vmem:[%s12950_s5 + $0x88] sm:$0xff]  ;;  %v9719_v18 = vld [vmem:[%s12950_s5 + $0x90] sm:$0xff] }
  0x2d   :  { %13159 = vst [vmem:[#allocation36_spill] sm:$0xff] %v9709_v16  ;;  %13160 = vst [vmem:[#allocation37_spill] sm:$0xff] %v9714_v17  ;;  %v9724_v19 = vld [vmem:[%s12950_s5 + $0x98] sm:$0xff]  ;;  %v9729_v20 = vld [vmem:[%s12950_s5 + $0xa0] sm:$0xff] }
  0x2e   :  { %13161 = vst [vmem:[#allocation38_spill] sm:$0xff] %v9719_v18  ;;  %13162 = vst [vmem:[#allocation39_spill] sm:$0xff] %v9724_v19  ;;  %v9734_v21 = vld [vmem:[%s12950_s5 + $0xa8] sm:$0xff]  ;;  %v9739_v22 = vld [vmem:[%s12950_s5 + $0xb0] sm:$0xff] }
  0x2f   :  { %13163 = vst [vmem:[#allocation40_spill] sm:$0xff] %v9729_v20  ;;  %13164 = vst [vmem:[#allocation41_spill] sm:$0xff] %v9734_v21  ;;  %v9744_v23 = vld [vmem:[%s12950_s5 + $0xb8] sm:$0xff]  ;;  %v9749_v24 = vld [vmem:[%s12950_s5 + $0xc0] sm:$0xff] }
  0x30   :  { %13165 = vst [vmem:[#allocation42_spill] sm:$0xff] %v9739_v22  ;;  %13166 = vst [vmem:[#allocation43_spill] sm:$0xff] %v9744_v23  ;;  %v9754_v25 = vld [vmem:[%s12950_s5 + $0xc8] sm:$0xff]  ;;  %v9759_v26 = vld [vmem:[%s12950_s5 + $0xd0] sm:$0xff] }
  0x31   :  { %13167 = vst [vmem:[#allocation44_spill] sm:$0xff] %v9749_v24  ;;  %13168 = vst [vmem:[#allocation45_spill] sm:$0xff] %v9754_v25  ;;  %v9764_v27 = vld [vmem:[%s12950_s5 + $0xd8] sm:$0xff]  ;;  %v9769_v28 = vld [vmem:[%s12950_s5 + $0xe0] sm:$0xff] }
  0x32   :  { %13169 = vst [vmem:[#allocation46_spill] sm:$0xff] %v9759_v26  ;;  %13170 = vst [vmem:[#allocation47_spill] sm:$0xff] %v9764_v27  ;;  %v9774_v29 = vld [vmem:[%s12950_s5 + $0xe8] sm:$0xff]  ;;  %v9779_v30 = vld [vmem:[%s12950_s5 + $0xf0] sm:$0xff] }
  0x33   :  { %13171 = vst [vmem:[#allocation48_spill] sm:$0xff] %v9769_v28  ;;  %13172 = vst [vmem:[#allocation49_spill] sm:$0xff] %v9774_v29  ;;  %v9784_v31 = vld [vmem:[%s12950_s5 + $0xf8] sm:$0xff]  ;;  %v9789_v32 = vld [vmem:[%s12950_s5 + $0x100] sm:$0xff] }
  0x34   :  { %13173 = vst [vmem:[#allocation50_spill] sm:$0xff] %v9779_v30  ;;  %13174 = vst [vmem:[#allocation51_spill] sm:$0xff] %v9784_v31  ;;  %v9794_v33 = vld [vmem:[%s12950_s5 + $0x108] sm:$0xff]  ;;  %v9799_v34 = vld [vmem:[%s12950_s5 + $0x110] sm:$0xff] }
  0x35   :  { %13175 = vst [vmem:[#allocation52_spill] sm:$0xff] %v9789_v32  ;;  %13176 = vst [vmem:[#allocation53_spill] sm:$0xff] %v9794_v33  ;;  %v9804_v35 = vld [vmem:[%s12950_s5 + $0x118] sm:$0xff]  ;;  %v9809_v36 = vld [vmem:[%s12950_s5 + $0x120] sm:$0xff] }
  0x36   :  { %13177 = vst [vmem:[#allocation54_spill] sm:$0xff] %v9799_v34  ;;  %13178 = vst [vmem:[#allocation55_spill] sm:$0xff] %v9804_v35  ;;  %v9814_v37 = vld [vmem:[%s12950_s5 + $0x128] sm:$0xff]  ;;  %v9819_v38 = vld [vmem:[%s12950_s5 + $0x130] sm:$0xff] }
  0x37   :  { %13179 = vst [vmem:[#allocation56_spill] sm:$0xff] %v9809_v36  ;;  %13180 = vst [vmem:[#allocation57_spill] sm:$0xff] %v9814_v37  ;;  %v9824_v39 = vld [vmem:[%s12950_s5 + $0x138] sm:$0xff]  ;;  %v9829_v40 = vld [vmem:[%s12950_s5 + $0x140] sm:$0xff] }
  0x38   :  { %13181 = vst [vmem:[#allocation58_spill] sm:$0xff] %v9819_v38  ;;  %13182 = vst [vmem:[#allocation59_spill] sm:$0xff] %v9824_v39  ;;  %v9834_v41 = vld [vmem:[%s12950_s5 + $0x148] sm:$0xff]  ;;  %v9839_v42 = vld [vmem:[%s12950_s5 + $0x150] sm:$0xff] }
  0x39   :  { %13183 = vst [vmem:[#allocation60_spill] sm:$0xff] %v9829_v40  ;;  %13184 = vst [vmem:[#allocation61_spill] sm:$0xff] %v9834_v41  ;;  %v9844_v43 = vld [vmem:[%s12950_s5 + $0x158] sm:$0xff]  ;;  %v9849_v44 = vld [vmem:[%s12950_s5 + $0x160] sm:$0xff] }
  0x3a   :  { %13185 = vst [vmem:[#allocation62_spill] sm:$0xff] %v9839_v42  ;;  %13186 = vst [vmem:[#allocation63_spill] sm:$0xff] %v9844_v43  ;;  %v9854_v45 = vld [vmem:[%s12950_s5 + $0x168] sm:$0xff]  ;;  %v9859_v46 = vld [vmem:[%s12950_s5 + $0x170] sm:$0xff] }
  0x3b   :  { %13187 = vst [vmem:[#allocation64_spill] sm:$0xff] %v9849_v44  ;;  %13188 = vst [vmem:[#allocation65_spill] sm:$0xff] %v9854_v45  ;;  %v9864_v47 = vld [vmem:[%s12950_s5 + $0x178] sm:$0xff]  ;;  %v9869_v48 = vld [vmem:[%s12950_s5 + $0x180] sm:$0xff] }
  0x3c   :  { %13189 = vst [vmem:[#allocation66_spill] sm:$0xff] %v9859_v46  ;;  %13190 = vst [vmem:[#allocation67_spill] sm:$0xff] %v9864_v47  ;;  %v9874_v49 = vld [vmem:[%s12950_s5 + $0x188] sm:$0xff]  ;;  %v9879_v50 = vld [vmem:[%s12950_s5 + $0x190] sm:$0xff] }
  0x3d   :  { %13191 = vst [vmem:[#allocation68_spill] sm:$0xff] %v9869_v48  ;;  %13192 = vst [vmem:[#allocation69_spill] sm:$0xff] %v9874_v49  ;;  %v9884_v51 = vld [vmem:[%s12950_s5 + $0x198] sm:$0xff]  ;;  %v9889_v52 = vld [vmem:[%s12950_s5 + $0x1a0] sm:$0xff] }
  0x3e   :  { %13193 = vst [vmem:[#allocation70_spill] sm:$0xff] %v9879_v50  ;;  %13194 = vst [vmem:[#allocation71_spill] sm:$0xff] %v9884_v51  ;;  %v9894_v53 = vld [vmem:[%s12950_s5 + $0x1a8] sm:$0xff]  ;;  %v9899_v54 = vld [vmem:[%s12950_s5 + $0x1b0] sm:$0xff] }
  0x3f   :  { %13195 = vst [vmem:[#allocation72_spill] sm:$0xff] %v9889_v52  ;;  %13196 = vst [vmem:[#allocation73_spill] sm:$0xff] %v9894_v53  ;;  %v9904_v55 = vld [vmem:[%s12950_s5 + $0x1b8] sm:$0xff]  ;;  %v9909_v56 = vld [vmem:[%s12950_s5 + $0x1c0] sm:$0xff] }
  0x40   :  { %13197 = vst [vmem:[#allocation74_spill] sm:$0xff] %v9899_v54  ;;  %13198 = vst [vmem:[#allocation75_spill] sm:$0xff] %v9904_v55  ;;  %v9914_v57 = vld [vmem:[%s12950_s5 + $0x1c8] sm:$0xff]  ;;  %v9919_v58 = vld [vmem:[%s12950_s5 + $0x1d0] sm:$0xff] }
  0x41   :  { %13199 = vst [vmem:[#allocation76_spill] sm:$0xff] %v9909_v56  ;;  %13200 = vst [vmem:[#allocation77_spill] sm:$0xff] %v9914_v57  ;;  %v9924_v59 = vld [vmem:[%s12950_s5 + $0x1d8] sm:$0xff]  ;;  %v9929_v60 = vld [vmem:[%s12950_s5 + $0x1e0] sm:$0xff] }
  0x42   :  { %13201 = vst [vmem:[#allocation78_spill] sm:$0xff] %v9919_v58  ;;  %13202 = vst [vmem:[#allocation79_spill] sm:$0xff] %v9924_v59  ;;  %v9934_v61 = vld [vmem:[%s12950_s5 + $0x1e8] sm:$0xff]  ;;  %v9939_v62 = vld [vmem:[%s12950_s5 + $0x1f0] sm:$0xff] }
  0x43   :  { %13203 = vst [vmem:[#allocation80_spill] sm:$0xff] %v9929_v60  ;;  %13204 = vst [vmem:[#allocation81_spill] sm:$0xff] %v9934_v61  ;;  %v9944_v63 = vld [vmem:[%s12950_s5 + $0x1f8] sm:$0xff]  ;;  %v9949_v59 = vld [vmem:[%s12945_s0] sm:$0xff] }
  0x44   :  { %13205 = vst [vmem:[#allocation82_spill] sm:$0xff] %v9939_v62  ;;  %13206 = vst [vmem:[#allocation83_spill] sm:$0xff] %v9944_v63  ;;  %v9954_v60 = vld [vmem:[%s12945_s0 + $0x8] sm:$0xff]  ;;  %v9959_v61 = vld [vmem:[%s12945_s0 + $0x10] sm:$0xff]  ;;  %v12959_v62 = vmov 0.0|0.0  }
  0x45   :  { %8442 = vmatprep.subr.bf16.mxu1 %v12959_v62  ;;  %v8443_v63 = vpack.c.bf16 %v9954_v60, %v9949_v59  ;;  %v9967_v58 = vld [vmem:[%s12945_s0 + $0x18] sm:$0xff]  ;;  %v9975_v56 = vld [vmem:[%s12945_s0 + $0x20] sm:$0xff]  ;;  %v9980_v55 = vld [vmem:[%s12945_s0 + $0x28] sm:$0xff] }
  0x46   :  { %v8446_v57 = vpack.c.bf16 %v9967_v58, %v9959_v61  ;;  %v8449_v54 = vpack.c.bf16 %v9980_v55, %v9975_v56  ;;  %v9993_v53 = vld [vmem:[%s12945_s0 + $0x38] sm:$0xff]  ;;  %v9998_v52 = vld [vmem:[%s12946_s1 + $0x8] sm:$0xff]  ;;  %v10007_v51 = vld [vmem:[%s12945_s0 + $0x40] sm:$0xff] }
  0x47   :  { %8444 = vmatpush1.bf16.msra.mxu1 %v8443_v63  ;;  %v9988_v63 = vld [vmem:[%s12945_s0 + $0x30] sm:$0xff]  ;;  %13207 = vst [vmem:[#allocation84_spill] sm:$0xff] %v9998_v52  ;;  %770 = vmatprep.mubr.f32.mxu1 %v9998_v52  ;;  %v10012_v50 = vld [vmem:[%s12945_s0 + $0x48] sm:$0xff]  ;;  %v10025_v48 = vld [vmem:[%s12945_s0 + $0x58] sm:$0xff] }
  0x48   :  { %8445 = vmatprep.subr.bf16.mxu1 %v12959_v62  ;;  %v10020_v49 = vld [vmem:[%s12945_s0 + $0x50] sm:$0xff]  ;;  %v10038_v30 = vld [vmem:[%s12945_s0 + $0x68] sm:$0xff]  ;;  %v10051_v28 = vld [vmem:[%s12945_s0 + $0x78] sm:$0xff] }
  0x49   :  { %v8458_v31 = vpack.c.bf16 %v10025_v48, %v10020_v49 }
  0x4b   :  { %8447 = vmatpush1.bf16.msra.mxu1 %v8446_v57  ;;  %v8452_v57 = vpack.c.bf16 %v9993_v53, %v9988_v63 }
  0x4c   :  { %8448 = vmatprep.subr.bf16.mxu1 %v12959_v62 }
  0x4f   :  { %8450 = vmatpush1.bf16.msra.mxu1 %v8449_v54  ;;  %v8455_v54 = vpack.c.bf16 %v10012_v50, %v10007_v51 }
  0x50   :  { %8451 = vmatprep.subr.bf16.mxu1 %v12959_v62 }
  0x53   :  { %8453 = vmatpush1.bf16.msra.mxu1 %v8452_v57  ;;  %v10033_v57 = vld [vmem:[%s12945_s0 + $0x60] sm:$0xff] }
  0x54   :  { %8454 = vmatprep.subr.bf16.mxu1 %v12959_v62  ;;  %v8461_v29 = vpack.c.bf16 %v10038_v30, %v10033_v57 }
  0x57   :  { %8456 = vmatpush1.bf16.msra.mxu1 %v8455_v54  ;;  %v10046_v54 = vld [vmem:[%s12945_s0 + $0x70] sm:$0xff] }
  0x58   :  { %8457 = vmatprep.subr.bf16.mxu1 %v12959_v62 }
  0x5b   :  { %8459 = vmatpush1.bf16.msra.mxu1 %v8458_v31 }
  0x5c   :  { %8460 = vmatprep.subr.bf16.mxu1 %v12959_v62 }
  0x5d   :  { %230 = vsyncadd [#allocation8], 8192  ;;  %v8464_v31 = vpack.c.bf16 %v10051_v28, %v10046_v54  ;;  %v10059_v27 = vld [vmem:[%s12945_s0 + $0x80] sm:$0xff]  ;;  %v10064_v26 = vld [vmem:[%s12945_s0 + $0x88] sm:$0xff]  ;;  %vm384_vm0 = vcmask 64512   ;;  %vm1288_vm1 = vcmask 523264  }
  0x5e   :  { %v8467_v25 = vpack.c.bf16 %v10064_v26, %v10059_v27  ;;  %v10077_v24 = vld [vmem:[%s12945_s0 + $0x98] sm:$0xff]  ;;  %v10090_v22 = vld [vmem:[%s12945_s0 + $0xa8] sm:$0xff]  ;;  %v10166_v42 = vld [vmem:[%s12946_s1] sm:$0xff]  ;;  %7749 = vmatprep.mubr.msk.f32.mxu0 %vm384_vm0, %v9949_v59  ;;  %s9446_s24 = scalar_lea.hbm %s12952_s7, 32768 }
  0x5f   :  { %8462 = vmatpush1.bf16.msra.mxu1 %v8461_v29  ;;  %v10072_v29 = vld [vmem:[%s12945_s0 + $0x90] sm:$0xff]  ;;  %v10103_v20 = vld [vmem:[%s12945_s0 + $0xb8] sm:$0xff]  ;;  %v10116_v18 = vld [vmem:[%s12945_s0 + $0xc8] sm:$0xff]  ;;  %13208 = vst [vmem:[#allocation85_spill] sm:$0xff] %v10166_v42  ;;  %p9447_p2 = scmp.ne.s32.totalorder %s12952_s7, %s9446_s24  ;;  %p9450_p3 = scmp.lt.u32.totalorder %s9446_s24, %s12952_s7 }
  0x60   :  { %8463 = vmatprep.subr.bf16.mxu1 %v12959_v62  ;;  %v8470_v23 = vpack.c.bf16 %v10077_v24, %v10072_v29  ;;  %v10129_v16 = vld [vmem:[%s12945_s0 + $0xd8] sm:$0xff]  ;;  %v10142_v46 = vld [vmem:[%s12945_s0 + $0xe8] sm:$0xff]  ;;  %v10200_v59 = vld [vmem:[%s12946_s1 + $0x20] sm:$0xff] }
  0x61   :  { %v10155_v44 = vld [vmem:[%s12945_s0 + $0xf8] sm:$0xff]  ;;  %13212 = vst [vmem:[#allocation89_spill] sm:$0xff] %v10200_v59  ;;  %v10458_v40 = vld [vmem:[%s12946_s1 + $0x130] sm:$0xff]  ;;  %v10463_v39 = vld [vmem:[%s12946_s1 + $0x148] sm:$0xff]  ;;  %p9452_p4 = pnand %p9450_p3, %p9447_p2 }
  0x62   :  { %v10451_v41 = vld [vmem:[%s12946_s1 + $0x138] sm:$0xff]  ;;  %13246 = vst [vmem:[#allocation123_spill] sm:$0xff] %v10458_v40  ;;  %13247 = vst [vmem:[#allocation124_spill] sm:$0xff] %v10463_v39  ;;  %v10470_v38 = vld [vmem:[%s12946_s1 + $0x140] sm:$0xff] }
  0x63   :  { %8465 = vmatpush1.bf16.msra.mxu1 %v8464_v31  ;;  %v10085_v31 = vld [vmem:[%s12945_s0 + $0xa0] sm:$0xff]  ;;  %13245 = vst [vmem:[#allocation122_spill] sm:$0xff] %v10451_v41  ;;  %13248 = vst [vmem:[#allocation125_spill] sm:$0xff] %v10470_v38  ;;  %v10475_v37 = vld [vmem:[%s12946_s1 + $0x158] sm:$0xff] }
  0x64   :  { %8466 = vmatprep.subr.bf16.mxu1 %v12959_v62  ;;  %v8473_v21 = vpack.c.bf16 %v10090_v22, %v10085_v31  ;;  %13249 = vst [vmem:[#allocation126_spill] sm:$0xff] %v10475_v37  ;;  %v10482_v36 = vld [vmem:[%s12946_s1 + $0x150] sm:$0xff]  ;;  %v10487_v35 = vld [vmem:[%s12946_s1 + $0x168] sm:$0xff]  ;;  %v319_v34 = vld [vmem:[%s12948_s3] sm:$0xff] }
  0x65   :  { %13250 = vst [vmem:[#allocation127_spill] sm:$0xff] %v10482_v36  ;;  %13251 = vst [vmem:[#allocation128_spill] sm:$0xff] %v10487_v35  ;;  %v10497_v33 = vld [vmem:[%s12946_s1 + $0x160] sm:$0xff]  ;;  %v10502_v32 = vld [vmem:[%s12946_s1 + $0x178] sm:$0xff] }
  0x66   :  { %13252 = vst [vmem:[#allocation129_spill] sm:$0xff] %v10497_v33  ;;  %13253 = vst [vmem:[#allocation130_spill] sm:$0xff] %v10502_v32 }
  0x67   :  { %8468 = vmatpush1.bf16.msra.mxu1 %v8467_v25  ;;  %v10098_v25 = vld [vmem:[%s12945_s0 + $0xb0] sm:$0xff] }
  0x68   :  { %8469 = vmatprep.subr.bf16.mxu1 %v12959_v62  ;;  %v8476_v19 = vpack.c.bf16 %v10103_v20, %v10098_v25 }
  0x6b   :  { %8471 = vmatpush1.bf16.msra.mxu1 %v8470_v23  ;;  %v10111_v23 = vld [vmem:[%s12945_s0 + $0xc0] sm:$0xff] }
  0x6c   :  { %8472 = vmatprep.subr.bf16.mxu1 %v12959_v62  ;;  %v8479_v17 = vpack.c.bf16 %v10116_v18, %v10111_v23 }
  0x6f   :  { %8474 = vmatpush1.bf16.msra.mxu1 %v8473_v21  ;;  %v10124_v21 = vld [vmem:[%s12945_s0 + $0xd0] sm:$0xff] }
  0x70   :  { %8475 = vmatprep.subr.bf16.mxu1 %v12959_v62  ;;  %v8482_v47 = vpack.c.bf16 %v10129_v16, %v10124_v21 }
  0x73   :  { %8477 = vmatpush1.bf16.msra.mxu1 %v8476_v19  ;;  %v10137_v19 = vld [vmem:[%s12945_s0 + $0xe0] sm:$0xff] }
  0x74   :  { %8478 = vmatprep.subr.bf16.mxu1 %v12959_v62  ;;  %v8485_v45 = vpack.c.bf16 %v10142_v46, %v10137_v19 }
  0x77   :  { %8480 = vmatpush1.bf16.msra.mxu1 %v8479_v17  ;;  %v10150_v17 = vld [vmem:[%s12945_s0 + $0xf0] sm:$0xff] }
  0x78   :  { %8481 = vmatprep.subr.bf16.mxu1 %v12959_v62  ;;  %v8488_v43 = vpack.c.bf16 %v10155_v44, %v10150_v17 }
  0x7b   :  { %8483 = vmatpush1.bf16.msra.mxu1 %v8482_v47  ;;  %v320_v47 = vld [vmem:[%s12948_s3 + $0x8] sm:$0xff] }
  0x7c   :  { %8484 = vmatprep.subr.bf16.mxu1 %v12959_v62  ;;  %7747 = vmatprep.subr.mxu0 %v320_v47 }
  0x7d   :  { %7748 = vmatpush3.msra.mxu0 %v320_v47  ;;  %v10189_v47 = vld [vmem:[%s12946_s1 + $0x28] sm:$0xff] }
  0x7e   :  { %7750 = vmatmul.mubr.msk.f32.vlgmr.msra.gmra.mrb[0].mxu0 %vm384_vm0, %v9954_v60  ;;  %13211 = vst [vmem:[#allocation88_spill] sm:$0xff] %v10189_v47  ;;  %v10205_v60 = vld [vmem:[%s12946_s1 + $0x38] sm:$0xff]  ;;  %7797 = vmatprep.subr.mxu0 %v319_v34 }
  0x7f   :  { %8486 = vmatpush1.bf16.msra.mxu1 %v8485_v45  ;;  %v10171_v45 = vld [vmem:[%s12946_s1 + $0x18] sm:$0xff]  ;;  %7752 = vmatprep.mubr.msk.f32.mxu0 %vm384_vm0, %v9959_v61  ;;  %13213 = vst [vmem:[#allocation90_spill] sm:$0xff] %v10205_v60 }
  0x80   :  { %8487 = vmatprep.subr.bf16.mxu1 %v12959_v62  ;;  %13209 = vst [vmem:[#allocation86_spill] sm:$0xff] %v10171_v45  ;;  %v10237_v61 = vld [vmem:[%s12946_s1 + $0x58] sm:$0xff]  ;;  %v10446_v62 = vld [vmem:[%s12946_s1 + $0x120] sm:$0xff]  ;;  %7798 = vmatpush3.msra.mxu0 %v319_v34 }
  0x81   :  { %13217 = vst [vmem:[#allocation94_spill] sm:$0xff] %v10237_v61  ;;  %13244 = vst [vmem:[#allocation121_spill] sm:$0xff] %v10446_v62  ;;  %v10521_v34 = vld [vmem:[%s12946_s1 + $0x180] sm:$0xff] }
  0x82   :  { %7753 = vmatmul.mubr.msk.f32.gmra.mrb[2].mxu0 %vm384_vm0, %v9967_v58  ;;  %v10221_v58 = vld [vmem:[%s12946_s1 + $0x48] sm:$0xff]  ;;  %13256 = vst [vmem:[#allocation133_spill] sm:$0xff] %v10521_v34 }
  0x83   :  { %8489 = vmatpush1.bf16.msra.mxu1 %v8488_v43  ;;  %v10184_v43 = vld [vmem:[%s12946_s1 + $0x10] sm:$0xff]  ;;  %7755 = vmatprep.mubr.msk.f32.mxu0 %vm384_vm0, %v9975_v56  ;;  %13215 = vst [vmem:[#allocation92_spill] sm:$0xff] %v10221_v58 }
  0x84   :  { %13210 = vst [vmem:[#allocation87_spill] sm:$0xff] %v10184_v43  ;;  %v10216_v56 = vld [vmem:[%s12946_s1 + $0x30] sm:$0xff] }
  0x85   :  { %13214 = vst [vmem:[#allocation91_spill] sm:$0xff] %v10216_v56 }
  0x86   :  { %771 = vmatmul.mubr.f32.vlgmr.msra.gmra.mrb[0].mxu1 %v10166_v42  ;;  %7756 = vmatmul.mubr.msk.f32.gmra.mrb[4].mxu0 %vm384_vm0, %v9980_v55  ;;  %v10232_v55 = vld [vmem:[%s12946_s1 + $0x40] sm:$0xff] }
  0x87   :  { %775 = vmatprep.mubr.f32.mxu1 %v10171_v45  ;;  %7758 = vmatprep.mubr.msk.f32.mxu0 %vm384_vm0, %v9988_v63  ;;  %13216 = vst [vmem:[#allocation93_spill] sm:$0xff] %v10232_v55  ;;  %v10285_v63 = vld [vmem:[%s12946_s1 + $0x88] sm:$0xff] }
  0x88   :  { %13223 = vst [vmem:[#allocation100_spill] sm:$0xff] %v10285_v63 }
  0x8a   :  { %776 = vmatmul.mubr.f32.gmra.mrb[2].mxu1 %v10184_v43  ;;  %7759 = vmatmul.mubr.msk.f32.gmra.mrb[6].mxu0 %vm384_vm0, %v9993_v53  ;;  %v10253_v53 = vld [vmem:[%s12946_s1 + $0x68] sm:$0xff] }
  0x8b   :  { %780 = vmatprep.mubr.f32.mxu1 %v10189_v47  ;;  %7761 = vmatprep.mubr.msk.f32.mxu0 %vm384_vm0, %v10007_v51  ;;  %v10248_v51 = vld [vmem:[%s12946_s1 + $0x50] sm:$0xff]  ;;  %13219 = vst [vmem:[#allocation96_spill] sm:$0xff] %v10253_v53 }
  0x8c   :  { %13218 = vst [vmem:[#allocation95_spill] sm:$0xff] %v10248_v51 }
  0x8e   :  { %781 = vmatmul.mubr.f32.gmra.mrb[4].mxu1 %v10200_v59  ;;  %7762 = vmatmul.mubr.msk.f32.gmra.mrb[8].mxu0 %vm384_vm0, %v10012_v50  ;;  %v10269_v50 = vld [vmem:[%s12946_s1 + $0x78] sm:$0xff] }
  0x8f   :  { %785 = vmatprep.mubr.f32.mxu1 %v10205_v60  ;;  %7764 = vmatprep.mubr.msk.f32.mxu0 %vm384_vm0, %v10020_v49  ;;  %v10264_v49 = vld [vmem:[%s12946_s1 + $0x60] sm:$0xff]  ;;  %13221 = vst [vmem:[#allocation98_spill] sm:$0xff] %v10269_v50 }
  0x90   :  { %13220 = vst [vmem:[#allocation97_spill] sm:$0xff] %v10264_v49 }
  0x92   :  { %786 = vmatmul.mubr.f32.gmra.mrb[6].mxu1 %v10216_v56  ;;  %7765 = vmatmul.mubr.msk.f32.gmra.mrb[10].mxu0 %vm384_vm0, %v10025_v48  ;;  %v10280_v48 = vld [vmem:[%s12946_s1 + $0x70] sm:$0xff] }
  0x93   :  { %790 = vmatprep.mubr.f32.mxu1 %v10221_v58  ;;  %7767 = vmatprep.mubr.msk.f32.mxu0 %vm384_vm0, %v10033_v57  ;;  %13222 = vst [vmem:[#allocation99_spill] sm:$0xff] %v10280_v48  ;;  %v10301_v57 = vld [vmem:[%s12946_s1 + $0x98] sm:$0xff] }
  0x94   :  { %13225 = vst [vmem:[#allocation102_spill] sm:$0xff] %v10301_v57 }
  0x96   :  { %791 = vmatmul.mubr.f32.gmra.mrb[8].mxu1 %v10232_v55  ;;  %7768 = vmatmul.mubr.msk.f32.gmra.mrb[12].mxu0 %vm384_vm0, %v10038_v30  ;;  %v10296_v30 = vld [vmem:[%s12946_s1 + $0x80] sm:$0xff] }
  0x97   :  { %795 = vmatprep.mubr.f32.mxu1 %v10237_v61  ;;  %7770 = vmatprep.mubr.msk.f32.mxu0 %vm384_vm0, %v10046_v54  ;;  %13224 = vst [vmem:[#allocation101_spill] sm:$0xff] %v10296_v30  ;;  %v10333_v54 = vld [vmem:[%s12946_s1 + $0xb8] sm:$0xff] }
  0x98   :  { %13229 = vst [vmem:[#allocation106_spill] sm:$0xff] %v10333_v54 }
  0x9a   :  { %796 = vmatmul.mubr.f32.gmra.mrb[10].mxu1 %v10248_v51  ;;  %7771 = vmatmul.mubr.msk.f32.gmra.mrb[14].mxu0 %vm384_vm0, %v10051_v28  ;;  %v10317_v28 = vld [vmem:[%s12946_s1 + $0xa8] sm:$0xff] }
  0x9b   :  { %800 = vmatprep.mubr.f32.mxu1 %v10253_v53  ;;  %7773 = vmatprep.mubr.msk.f32.mxu0 %vm384_vm0, %v10059_v27  ;;  %v10312_v27 = vld [vmem:[%s12946_s1 + $0x90] sm:$0xff]  ;;  %13227 = vst [vmem:[#allocation104_spill] sm:$0xff] %v10317_v28 }
  0x9c   :  { %13226 = vst [vmem:[#allocation103_spill] sm:$0xff] %v10312_v27 }
  0x9e   :  { %801 = vmatmul.mubr.f32.gmra.mrb[12].mxu1 %v10264_v49  ;;  %7774 = vmatmul.mubr.msk.f32.gmra.mrb[16].mxu0 %vm384_vm0, %v10064_v26  ;;  %v10328_v26 = vld [vmem:[%s12946_s1 + $0xa0] sm:$0xff] }
  0x9f   :  { %805 = vmatprep.mubr.f32.mxu1 %v10269_v50  ;;  %7776 = vmatprep.mubr.msk.f32.mxu0 %vm384_vm0, %v10072_v29  ;;  %13228 = vst [vmem:[#allocation105_spill] sm:$0xff] %v10328_v26  ;;  %v10349_v29 = vld [vmem:[%s12946_s1 + $0xc8] sm:$0xff] }
  0xa0   :  { %13231 = vst [vmem:[#allocation108_spill] sm:$0xff] %v10349_v29 }
  0xa2   :  { %806 = vmatmul.mubr.f32.gmra.mrb[14].mxu1 %v10280_v48  ;;  %7777 = vmatmul.mubr.msk.f32.gmra.mrb[18].mxu0 %vm384_vm0, %v10077_v24  ;;  %v10344_v24 = vld [vmem:[%s12946_s1 + $0xb0] sm:$0xff] }
  0xa3   :  { %810 = vmatprep.mubr.f32.mxu1 %v10285_v63  ;;  %7779 = vmatprep.mubr.msk.f32.mxu0 %vm384_vm0, %v10085_v31  ;;  %13230 = vst [vmem:[#allocation107_spill] sm:$0xff] %v10344_v24  ;;  %v10365_v31 = vld [vmem:[%s12946_s1 + $0xd8] sm:$0xff] }
  0xa4   :  { %13233 = vst [vmem:[#allocation110_spill] sm:$0xff] %v10365_v31 }
  0xa6   :  { %811 = vmatmul.mubr.f32.gmra.mrb[16].mxu1 %v10296_v30  ;;  %7780 = vmatmul.mubr.msk.f32.gmra.mrb[20].mxu0 %vm384_vm0, %v10090_v22  ;;  %v10360_v22 = vld [vmem:[%s12946_s1 + $0xc0] sm:$0xff] }
  0xa7   :  { %815 = vmatprep.mubr.f32.mxu1 %v10301_v57  ;;  %7782 = vmatprep.mubr.msk.f32.mxu0 %vm384_vm0, %v10098_v25  ;;  %13232 = vst [vmem:[#allocation109_spill] sm:$0xff] %v10360_v22  ;;  %v10381_v25 = vld [vmem:[%s12946_s1 + $0xe8] sm:$0xff] }
  0xa8   :  { %13235 = vst [vmem:[#allocation112_spill] sm:$0xff] %v10381_v25 }
  0xaa   :  { %816 = vmatmul.mubr.f32.gmra.mrb[18].mxu1 %v10312_v27  ;;  %7783 = vmatmul.mubr.msk.f32.gmra.mrb[22].mxu0 %vm384_vm0, %v10103_v20  ;;  %v10376_v20 = vld [vmem:[%s12946_s1 + $0xd0] sm:$0xff] }
  0xab   :  { %820 = vmatprep.mubr.f32.mxu1 %v10317_v28  ;;  %7785 = vmatprep.mubr.msk.f32.mxu0 %vm384_vm0, %v10111_v23  ;;  %13234 = vst [vmem:[#allocation111_spill] sm:$0xff] %v10376_v20  ;;  %v10397_v23 = vld [vmem:[%s12946_s1 + $0xf8] sm:$0xff] }
  0xac   :  { %13237 = vst [vmem:[#allocation114_spill] sm:$0xff] %v10397_v23 }
  0xae   :  { %821 = vmatmul.mubr.f32.gmra.mrb[20].mxu1 %v10328_v26  ;;  %7786 = vmatmul.mubr.msk.f32.gmra.mrb[24].mxu0 %vm384_vm0, %v10116_v18  ;;  %v10392_v18 = vld [vmem:[%s12946_s1 + $0xe0] sm:$0xff] }
  0xaf   :  { %825 = vmatprep.mubr.f32.mxu1 %v10333_v54  ;;  %7788 = vmatprep.mubr.msk.f32.mxu0 %vm384_vm0, %v10124_v21  ;;  %13236 = vst [vmem:[#allocation113_spill] sm:$0xff] %v10392_v18  ;;  %v10413_v21 = vld [vmem:[%s12946_s1 + $0x108] sm:$0xff] }
  0xb0   :  { %13239 = vst [vmem:[#allocation116_spill] sm:$0xff] %v10413_v21 }
  0xb2   :  { %826 = vmatmul.mubr.f32.gmra.mrb[22].mxu1 %v10344_v24  ;;  %7789 = vmatmul.mubr.msk.f32.gmra.mrb[26].mxu0 %vm384_vm0, %v10129_v16  ;;  %v10408_v16 = vld [vmem:[%s12946_s1 + $0xf0] sm:$0xff] }
  0xb3   :  { %830 = vmatprep.mubr.f32.mxu1 %v10349_v29  ;;  %7791 = vmatprep.mubr.msk.f32.mxu0 %vm384_vm0, %v10137_v19  ;;  %13238 = vst [vmem:[#allocation115_spill] sm:$0xff] %v10408_v16  ;;  %v10427_v19 = vld [vmem:[%s12946_s1 + $0x118] sm:$0xff] }
  0xb4   :  { %13241 = vst [vmem:[#allocation118_spill] sm:$0xff] %v10427_v19 }
  0xb6   :  { %831 = vmatmul.mubr.f32.gmra.mrb[24].mxu1 %v10360_v22  ;;  %7792 = vmatmul.mubr.msk.f32.gmra.mrb[28].mxu0 %vm384_vm0, %v10142_v46  ;;  %v10422_v46 = vld [vmem:[%s12946_s1 + $0x100] sm:$0xff] }
  0xb7   :  { %835 = vmatprep.mubr.f32.mxu1 %v10365_v31  ;;  %7794 = vmatprep.mubr.msk.f32.mxu0 %vm384_vm0, %v10150_v17  ;;  %13240 = vst [vmem:[#allocation117_spill] sm:$0xff] %v10422_v46  ;;  %v10439_v17 = vld [vmem:[%s12946_s1 + $0x128] sm:$0xff] }
  0xb8   :  { %13243 = vst [vmem:[#allocation120_spill] sm:$0xff] %v10439_v17 }
  0xba   :  { %836 = vmatmul.mubr.f32.gmra.mrb[26].mxu1 %v10376_v20  ;;  %7795 = vmatmul.mubr.msk.f32.gmra.mrb[30].mxu0 %vm384_vm0, %v10155_v44  ;;  %v10434_v44 = vld [vmem:[%s12946_s1 + $0x110] sm:$0xff] }
  0xbb   :  { %840 = vmatprep.mubr.f32.mxu1 %v10381_v25  ;;  %13242 = vst [vmem:[#allocation119_spill] sm:$0xff] %v10434_v44 }
  0xbe   :  { %841 = vmatmul.mubr.f32.gmra.mrb[28].mxu1 %v10392_v18 }
  0xbf   :  { %845 = vmatprep.mubr.f32.mxu1 %v10397_v23 }
  0xc2   :  { %846 = vmatmul.mubr.f32.gmra.mrb[30].mxu1 %v10408_v16 }
  0xc3   :  { %850 = vmatprep.mubr.f32.mxu1 %v10413_v21 }
  0xc6   :  { %851 = vmatmul.mubr.f32.gmra.mrb[32].mxu1 %v10422_v46 }
  0xc7   :  { %855 = vmatprep.mubr.f32.mxu1 %v10427_v19 }
  0xca   :  { %856 = vmatmul.mubr.f32.gmra.mrb[34].mxu1 %v10434_v44 }
  0xcb   :  { %860 = vmatprep.mubr.f32.mxu1 %v10439_v17 }
  0xce   :  { %861 = vmatmul.mubr.f32.gmra.mrb[36].mxu1 %v10446_v62 }
  0xcf   :  { %865 = vmatprep.mubr.f32.mxu1 %v10451_v41 }
  0xd2   :  { %866 = vmatmul.mubr.f32.gmra.mrb[38].mxu1 %v10458_v40  ;;  %v334_v40 = vld [vmem:[%s12948_s3 + $0x78] sm:$0xff] }
  0xd3   :  { %870 = vmatprep.mubr.f32.mxu1 %v10463_v39  ;;  %v333_v39 = vld [vmem:[%s12948_s3 + $0x70] sm:$0xff] }
  0xd6   :  { %871 = vmatmul.mubr.f32.gmra.mrb[40].mxu1 %v10470_v38 }
  0xd7   :  { %875 = vmatprep.mubr.f32.mxu1 %v10475_v37  ;;  %v331_v37 = vld [vmem:[%s12948_s3 + $0x60] sm:$0xff] }
  0xda   :  { %876 = vmatmul.mubr.f32.gmra.mrb[42].mxu1 %v10482_v36  ;;  %v10509_v36 = vld [vmem:[%s12946_s1 + $0x170] sm:$0xff] }
  0xdb   :  { %880 = vmatprep.mubr.f32.mxu1 %v10487_v35  ;;  %13254 = vst [vmem:[#allocation131_spill] sm:$0xff] %v10509_v36  ;;  %v10514_v35 = vld [vmem:[%s12946_s1 + $0x188] sm:$0xff] }
  0xdc   :  { %13255 = vst [vmem:[#allocation132_spill] sm:$0xff] %v10514_v35 }
  0xde   :  { %881 = vmatmul.mubr.f32.gmra.mrb[44].mxu1 %v10497_v33  ;;  %v330_v33 = vld [vmem:[%s12948_s3 + $0x58] sm:$0xff] }
  0xdf   :  { %885 = vmatprep.mubr.f32.mxu1 %v10502_v32  ;;  %v10526_v32 = vld [vmem:[%s12946_s1 + $0x198] sm:$0xff] }
  0xe0   :  { %13257 = vst [vmem:[#allocation134_spill] sm:$0xff] %v10526_v32 }
  0xe2   :  { %886 = vmatmul.mubr.f32.gmra.mrb[46].mxu1 %v10509_v36  ;;  %v10533_v36 = vld [vmem:[%s12946_s1 + $0x190] sm:$0xff] }
  0xe3   :  { %890 = vmatprep.mubr.f32.mxu1 %v10514_v35  ;;  %13258 = vst [vmem:[#allocation135_spill] sm:$0xff] %v10533_v36  ;;  %v10538_v35 = vld [vmem:[%s12946_s1 + $0x1a8] sm:$0xff] }
  0xe4   :  { %13259 = vst [vmem:[#allocation136_spill] sm:$0xff] %v10538_v35 }
  0xe6   :  { %891 = vmatmul.mubr.f32.gmra.mrb[48].mxu1 %v10521_v34  ;;  %v10545_v34 = vld [vmem:[%s12946_s1 + $0x1a0] sm:$0xff] }
  0xe7   :  { %895 = vmatprep.mubr.f32.mxu1 %v10526_v32  ;;  %13260 = vst [vmem:[#allocation137_spill] sm:$0xff] %v10545_v34  ;;  %v10550_v32 = vld [vmem:[%s12946_s1 + $0x1b8] sm:$0xff] }
  0xe8   :  { %13261 = vst [vmem:[#allocation138_spill] sm:$0xff] %v10550_v32 }
  0xea   :  { %896 = vmatmul.mubr.f32.gmra.mrb[50].mxu1 %v10533_v36  ;;  %v10557_v36 = vld [vmem:[%s12946_s1 + $0x1b0] sm:$0xff] }
  0xeb   :  { %900 = vmatprep.mubr.f32.mxu1 %v10538_v35  ;;  %13262 = vst [vmem:[#allocation139_spill] sm:$0xff] %v10557_v36  ;;  %v10562_v35 = vld [vmem:[%s12946_s1 + $0x1c8] sm:$0xff] }
  0xec   :  { %13263 = vst [vmem:[#allocation140_spill] sm:$0xff] %v10562_v35 }
  0xee   :  { %901 = vmatmul.mubr.f32.gmra.mrb[52].mxu1 %v10545_v34  ;;  %v10569_v34 = vld [vmem:[%s12946_s1 + $0x1c0] sm:$0xff] }
  0xef   :  { %905 = vmatprep.mubr.f32.mxu1 %v10550_v32  ;;  %13264 = vst [vmem:[#allocation141_spill] sm:$0xff] %v10569_v34  ;;  %v10574_v32 = vld [vmem:[%s12946_s1 + $0x1d8] sm:$0xff] }
  0xf0   :  { %13265 = vst [vmem:[#allocation142_spill] sm:$0xff] %v10574_v32 }
  0xf2   :  { %906 = vmatmul.mubr.f32.gmra.mrb[54].mxu1 %v10557_v36  ;;  %v10581_v36 = vld [vmem:[%s12946_s1 + $0x1d0] sm:$0xff] }
  0xf3   :  { %910 = vmatprep.mubr.f32.mxu1 %v10562_v35  ;;  %13266 = vst [vmem:[#allocation143_spill] sm:$0xff] %v10581_v36  ;;  %v10586_v35 = vld [vmem:[%s12946_s1 + $0x1e8] sm:$0xff] }
  0xf4   :  { %13267 = vst [vmem:[#allocation144_spill] sm:$0xff] %v10586_v35 }
  0xf6   :  { %911 = vmatmul.mubr.f32.gmra.mrb[56].mxu1 %v10569_v34  ;;  %v10593_v34 = vld [vmem:[%s12946_s1 + $0x1e0] sm:$0xff] }
  0xf7   :  { %915 = vmatprep.mubr.f32.mxu1 %v10574_v32  ;;  %13268 = vst [vmem:[#allocation145_spill] sm:$0xff] %v10593_v34  ;;  %v10598_v32 = vld [vmem:[%s12946_s1 + $0x1f8] sm:$0xff] }
  0xf8   :  { %13269 = vst [vmem:[#allocation146_spill] sm:$0xff] %v10598_v32 }
  0xfa   :  { %916 = vmatmul.mubr.f32.gmra.mrb[58].mxu1 %v10581_v36  ;;  %v10605_v36 = vld [vmem:[%s12946_s1 + $0x1f0] sm:$0xff]  ;;  %s9529_s1 = smov [#allocation4]  }
  0xfb   :  { %920 = vmatprep.mubr.f32.mxu1 %v10586_v35  ;;  %13270 = vst [vmem:[#allocation147_spill] sm:$0xff] %v10605_v36  ;;  %v329_v35 = vld [vmem:[%s12948_s3 + $0x50] sm:$0xff]  ;;  %s251_s21 = sshll.u32 %s9529_s1, 4  ;;  %s252_s21 = int_to_ptr.vmem [resolvable:$true] %s251_s21 }
  0xfc   :  { %v8490_v7 = vpack.c.bf16 %v330_v33, %v329_v35 }
  0xfe   :  { %921 = vmatmul.mubr.f32.gmra.mrb[60].mxu1 %v10593_v34  ;;  %8491 = vmatprep.subr.bf16.mxu0 %v8490_v7 }
  0xff   :  { %925 = vmatprep.mubr.f32.mxu1 %v10598_v32 }
 0x102   :  { %926 = vmatmul.mubr.f32.gmra.mrb[62].mxu1 %v10605_v36  ;;  %v332_v36 = vld [vmem:[%s12948_s3 + $0x68] sm:$0xff] }
 0x103   :  { %v8494_v33 = vpack.c.bf16 %v332_v36, %v331_v37 }
 0x151   :  { %v10614_v6 = vpop.f32.mrb[0].mxu0 }
 0x152   :  { %v10616_v32 = vpop.f32.mrb[1].mxu0 }
 0x155   :  { %v10625_v5 = vpop.f32.mrb[2].mxu0 }
 0x156   :  { %v10627_v4 = vpop.f32.mrb[3].mxu0 }
 0x159   :  { %v772_v34 = vpop.f32.mrb[0].mxu1 }
 0x15a   :  { %v774_v38 = vpop.f32.mrb[1].mxu1  ;;  %7799 = vmatprep.mubr.msk.f32.mxu0 %vm384_vm0, %v772_v34  ;;  %v8498_v34 = vpack.c.bf16 %v334_v40, %v333_v39 }
 0x15b   :  { %v10636_v38 = vpop.f32.mrb[4].mxu0 }
 0x15c   :  { %v10638_v37 = vpop.f32.mrb[5].mxu0 }
 0x15d   :  { %v777_v35 = vpop.f32.mrb[2].mxu1  ;;  %v10641_v41 = vpop.f32.mrb[6].mxu0 }
 0x15e   :  { %v779_v3 = vpop.f32.mrb[3].mxu1  ;;  %7800 = vmatmul.mubr.msk.f32.vlgmr.msra.gmra.mrb[32].mxu0 %vm384_vm0, %v777_v35  ;;  %v10643_v1 = vpop.f32.mrb[7].mxu0 }
 0x15f   :  { %8493 = vmatpush3.bf16.msra.mxu0 %v8490_v7 }
 0x160   :  { %8495 = vmatprep.subr.bf16.mxu0 %v8494_v33 }
 0x161   :  { %v782_v36 = vpop.f32.mrb[4].mxu1  ;;  %v10646_v7 = vpop.f32.mrb[8].mxu0 }
 0x162   :  { %v784_v2 = vpop.f32.mrb[5].mxu1  ;;  %7802 = vmatprep.mubr.msk.f32.mxu0 %vm384_vm0, %v782_v36  ;;  %v10648_v40 = vpop.f32.mrb[9].mxu0 }
 0x163   :  { %8497 = vmatpush3.bf16.msra.mxu0 %v8494_v33 }
 0x164   :  { %8499 = vmatprep.subr.bf16.mxu0 %v8498_v34 }
 0x165   :  { %v787_v62 = vpop.f32.mrb[6].mxu1  ;;  %v10651_v2 = vpop.f32.mrb[10].mxu0 }
 0x166   :  { %v789_v3 = vpop.f32.mrb[7].mxu1  ;;  %7803 = vmatmul.mubr.msk.f32.gmra.mrb[34].mxu0 %vm384_vm0, %v787_v62  ;;  %v10653_v36 = vpop.f32.mrb[11].mxu0 }
 0x167   :  { %8501 = vmatpush3.bf16.msra.mxu0 %v8498_v34 }
 0x169   :  { %v792_v39 = vpop.f32.mrb[8].mxu1  ;;  %v10656_v3 = vpop.f32.mrb[12].mxu0 }
 0x16a   :  { %v794_v35 = vpop.f32.mrb[9].mxu1  ;;  %7805 = vmatprep.mubr.msk.f32.mxu0 %vm384_vm0, %v792_v39  ;;  %v10658_v34 = vpop.f32.mrb[13].mxu0 }
 0x16d   :  { %v797_v33 = vpop.f32.mrb[10].mxu1  ;;  %v10661_v44 = vpop.f32.mrb[14].mxu0 }
 0x16e   :  { %v799_v0 = vpop.f32.mrb[11].mxu1  ;;  %7806 = vmatmul.mubr.msk.f32.gmra.mrb[36].mxu0 %vm384_vm0, %v797_v33  ;;  %v10663_v39 = vpop.f32.mrb[15].mxu0 }
 0x171   :  { %v802_v62 = vpop.f32.mrb[12].mxu1  ;;  %v10666_v46 = vpop.f32.mrb[16].mxu0 }
 0x172   :  { %v804_v17 = vpop.f32.mrb[13].mxu1  ;;  %7808 = vmatprep.mubr.msk.f32.mxu0 %vm384_vm0, %v802_v62  ;;  %v10668_v33 = vpop.f32.mrb[17].mxu0 }
 0x175   :  { %v807_v35 = vpop.f32.mrb[14].mxu1  ;;  %v10671_v16 = vpop.f32.mrb[18].mxu0 }
 0x176   :  { %v809_v19 = vpop.f32.mrb[15].mxu1  ;;  %7809 = vmatmul.mubr.msk.f32.gmra.mrb[38].mxu0 %vm384_vm0, %v807_v35  ;;  %v10673_v62 = vpop.f32.mrb[19].mxu0 }
 0x179   :  { %v812_v0 = vpop.f32.mrb[16].mxu1  ;;  %v10676_v18 = vpop.f32.mrb[20].mxu0 }
 0x17a   :  { %v814_v21 = vpop.f32.mrb[17].mxu1  ;;  %7811 = vmatprep.mubr.msk.f32.mxu0 %vm384_vm0, %v812_v0  ;;  %v10678_v35 = vpop.f32.mrb[21].mxu0 }
 0x17d   :  { %v817_v17 = vpop.f32.mrb[18].mxu1  ;;  %v10681_v20 = vpop.f32.mrb[22].mxu0 }
 0x17e   :  { %v819_v23 = vpop.f32.mrb[19].mxu1  ;;  %7812 = vmatmul.mubr.msk.f32.gmra.mrb[40].mxu0 %vm384_vm0, %v817_v17  ;;  %v10683_v0 = vpop.f32.mrb[23].mxu0 }
 0x181   :  { %v822_v19 = vpop.f32.mrb[20].mxu1  ;;  %v10686_v22 = vpop.f32.mrb[24].mxu0 }
 0x182   :  { %v824_v25 = vpop.f32.mrb[21].mxu1  ;;  %7814 = vmatprep.mubr.msk.f32.mxu0 %vm384_vm0, %v822_v19  ;;  %v10688_v17 = vpop.f32.mrb[25].mxu0 }
 0x185   :  { %v827_v21 = vpop.f32.mrb[22].mxu1  ;;  %v10691_v24 = vpop.f32.mrb[26].mxu0 }
 0x186   :  { %v829_v31 = vpop.f32.mrb[23].mxu1  ;;  %7815 = vmatmul.mubr.msk.f32.gmra.mrb[42].mxu0 %vm384_vm0, %v827_v21  ;;  %v10693_v19 = vpop.f32.mrb[27].mxu0 }
 0x189   :  { %v832_v23 = vpop.f32.mrb[24].mxu1  ;;  %v10696_v26 = vpop.f32.mrb[28].mxu0 }
 0x18a   :  { %v834_v29 = vpop.f32.mrb[25].mxu1  ;;  %7817 = vmatprep.mubr.msk.f32.mxu0 %vm384_vm0, %v832_v23  ;;  %v10698_v21 = vpop.f32.mrb[29].mxu0 }
 0x18d   :  { %v837_v25 = vpop.f32.mrb[26].mxu1  ;;  %v10701_v27 = vpop.f32.mrb[30].mxu0 }
 0x18e   :  { %v839_v54 = vpop.f32.mrb[27].mxu1  ;;  %7818 = vmatmul.mubr.msk.f32.gmra.mrb[44].mxu0 %vm384_vm0, %v837_v25  ;;  %v10703_v23 = vpop.f32.mrb[31].mxu0 }
 0x191   :  { %v842_v31 = vpop.f32.mrb[28].mxu1 }
 0x192   :  { %v844_v28 = vpop.f32.mrb[29].mxu1  ;;  %7820 = vmatprep.mubr.msk.f32.mxu0 %vm384_vm0, %v842_v31 }
 0x195   :  { %v847_v29 = vpop.f32.mrb[30].mxu1 }
 0x196   :  { %v849_v57 = vpop.f32.mrb[31].mxu1  ;;  %7821 = vmatmul.mubr.msk.f32.gmra.mrb[46].mxu0 %vm384_vm0, %v847_v29 }
 0x199   :  { %v852_v30 = vpop.f32.mrb[32].mxu1 }
 0x19a   :  { %v854_v54 = vpop.f32.mrb[33].mxu1  ;;  %7823 = vmatprep.mubr.msk.f32.mxu0 %vm384_vm0, %v852_v30 }
 0x19d   :  { %v857_v25 = vpop.f32.mrb[34].mxu1 }
 0x19e   :  { %v859_v63 = vpop.f32.mrb[35].mxu1  ;;  %7824 = vmatmul.mubr.msk.f32.gmra.mrb[48].mxu0 %vm384_vm0, %v857_v25 }
 0x19f   :  { %v335_v63 = vld [vmem:[%s12948_s3 + $0x80] sm:$0xff] }
 0x1a1   :  { %v862_v48 = vpop.f32.mrb[36].mxu1 }
 0x1a2   :  { %v864_v28 = vpop.f32.mrb[37].mxu1  ;;  %7826 = vmatprep.mubr.msk.f32.mxu0 %vm384_vm0, %v862_v48  ;;  %v336_v48 = vld [vmem:[%s12948_s3 + $0x88] sm:$0xff] }
 0x1a3   :  { %v8502_v25 = vpack.c.bf16 %v336_v48, %v335_v63 }
 0x1a5   :  { %v867_v31 = vpop.f32.mrb[38].mxu1  ;;  %8503 = vmatprep.subr.bf16.mxu0 %v8502_v25 }
 0x1a6   :  { %v869_v50 = vpop.f32.mrb[39].mxu1  ;;  %7827 = vmatmul.mubr.msk.f32.gmra.mrb[50].mxu0 %vm384_vm0, %v867_v31 }
 0x1a7   :  { %8505 = vmatpush3.bf16.msra.mxu0 %v8502_v25 }
 0x1a9   :  { %v872_v49 = vpop.f32.mrb[40].mxu1 }
 0x1aa   :  { %v874_v57 = vpop.f32.mrb[41].mxu1  ;;  %7829 = vmatprep.mubr.msk.f32.mxu0 %vm384_vm0, %v872_v49 }
 0x1ad   :  { %v877_v29 = vpop.f32.mrb[42].mxu1 }
 0x1ae   :  { %v879_v54 = vpop.f32.mrb[43].mxu1  ;;  %7830 = vmatmul.mubr.msk.f32.gmra.mrb[52].mxu0 %vm384_vm0, %v877_v29 }
 0x1b1   :  { %v882_v30 = vpop.f32.mrb[44].mxu1 }
 0x1b2   :  { %v884_v50 = vpop.f32.mrb[45].mxu1  ;;  %7832 = vmatprep.mubr.msk.f32.mxu0 %vm384_vm0, %v882_v30 }
 0x1b5   :  { %v887_v28 = vpop.f32.mrb[46].mxu1 }
 0x1b6   :  { %v889_v49 = vpop.f32.mrb[47].mxu1  ;;  %7833 = vmatmul.mubr.msk.f32.gmra.mrb[54].mxu0 %vm384_vm0, %v887_v28 }
 0x1b9   :  { %v892_v31 = vpop.f32.mrb[48].mxu1 }
 0x1ba   :  { %v894_v57 = vpop.f32.mrb[49].mxu1  ;;  %7835 = vmatprep.mubr.msk.f32.mxu0 %vm384_vm0, %v892_v31 }
 0x1bd   :  { %v897_v29 = vpop.f32.mrb[50].mxu1 }
 0x1be   :  { %v899_v54 = vpop.f32.mrb[51].mxu1  ;;  %7836 = vmatmul.mubr.msk.f32.gmra.mrb[56].mxu0 %vm384_vm0, %v897_v29  ;;  %v322_v29 = vld [vmem:[%s12948_s3 + $0x18] sm:$0xff] }
 0x1c1   :  { %v902_v53 = vpop.f32.mrb[52].mxu1 }
 0x1c2   :  { %v904_v51 = vpop.f32.mrb[53].mxu1  ;;  %7838 = vmatprep.mubr.msk.f32.mxu0 %vm384_vm0, %v902_v53  ;;  %v321_v53 = vld [vmem:[%s12948_s3 + $0x10] sm:$0xff] }
 0x1c3   :  { %v8506_v54 = vpack.c.bf16 %v322_v29, %v321_v53  ;;  %v325_v29 = vld [vmem:[%s12948_s3 + $0x30] sm:$0xff] }
 0x1c5   :  { %v907_v30 = vpop.f32.mrb[54].mxu1  ;;  %8507 = vmatprep.subr.bf16.mxu0 %v8506_v54 }
 0x1c6   :  { %v909_v63 = vpop.f32.mrb[55].mxu1  ;;  %7839 = vmatmul.mubr.msk.f32.gmra.mrb[58].mxu0 %vm384_vm0, %v907_v30  ;;  %v13067_v30 = vmov 0.0  }
 0x1c7   :  { %1289 = vst.msk [vmem:[#allocation5] sm:$0xff] %vm1288_vm1, %v13067_v30  ;;  %1290 = vst.msk [vmem:[#allocation5 + $0x8] sm:$0xff] %vm1288_vm1, %v13067_v30  ;;  %v10750_v63 = vld [vmem:[#allocation9] ss:$0 sm:$0xff] }
 0x1c8   :  { %1291 = vst.msk [vmem:[#allocation5 + $0x10] sm:$0xff] %vm1288_vm1, %v13067_v30  ;;  %1292 = vst.msk [vmem:[#allocation5 + $0x18] sm:$0xff] %vm1288_vm1, %v13067_v30 }
 0x1c9   :  { %v912_v48 = vpop.f32.mrb[56].mxu1  ;;  %1293 = vst.msk [vmem:[#allocation5 + $0x120] sm:$0xff] %vm1288_vm1, %v13067_v30  ;;  %1294 = vst.msk [vmem:[#allocation5 + $0x128] sm:$0xff] %vm1288_vm1, %v13067_v30 }
 0x1ca   :  { %v914_v50 = vpop.f32.mrb[57].mxu1  ;;  %7841 = vmatprep.mubr.msk.f32.mxu0 %vm384_vm0, %v912_v48  ;;  %1295 = vst.msk [vmem:[#allocation5 + $0x130] sm:$0xff] %vm1288_vm1, %v13067_v30  ;;  %1296 = vst.msk [vmem:[#allocation5 + $0x138] sm:$0xff] %vm1288_vm1, %v13067_v30  ;;  %v328_v30 = vld [vmem:[%s12948_s3 + $0x48] sm:$0xff] }
 0x1cd   :  { %v917_v25 = vpop.f32.mrb[58].mxu1 }
 0x1ce   :  { %v919_v28 = vpop.f32.mrb[59].mxu1  ;;  %7842 = vmatmul.mubr.msk.f32.gmra.mrb[60].mxu0 %vm384_vm0, %v917_v25 }
 0x1d1   :  { %v922_v49 = vpop.f32.mrb[60].mxu1 }
 0x1d2   :  { %v924_v31 = vpop.f32.mrb[61].mxu1  ;;  %7844 = vmatprep.mubr.msk.f32.mxu0 %vm384_vm0, %v922_v49  ;;  %v323_v49 = vld [vmem:[%s12948_s3 + $0x20] sm:$0xff] }
 0x1d3   :  { %v324_v31 = vld [vmem:[%s12948_s3 + $0x28] sm:$0xff] }
 0x1d4   :  { %v8510_v53 = vpack.c.bf16 %v324_v31, %v323_v49 }
 0x1d5   :  { %v927_v57 = vpop.f32.mrb[62].mxu1 }
 0x1d6   :  { %v929_v51 = vpop.f32.mrb[63].mxu1  ;;  %7845 = vmatmul.mubr.msk.f32.gmra.mrb[62].mxu0 %vm384_vm0, %v927_v57 }
 0x231   :  { %v7801_v48 = vpop.f32.mrb[32].mxu0 }
 0x232   :  { %v1103_v50 = vadd.f32 %v7801_v48, %v10750_v63  ;;  %v1097_v25 = vpop.f32.mrb[33].mxu0  ;;  %v326_v48 = vld [vmem:[%s12948_s3 + $0x38] sm:$0xff] }
 0x233   :  { %v1098_v28 = vadd.f32 %v10750_v63, %v1097_v25  ;;  %v8514_v49 = vpack.c.bf16 %v326_v48, %v325_v29  ;;  %v338_v29 = vld [vmem:[%s12948_s3 + $0x98] sm:$0xff] }
 0x234   :  { %v1257_v57 = vmax.f32 %v1103_v50, 0.0 }
 0x235   :  { %v1256_v51 = vmax.f32 %v1098_v28, 0.0 }
 0x236   :  { %1298 = vst.msk [vmem:[#allocation5 + $0x28] sm:$0xff] %vm1288_vm1, %v1257_v57 }
 0x237   :  { %1297 = vst.msk [vmem:[#allocation5 + $0x20] sm:$0xff] %vm1288_vm1, %v1256_v51  ;;  %7863 = vmatprep.mubr.msk.f32.mxu0 %vm1288_vm1, %v1256_v51  ;;  %v327_v51 = vld [vmem:[%s12948_s3 + $0x40] sm:$0xff] }
 0x238   :  { %7864 = vmatmul.mubr.msk.f32.vlgmr.msra.gmra.mrb[64].mxu0 %vm1288_vm1, %v1257_v57  ;;  %v337_v57 = vld [vmem:[%s12948_s3 + $0x90] sm:$0xff] }
 0x239   :  { %v7804_v25 = vpop.f32.mrb[34].mxu0  ;;  %8509 = vmatpush3.bf16.msra.mxu0 %v8506_v54  ;;  %v8518_v54 = vpack.c.bf16 %v328_v30, %v327_v51  ;;  %v10789_v30 = vpack.c.bf16 %v338_v29, %v337_v57 }
 0x23a   :  { %v1113_v50 = vadd.f32 %v7804_v25, %v10750_v63  ;;  %v1107_v28 = vpop.f32.mrb[35].mxu0  ;;  %8511 = vmatprep.subr.bf16.mxu0 %v8510_v53 }
 0x23b   :  { %v1108_v31 = vadd.f32 %v10750_v63, %v1107_v28 }
 0x23c   :  { %v1259_v61 = vmax.f32 %v1113_v50, 0.0 }
 0x23d   :  { %v1258_v55 = vmax.f32 %v1108_v31, 0.0  ;;  %8513 = vmatpush3.bf16.msra.mxu0 %v8510_v53 }
 0x23e   :  { %1300 = vst.msk [vmem:[#allocation5 + $0x38] sm:$0xff] %vm1288_vm1, %v1259_v61  ;;  %8515 = vmatprep.subr.bf16.mxu0 %v8514_v49 }
 0x23f   :  { %1299 = vst.msk [vmem:[#allocation5 + $0x30] sm:$0xff] %vm1288_vm1, %v1258_v55  ;;  %7866 = vmatprep.mubr.msk.f32.mxu0 %vm1288_vm1, %v1258_v55 }
 0x240   :  { %7867 = vmatmul.mubr.msk.f32.gmra.mrb[66].mxu0 %vm1288_vm1, %v1259_v61 }
 0x241   :  { %v7807_v48 = vpop.f32.mrb[36].mxu0  ;;  %8517 = vmatpush3.bf16.msra.mxu0 %v8514_v49 }
 0x242   :  { %v1123_v53 = vadd.f32 %v7807_v48, %v10750_v63  ;;  %v1117_v25 = vpop.f32.mrb[37].mxu0  ;;  %8519 = vmatprep.subr.bf16.mxu0 %v8518_v54 }
 0x243   :  { %v1118_v55 = vadd.f32 %v10750_v63, %v1117_v25 }
 0x244   :  { %v1261_v50 = vmax.f32 %v1123_v53, 0.0 }
 0x245   :  { %v1260_v28 = vmax.f32 %v1118_v55, 0.0  ;;  %8521 = vmatpush3.bf16.msra.mxu0 %v8518_v54 }
 0x246   :  { %1302 = vst.msk [vmem:[#allocation5 + $0x48] sm:$0xff] %vm1288_vm1, %v1261_v50  ;;  %8523 = vmatprep.subr.bf16.mxu0 %v10789_v30 }
 0x247   :  { %1301 = vst.msk [vmem:[#allocation5 + $0x40] sm:$0xff] %vm1288_vm1, %v1260_v28  ;;  %7869 = vmatprep.mubr.msk.f32.mxu0 %vm1288_vm1, %v1260_v28 }
 0x248   :  { %7870 = vmatmul.mubr.msk.f32.gmra.mrb[68].mxu0 %vm1288_vm1, %v1261_v50 }
 0x249   :  { %v7810_v61 = vpop.f32.mrb[38].mxu0 }
 0x24a   :  { %v1133_v49 = vadd.f32 %v7810_v61, %v10750_v63  ;;  %v1127_v31 = vpop.f32.mrb[39].mxu0 }
 0x24b   :  { %v1128_v51 = vadd.f32 %v10750_v63, %v1127_v31 }
 0x24c   :  { %v1263_v57 = vmax.f32 %v1133_v49, 0.0 }
 0x24d   :  { %v1262_v29 = vmax.f32 %v1128_v51, 0.0 }
 0x24e   :  { %1304 = vst.msk [vmem:[#allocation5 + $0x58] sm:$0xff] %vm1288_vm1, %v1263_v57 }
 0x24f   :  { %1303 = vst.msk [vmem:[#allocation5 + $0x50] sm:$0xff] %vm1288_vm1, %v1262_v29  ;;  %7872 = vmatprep.mubr.msk.f32.mxu0 %vm1288_vm1, %v1262_v29 }
 0x250   :  { %7873 = vmatmul.mubr.msk.f32.gmra.mrb[70].mxu0 %vm1288_vm1, %v1263_v57 }
 0x251   :  { %v7813_v54 = vpop.f32.mrb[40].mxu0 }
 0x252   :  { %v1143_v48 = vadd.f32 %v7813_v54, %v10750_v63  ;;  %v1137_v53 = vpop.f32.mrb[41].mxu0 }
 0x253   :  { %v1138_v25 = vadd.f32 %v10750_v63, %v1137_v53 }
 0x254   :  { %v1265_v55 = vmax.f32 %v1143_v48, 0.0 }
 0x255   :  { %v1264_v50 = vmax.f32 %v1138_v25, 0.0 }
 0x256   :  { %1306 = vst.msk [vmem:[#allocation5 + $0x68] sm:$0xff] %vm1288_vm1, %v1265_v55 }
 0x257   :  { %1305 = vst.msk [vmem:[#allocation5 + $0x60] sm:$0xff] %vm1288_vm1, %v1264_v50  ;;  %7875 = vmatprep.mubr.msk.f32.mxu0 %vm1288_vm1, %v1264_v50 }
 0x258   :  { %7876 = vmatmul.mubr.msk.f32.gmra.mrb[72].mxu0 %vm1288_vm1, %v1265_v55 }
 0x259   :  { %v7816_v28 = vpop.f32.mrb[42].mxu0 }
 0x25a   :  { %v1153_v61 = vadd.f32 %v7816_v28, %v10750_v63  ;;  %v1147_v49 = vpop.f32.mrb[43].mxu0 }
 0x25b   :  { %v1148_v31 = vadd.f32 %v10750_v63, %v1147_v49 }
 0x25c   :  { %v1267_v51 = vmax.f32 %v1153_v61, 0.0 }
 0x25d   :  { %v1266_v57 = vmax.f32 %v1148_v31, 0.0 }
 0x25e   :  { %1308 = vst.msk [vmem:[#allocation5 + $0x78] sm:$0xff] %vm1288_vm1, %v1267_v51 }
 0x25f   :  { %1307 = vst.msk [vmem:[#allocation5 + $0x70] sm:$0xff] %vm1288_vm1, %v1266_v57  ;;  %7878 = vmatprep.mubr.msk.f32.mxu0 %vm1288_vm1, %v1266_v57 }
 0x260   :  { %7879 = vmatmul.mubr.msk.f32.gmra.mrb[74].mxu0 %vm1288_vm1, %v1267_v51 }
 0x261   :  { %v7819_v29 = vpop.f32.mrb[44].mxu0 }
 0x262   :  { %v1163_v54 = vadd.f32 %v7819_v29, %v10750_v63  ;;  %v1157_v48 = vpop.f32.mrb[45].mxu0 }
 0x263   :  { %v1158_v53 = vadd.f32 %v10750_v63, %v1157_v48 }
 0x264   :  { %v1269_v25 = vmax.f32 %v1163_v54, 0.0 }
 0x265   :  { %v1268_v55 = vmax.f32 %v1158_v53, 0.0 }
 0x266   :  { %1310 = vst.msk [vmem:[#allocation5 + $0x88] sm:$0xff] %vm1288_vm1, %v1269_v25 }
 0x267   :  { %1309 = vst.msk [vmem:[#allocation5 + $0x80] sm:$0xff] %vm1288_vm1, %v1268_v55  ;;  %7881 = vmatprep.mubr.msk.f32.mxu0 %vm1288_vm1, %v1268_v55 }
 0x268   :  { %7882 = vmatmul.mubr.msk.f32.gmra.mrb[76].mxu0 %vm1288_vm1, %v1269_v25 }
 0x269   :  { %v7822_v50 = vpop.f32.mrb[46].mxu0 }
 0x26a   :  { %v1173_v28 = vadd.f32 %v7822_v50, %v10750_v63  ;;  %v1167_v61 = vpop.f32.mrb[47].mxu0 }
 0x26b   :  { %v1168_v49 = vadd.f32 %v10750_v63, %v1167_v61 }
 0x26c   :  { %v1271_v31 = vmax.f32 %v1173_v28, 0.0 }
 0x26d   :  { %v1270_v51 = vmax.f32 %v1168_v49, 0.0 }
 0x26e   :  { %1312 = vst.msk [vmem:[#allocation5 + $0x98] sm:$0xff] %vm1288_vm1, %v1271_v31 }
 0x26f   :  { %1311 = vst.msk [vmem:[#allocation5 + $0x90] sm:$0xff] %vm1288_vm1, %v1270_v51  ;;  %7884 = vmatprep.mubr.msk.f32.mxu0 %vm1288_vm1, %v1270_v51 }
 0x270   :  { %7885 = vmatmul.mubr.msk.f32.gmra.mrb[78].mxu0 %vm1288_vm1, %v1271_v31 }
 0x271   :  { %v7825_v57 = vpop.f32.mrb[48].mxu0 }
 0x272   :  { %v1183_v29 = vadd.f32 %v7825_v57, %v10750_v63  ;;  %v1177_v54 = vpop.f32.mrb[49].mxu0 }
 0x273   :  { %v1178_v48 = vadd.f32 %v10750_v63, %v1177_v54 }
 0x274   :  { %v1273_v53 = vmax.f32 %v1183_v29, 0.0 }
 0x275   :  { %v1272_v25 = vmax.f32 %v1178_v48, 0.0 }
 0x276   :  { %1314 = vst.msk [vmem:[#allocation5 + $0xa8] sm:$0xff] %vm1288_vm1, %v1273_v53 }
 0x277   :  { %1313 = vst.msk [vmem:[#allocation5 + $0xa0] sm:$0xff] %vm1288_vm1, %v1272_v25  ;;  %7887 = vmatprep.mubr.msk.f32.mxu0 %vm1288_vm1, %v1272_v25 }
 0x278   :  { %7888 = vmatmul.mubr.msk.f32.gmra.mrb[80].mxu0 %vm1288_vm1, %v1273_v53 }
 0x279   :  { %v7828_v55 = vpop.f32.mrb[50].mxu0 }
 0x27a   :  { %v1193_v50 = vadd.f32 %v7828_v55, %v10750_v63  ;;  %v1187_v28 = vpop.f32.mrb[51].mxu0 }
 0x27b   :  { %v1188_v61 = vadd.f32 %v10750_v63, %v1187_v28 }
 0x27c   :  { %v1275_v49 = vmax.f32 %v1193_v50, 0.0 }
 0x27d   :  { %v1274_v31 = vmax.f32 %v1188_v61, 0.0 }
 0x27e   :  { %1316 = vst.msk [vmem:[#allocation5 + $0xb8] sm:$0xff] %vm1288_vm1, %v1275_v49 }
 0x27f   :  { %1315 = vst.msk [vmem:[#allocation5 + $0xb0] sm:$0xff] %vm1288_vm1, %v1274_v31  ;;  %7890 = vmatprep.mubr.msk.f32.mxu0 %vm1288_vm1, %v1274_v31 }
 0x280   :  { %7891 = vmatmul.mubr.msk.f32.gmra.mrb[82].mxu0 %vm1288_vm1, %v1275_v49 }
 0x281   :  { %v7831_v51 = vpop.f32.mrb[52].mxu0 }
 0x282   :  { %v1203_v57 = vadd.f32 %v7831_v51, %v10750_v63  ;;  %v1197_v29 = vpop.f32.mrb[53].mxu0 }
 0x283   :  { %v1198_v54 = vadd.f32 %v10750_v63, %v1197_v29 }
 0x284   :  { %v1277_v48 = vmax.f32 %v1203_v57, 0.0 }
 0x285   :  { %v1276_v53 = vmax.f32 %v1198_v54, 0.0  ;;  %v1352_v58 = vld [vmem:[#allocation5 + $0xb8] sm:$0xff] }
 0x286   :  { %1318 = vst.msk [vmem:[#allocation5 + $0xc8] sm:$0xff] %vm1288_vm1, %v1277_v48 }
 0x287   :  { %1317 = vst.msk [vmem:[#allocation5 + $0xc0] sm:$0xff] %vm1288_vm1, %v1276_v53  ;;  %7893 = vmatprep.mubr.msk.f32.mxu0 %vm1288_vm1, %v1276_v53 }
 0x288   :  { %7894 = vmatmul.mubr.msk.f32.gmra.mrb[84].mxu0 %vm1288_vm1, %v1277_v48 }
 0x289   :  { %v7834_v25 = vpop.f32.mrb[54].mxu0 }
 0x28a   :  { %v1213_v55 = vadd.f32 %v7834_v25, %v10750_v63  ;;  %v1207_v50 = vpop.f32.mrb[55].mxu0 }
 0x28b   :  { %v1208_v28 = vadd.f32 %v10750_v63, %v1207_v50 }
 0x28c   :  { %v1279_v61 = vmax.f32 %v1213_v55, 0.0 }
 0x28d   :  { %v1278_v49 = vmax.f32 %v1208_v28, 0.0  ;;  %v1354_v60 = vld [vmem:[#allocation5 + $0xc8] sm:$0xff] }
 0x28e   :  { %1320 = vst.msk [vmem:[#allocation5 + $0xd8] sm:$0xff] %vm1288_vm1, %v1279_v61  ;;  %v1353_v56 = vld [vmem:[#allocation5 + $0xc0] sm:$0xff] }
 0x28f   :  { %1319 = vst.msk [vmem:[#allocation5 + $0xd0] sm:$0xff] %vm1288_vm1, %v1278_v49  ;;  %7896 = vmatprep.mubr.msk.f32.mxu0 %vm1288_vm1, %v1278_v49 }
 0x290   :  { %7897 = vmatmul.mubr.msk.f32.gmra.mrb[86].mxu0 %vm1288_vm1, %v1279_v61 }
 0x291   :  { %v7837_v31 = vpop.f32.mrb[56].mxu0 }
 0x292   :  { %v1223_v51 = vadd.f32 %v7837_v31, %v10750_v63  ;;  %v1217_v57 = vpop.f32.mrb[57].mxu0 }
 0x293   :  { %v1218_v29 = vadd.f32 %v10750_v63, %v1217_v57 }
 0x294   :  { %v1281_v54 = vmax.f32 %v1223_v51, 0.0 }
 0x295   :  { %v1280_v48 = vmax.f32 %v1218_v29, 0.0  ;;  %v1356_v47 = vld [vmem:[#allocation5 + $0xd8] sm:$0xff] }
 0x296   :  { %1322 = vst.msk [vmem:[#allocation5 + $0xe8] sm:$0xff] %vm1288_vm1, %v1281_v54  ;;  %v1355_v59 = vld [vmem:[#allocation5 + $0xd0] sm:$0xff] }
 0x297   :  { %1321 = vst.msk [vmem:[#allocation5 + $0xe0] sm:$0xff] %vm1288_vm1, %v1280_v48  ;;  %7899 = vmatprep.mubr.msk.f32.mxu0 %vm1288_vm1, %v1280_v48 }
 0x298   :  { %7900 = vmatmul.mubr.msk.f32.gmra.mrb[88].mxu0 %vm1288_vm1, %v1281_v54 }
 0x299   :  { %v7840_v53 = vpop.f32.mrb[58].mxu0 }
 0x29a   :  { %v1233_v25 = vadd.f32 %v7840_v53, %v10750_v63  ;;  %v1227_v55 = vpop.f32.mrb[59].mxu0 }
 0x29b   :  { %v1228_v50 = vadd.f32 %v10750_v63, %v1227_v55 }
 0x29c   :  { %v1283_v28 = vmax.f32 %v1233_v25, 0.0 }
 0x29d   :  { %v1282_v61 = vmax.f32 %v1228_v50, 0.0  ;;  %v1358_v45 = vld [vmem:[#allocation5 + $0xe8] sm:$0xff] }
 0x29e   :  { %1324 = vst.msk [vmem:[#allocation5 + $0xf8] sm:$0xff] %vm1288_vm1, %v1283_v28  ;;  %v1357_v43 = vld [vmem:[#allocation5 + $0xe0] sm:$0xff] }
 0x29f   :  { %1323 = vst.msk [vmem:[#allocation5 + $0xf0] sm:$0xff] %vm1288_vm1, %v1282_v61  ;;  %7902 = vmatprep.mubr.msk.f32.mxu0 %vm1288_vm1, %v1282_v61  ;;  %v1329_v61 = vld [vmem:[#allocation5] sm:$0xff] }
 0x2a0   :  { %7903 = vmatmul.mubr.msk.f32.gmra.mrb[90].mxu0 %vm1288_vm1, %v1283_v28 }
 0x2a1   :  { %v7843_v49 = vpop.f32.mrb[60].mxu0 }
 0x2a2   :  { %v1243_v31 = vadd.f32 %v7843_v49, %v10750_v63  ;;  %v1237_v51 = vpop.f32.mrb[61].mxu0  ;;  %v339_v49 = vld [vmem:[%s12948_s3 + $0xa0] sm:$0xff] }
 0x2a3   :  { %v1238_v57 = vadd.f32 %v10750_v63, %v1237_v51  ;;  %v1331_v51 = vld [vmem:[#allocation5 + $0x10] sm:$0xff] }
 0x2a4   :  { %v1285_v29 = vmax.f32 %v1243_v31, 0.0  ;;  %v340_v31 = vld [vmem:[%s12948_s3 + $0xa8] sm:$0xff] }
 0x2a5   :  { %v1284_v54 = vmax.f32 %v1238_v57, 0.0  ;;  %v8526_v57 = vpack.c.bf16 %v340_v31, %v339_v49  ;;  %v1336_v49 = vld [vmem:[#allocation5 + $0x38] sm:$0xff]  ;;  %v1337_v31 = vld [vmem:[#allocation5 + $0x40] sm:$0xff] }
 0x2a6   :  { %1326 = vst.msk [vmem:[#allocation5 + $0x108] sm:$0xff] %vm1288_vm1, %v1285_v29  ;;  %v1359_v42 = vld [vmem:[#allocation5 + $0xf0] sm:$0xff]  ;;  %v1360_v52 = vld [vmem:[#allocation5 + $0xf8] sm:$0xff] }
 0x2a7   :  { %1325 = vst.msk [vmem:[#allocation5 + $0x100] sm:$0xff] %vm1288_vm1, %v1284_v54  ;;  %7905 = vmatprep.mubr.msk.f32.mxu0 %vm1288_vm1, %v1284_v54  ;;  %v342_v54 = vld [vmem:[%s12948_s3 + $0xb8] sm:$0xff] }
 0x2a8   :  { %7906 = vmatmul.mubr.msk.f32.gmra.mrb[92].mxu0 %vm1288_vm1, %v1285_v29  ;;  %v341_v29 = vld [vmem:[%s12948_s3 + $0xb0] sm:$0xff] }
 0x2a9   :  { %v7846_v48 = vpop.f32.mrb[62].mxu0 }
 0x2aa   :  { %v1253_v53 = vadd.f32 %v7846_v48, %v10750_v63  ;;  %v1247_v25 = vpop.f32.mrb[63].mxu0  ;;  %v1332_v48 = vld [vmem:[#allocation5 + $0x18] sm:$0xff] }
 0x2ab   :  { %v1248_v55 = vadd.f32 %v10750_v63, %v1247_v25  ;;  %v1330_v63 = vld [vmem:[#allocation5 + $0x8] sm:$0xff]  ;;  %v343_v25 = vld [vmem:[%s12948_s3 + $0xc0] sm:$0xff] }
 0x2ac   :  { %v1287_v50 = vmax.f32 %v1253_v53, 0.0  ;;  %v8530_v53 = vpack.c.bf16 %v342_v54, %v341_v29  ;;  %v1341_v29 = vld [vmem:[#allocation5 + $0x60] sm:$0xff]  ;;  %v1342_v54 = vld [vmem:[#allocation5 + $0x68] sm:$0xff] }
 0x2ad   :  { %v1286_v28 = vmax.f32 %v1248_v55, 0.0  ;;  %v344_v55 = vld [vmem:[%s12948_s3 + $0xc8] sm:$0xff]  ;;  %s9528_s3 = smov [#allocation3]  }
 0x2ae   :  { %1328 = vst.msk [vmem:[#allocation5 + $0x118] sm:$0xff] %vm1288_vm1, %v1287_v50  ;;  %s239_s28 = sshll.u32 %s9528_s3, 4  ;;  %s240_s28 = int_to_ptr.vmem [resolvable:$true] %s239_s28 }
 0x2af   :  { %1327 = vst.msk [vmem:[#allocation5 + $0x110] sm:$0xff] %vm1288_vm1, %v1286_v28  ;;  %7908 = vmatprep.mubr.msk.f32.mxu0 %vm1288_vm1, %v1286_v28  ;;  %v1334_v28 = vld [vmem:[#allocation5 + $0x28] sm:$0xff] }
 0x2b0   :  { %7909 = vmatmul.mubr.msk.f32.gmra.mrb[94].mxu0 %vm1288_vm1, %v1287_v50  ;;  %v1333_v50 = vld [vmem:[#allocation5 + $0x20] sm:$0xff] }
 0x2b1   :  { %7927 = vmatprep.mubr.msk.f32.mxu0 %vm1288_vm1, %v1329_v61  ;;  %v1335_v61 = vld [vmem:[#allocation5 + $0x30] sm:$0xff] }
 0x2b4   :  { %7928 = vmatmul.mubr.msk.f32.vlgmr.msra.gmra.mrb[64].mxu0 %vm1288_vm1, %v1330_v63  ;;  %v1338_v63 = vld [vmem:[#allocation5 + $0x48] sm:$0xff] }
 0x2b5   :  { %8525 = vmatpush3.bf16.msra.mxu0 %v10789_v30  ;;  %7930 = vmatprep.mubr.msk.f32.mxu0 %vm1288_vm1, %v1331_v51  ;;  %v8534_v30 = vpack.c.bf16 %v344_v55, %v343_v25  ;;  %v1339_v51 = vld [vmem:[#allocation5 + $0x50] sm:$0xff]  ;;  %v1345_v25 = vld [vmem:[#allocation5 + $0x80] sm:$0xff]  ;;  %v1346_v55 = vld [vmem:[#allocation5 + $0x88] sm:$0xff] }
 0x2b6   :  { %8527 = vmatprep.subr.bf16.mxu0 %v8526_v57 }
 0x2b8   :  { %7931 = vmatmul.mubr.msk.f32.gmra.mrb[66].mxu0 %vm1288_vm1, %v1332_v48  ;;  %v1343_v48 = vld [vmem:[#allocation5 + $0x70] sm:$0xff] }
 0x2b9   :  { %7933 = vmatprep.mubr.msk.f32.mxu0 %vm1288_vm1, %v1333_v50  ;;  %8529 = vmatpush3.bf16.msra.mxu0 %v8526_v57  ;;  %v1340_v57 = vld [vmem:[#allocation5 + $0x58] sm:$0xff]  ;;  %v1347_v50 = vld [vmem:[#allocation5 + $0x90] sm:$0xff] }
 0x2ba   :  { %8531 = vmatprep.subr.bf16.mxu0 %v8530_v53 }
 0x2bc   :  { %7934 = vmatmul.mubr.msk.f32.gmra.mrb[68].mxu0 %vm1288_vm1, %v1334_v28  ;;  %v1349_v28 = vld [vmem:[#allocation5 + $0xa0] sm:$0xff] }
 0x2bd   :  { %7936 = vmatprep.mubr.msk.f32.mxu0 %vm1288_vm1, %v1335_v61  ;;  %8533 = vmatpush3.bf16.msra.mxu0 %v8530_v53  ;;  %v1344_v53 = vld [vmem:[#allocation5 + $0x78] sm:$0xff]  ;;  %v1350_v61 = vld [vmem:[#allocation5 + $0xa8] sm:$0xff] }
 0x2be   :  { %8535 = vmatprep.subr.bf16.mxu0 %v8534_v30 }
 0x2c0   :  { %7937 = vmatmul.mubr.msk.f32.gmra.mrb[70].mxu0 %vm1288_vm1, %v1336_v49  ;;  %v1351_v49 = vld [vmem:[#allocation5 + $0xb0] sm:$0xff] }
 0x2c1   :  { %7939 = vmatprep.mubr.msk.f32.mxu0 %vm1288_vm1, %v1337_v31  ;;  %8537 = vmatpush3.bf16.msra.mxu0 %v8534_v30  ;;  %v1348_v30 = vld [vmem:[#allocation5 + $0x98] sm:$0xff] }
 0x2c4   :  { %7940 = vmatmul.mubr.msk.f32.gmra.mrb[72].mxu0 %vm1288_vm1, %v1338_v63 }
 0x2c5   :  { %7942 = vmatprep.mubr.msk.f32.mxu0 %vm1288_vm1, %v1339_v51 }
 0x2c8   :  { %7943 = vmatmul.mubr.msk.f32.gmra.mrb[74].mxu0 %vm1288_vm1, %v1340_v57 }
 0x2c9   :  { %7945 = vmatprep.mubr.msk.f32.mxu0 %vm1288_vm1, %v1341_v29 }
 0x2cc   :  { %7946 = vmatmul.mubr.msk.f32.gmra.mrb[76].mxu0 %vm1288_vm1, %v1342_v54 }
 0x2cd   :  { %7948 = vmatprep.mubr.msk.f32.mxu0 %vm1288_vm1, %v1343_v48 }
 0x2d0   :  { %7949 = vmatmul.mubr.msk.f32.gmra.mrb[78].mxu0 %vm1288_vm1, %v1344_v53 }
 0x2d1   :  { %7951 = vmatprep.mubr.msk.f32.mxu0 %vm1288_vm1, %v1345_v25 }
 0x2d4   :  { %7952 = vmatmul.mubr.msk.f32.gmra.mrb[80].mxu0 %vm1288_vm1, %v1346_v55 }
 0x2d5   :  { %7954 = vmatprep.mubr.msk.f32.mxu0 %vm1288_vm1, %v1347_v50 }
 0x2d8   :  { %7955 = vmatmul.mubr.msk.f32.gmra.mrb[82].mxu0 %vm1288_vm1, %v1348_v30 }
 0x2d9   :  { %7957 = vmatprep.mubr.msk.f32.mxu0 %vm1288_vm1, %v1349_v28 }
 0x2dc   :  { %7958 = vmatmul.mubr.msk.f32.gmra.mrb[84].mxu0 %vm1288_vm1, %v1350_v61 }
 0x2dd   :  { %7960 = vmatprep.mubr.msk.f32.mxu0 %vm1288_vm1, %v1351_v49 }
 0x2e0   :  { %7961 = vmatmul.mubr.msk.f32.gmra.mrb[86].mxu0 %vm1288_vm1, %v1352_v58 }
 0x2e1   :  { %7963 = vmatprep.mubr.msk.f32.mxu0 %vm1288_vm1, %v1353_v56 }
 0x2e4   :  { %7964 = vmatmul.mubr.msk.f32.gmra.mrb[88].mxu0 %vm1288_vm1, %v1354_v60 }
 0x2e5   :  { %7966 = vmatprep.mubr.msk.f32.mxu0 %vm1288_vm1, %v1355_v59 }
 0x2e8   :  { %7967 = vmatmul.mubr.msk.f32.gmra.mrb[90].mxu0 %vm1288_vm1, %v1356_v47 }
 0x2e9   :  { %7969 = vmatprep.mubr.msk.f32.mxu0 %vm1288_vm1, %v1357_v43 }
 0x2ec   :  { %7970 = vmatmul.mubr.msk.f32.gmra.mrb[92].mxu0 %vm1288_vm1, %v1358_v45 }
 0x2ed   :  { %7972 = vmatprep.mubr.msk.f32.mxu0 %vm1288_vm1, %v1359_v42 }
 0x2f0   :  { %7973 = vmatmul.mubr.msk.f32.gmra.mrb[94].mxu0 %vm1288_vm1, %v1360_v52 }
 0x2f1   :  { %7991 = vmatprep.mubr.msk.f32.mxu0 %vm1288_vm1, %v1337_v31  ;;  %v2027_v31 = vld [vmem:[#allocation5 + $0x100] sm:$0xff] }
 0x2f4   :  { %7992 = vmatmul.mubr.msk.f32.vlgmr.msra.gmra.mrb[64].mxu0 %vm1288_vm1, %v1338_v63 }
 0x2f5   :  { %7994 = vmatprep.mubr.msk.f32.mxu0 %vm1288_vm1, %v1339_v51 }
 0x2f8   :  { %7995 = vmatmul.mubr.msk.f32.gmra.mrb[66].mxu0 %vm1288_vm1, %v1340_v57 }
 0x2f9   :  { %7997 = vmatprep.mubr.msk.f32.mxu0 %vm1288_vm1, %v1341_v29 }
 0x2fc   :  { %7998 = vmatmul.mubr.msk.f32.gmra.mrb[68].mxu0 %vm1288_vm1, %v1342_v54 }
 0x2fd   :  { %8000 = vmatprep.mubr.msk.f32.mxu0 %vm1288_vm1, %v1343_v48 }
 0x300   :  { %8001 = vmatmul.mubr.msk.f32.gmra.mrb[70].mxu0 %vm1288_vm1, %v1344_v53 }
 0x301   :  { %8003 = vmatprep.mubr.msk.f32.mxu0 %vm1288_vm1, %v1345_v25 }
 0x304   :  { %8004 = vmatmul.mubr.msk.f32.gmra.mrb[72].mxu0 %vm1288_vm1, %v1346_v55 }
 0x305   :  { %8006 = vmatprep.mubr.msk.f32.mxu0 %vm1288_vm1, %v1347_v50 }
 0x308   :  { %8007 = vmatmul.mubr.msk.f32.gmra.mrb[74].mxu0 %vm1288_vm1, %v1348_v30 }
 0x309   :  { %8009 = vmatprep.mubr.msk.f32.mxu0 %vm1288_vm1, %v1349_v28 }
 0x30c   :  { %8010 = vmatmul.mubr.msk.f32.gmra.mrb[76].mxu0 %vm1288_vm1, %v1350_v61 }
 0x30d   :  { %8012 = vmatprep.mubr.msk.f32.mxu0 %vm1288_vm1, %v1351_v49 }
 0x310   :  { %8013 = vmatmul.mubr.msk.f32.gmra.mrb[78].mxu0 %vm1288_vm1, %v1352_v58  ;;  %v2028_v58 = vld [vmem:[#allocation5 + $0x108] sm:$0xff] }
 0x311   :  { %8015 = vmatprep.mubr.msk.f32.mxu0 %vm1288_vm1, %v1353_v56  ;;  %v2029_v56 = vld [vmem:[#allocation5 + $0x110] sm:$0xff] }
 0x314   :  { %8016 = vmatmul.mubr.msk.f32.gmra.mrb[80].mxu0 %vm1288_vm1, %v1354_v60  ;;  %v2030_v60 = vld [vmem:[#allocation5 + $0x118] sm:$0xff] }
 0x315   :  { %8018 = vmatprep.mubr.msk.f32.mxu0 %vm1288_vm1, %v1355_v59  ;;  %v2031_v59 = vld [vmem:[#allocation5 + $0x120] sm:$0xff] }
 0x318   :  { %8019 = vmatmul.mubr.msk.f32.gmra.mrb[82].mxu0 %vm1288_vm1, %v1356_v47 }
 0x319   :  { %8021 = vmatprep.mubr.msk.f32.mxu0 %vm1288_vm1, %v1357_v43  ;;  %v2033_v43 = vld [vmem:[#allocation5 + $0x130] sm:$0xff] }
 0x31c   :  { %8022 = vmatmul.mubr.msk.f32.gmra.mrb[84].mxu0 %vm1288_vm1, %v1358_v45  ;;  %v2032_v45 = vld [vmem:[#allocation5 + $0x128] sm:$0xff] }
 0x31d   :  { %8024 = vmatprep.mubr.msk.f32.mxu0 %vm1288_vm1, %v1359_v42  ;;  %v2034_v42 = vld [vmem:[#allocation5 + $0x138] sm:$0xff] }
 0x320   :  { %8025 = vmatmul.mubr.msk.f32.gmra.mrb[86].mxu0 %vm1288_vm1, %v1360_v52 }
 0x321   :  { %8027 = vmatprep.mubr.msk.f32.mxu0 %vm1288_vm1, %v2027_v31 }
 0x324   :  { %8028 = vmatmul.mubr.msk.f32.gmra.mrb[88].mxu0 %vm1288_vm1, %v2028_v58 }
 0x325   :  { %8030 = vmatprep.mubr.msk.f32.mxu0 %vm1288_vm1, %v2029_v56 }
 0x328   :  { %8031 = vmatmul.mubr.msk.f32.gmra.mrb[90].mxu0 %vm1288_vm1, %v2030_v60 }
 0x329   :  { %8033 = vmatprep.mubr.msk.f32.mxu0 %vm1288_vm1, %v2031_v59 }
 0x32c   :  { %8034 = vmatmul.mubr.msk.f32.gmra.mrb[92].mxu0 %vm1288_vm1, %v2032_v45 }
 0x32d   :  { %8036 = vmatprep.mubr.msk.f32.mxu0 %vm1288_vm1, %v2033_v43 }
 0x330   :  { %8037 = vmatmul.mubr.msk.f32.gmra.mrb[94].mxu0 %vm1288_vm1, %v2034_v42 }
 0x331   :  { %9455 = shalt.err (!%p9452_p4)  }
 0x332   :  { %s9456_s14 = scalar_lea.vmem %s240_s28, 32768  ;;  %p9461_p6 = scmp.lt.s32.totalorder %s240_s28, %s240_s28 }
 0x333   :  { %p9457_p5 = scmp.ne.s32.totalorder %s240_s28, %s9456_s14  ;;  %p9462_p7 = scmp.lt.s32.totalorder %s9456_s14, %s9456_s14 }
 0x335   :  { %p9463_p8 = por %p9462_p7, %p9461_p6 }
 0x337   :  { %p9464_p9 = pnand %p9463_p8, %p9457_p5 }
 0x339   :  { %9467 = shalt.err (!%p9464_p9)  }
 0x33a   :  { %242 = dma.hbm_to_vmem [thread:$0]  %s12952_s7, 32768, %s240_s28, [#allocation8 + $0x1] }
 0x33b   :  { %s9468_s16 = scalar_lea.hbm %s12954_s9, 4096 }
 0x33c   :  { %p9469_p10 = scmp.ne.s32.totalorder %s12954_s9, %s9468_s16  ;;  %p9472_p11 = scmp.lt.u32.totalorder %s9468_s16, %s12954_s9 }
 0x33e   :  { %p9474_p12 = pnand %p9472_p11, %p9469_p10 }
 0x340   :  { %9477 = shalt.err (!%p9474_p12)  }
 0x341   :  { %s9478_s20 = scalar_lea.vmem %s252_s21, 4096  ;;  %p9483_p0 = scmp.lt.s32.totalorder %s252_s21, %s252_s21 }
 0x342   :  { %p9479_p13 = scmp.ne.s32.totalorder %s252_s21, %s9478_s20  ;;  %p9484_p1 = scmp.lt.s32.totalorder %s9478_s20, %s9478_s20 }
 0x344   :  { %p9485_p2 = por %p9484_p1, %p9483_p0 }
 0x346   :  { %p9486_p3 = pnand %p9485_p2, %p9479_p13 }
 0x348   :  { %9489 = shalt.err (!%p9486_p3)  }
 0x349   :  { %254 = dma.hbm_to_vmem [thread:$0]  %s12954_s9, 4096, %s252_s21, [#allocation8 + $0x2]  ;;  %v10982_v52 = vld [vmem:[#allocation9 + $0x1] ss:$0 sm:$0xff]  ;;  %v10984_v47 = vld [vmem:[#allocation9 + $0x2] ss:$0 sm:$0xff] }
 0x34a   :  { %v553_v54 = vadd.f32 %v10614_v6, %v10984_v47  ;;  %v548_v53 = vadd.f32 %v10984_v47, %v10616_v32  ;;  %v563_v31 = vadd.f32 %v10625_v5, %v10984_v47  ;;  %v558_v6 = vadd.f32 %v10984_v47, %v10627_v4 }
 0x34b   :  { %v568_v5 = vadd.f32 %v10984_v47, %v10638_v37 }
 0x3c7   :  { %v7993_v63 = vpop.f32.mrb[64].mxu0 }
 0x3c8   :  { %v2393_v51 = vadd.f32 %v7993_v63, %v10982_v52  ;;  %v2197_v57 = vpop.f32.mrb[65].mxu0  ;;  %v573_v63 = vadd.f32 %v10636_v38, %v10984_v47  ;;  %v578_v38 = vadd.f32 %v10984_v47, %v10643_v1 }
 0x3c9   :  { %v2392_v29 = vadd.f32 %v10982_v52, %v2197_v57 }
 0x3ca   :  { %v2425_v48 = vmax.f32 %v2393_v51, 0.0 }
 0x3cb   :  { %v2424_v25 = vmax.f32 %v2392_v29, 0.0  ;;  %v7996_v55 = vpop.f32.mrb[66].mxu0 }
 0x3cc   :  { %v10992_v50 = vadd.f32 %v2425_v48, %v553_v54  ;;  %v2395_v30 = vadd.f32 %v7996_v55, %v10982_v52  ;;  %v2207_v28 = vpop.f32.mrb[67].mxu0  ;;  %v583_v55 = vadd.f32 %v10641_v41, %v10984_v47  ;;  %v588_v41 = vadd.f32 %v10984_v47, %v10648_v40 }
 0x3cd   :  { %v10995_v61 = vadd.f32 %v2424_v25, %v548_v53  ;;  %v2394_v49 = vadd.f32 %v10982_v52, %v2207_v28 }
 0x3ce   :  { %v2427_v58 = vmax.f32 %v2395_v30, 0.0 }
 0x3cf   :  { %v2426_v56 = vmax.f32 %v2394_v49, 0.0  ;;  %v7999_v32 = vpop.f32.mrb[68].mxu0  ;;  %8055 = vmatprep.mubr.msk.f32.mxu1 %vm1288_vm1, %v10995_v61 }
 0x3d0   :  { %v11002_v59 = vadd.f32 %v2427_v58, %v563_v31  ;;  %v2397_v60 = vadd.f32 %v7999_v32, %v10982_v52  ;;  %v2217_v45 = vpop.f32.mrb[69].mxu0  ;;  %v593_v32 = vadd.f32 %v10646_v7, %v10984_v47  ;;  %v598_v7 = vadd.f32 %v10984_v47, %v10653_v36 }
 0x3d1   :  { %v11005_v43 = vadd.f32 %v2426_v56, %v558_v6  ;;  %v2396_v42 = vadd.f32 %v10982_v52, %v2217_v45 }
 0x3d2   :  { %v2429_v51 = vmax.f32 %v2397_v60, 0.0 }
 0x3d3   :  { %v2428_v57 = vmax.f32 %v2396_v42, 0.0  ;;  %v8002_v4 = vpop.f32.mrb[70].mxu0 }
 0x3d4   :  { %v11012_v29 = vadd.f32 %v2429_v51, %v573_v63  ;;  %v2399_v54 = vadd.f32 %v8002_v4, %v10982_v52  ;;  %v2227_v48 = vpop.f32.mrb[71].mxu0  ;;  %v603_v4 = vadd.f32 %v10651_v2, %v10984_v47  ;;  %v608_v2 = vadd.f32 %v10984_v47, %v10658_v34 }
 0x3d5   :  { %v11015_v53 = vadd.f32 %v2428_v57, %v568_v5  ;;  %v2398_v25 = vadd.f32 %v10982_v52, %v2227_v48 }
 0x3d6   :  { %v2431_v30 = vmax.f32 %v2399_v54, 0.0 }
 0x3d7   :  { %v2430_v28 = vmax.f32 %v2398_v25, 0.0  ;;  %v8005_v37 = vpop.f32.mrb[72].mxu0 }
 0x3d8   :  { %v11022_v49 = vadd.f32 %v2431_v30, %v583_v55  ;;  %v2401_v31 = vadd.f32 %v8005_v37, %v10982_v52  ;;  %v2237_v58 = vpop.f32.mrb[73].mxu0  ;;  %v613_v37 = vadd.f32 %v10656_v3, %v10984_v47  ;;  %v618_v3 = vadd.f32 %v10984_v47, %v10663_v39 }
 0x3d9   :  { %v11025_v6 = vadd.f32 %v2430_v28, %v578_v38  ;;  %v2400_v56 = vadd.f32 %v10982_v52, %v2237_v58 }
 0x3da   :  { %v2433_v60 = vmax.f32 %v2401_v31, 0.0 }
 0x3db   :  { %v2432_v45 = vmax.f32 %v2400_v56, 0.0  ;;  %v8008_v1 = vpop.f32.mrb[74].mxu0 }
 0x3dc   :  { %v11032_v42 = vadd.f32 %v2433_v60, %v593_v32  ;;  %v2403_v63 = vadd.f32 %v8008_v1, %v10982_v52  ;;  %v2247_v51 = vpop.f32.mrb[75].mxu0  ;;  %v623_v1 = vadd.f32 %v10661_v44, %v10984_v47  ;;  %v628_v44 = vadd.f32 %v10984_v47, %v10668_v33 }
 0x3dd   :  { %v11035_v5 = vadd.f32 %v2432_v45, %v588_v41  ;;  %v2402_v57 = vadd.f32 %v10982_v52, %v2247_v51 }
 0x3de   :  { %v2435_v54 = vmax.f32 %v2403_v63, 0.0 }
 0x3df   :  { %v2434_v48 = vmax.f32 %v2402_v57, 0.0  ;;  %v8011_v40 = vpop.f32.mrb[76].mxu0 }
 0x3e0   :  { %v11042_v25 = vadd.f32 %v2435_v54, %v603_v4  ;;  %v2405_v55 = vadd.f32 %v8011_v40, %v10982_v52  ;;  %v2257_v30 = vpop.f32.mrb[77].mxu0  ;;  %v633_v40 = vadd.f32 %v10666_v46, %v10984_v47  ;;  %v638_v46 = vadd.f32 %v10984_v47, %v10673_v62 }
 0x3e1   :  { %v11045_v38 = vadd.f32 %v2434_v48, %v598_v7  ;;  %v2404_v28 = vadd.f32 %v10982_v52, %v2257_v30 }
 0x3e2   :  { %v2437_v31 = vmax.f32 %v2405_v55, 0.0 }
 0x3e3   :  { %v2436_v58 = vmax.f32 %v2404_v28, 0.0  ;;  %v8014_v36 = vpop.f32.mrb[78].mxu0 }
 0x3e4   :  { %v11052_v56 = vadd.f32 %v2437_v31, %v613_v37  ;;  %v2407_v32 = vadd.f32 %v8014_v36, %v10982_v52  ;;  %v2267_v60 = vpop.f32.mrb[79].mxu0  ;;  %v643_v36 = vadd.f32 %v10671_v16, %v10984_v47  ;;  %v648_v16 = vadd.f32 %v10984_v47, %v10678_v35 }
 0x3e5   :  { %v11055_v41 = vadd.f32 %v2436_v58, %v608_v2  ;;  %v2406_v45 = vadd.f32 %v10982_v52, %v2267_v60 }
 0x3e6   :  { %v2439_v63 = vmax.f32 %v2407_v32, 0.0 }
 0x3e7   :  { %v2438_v51 = vmax.f32 %v2406_v45, 0.0  ;;  %v8017_v34 = vpop.f32.mrb[80].mxu0 }
 0x3e8   :  { %v11062_v57 = vadd.f32 %v2439_v63, %v623_v1  ;;  %v2409_v4 = vadd.f32 %v8017_v34, %v10982_v52  ;;  %v2277_v54 = vpop.f32.mrb[81].mxu0  ;;  %v653_v34 = vadd.f32 %v10676_v18, %v10984_v47  ;;  %v658_v18 = vadd.f32 %v10984_v47, %v10683_v0 }
 0x3e9   :  { %v11065_v7 = vadd.f32 %v2438_v51, %v618_v3  ;;  %v2408_v48 = vadd.f32 %v10982_v52, %v2277_v54 }
 0x3ea   :  { %v2441_v55 = vmax.f32 %v2409_v4, 0.0 }
 0x3eb   :  { %v2440_v30 = vmax.f32 %v2408_v48, 0.0  ;;  %v8020_v39 = vpop.f32.mrb[82].mxu0 }
 0x3ec   :  { %v11072_v28 = vadd.f32 %v2441_v55, %v633_v40  ;;  %v2411_v37 = vadd.f32 %v8020_v39, %v10982_v52  ;;  %v2287_v31 = vpop.f32.mrb[83].mxu0  ;;  %v663_v39 = vadd.f32 %v10681_v20, %v10984_v47  ;;  %v668_v20 = vadd.f32 %v10984_v47, %v10688_v17 }
 0x3ed   :  { %v11075_v2 = vadd.f32 %v2440_v30, %v628_v44  ;;  %v2410_v58 = vadd.f32 %v10982_v52, %v2287_v31 }
 0x3ee   :  { %v2443_v32 = vmax.f32 %v2411_v37, 0.0 }
 0x3ef   :  { %v2442_v60 = vmax.f32 %v2410_v58, 0.0  ;;  %v8023_v33 = vpop.f32.mrb[84].mxu0 }
 0x3f0   :  { %v11082_v45 = vadd.f32 %v2443_v32, %v643_v36  ;;  %v2413_v1 = vadd.f32 %v8023_v33, %v10982_v52  ;;  %v2297_v63 = vpop.f32.mrb[85].mxu0  ;;  %v673_v33 = vadd.f32 %v10686_v22, %v10984_v47  ;;  %v678_v22 = vadd.f32 %v10984_v47, %v10693_v19 }
 0x3f1   :  { %v11085_v3 = vadd.f32 %v2442_v60, %v638_v46  ;;  %v2412_v51 = vadd.f32 %v10982_v52, %v2297_v63 }
 0x3f2   :  { %v2445_v4 = vmax.f32 %v2413_v1, 0.0 }
 0x3f3   :  { %v2444_v54 = vmax.f32 %v2412_v51, 0.0  ;;  %v8026_v62 = vpop.f32.mrb[86].mxu0 }
 0x3f4   :  { %v11092_v48 = vadd.f32 %v2445_v4, %v653_v34  ;;  %v2415_v40 = vadd.f32 %v8026_v62, %v10982_v52  ;;  %v2307_v55 = vpop.f32.mrb[87].mxu0  ;;  %v683_v62 = vadd.f32 %v10691_v24, %v10984_v47  ;;  %v688_v24 = vadd.f32 %v10984_v47, %v10698_v21 }
 0x3f5   :  { %v11095_v44 = vadd.f32 %v2444_v54, %v648_v16  ;;  %v2414_v30 = vadd.f32 %v10982_v52, %v2307_v55 }
 0x3f6   :  { %v2447_v37 = vmax.f32 %v2415_v40, 0.0 }
 0x3f7   :  { %v2446_v31 = vmax.f32 %v2414_v30, 0.0  ;;  %v8029_v35 = vpop.f32.mrb[88].mxu0 }
 0x3f8   :  { %v11102_v58 = vadd.f32 %v2447_v37, %v663_v39  ;;  %v2417_v36 = vadd.f32 %v8029_v35, %v10982_v52  ;;  %v2317_v32 = vpop.f32.mrb[89].mxu0  ;;  %v693_v35 = vadd.f32 %v10696_v26, %v10984_v47  ;;  %v698_v26 = vadd.f32 %v10984_v47, %v10703_v23 }
 0x3f9   :  { %v11105_v46 = vadd.f32 %v2446_v31, %v658_v18  ;;  %v2416_v60 = vadd.f32 %v10982_v52, %v2317_v32 }
 0x3fa   :  { %v2449_v1 = vmax.f32 %v2417_v36, 0.0 }
 0x3fb   :  { %v2448_v63 = vmax.f32 %v2416_v60, 0.0  ;;  %v8032_v0 = vpop.f32.mrb[90].mxu0 }
 0x3fc   :  { %v11112_v51 = vadd.f32 %v2449_v1, %v673_v33  ;;  %v2419_v34 = vadd.f32 %v8032_v0, %v10982_v52  ;;  %v2327_v4 = vpop.f32.mrb[91].mxu0  ;;  %v703_v0 = vadd.f32 %v10701_v27, %v10984_v47 }
 0x3fd   :  { %v11115_v16 = vadd.f32 %v2448_v63, %v668_v20  ;;  %v2418_v54 = vadd.f32 %v10982_v52, %v2327_v4 }
 0x3fe   :  { %v2451_v40 = vmax.f32 %v2419_v34, 0.0 }
 0x3ff   :  { %v2450_v55 = vmax.f32 %v2418_v54, 0.0  ;;  %v8035_v17 = vpop.f32.mrb[92].mxu0 }
 0x400   :  { %v11122_v30 = vadd.f32 %v2451_v40, %v683_v62  ;;  %v2421_v39 = vadd.f32 %v8035_v17, %v10982_v52  ;;  %v2337_v37 = vpop.f32.mrb[93].mxu0  ;;  %v8538_v62 = vpack.c.bf16 %v9674_v9, %v9669_v8  ;;  %v8542_v40 = vpack.c.bf16 %v9684_v11, %v9679_v10 }
 0x401   :  { %v11125_v18 = vadd.f32 %v2450_v55, %v678_v22  ;;  %v2420_v31 = vadd.f32 %v10982_v52, %v2337_v37 }
 0x402   :  { %v2453_v36 = vmax.f32 %v2421_v39, 0.0 }
 0x403   :  { %v2452_v32 = vmax.f32 %v2420_v31, 0.0  ;;  %v8038_v19 = vpop.f32.mrb[94].mxu0 }
 0x404   :  { %v11132_v60 = vadd.f32 %v2453_v36, %v693_v35  ;;  %v2423_v33 = vadd.f32 %v8038_v19, %v10982_v52  ;;  %v2347_v1 = vpop.f32.mrb[95].mxu0 }
 0x405   :  { %v11135_v20 = vadd.f32 %v2452_v32, %v688_v24  ;;  %v2422_v63 = vadd.f32 %v10982_v52, %v2347_v1 }
 0x406   :  { %v2455_v34 = vmax.f32 %v2423_v33, 0.0 }
 0x407   :  { %v2454_v4 = vmax.f32 %v2422_v63, 0.0 }
 0x408   :  { %v11142_v21 = vadd.f32 %v2455_v34, %v703_v0 }
 0x409   :  { %v11144_v54 = vadd.f32 %v2454_v4, %v698_v26 }
 0x40a   :  { %9516 = dma.done.wait [#allocation8], 8192 }
 0x40b   :  { %9517 = vsyncadd [#allocation8], 4294959104  ;;  %8539 = vmatprep.subr.bf16.mxu1 %v8538_v62  ;;  %v8546_v27 = vpack.c.bf16 %v9694_v13, %v9689_v12  ;;  %v8550_v23 = vpack.c.bf16 %v9704_v15, %v9699_v14  ;;  %v8555_v8 = vpack.c.bf16 %v10992_v50, %v10995_v61  ;;  %v13271_v9 = vmov 0.0|0.0   ;;  %v13291_v22 = vld [vmem:[#allocation103_spill] sm:$0xff]  ;;  %v13292_v55 = vld [vmem:[#allocation104_spill] sm:$0xff] }
 0x40c   :  { %8541 = vmatpush3.bf16.msra.mxu1 %v8538_v62  ;;  %v8558_v10 = vpack.c.bf16 %v11002_v59, %v11005_v43  ;;  %v8561_v11 = vpack.c.bf16 %v11012_v29, %v11015_v53  ;;  %v8564_v12 = vpack.c.bf16 %v11022_v49, %v11025_v6  ;;  %v8567_v13 = vpack.c.bf16 %v11032_v42, %v11035_v5  ;;  %v13293_v17 = vld [vmem:[#allocation105_spill] sm:$0xff]  ;;  %v13295_v39 = vld [vmem:[#allocation107_spill] sm:$0xff]  ;;  %v13296_v37 = vld [vmem:[#allocation108_spill] sm:$0xff] }
 0x40d   :  { %8543 = vmatprep.subr.bf16.mxu1 %v8542_v40  ;;  %v8570_v14 = vpack.c.bf16 %v11042_v25, %v11045_v38  ;;  %v8573_v15 = vpack.c.bf16 %v11052_v56, %v11055_v41  ;;  %v8576_v52 = vpack.c.bf16 %v11062_v57, %v11065_v7  ;;  %v8579_v47 = vpack.c.bf16 %v11072_v28, %v11075_v2  ;;  %v13298_v31 = vld [vmem:[#allocation110_spill] sm:$0xff]  ;;  %v13299_v35 = vld [vmem:[#allocation111_spill] sm:$0xff]  ;;  %v13300_v36 = vld [vmem:[#allocation112_spill] sm:$0xff] }
 0x40e   :  { %v8585_v61 = vpack.c.bf16 %v11092_v48, %v11095_v44  ;;  %v13301_v24 = vld [vmem:[#allocation113_spill] sm:$0xff]  ;;  %v13302_v32 = vld [vmem:[#allocation114_spill] sm:$0xff]  ;;  %v13303_v19 = vld [vmem:[#allocation115_spill] sm:$0xff] }
 0x40f   :  { %v13305_v33 = vld [vmem:[#allocation117_spill] sm:$0xff]  ;;  %v13306_v1 = vld [vmem:[#allocation118_spill] sm:$0xff]  ;;  %v13308_v63 = vld [vmem:[#allocation120_spill] sm:$0xff] }
 0x410   :  { %8545 = vmatpush3.bf16.msra.mxu1 %v8542_v40  ;;  %v13309_v0 = vld [vmem:[#allocation28_spill] sm:$0xff]  ;;  %v13310_v34 = vld [vmem:[#allocation29_spill] sm:$0xff]  ;;  %v13314_v62 = vld [vmem:[#allocation31_spill] sm:$0xff] }
 0x411   :  { %8547 = vmatprep.subr.bf16.mxu1 %v8546_v27  ;;  %v8602_v26 = vpack.c.bf16 %v13310_v34, %v13309_v0  ;;  %v13311_v4 = vld [vmem:[#allocation121_spill] sm:$0xff]  ;;  %v13331_v0 = vld [vmem:[#allocation135_spill] sm:$0xff]  ;;  %v13332_v34 = vld [vmem:[#allocation136_spill] sm:$0xff] }
 0x413   :  { %8603 = vmatprep.subr.bf16.mxu0 %v8602_v26 }
 0x414   :  { %8549 = vmatpush3.bf16.msra.mxu1 %v8546_v27  ;;  %8605 = vmatpush3.bf16.msra.mxu0 %v8602_v26  ;;  %v13315_v27 = vld [vmem:[#allocation123_spill] sm:$0xff]  ;;  %v13333_v26 = vld [vmem:[#allocation137_spill] sm:$0xff] }
 0x415   :  { %8551 = vmatprep.subr.bf16.mxu1 %v8550_v23 }
 0x418   :  { %8553 = vmatpush3.bf16.msra.mxu1 %v8550_v23  ;;  %v13316_v23 = vld [vmem:[#allocation124_spill] sm:$0xff] }
 0x419   :  { %8554 = vmatprep.subr.bf16.mxu1 %v13271_v9 }
 0x41b   :  { %8056 = vmatmul.mubr.msk.f32.vlgmr.msra.gmra.mrb[64].mxu1 %vm1288_vm1, %v10992_v50  ;;  %v8582_v50 = vpack.c.bf16 %v11082_v45, %v11085_v3 }
 0x41c   :  { %8556 = vmatpush1.bf16.msra.mxu1 %v8555_v8  ;;  %8058 = vmatprep.mubr.msk.f32.mxu1 %vm1288_vm1, %v11005_v43  ;;  %v8591_v43 = vpack.c.bf16 %v11112_v51, %v11115_v16  ;;  %v13317_v8 = vld [vmem:[#allocation32_spill] sm:$0xff] }
 0x41d   :  { %8557 = vmatprep.subr.bf16.mxu1 %v13271_v9 }
 0x41f   :  { %8059 = vmatmul.mubr.msk.f32.gmra.mrb[66].mxu1 %vm1288_vm1, %v11002_v59  ;;  %v8588_v59 = vpack.c.bf16 %v11102_v58, %v11105_v46 }
 0x420   :  { %8559 = vmatpush1.bf16.msra.mxu1 %v8558_v10  ;;  %8061 = vmatprep.mubr.msk.f32.mxu1 %vm1288_vm1, %v11015_v53  ;;  %v8597_v53 = vpack.c.bf16 %v11132_v60, %v11135_v20  ;;  %v13318_v10 = vld [vmem:[#allocation33_spill] sm:$0xff] }
 0x421   :  { %8560 = vmatprep.subr.bf16.mxu1 %v13271_v9 }
 0x423   :  { %8062 = vmatmul.mubr.msk.f32.gmra.mrb[68].mxu1 %vm1288_vm1, %v11012_v29  ;;  %v8594_v29 = vpack.c.bf16 %v11122_v30, %v11125_v18 }
 0x424   :  { %8562 = vmatpush1.bf16.msra.mxu1 %v8561_v11  ;;  %8064 = vmatprep.mubr.msk.f32.mxu1 %vm1288_vm1, %v11025_v6  ;;  %v13272_v6 = vld [vmem:[#allocation84_spill] sm:$0xff]  ;;  %v8610_v11 = vpack.c.bf16 %v13318_v10, %v13317_v8  ;;  %v13337_v8 = vld [vmem:[#allocation141_spill] sm:$0xff]  ;;  %v13338_v10 = vld [vmem:[#allocation142_spill] sm:$0xff] }
 0x425   :  { %8563 = vmatprep.subr.bf16.mxu1 %v13271_v9 }
 0x427   :  { %8065 = vmatmul.mubr.msk.f32.gmra.mrb[70].mxu1 %vm1288_vm1, %v11022_v49  ;;  %v8600_v49 = vpack.c.bf16 %v11142_v21, %v11144_v54 }
 0x428   :  { %8565 = vmatpush1.bf16.msra.mxu1 %v8564_v12  ;;  %8067 = vmatprep.mubr.msk.f32.mxu1 %vm1288_vm1, %v11035_v5  ;;  %v13274_v5 = vld [vmem:[#allocation86_spill] sm:$0xff]  ;;  %v13319_v12 = vld [vmem:[#allocation125_spill] sm:$0xff] }
 0x429   :  { %8566 = vmatprep.subr.bf16.mxu1 %v13271_v9 }
 0x42b   :  { %8068 = vmatmul.mubr.msk.f32.gmra.mrb[72].mxu1 %vm1288_vm1, %v11032_v42  ;;  %v13273_v42 = vld [vmem:[#allocation85_spill] sm:$0xff] }
 0x42c   :  { %8568 = vmatpush1.bf16.msra.mxu1 %v8567_v13  ;;  %8070 = vmatprep.mubr.msk.f32.mxu1 %vm1288_vm1, %v11045_v38  ;;  %v13276_v38 = vld [vmem:[#allocation88_spill] sm:$0xff]  ;;  %v13320_v13 = vld [vmem:[#allocation126_spill] sm:$0xff] }
 0x42d   :  { %8569 = vmatprep.subr.bf16.mxu1 %v13271_v9 }
 0x42f   :  { %8071 = vmatmul.mubr.msk.f32.gmra.mrb[74].mxu1 %vm1288_vm1, %v11042_v25  ;;  %v13275_v25 = vld [vmem:[#allocation87_spill] sm:$0xff] }
 0x430   :  { %8571 = vmatpush1.bf16.msra.mxu1 %v8570_v14  ;;  %8073 = vmatprep.mubr.msk.f32.mxu1 %vm1288_vm1, %v11055_v41  ;;  %v13278_v41 = vld [vmem:[#allocation90_spill] sm:$0xff] }
 0x431   :  { %8572 = vmatprep.subr.bf16.mxu1 %v13271_v9  ;;  %v13321_v14 = vld [vmem:[#allocation34_spill] sm:$0xff] }
 0x433   :  { %8074 = vmatmul.mubr.msk.f32.gmra.mrb[76].mxu1 %vm1288_vm1, %v11052_v56  ;;  %v13277_v56 = vld [vmem:[#allocation89_spill] sm:$0xff] }
 0x434   :  { %8574 = vmatpush1.bf16.msra.mxu1 %v8573_v15  ;;  %8076 = vmatprep.mubr.msk.f32.mxu1 %vm1288_vm1, %v11065_v7  ;;  %v13280_v7 = vld [vmem:[#allocation92_spill] sm:$0xff]  ;;  %v13322_v15 = vld [vmem:[#allocation35_spill] sm:$0xff] }
 0x435   :  { %8575 = vmatprep.subr.bf16.mxu1 %v13271_v9 }
 0x437   :  { %8077 = vmatmul.mubr.msk.f32.gmra.mrb[78].mxu1 %vm1288_vm1, %v11062_v57  ;;  %v13279_v57 = vld [vmem:[#allocation91_spill] sm:$0xff] }
 0x438   :  { %8577 = vmatpush1.bf16.msra.mxu1 %v8576_v52  ;;  %8079 = vmatprep.mubr.msk.f32.mxu1 %vm1288_vm1, %v11075_v2  ;;  %v13282_v2 = vld [vmem:[#allocation94_spill] sm:$0xff]  ;;  %v8614_v52 = vpack.c.bf16 %v13322_v15, %v13321_v14  ;;  %v13340_v14 = vld [vmem:[#allocation144_spill] sm:$0xff]  ;;  %v13341_v15 = vld [vmem:[#allocation145_spill] sm:$0xff] }
 0x439   :  { %8578 = vmatprep.subr.bf16.mxu1 %v13271_v9 }
 0x43b   :  { %8080 = vmatmul.mubr.msk.f32.gmra.mrb[80].mxu1 %vm1288_vm1, %v11072_v28  ;;  %v13281_v28 = vld [vmem:[#allocation93_spill] sm:$0xff] }
 0x43c   :  { %8580 = vmatpush1.bf16.msra.mxu1 %v8579_v47  ;;  %8082 = vmatprep.mubr.msk.f32.mxu1 %vm1288_vm1, %v11085_v3  ;;  %v13284_v3 = vld [vmem:[#allocation96_spill] sm:$0xff]  ;;  %v13323_v47 = vld [vmem:[#allocation127_spill] sm:$0xff] }
 0x43d   :  { %8581 = vmatprep.subr.bf16.mxu1 %v13271_v9 }
 0x43f   :  { %8083 = vmatmul.mubr.msk.f32.gmra.mrb[82].mxu1 %vm1288_vm1, %v11082_v45  ;;  %v13283_v45 = vld [vmem:[#allocation95_spill] sm:$0xff] }
 0x440   :  { %8583 = vmatpush1.bf16.msra.mxu1 %v8582_v50  ;;  %8085 = vmatprep.mubr.msk.f32.mxu1 %vm1288_vm1, %v11095_v44  ;;  %v13286_v44 = vld [vmem:[#allocation98_spill] sm:$0xff]  ;;  %v13324_v50 = vld [vmem:[#allocation128_spill] sm:$0xff] }
 0x441   :  { %8584 = vmatprep.subr.bf16.mxu1 %v13271_v9 }
 0x443   :  { %8086 = vmatmul.mubr.msk.f32.gmra.mrb[84].mxu1 %vm1288_vm1, %v11092_v48  ;;  %v13285_v48 = vld [vmem:[#allocation97_spill] sm:$0xff] }
 0x444   :  { %8586 = vmatpush1.bf16.msra.mxu1 %v8585_v61  ;;  %8088 = vmatprep.mubr.msk.f32.mxu1 %vm1288_vm1, %v11105_v46  ;;  %v13288_v46 = vld [vmem:[#allocation100_spill] sm:$0xff]  ;;  %v13325_v61 = vld [vmem:[#allocation129_spill] sm:$0xff] }
 0x445   :  { %8587 = vmatprep.subr.bf16.mxu1 %v13271_v9 }
 0x447   :  { %8089 = vmatmul.mubr.msk.f32.gmra.mrb[86].mxu1 %vm1288_vm1, %v11102_v58  ;;  %v13287_v58 = vld [vmem:[#allocation99_spill] sm:$0xff] }
 0x448   :  { %8589 = vmatpush1.bf16.msra.mxu1 %v8588_v59  ;;  %8091 = vmatprep.mubr.msk.f32.mxu1 %vm1288_vm1, %v11115_v16  ;;  %v13290_v16 = vld [vmem:[#allocation102_spill] sm:$0xff] }
 0x449   :  { %8590 = vmatprep.subr.bf16.mxu1 %v13271_v9  ;;  %v13326_v59 = vld [vmem:[#allocation130_spill] sm:$0xff] }
 0x44b   :  { %8092 = vmatmul.mubr.msk.f32.gmra.mrb[88].mxu1 %vm1288_vm1, %v11112_v51  ;;  %v13289_v51 = vld [vmem:[#allocation101_spill] sm:$0xff] }
 0x44c   :  { %8592 = vmatpush1.bf16.msra.mxu1 %v8591_v43  ;;  %8094 = vmatprep.mubr.msk.f32.mxu1 %vm1288_vm1, %v11125_v18  ;;  %v13297_v18 = vld [vmem:[#allocation109_spill] sm:$0xff]  ;;  %v13327_v43 = vld [vmem:[#allocation131_spill] sm:$0xff] }
 0x44d   :  { %8593 = vmatprep.subr.bf16.mxu1 %v13271_v9 }
 0x44f   :  { %8095 = vmatmul.mubr.msk.f32.gmra.mrb[90].mxu1 %vm1288_vm1, %v11122_v30  ;;  %v13294_v30 = vld [vmem:[#allocation106_spill] sm:$0xff] }
 0x450   :  { %8595 = vmatpush1.bf16.msra.mxu1 %v8594_v29  ;;  %8097 = vmatprep.mubr.msk.f32.mxu1 %vm1288_vm1, %v11135_v20  ;;  %v13307_v20 = vld [vmem:[#allocation119_spill] sm:$0xff]  ;;  %v13328_v29 = vld [vmem:[#allocation132_spill] sm:$0xff] }
 0x451   :  { %8596 = vmatprep.subr.bf16.mxu1 %v13271_v9 }
 0x453   :  { %8098 = vmatmul.mubr.msk.f32.gmra.mrb[92].mxu1 %vm1288_vm1, %v11132_v60  ;;  %v13304_v60 = vld [vmem:[#allocation116_spill] sm:$0xff] }
 0x454   :  { %8598 = vmatpush1.bf16.msra.mxu1 %v8597_v53  ;;  %8100 = vmatprep.mubr.msk.f32.mxu1 %vm1288_vm1, %v11144_v54  ;;  %v13313_v54 = vld [vmem:[#allocation30_spill] sm:$0xff]  ;;  %v13329_v53 = vld [vmem:[#allocation133_spill] sm:$0xff] }
 0x455   :  { %8599 = vmatprep.subr.bf16.mxu1 %v13271_v9  ;;  %v8606_v40 = vpack.c.bf16 %v13314_v62, %v13313_v54  ;;  %v13334_v54 = vld [vmem:[#allocation138_spill] sm:$0xff]  ;;  %v13335_v62 = vld [vmem:[#allocation139_spill] sm:$0xff] }
 0x457   :  { %8101 = vmatmul.mubr.msk.f32.gmra.mrb[94].mxu1 %vm1288_vm1, %v11142_v21  ;;  %v13312_v21 = vld [vmem:[#allocation122_spill] sm:$0xff]  ;;  %8607 = vmatprep.subr.bf16.mxu0 %v8606_v40 }
 0x458   :  { %8601 = vmatpush1.bf16.msra.mxu1 %v8600_v49  ;;  %2947 = vmatprep.mubr.f32.mxu1 %v13272_v6  ;;  %v13330_v49 = vld [vmem:[#allocation134_spill] sm:$0xff] }
 0x459   :  { %8609 = vmatpush3.bf16.msra.mxu0 %v8606_v40  ;;  %v13336_v40 = vld [vmem:[#allocation140_spill] sm:$0xff] }
 0x45a   :  { %8611 = vmatprep.subr.bf16.mxu0 %v8610_v11 }
 0x45b   :  { %2948 = vmatmul.mubr.f32.vlgmr.msra.gmra.mrb[96].mxu1 %v13273_v42 }
 0x45c   :  { %2952 = vmatprep.mubr.f32.mxu1 %v13274_v5 }
 0x45d   :  { %8613 = vmatpush3.bf16.msra.mxu0 %v8610_v11  ;;  %v13339_v11 = vld [vmem:[#allocation143_spill] sm:$0xff] }
 0x45e   :  { %8615 = vmatprep.subr.bf16.mxu0 %v8614_v52 }
 0x45f   :  { %2953 = vmatmul.mubr.f32.gmra.mrb[98].mxu1 %v13275_v25 }
 0x460   :  { %2957 = vmatprep.mubr.f32.mxu1 %v13276_v38 }
 0x461   :  { %8617 = vmatpush3.bf16.msra.mxu0 %v8614_v52  ;;  %v13342_v52 = vld [vmem:[#allocation146_spill] sm:$0xff] }
 0x463   :  { %2958 = vmatmul.mubr.f32.gmra.mrb[100].mxu1 %v13277_v56 }
 0x464   :  { %2962 = vmatprep.mubr.f32.mxu1 %v13278_v41 }
 0x467   :  { %2963 = vmatmul.mubr.f32.gmra.mrb[102].mxu1 %v13279_v57 }
 0x468   :  { %2967 = vmatprep.mubr.f32.mxu1 %v13280_v7 }
 0x46b   :  { %2968 = vmatmul.mubr.f32.gmra.mrb[104].mxu1 %v13281_v28 }
 0x46c   :  { %2972 = vmatprep.mubr.f32.mxu1 %v13282_v2 }
 0x46f   :  { %2973 = vmatmul.mubr.f32.gmra.mrb[106].mxu1 %v13283_v45 }
 0x470   :  { %2977 = vmatprep.mubr.f32.mxu1 %v13284_v3 }
 0x473   :  { %2978 = vmatmul.mubr.f32.gmra.mrb[108].mxu1 %v13285_v48 }
 0x474   :  { %2982 = vmatprep.mubr.f32.mxu1 %v13286_v44 }
 0x477   :  { %2983 = vmatmul.mubr.f32.gmra.mrb[110].mxu1 %v13287_v58 }
 0x478   :  { %2987 = vmatprep.mubr.f32.mxu1 %v13288_v46 }
 0x47b   :  { %2988 = vmatmul.mubr.f32.gmra.mrb[112].mxu1 %v13289_v51 }
 0x47c   :  { %2992 = vmatprep.mubr.f32.mxu1 %v13290_v16 }
 0x47f   :  { %2993 = vmatmul.mubr.f32.gmra.mrb[114].mxu1 %v13291_v22 }
 0x480   :  { %2997 = vmatprep.mubr.f32.mxu1 %v13292_v55 }
 0x483   :  { %2998 = vmatmul.mubr.f32.gmra.mrb[116].mxu1 %v13293_v17  ;;  %v13362_v17 = vld [vmem:[#allocation57_spill] sm:$0xff] }
 0x484   :  { %3002 = vmatprep.mubr.f32.mxu1 %v13294_v30  ;;  %v13361_v30 = vld [vmem:[#allocation56_spill] sm:$0xff] }
 0x485   :  { %v8626_v55 = vpack.c.bf16 %v13362_v17, %v13361_v30 }
 0x487   :  { %3003 = vmatmul.mubr.f32.gmra.mrb[118].mxu1 %v13295_v39 }
 0x488   :  { %3007 = vmatprep.mubr.f32.mxu1 %v13296_v37 }
 0x48b   :  { %3008 = vmatmul.mubr.f32.gmra.mrb[120].mxu1 %v13297_v18 }
 0x48c   :  { %3012 = vmatprep.mubr.f32.mxu1 %v13298_v31  ;;  %v13360_v31 = vld [vmem:[#allocation55_spill] sm:$0xff] }
 0x48f   :  { %3013 = vmatmul.mubr.f32.gmra.mrb[122].mxu1 %v13299_v35  ;;  %v13359_v35 = vld [vmem:[#allocation54_spill] sm:$0xff] }
 0x490   :  { %3017 = vmatprep.mubr.f32.mxu1 %v13300_v36  ;;  %v8622_v18 = vpack.c.bf16 %v13360_v31, %v13359_v35 }
 0x493   :  { %3018 = vmatmul.mubr.f32.gmra.mrb[124].mxu1 %v13301_v24  ;;  %v13358_v24 = vld [vmem:[#allocation53_spill] sm:$0xff] }
 0x494   :  { %3022 = vmatprep.mubr.f32.mxu1 %v13302_v32  ;;  %v13357_v32 = vld [vmem:[#allocation52_spill] sm:$0xff] }
 0x495   :  { %v8618_v36 = vpack.c.bf16 %v13358_v24, %v13357_v32  ;;  %v13363_v24 = vld [vmem:[#allocation58_spill] sm:$0xff]  ;;  %v13364_v32 = vld [vmem:[#allocation59_spill] sm:$0xff] }
 0x496   :  { %v8630_v51 = vpack.c.bf16 %v13364_v32, %v13363_v24  ;;  %v13370_v32 = vld [vmem:[#allocation65_spill] sm:$0xff] }
 0x497   :  { %3023 = vmatmul.mubr.f32.gmra.mrb[126].mxu1 %v13303_v19  ;;  %8619 = vmatprep.subr.bf16.mxu1 %v8618_v36 }
 0x498   :  { %3027 = vmatprep.mubr.f32.mxu1 %v13304_v60  ;;  %8621 = vmatpush3.bf16.msra.mxu1 %v8618_v36 }
 0x499   :  { %8623 = vmatprep.subr.bf16.mxu1 %v8622_v18 }
 0x49b   :  { %3028 = vmatmul.mubr.f32.gmra.mrb[128].mxu1 %v13305_v33 }
 0x49c   :  { %3032 = vmatprep.mubr.f32.mxu1 %v13306_v1  ;;  %8625 = vmatpush3.bf16.msra.mxu1 %v8622_v18 }
 0x49d   :  { %8627 = vmatprep.subr.bf16.mxu1 %v8626_v55 }
 0x49f   :  { %3033 = vmatmul.mubr.f32.gmra.mrb[130].mxu1 %v13307_v20 }
 0x4a0   :  { %3037 = vmatprep.mubr.f32.mxu1 %v13308_v63  ;;  %8629 = vmatpush3.bf16.msra.mxu1 %v8626_v55  ;;  %v13369_v55 = vld [vmem:[#allocation64_spill] sm:$0xff] }
 0x4a1   :  { %8631 = vmatprep.subr.bf16.mxu1 %v8630_v51 }
 0x4a3   :  { %3038 = vmatmul.mubr.f32.gmra.mrb[132].mxu1 %v13311_v4 }
 0x4a4   :  { %3042 = vmatprep.mubr.f32.mxu1 %v13312_v21  ;;  %8633 = vmatpush3.bf16.msra.mxu1 %v8630_v51 }
 0x4a7   :  { %3043 = vmatmul.mubr.f32.gmra.mrb[134].mxu1 %v13315_v27 }
 0x4a8   :  { %3047 = vmatprep.mubr.f32.mxu1 %v13316_v23 }
 0x4ab   :  { %3048 = vmatmul.mubr.f32.gmra.mrb[136].mxu1 %v13319_v12 }
 0x4ac   :  { %3052 = vmatprep.mubr.f32.mxu1 %v13320_v13 }
 0x4af   :  { %3053 = vmatmul.mubr.f32.gmra.mrb[138].mxu1 %v13323_v47 }
 0x4b0   :  { %3057 = vmatprep.mubr.f32.mxu1 %v13324_v50 }
 0x4b3   :  { %3058 = vmatmul.mubr.f32.gmra.mrb[140].mxu1 %v13325_v61 }
 0x4b4   :  { %3062 = vmatprep.mubr.f32.mxu1 %v13326_v59 }
 0x4b7   :  { %3063 = vmatmul.mubr.f32.gmra.mrb[142].mxu1 %v13327_v43 }
 0x4b8   :  { %3067 = vmatprep.mubr.f32.mxu1 %v13328_v29 }
 0x4bb   :  { %3068 = vmatmul.mubr.f32.gmra.mrb[144].mxu1 %v13329_v53 }
 0x4bc   :  { %3072 = vmatprep.mubr.f32.mxu1 %v13330_v49 }
 0x4bf   :  { %3073 = vmatmul.mubr.f32.gmra.mrb[146].mxu1 %v13331_v0 }
 0x4c0   :  { %3077 = vmatprep.mubr.f32.mxu1 %v13332_v34  ;;  %v13343_v34 = vld [vmem:[#allocation147_spill] sm:$0xff] }
 0x4c3   :  { %3078 = vmatmul.mubr.f32.gmra.mrb[148].mxu1 %v13333_v26 }
 0x4c4   :  { %3082 = vmatprep.mubr.f32.mxu1 %v13334_v54 }
 0x4c7   :  { %3083 = vmatmul.mubr.f32.gmra.mrb[150].mxu1 %v13335_v62 }
 0x4c8   :  { %3087 = vmatprep.mubr.f32.mxu1 %v13336_v40 }
 0x4cb   :  { %3088 = vmatmul.mubr.f32.gmra.mrb[152].mxu1 %v13337_v8 }
 0x4cc   :  { %3092 = vmatprep.mubr.f32.mxu1 %v13338_v10 }
 0x4cf   :  { %3093 = vmatmul.mubr.f32.gmra.mrb[154].mxu1 %v13339_v11 }
 0x4d0   :  { %3097 = vmatprep.mubr.f32.mxu1 %v13340_v14 }
 0x4d3   :  { %3098 = vmatmul.mubr.f32.gmra.mrb[156].mxu1 %v13341_v15 }
 0x4d4   :  { %3102 = vmatprep.mubr.f32.mxu1 %v13342_v52 }
 0x4d7   :  { %3103 = vmatmul.mubr.f32.gmra.mrb[158].mxu1 %v13343_v34 }
 0x4ee   :  { %v11338_v26 = vpop.f32.mrb[64].mxu1 }
 0x4ef   :  { %v11340_v54 = vpop.f32.mrb[65].mxu1 }
 0x4f2   :  { %v11342_v62 = vpop.f32.mrb[66].mxu1 }
 0x4f3   :  { %v11344_v40 = vpop.f32.mrb[67].mxu1 }
 0x4f6   :  { %v11346_v8 = vpop.f32.mrb[68].mxu1 }
 0x4f7   :  { %v11348_v10 = vpop.f32.mrb[69].mxu1 }
 0x4fa   :  { %v11350_v11 = vpop.f32.mrb[70].mxu1 }
 0x4fb   :  { %v11352_v14 = vpop.f32.mrb[71].mxu1 }
 0x4fe   :  { %v11354_v15 = vpop.f32.mrb[72].mxu1 }
 0x4ff   :  { %v11356_v52 = vpop.f32.mrb[73].mxu1 }
 0x502   :  { %v11358_v34 = vpop.f32.mrb[74].mxu1 }
 0x503   :  { %v11360_v0 = vpop.f32.mrb[75].mxu1 }
 0x506   :  { %v11362_v49 = vpop.f32.mrb[76].mxu1 }
 0x507   :  { %v11364_v53 = vpop.f32.mrb[77].mxu1 }
 0x50a   :  { %v11366_v29 = vpop.f32.mrb[78].mxu1 }
 0x50b   :  { %v11368_v43 = vpop.f32.mrb[79].mxu1 }
 0x50e   :  { %v11370_v59 = vpop.f32.mrb[80].mxu1 }
 0x50f   :  { %v11372_v61 = vpop.f32.mrb[81].mxu1 }
 0x512   :  { %v11374_v50 = vpop.f32.mrb[82].mxu1 }
 0x513   :  { %v11376_v47 = vpop.f32.mrb[83].mxu1 }
 0x514   :  { %13344 = vst [vmem:[#allocation28_spill] sm:$0xff] %v11376_v47 }
 0x516   :  { %v11378_v13 = vpop.f32.mrb[84].mxu1 }
 0x517   :  { %13345 = vst [vmem:[#allocation29_spill] sm:$0xff] %v11378_v13  ;;  %v11380_v12 = vpop.f32.mrb[85].mxu1  ;;  %v13401_v13 = vld [vmem:[#allocation76_spill] sm:$0xff] }
 0x518   :  { %13346 = vst [vmem:[#allocation30_spill] sm:$0xff] %v11380_v12  ;;  %v13398_v12 = vld [vmem:[#allocation75_spill] sm:$0xff] }
 0x51a   :  { %v11382_v23 = vpop.f32.mrb[86].mxu1 }
 0x51b   :  { %13347 = vst [vmem:[#allocation31_spill] sm:$0xff] %v11382_v23  ;;  %v11384_v27 = vpop.f32.mrb[87].mxu1 }
 0x51c   :  { %13348 = vst [vmem:[#allocation32_spill] sm:$0xff] %v11384_v27  ;;  %v13393_v27 = vld [vmem:[#allocation71_spill] sm:$0xff] }
 0x51e   :  { %v11386_v21 = vpop.f32.mrb[88].mxu1 }
 0x51f   :  { %13349 = vst [vmem:[#allocation33_spill] sm:$0xff] %v11386_v21  ;;  %v11388_v4 = vpop.f32.mrb[89].mxu1 }
 0x520   :  { %13350 = vst [vmem:[#allocation34_spill] sm:$0xff] %v11388_v4 }
 0x522   :  { %v11390_v63 = vpop.f32.mrb[90].mxu1 }
 0x523   :  { %13351 = vst [vmem:[#allocation35_spill] sm:$0xff] %v11390_v63  ;;  %v11392_v20 = vpop.f32.mrb[91].mxu1 }
 0x524   :  { %13352 = vst [vmem:[#allocation148_spill] sm:$0xff] %v11392_v20 }
 0x526   :  { %v11394_v1 = vpop.f32.mrb[92].mxu1 }
 0x527   :  { %13353 = vst [vmem:[#allocation149_spill] sm:$0xff] %v11394_v1  ;;  %v11396_v33 = vpop.f32.mrb[93].mxu1 }
 0x528   :  { %13354 = vst [vmem:[#allocation150_spill] sm:$0xff] %v11396_v33 }
 0x52a   :  { %v11398_v60 = vpop.f32.mrb[94].mxu1 }
 0x52b   :  { %13355 = vst [vmem:[#allocation151_spill] sm:$0xff] %v11398_v60  ;;  %v11400_v19 = vpop.f32.mrb[95].mxu1 }
 0x52c   :  { %13356 = vst [vmem:[#allocation152_spill] sm:$0xff] %v11400_v19 }
 0x52e   :  { %v2949_v37 = vpop.f32.mrb[96].mxu1 }
 0x52f   :  { %v2951_v39 = vpop.f32.mrb[97].mxu1  ;;  %8119 = vmatprep.mubr.msk.f32.mxu0 %vm1288_vm1, %v2949_v37  ;;  %v13366_v37 = vld [vmem:[#allocation61_spill] sm:$0xff] }
 0x530   :  { %v13365_v39 = vld [vmem:[#allocation60_spill] sm:$0xff] }
 0x531   :  { %v8634_v36 = vpack.c.bf16 %v13366_v37, %v13365_v39 }
 0x532   :  { %v2954_v22 = vpop.f32.mrb[98].mxu1 }
 0x533   :  { %v2956_v16 = vpop.f32.mrb[99].mxu1  ;;  %8120 = vmatmul.mubr.msk.f32.vlgmr.msra.gmra.mrb[96].mxu0 %vm1288_vm1, %v2954_v22  ;;  %8635 = vmatprep.subr.bf16.mxu1 %v8634_v36  ;;  %v13368_v22 = vld [vmem:[#allocation63_spill] sm:$0xff] }
 0x534   :  { %v13367_v16 = vld [vmem:[#allocation62_spill] sm:$0xff]  ;;  %8637 = vmatpush3.bf16.msra.mxu1 %v8634_v36 }
 0x535   :  { %v8638_v30 = vpack.c.bf16 %v13368_v22, %v13367_v16 }
 0x536   :  { %v2959_v31 = vpop.f32.mrb[100].mxu1 }
 0x537   :  { %v2961_v35 = vpop.f32.mrb[101].mxu1  ;;  %8122 = vmatprep.mubr.msk.f32.mxu0 %vm1288_vm1, %v2959_v31  ;;  %8639 = vmatprep.subr.bf16.mxu1 %v8638_v30  ;;  %v8642_v31 = vpack.c.bf16 %v13370_v32, %v13369_v55 }
 0x538   :  { %8641 = vmatpush3.bf16.msra.mxu1 %v8638_v30 }
 0x539   :  { %8643 = vmatprep.subr.bf16.mxu1 %v8642_v31 }
 0x53a   :  { %v2964_v46 = vpop.f32.mrb[102].mxu1 }
 0x53b   :  { %v2966_v17 = vpop.f32.mrb[103].mxu1  ;;  %8123 = vmatmul.mubr.msk.f32.gmra.mrb[98].mxu0 %vm1288_vm1, %v2964_v46 }
 0x53c   :  { %8645 = vmatpush3.bf16.msra.mxu1 %v8642_v31 }
 0x53e   :  { %v2969_v18 = vpop.f32.mrb[104].mxu1 }
 0x53f   :  { %v2971_v24 = vpop.f32.mrb[105].mxu1  ;;  %8125 = vmatprep.mubr.msk.f32.mxu0 %vm1288_vm1, %v2969_v18 }
 0x542   :  { %v2974_v35 = vpop.f32.mrb[106].mxu1 }
 0x543   :  { %v2976_v39 = vpop.f32.mrb[107].mxu1  ;;  %8126 = vmatmul.mubr.msk.f32.gmra.mrb[100].mxu0 %vm1288_vm1, %v2974_v35 }
 0x546   :  { %v2979_v46 = vpop.f32.mrb[108].mxu1 }
 0x547   :  { %v2981_v51 = vpop.f32.mrb[109].mxu1  ;;  %8128 = vmatprep.mubr.msk.f32.mxu0 %vm1288_vm1, %v2979_v46 }
 0x54a   :  { %v2984_v37 = vpop.f32.mrb[110].mxu1 }
 0x54b   :  { %v2986_v36 = vpop.f32.mrb[111].mxu1  ;;  %8129 = vmatmul.mubr.msk.f32.gmra.mrb[102].mxu0 %vm1288_vm1, %v2984_v37 }
 0x54e   :  { %v2989_v17 = vpop.f32.mrb[112].mxu1 }
 0x54f   :  { %v2991_v16 = vpop.f32.mrb[113].mxu1  ;;  %8131 = vmatprep.mubr.msk.f32.mxu0 %vm1288_vm1, %v2989_v17 }
 0x552   :  { %v2994_v22 = vpop.f32.mrb[114].mxu1 }
 0x553   :  { %v2996_v18 = vpop.f32.mrb[115].mxu1  ;;  %8132 = vmatmul.mubr.msk.f32.gmra.mrb[104].mxu0 %vm1288_vm1, %v2994_v22 }
 0x556   :  { %v2999_v30 = vpop.f32.mrb[116].mxu1 }
 0x557   :  { %v3001_v24 = vpop.f32.mrb[117].mxu1  ;;  %8134 = vmatprep.mubr.msk.f32.mxu0 %vm1288_vm1, %v2999_v30 }
 0x55a   :  { %v3004_v55 = vpop.f32.mrb[118].mxu1 }
 0x55b   :  { %v3006_v32 = vpop.f32.mrb[119].mxu1  ;;  %8135 = vmatmul.mubr.msk.f32.gmra.mrb[106].mxu0 %vm1288_vm1, %v3004_v55 }
 0x55e   :  { %v3009_v31 = vpop.f32.mrb[120].mxu1 }
 0x55f   :  { %v3011_v35 = vpop.f32.mrb[121].mxu1  ;;  %8137 = vmatprep.mubr.msk.f32.mxu0 %vm1288_vm1, %v3009_v31 }
 0x562   :  { %v3014_v39 = vpop.f32.mrb[122].mxu1 }
 0x563   :  { %v3016_v46 = vpop.f32.mrb[123].mxu1  ;;  %8138 = vmatmul.mubr.msk.f32.gmra.mrb[108].mxu0 %vm1288_vm1, %v3014_v39 }
 0x566   :  { %v3019_v51 = vpop.f32.mrb[124].mxu1 }
 0x567   :  { %v3021_v37 = vpop.f32.mrb[125].mxu1  ;;  %8140 = vmatprep.mubr.msk.f32.mxu0 %vm1288_vm1, %v3019_v51 }
 0x56a   :  { %v3024_v36 = vpop.f32.mrb[126].mxu1 }
 0x56b   :  { %v3026_v17 = vpop.f32.mrb[127].mxu1  ;;  %8141 = vmatmul.mubr.msk.f32.gmra.mrb[110].mxu0 %vm1288_vm1, %v3024_v36 }
 0x56c   :  { %v13371_v17 = vld [vmem:[#allocation66_spill] sm:$0xff] }
 0x56e   :  { %v3029_v16 = vpop.f32.mrb[128].mxu1 }
 0x56f   :  { %v3031_v22 = vpop.f32.mrb[129].mxu1  ;;  %8143 = vmatprep.mubr.msk.f32.mxu0 %vm1288_vm1, %v3029_v16  ;;  %v13372_v16 = vld [vmem:[#allocation67_spill] sm:$0xff] }
 0x570   :  { %v8646_v22 = vpack.c.bf16 %v13372_v16, %v13371_v17 }
 0x572   :  { %v3034_v18 = vpop.f32.mrb[130].mxu1  ;;  %8647 = vmatprep.subr.bf16.mxu1 %v8646_v22 }
 0x573   :  { %v3036_v30 = vpop.f32.mrb[131].mxu1  ;;  %8144 = vmatmul.mubr.msk.f32.gmra.mrb[112].mxu0 %vm1288_vm1, %v3034_v18  ;;  %8649 = vmatpush3.bf16.msra.mxu1 %v8646_v22 }
 0x576   :  { %v3039_v24 = vpop.f32.mrb[132].mxu1 }
 0x577   :  { %v3041_v55 = vpop.f32.mrb[133].mxu1  ;;  %8146 = vmatprep.mubr.msk.f32.mxu0 %vm1288_vm1, %v3039_v24 }
 0x57a   :  { %v3044_v32 = vpop.f32.mrb[134].mxu1 }
 0x57b   :  { %v3046_v31 = vpop.f32.mrb[135].mxu1  ;;  %8147 = vmatmul.mubr.msk.f32.gmra.mrb[114].mxu0 %vm1288_vm1, %v3044_v32 }
 0x57e   :  { %v3049_v35 = vpop.f32.mrb[136].mxu1 }
 0x57f   :  { %v3051_v39 = vpop.f32.mrb[137].mxu1  ;;  %8149 = vmatprep.mubr.msk.f32.mxu0 %vm1288_vm1, %v3049_v35 }
 0x582   :  { %v3054_v46 = vpop.f32.mrb[138].mxu1 }
 0x583   :  { %v3056_v51 = vpop.f32.mrb[139].mxu1  ;;  %8150 = vmatmul.mubr.msk.f32.gmra.mrb[116].mxu0 %vm1288_vm1, %v3054_v46 }
 0x586   :  { %v3059_v37 = vpop.f32.mrb[140].mxu1 }
 0x587   :  { %v3061_v36 = vpop.f32.mrb[141].mxu1  ;;  %8152 = vmatprep.mubr.msk.f32.mxu0 %vm1288_vm1, %v3059_v37 }
 0x58a   :  { %v3064_v18 = vpop.f32.mrb[142].mxu1 }
 0x58b   :  { %v3066_v30 = vpop.f32.mrb[143].mxu1  ;;  %8153 = vmatmul.mubr.msk.f32.gmra.mrb[118].mxu0 %vm1288_vm1, %v3064_v18 }
 0x58e   :  { %v3069_v24 = vpop.f32.mrb[144].mxu1 }
 0x58f   :  { %v3071_v55 = vpop.f32.mrb[145].mxu1  ;;  %8155 = vmatprep.mubr.msk.f32.mxu0 %vm1288_vm1, %v3069_v24 }
 0x590   :  { %v13373_v55 = vld [vmem:[#allocation36_spill] sm:$0xff] }
 0x592   :  { %v3074_v32 = vpop.f32.mrb[146].mxu1 }
 0x593   :  { %v3076_v31 = vpop.f32.mrb[147].mxu1  ;;  %8156 = vmatmul.mubr.msk.f32.gmra.mrb[120].mxu0 %vm1288_vm1, %v3074_v32  ;;  %v13374_v32 = vld [vmem:[#allocation37_spill] sm:$0xff] }
 0x594   :  { %v8650_v31 = vpack.c.bf16 %v13374_v32, %v13373_v55  ;;  %v13377_v32 = vld [vmem:[#allocation40_spill] sm:$0xff] }
 0x596   :  { %v3079_v35 = vpop.f32.mrb[148].mxu1  ;;  %8651 = vmatprep.subr.bf16.mxu1 %v8650_v31 }
 0x597   :  { %v3081_v39 = vpop.f32.mrb[149].mxu1  ;;  %8158 = vmatprep.mubr.msk.f32.mxu0 %vm1288_vm1, %v3079_v35  ;;  %v11452_v35 = vld [vmem:[#allocation12] ss:$0 sm:$0xff] }
 0x59a   :  { %v3084_v46 = vpop.f32.mrb[150].mxu1 }
 0x59b   :  { %v3086_v51 = vpop.f32.mrb[151].mxu1  ;;  %8159 = vmatmul.mubr.msk.f32.gmra.mrb[122].mxu0 %vm1288_vm1, %v3084_v46 }
 0x59e   :  { %v3089_v37 = vpop.f32.mrb[152].mxu1 }
 0x59f   :  { %v3091_v36 = vpop.f32.mrb[153].mxu1  ;;  %8161 = vmatprep.mubr.msk.f32.mxu0 %vm1288_vm1, %v3089_v37 }
 0x5a2   :  { %v3094_v17 = vpop.f32.mrb[154].mxu1 }
 0x5a3   :  { %v3096_v16 = vpop.f32.mrb[155].mxu1  ;;  %8162 = vmatmul.mubr.msk.f32.gmra.mrb[124].mxu0 %vm1288_vm1, %v3094_v17 }
 0x5a4   :  { %v13375_v16 = vld [vmem:[#allocation38_spill] sm:$0xff] }
 0x5a6   :  { %v3099_v22 = vpop.f32.mrb[156].mxu1 }
 0x5a7   :  { %v3101_v18 = vpop.f32.mrb[157].mxu1  ;;  %8164 = vmatprep.mubr.msk.f32.mxu0 %vm1288_vm1, %v3099_v22  ;;  %v13376_v22 = vld [vmem:[#allocation39_spill] sm:$0xff] }
 0x5a8   :  { %v8654_v18 = vpack.c.bf16 %v13376_v22, %v13375_v16 }
 0x5aa   :  { %v3104_v30 = vpop.f32.mrb[158].mxu1 }
 0x5ab   :  { %v3106_v24 = vpop.f32.mrb[159].mxu1  ;;  %8165 = vmatmul.mubr.msk.f32.gmra.mrb[126].mxu0 %vm1288_vm1, %v3104_v30 }
 0x606   :  { %v8121_v39 = vpop.f32.mrb[96].mxu0 }
 0x607   :  { %v11455_v46 = vadd.f32 %v8121_v39, %v11452_v35  ;;  %v3274_v51 = vpop.f32.mrb[97].mxu0  ;;  %v13378_v39 = vld [vmem:[#allocation41_spill] sm:$0xff] }
 0x608   :  { %v11458_v37 = vadd.f32 %v11452_v35, %v3274_v51  ;;  %v8658_v51 = vpack.c.bf16 %v13378_v39, %v13377_v32  ;;  %v13381_v39 = vld [vmem:[#allocation44_spill] sm:$0xff] }
 0x609   :  { %v13091_v17 = vmax.f32 %v11455_v46, 0.0 }
 0x60a   :  { %v13092_v36 = vmax.f32 %v11458_v37, 0.0 }
 0x60c   :  { %8199 = vmatprep.mubr.f32.mxu1 %v13092_v36  ;;  %v13380_v36 = vld [vmem:[#allocation43_spill] sm:$0xff] }
 0x60d   :  { %8200 = vmatmul.mubr.f32.vlgmr.msra.gmra.mrb[160].mxu1 %v13091_v17  ;;  %v13379_v17 = vld [vmem:[#allocation42_spill] sm:$0xff] }
 0x60e   :  { %v8124_v30 = vpop.f32.mrb[98].mxu0  ;;  %8653 = vmatpush3.bf16.msra.mxu1 %v8650_v31  ;;  %v8662_v31 = vpack.c.bf16 %v13380_v36, %v13379_v17  ;;  %v13383_v17 = vld [vmem:[#allocation46_spill] sm:$0xff] }
 0x60f   :  { %v11469_v24 = vadd.f32 %v8124_v30, %v11452_v35  ;;  %v3284_v55 = vpop.f32.mrb[99].mxu0  ;;  %8655 = vmatprep.subr.bf16.mxu1 %v8654_v18 }
 0x610   :  { %v11474_v58 = vadd.f32 %v11452_v35, %v3284_v55 }
 0x611   :  { %v13094_v22 = vmax.f32 %v11469_v24, 0.0  ;;  %v13403_v47 = vmax.f32 %v11469_v24, 0.0 }
 0x612   :  { %v13093_v16 = vmax.f32 %v11474_v58, 0.0  ;;  %8657 = vmatpush3.bf16.msra.mxu1 %v8654_v18  ;;  %v13382_v18 = vld [vmem:[#allocation45_spill] sm:$0xff] }
 0x613   :  { %8659 = vmatprep.subr.bf16.mxu1 %v8658_v51  ;;  %v8666_v44 = vpack.c.bf16 %v13382_v18, %v13381_v39 }
 0x614   :  { %8202 = vmatprep.mubr.f32.mxu1 %v13093_v16  ;;  %v13384_v16 = vld [vmem:[#allocation47_spill] sm:$0xff] }
 0x615   :  { %8203 = vmatmul.mubr.f32.gmra.mrb[162].mxu1 %v13094_v22  ;;  %v8670_v22 = vpack.c.bf16 %v13384_v16, %v13383_v17  ;;  %v13387_v16 = vld [vmem:[#allocation50_spill] sm:$0xff]  ;;  %v13388_v17 = vld [vmem:[#allocation51_spill] sm:$0xff] }
 0x616   :  { %v8127_v30 = vpop.f32.mrb[100].mxu0  ;;  %8661 = vmatpush3.bf16.msra.mxu1 %v8658_v51  ;;  %v8678_v2 = vpack.c.bf16 %v13388_v17, %v13387_v16 }
 0x617   :  { %v3300_v55 = vadd.f32 %v8127_v30, %v11452_v35  ;;  %v3294_v32 = vpop.f32.mrb[101].mxu0  ;;  %8663 = vmatprep.subr.bf16.mxu1 %v8662_v31 }
 0x618   :  { %v3295_v48 = vadd.f32 %v11452_v35, %v3294_v32  ;;  %v13385_v32 = vld [vmem:[#allocation48_spill] sm:$0xff] }
 0x619   :  { %v11490_v36 = vmax.f32 %v3300_v55, 0.0 }
 0x61a   :  { %v11488_v3 = vmax.f32 %v3295_v48, 0.0  ;;  %8665 = vmatpush3.bf16.msra.mxu1 %v8662_v31  ;;  %v13386_v48 = vld [vmem:[#allocation49_spill] sm:$0xff] }
 0x61b   :  { %8667 = vmatprep.subr.bf16.mxu1 %v8666_v44  ;;  %v8674_v18 = vpack.c.bf16 %v13386_v48, %v13385_v32  ;;  %v13390_v48 = vld [vmem:[#allocation69_spill] sm:$0xff] }
 0x61c   :  { %8205 = vmatprep.mubr.f32.mxu1 %v11488_v3 }
 0x61d   :  { %8206 = vmatmul.mubr.f32.gmra.mrb[164].mxu1 %v11490_v36 }
 0x61e   :  { %v8130_v51 = vpop.f32.mrb[102].mxu0  ;;  %8669 = vmatpush3.bf16.msra.mxu1 %v8666_v44 }
 0x61f   :  { %v3310_v30 = vadd.f32 %v8130_v51, %v11452_v35  ;;  %v3304_v39 = vpop.f32.mrb[103].mxu0  ;;  %8671 = vmatprep.subr.bf16.mxu1 %v8670_v22 }
 0x620   :  { %v3305_v31 = vadd.f32 %v11452_v35, %v3304_v39  ;;  %v13389_v39 = vld [vmem:[#allocation68_spill] sm:$0xff] }
 0x621   :  { %v11502_v45 = vmax.f32 %v3310_v30, 0.0 }
 0x622   :  { %v11500_v55 = vmax.f32 %v3305_v31, 0.0  ;;  %8673 = vmatpush3.bf16.msra.mxu1 %v8670_v22  ;;  %v11511_v31 = vpack.c.bf16 %v13390_v48, %v13389_v39 }
 0x623   :  { %8675 = vmatprep.subr.bf16.mxu1 %v8674_v18 }
 0x624   :  { %8208 = vmatprep.mubr.f32.mxu1 %v11500_v55 }
 0x625   :  { %8209 = vmatmul.mubr.f32.gmra.mrb[166].mxu1 %v11502_v45 }
 0x626   :  { %v8133_v44 = vpop.f32.mrb[104].mxu0  ;;  %8677 = vmatpush3.bf16.msra.mxu1 %v8674_v18 }
 0x627   :  { %v3320_v51 = vadd.f32 %v8133_v44, %v11452_v35  ;;  %v3314_v32 = vpop.f32.mrb[105].mxu0  ;;  %8679 = vmatprep.subr.bf16.mxu1 %v8678_v2 }
 0x628   :  { %v3315_v22 = vadd.f32 %v11452_v35, %v3314_v32 }
 0x629   :  { %v11516_v16 = vmax.f32 %v3320_v51, 0.0 }
 0x62a   :  { %v11514_v30 = vmax.f32 %v3315_v22, 0.0  ;;  %8681 = vmatpush3.bf16.msra.mxu1 %v8678_v2 }
 0x62b   :  { %8683 = vmatprep.subr.bf16.mxu1 %v11511_v31 }
 0x62c   :  { %8211 = vmatprep.mubr.f32.mxu1 %v11514_v30 }
 0x62d   :  { %8212 = vmatmul.mubr.f32.gmra.mrb[168].mxu1 %v11516_v16 }
 0x62e   :  { %v8136_v18 = vpop.f32.mrb[106].mxu0 }
 0x62f   :  { %v3330_v17 = vadd.f32 %v8136_v18, %v11452_v35  ;;  %v3324_v44 = vpop.f32.mrb[107].mxu0 }
 0x630   :  { %v3325_v39 = vadd.f32 %v11452_v35, %v3324_v44 }
 0x631   :  { %v11525_v32 = vmax.f32 %v3330_v17, 0.0 }
 0x632   :  { %v11523_v48 = vmax.f32 %v3325_v39, 0.0 }
 0x634   :  { %8214 = vmatprep.mubr.f32.mxu1 %v11523_v48 }
 0x635   :  { %8215 = vmatmul.mubr.f32.gmra.mrb[170].mxu1 %v11525_v32 }
 0x636   :  { %v8139_v2 = vpop.f32.mrb[108].mxu0 }
 0x637   :  { %v3340_v51 = vadd.f32 %v8139_v2, %v11452_v35  ;;  %v3334_v22 = vpop.f32.mrb[109].mxu0 }
 0x638   :  { %v3335_v28 = vadd.f32 %v11452_v35, %v3334_v22 }
 0x639   :  { %v11533_v18 = vmax.f32 %v3340_v51, 0.0 }
 0x63a   :  { %v11531_v7 = vmax.f32 %v3335_v28, 0.0 }
 0x63c   :  { %8217 = vmatprep.mubr.f32.mxu1 %v11531_v7 }
 0x63d   :  { %8218 = vmatmul.mubr.f32.gmra.mrb[172].mxu1 %v11533_v18 }
 0x63e   :  { %v8142_v17 = vpop.f32.mrb[110].mxu0 }
 0x63f   :  { %v3350_v44 = vadd.f32 %v8142_v17, %v11452_v35  ;;  %v3344_v39 = vpop.f32.mrb[111].mxu0 }
 0x640   :  { %v3345_v57 = vadd.f32 %v11452_v35, %v3344_v39 }
 0x641   :  { %v11541_v2 = vmax.f32 %v3350_v44, 0.0 }
 0x642   :  { %v11539_v41 = vmax.f32 %v3345_v57, 0.0 }
 0x644   :  { %8220 = vmatprep.mubr.f32.mxu1 %v11539_v41 }
 0x645   :  { %8221 = vmatmul.mubr.f32.gmra.mrb[174].mxu1 %v11541_v2 }
 0x646   :  { %v8145_v28 = vpop.f32.mrb[112].mxu0 }
 0x647   :  { %v3360_v51 = vadd.f32 %v8145_v28, %v11452_v35  ;;  %v3354_v22 = vpop.f32.mrb[113].mxu0 }
 0x648   :  { %v3355_v56 = vadd.f32 %v11452_v35, %v3354_v22 }
 0x649   :  { %v11549_v17 = vmax.f32 %v3360_v51, 0.0 }
 0x64a   :  { %v11547_v38 = vmax.f32 %v3355_v56, 0.0 }
 0x64c   :  { %8223 = vmatprep.mubr.f32.mxu1 %v11547_v38 }
 0x64d   :  { %8224 = vmatmul.mubr.f32.gmra.mrb[176].mxu1 %v11549_v17 }
 0x64e   :  { %v8148_v57 = vpop.f32.mrb[114].mxu0 }
 0x64f   :  { %v3370_v44 = vadd.f32 %v8148_v57, %v11452_v35  ;;  %v3364_v39 = vpop.f32.mrb[115].mxu0 }
 0x650   :  { %v3365_v25 = vadd.f32 %v11452_v35, %v3364_v39 }
 0x651   :  { %v11557_v28 = vmax.f32 %v3370_v44, 0.0 }
 0x652   :  { %v11555_v5 = vmax.f32 %v3365_v25, 0.0 }
 0x654   :  { %8226 = vmatprep.mubr.f32.mxu1 %v11555_v5 }
 0x655   :  { %8227 = vmatmul.mubr.f32.gmra.mrb[178].mxu1 %v11557_v28 }
 0x656   :  { %v8151_v56 = vpop.f32.mrb[116].mxu0 }
 0x657   :  { %v3380_v51 = vadd.f32 %v8151_v56, %v11452_v35  ;;  %v3374_v22 = vpop.f32.mrb[117].mxu0 }
 0x658   :  { %v3375_v42 = vadd.f32 %v11452_v35, %v3374_v22 }
 0x659   :  { %v11565_v57 = vmax.f32 %v3380_v51, 0.0 }
 0x65a   :  { %v11563_v6 = vmax.f32 %v3375_v42, 0.0 }
 0x65c   :  { %8229 = vmatprep.mubr.f32.mxu1 %v11563_v6 }
 0x65d   :  { %8230 = vmatmul.mubr.f32.gmra.mrb[180].mxu1 %v11565_v57 }
 0x65e   :  { %v8154_v25 = vpop.f32.mrb[118].mxu0 }
 0x65f   :  { %v3390_v44 = vadd.f32 %v8154_v25, %v11452_v35  ;;  %v3384_v39 = vpop.f32.mrb[119].mxu0 }
 0x660   :  { %v3385_v9 = vadd.f32 %v11452_v35, %v3384_v39 }
 0x661   :  { %v11573_v56 = vmax.f32 %v3390_v44, 0.0 }
 0x662   :  { %v11571_v19 = vmax.f32 %v3385_v9, 0.0 }
 0x664   :  { %8232 = vmatprep.mubr.f32.mxu1 %v11571_v19 }
 0x665   :  { %8233 = vmatmul.mubr.f32.gmra.mrb[182].mxu1 %v11573_v56 }
 0x666   :  { %v8157_v42 = vpop.f32.mrb[120].mxu0 }
 0x667   :  { %v3400_v51 = vadd.f32 %v8157_v42, %v11452_v35  ;;  %v3394_v22 = vpop.f32.mrb[121].mxu0 }
 0x668   :  { %v3395_v60 = vadd.f32 %v11452_v35, %v3394_v22 }
 0x669   :  { %v11581_v25 = vmax.f32 %v3400_v51, 0.0 }
 0x66a   :  { %v11579_v33 = vmax.f32 %v3395_v60, 0.0 }
 0x66c   :  { %8235 = vmatprep.mubr.f32.mxu1 %v11579_v33 }
 0x66d   :  { %8236 = vmatmul.mubr.f32.gmra.mrb[184].mxu1 %v11581_v25 }
 0x66e   :  { %v8160_v9 = vpop.f32.mrb[122].mxu0 }
 0x66f   :  { %v3410_v44 = vadd.f32 %v8160_v9, %v11452_v35  ;;  %v3404_v39 = vpop.f32.mrb[123].mxu0 }
 0x670   :  { %v3405_v1 = vadd.f32 %v11452_v35, %v3404_v39 }
 0x671   :  { %v11589_v42 = vmax.f32 %v3410_v44, 0.0 }
 0x672   :  { %v11587_v20 = vmax.f32 %v3405_v1, 0.0 }
 0x674   :  { %8238 = vmatprep.mubr.f32.mxu1 %v11587_v20 }
 0x675   :  { %8239 = vmatmul.mubr.f32.gmra.mrb[186].mxu1 %v11589_v42 }
 0x676   :  { %v8163_v60 = vpop.f32.mrb[124].mxu0 }
 0x677   :  { %v11594_v51 = vadd.f32 %v8163_v60, %v11452_v35  ;;  %v3414_v22 = vpop.f32.mrb[125].mxu0 }
 0x678   :  { %v11597_v63 = vadd.f32 %v11452_v35, %v3414_v22 }
 0x679   :  { %v13097_v39 = vmax.f32 %v11594_v51, 0.0 }
 0x67a   :  { %v13096_v9 = vmax.f32 %v11597_v63, 0.0 }
 0x67c   :  { %8241 = vmatprep.mubr.f32.mxu1 %v13096_v9  ;;  %v13391_v9 = vmov 0.0  }
 0x67d   :  { %8242 = vmatmul.mubr.f32.gmra.mrb[188].mxu1 %v13097_v39  ;;  %v13392_v39 = vld [vmem:[#allocation70_spill] sm:$0xff] }
 0x67e   :  { %v8166_v1 = vpop.f32.mrb[126].mxu0 }
 0x67f   :  { %v11606_v44 = vadd.f32 %v8166_v1, %v11452_v35  ;;  %v3424_v60 = vpop.f32.mrb[127].mxu0  ;;  %v8686_v1 = vpack.c.bf16 %v13393_v27, %v13392_v39  ;;  %v13399_v39 = vmax.f32 %v11455_v46, 0.0 }
 0x680   :  { %v11609_v4 = vadd.f32 %v11452_v35, %v3424_v60  ;;  %v13394_v35 = vld [vmem:[#allocation72_spill] sm:$0xff]  ;;  %v13395_v60 = vld [vmem:[#allocation73_spill] sm:$0xff] }
 0x681   :  { %v13099_v21 = vmax.f32 %v11606_v44, 0.0  ;;  %v8690_v23 = vpack.c.bf16 %v13395_v60, %v13394_v35  ;;  %v13402_v35 = vld [vmem:[#allocation77_spill] sm:$0xff] }
 0x682   :  { %v13098_v22 = vmax.f32 %v11609_v4, 0.0  ;;  %v8698_v60 = vpack.c.bf16 %v13402_v35, %v13401_v13  ;;  %v13408_v13 = vld [vmem:[#allocation82_spill] sm:$0xff] }
 0x684   :  { %8244 = vmatprep.mubr.f32.mxu1 %v13098_v22  ;;  %v13396_v22 = vmax.f32 %v11458_v37, 0.0  ;;  %v13404_v37 = vld [vmem:[#allocation78_spill] sm:$0xff] }
 0x685   :  { %8245 = vmatmul.mubr.f32.gmra.mrb[190].mxu1 %v13099_v21  ;;  %v13397_v21 = vld [vmem:[#allocation74_spill] sm:$0xff] }
 0x686   :  { %8279 = vmatprep.mubr.f32.mxu1 %v13391_v9  ;;  %v8694_v27 = vpack.c.bf16 %v13398_v12, %v13397_v21  ;;  %v13405_v21 = vld [vmem:[#allocation79_spill] sm:$0xff] }
 0x687   :  { %v8702_v12 = vpack.c.bf16 %v13405_v21, %v13404_v37 }
 0x689   :  { %8280 = vmatmul.mubr.f32.vlgmr.msra.gmra.mrb[160].mxu1 %v13391_v9 }
 0x68a   :  { %8685 = vmatpush3.bf16.msra.mxu1 %v11511_v31  ;;  %8282 = vmatprep.mubr.f32.mxu1 %v13391_v9  ;;  %v13400_v31 = vmax.f32 %v11474_v58, 0.0  ;;  %v13406_v58 = vld [vmem:[#allocation80_spill] sm:$0xff] }
 0x68b   :  { %8687 = vmatprep.subr.bf16.mxu1 %v8686_v1 }
 0x68d   :  { %8283 = vmatmul.mubr.f32.gmra.mrb[162].mxu1 %v13391_v9 }
 0x68e   :  { %8285 = vmatprep.mubr.f32.mxu1 %v13396_v22  ;;  %8689 = vmatpush3.bf16.msra.mxu1 %v8686_v1 }
 0x68f   :  { %8691 = vmatprep.subr.bf16.mxu1 %v8690_v23 }
 0x691   :  { %8286 = vmatmul.mubr.f32.gmra.mrb[164].mxu1 %v13399_v39 }
 0x692   :  { %8288 = vmatprep.mubr.f32.mxu1 %v13400_v31  ;;  %8693 = vmatpush3.bf16.msra.mxu1 %v8690_v23  ;;  %v13407_v23 = vld [vmem:[#allocation81_spill] sm:$0xff] }
 0x693   :  { %8695 = vmatprep.subr.bf16.mxu1 %v8694_v27  ;;  %v8706_v46 = vpack.c.bf16 %v13407_v23, %v13406_v58 }
 0x695   :  { %8289 = vmatmul.mubr.f32.gmra.mrb[166].mxu1 %v13403_v47  ;;  %v13409_v47 = vld [vmem:[#allocation83_spill] sm:$0xff] }
 0x696   :  { %8291 = vmatprep.mubr.f32.mxu1 %v11488_v3  ;;  %8697 = vmatpush3.bf16.msra.mxu1 %v8694_v27  ;;  %v8710_v24 = vpack.c.bf16 %v13409_v47, %v13408_v13 }
 0x697   :  { %8699 = vmatprep.subr.bf16.mxu1 %v8698_v60 }
 0x699   :  { %8292 = vmatmul.mubr.f32.gmra.mrb[168].mxu1 %v11490_v36 }
 0x69a   :  { %8294 = vmatprep.mubr.f32.mxu1 %v11500_v55  ;;  %8701 = vmatpush3.bf16.msra.mxu1 %v8698_v60 }
 0x69b   :  { %8703 = vmatprep.subr.bf16.mxu1 %v8702_v12 }
 0x69d   :  { %8295 = vmatmul.mubr.f32.gmra.mrb[170].mxu1 %v11502_v45 }
 0x69e   :  { %8297 = vmatprep.mubr.f32.mxu1 %v11514_v30  ;;  %8705 = vmatpush3.bf16.msra.mxu1 %v8702_v12 }
 0x69f   :  { %8707 = vmatprep.subr.bf16.mxu1 %v8706_v46 }
 0x6a1   :  { %8298 = vmatmul.mubr.f32.gmra.mrb[172].mxu1 %v11516_v16 }
 0x6a2   :  { %8300 = vmatprep.mubr.f32.mxu1 %v11523_v48  ;;  %8709 = vmatpush3.bf16.msra.mxu1 %v8706_v46 }
 0x6a3   :  { %8711 = vmatprep.subr.bf16.mxu1 %v8710_v24 }
 0x6a5   :  { %8301 = vmatmul.mubr.f32.gmra.mrb[174].mxu1 %v11525_v32 }
 0x6a6   :  { %8303 = vmatprep.mubr.f32.mxu1 %v11531_v7  ;;  %8713 = vmatpush3.bf16.msra.mxu1 %v8710_v24 }
 0x6a9   :  { %8304 = vmatmul.mubr.f32.gmra.mrb[176].mxu1 %v11533_v18 }
 0x6aa   :  { %8306 = vmatprep.mubr.f32.mxu1 %v11539_v41 }
 0x6ad   :  { %8307 = vmatmul.mubr.f32.gmra.mrb[178].mxu1 %v11541_v2 }
 0x6ae   :  { %8309 = vmatprep.mubr.f32.mxu1 %v11547_v38 }
 0x6b1   :  { %8310 = vmatmul.mubr.f32.gmra.mrb[180].mxu1 %v11549_v17 }
 0x6b2   :  { %8312 = vmatprep.mubr.f32.mxu1 %v11555_v5 }
 0x6b5   :  { %8313 = vmatmul.mubr.f32.gmra.mrb[182].mxu1 %v11557_v28 }
 0x6b6   :  { %8315 = vmatprep.mubr.f32.mxu1 %v11563_v6 }
 0x6b9   :  { %8316 = vmatmul.mubr.f32.gmra.mrb[184].mxu1 %v11565_v57 }
 0x6ba   :  { %8318 = vmatprep.mubr.f32.mxu1 %v11571_v19 }
 0x6bd   :  { %8319 = vmatmul.mubr.f32.gmra.mrb[186].mxu1 %v11573_v56 }
 0x6be   :  { %8321 = vmatprep.mubr.f32.mxu1 %v11579_v33 }
 0x6c1   :  { %8322 = vmatmul.mubr.f32.gmra.mrb[188].mxu1 %v11581_v25 }
 0x6c2   :  { %8324 = vmatprep.mubr.f32.mxu1 %v11587_v20 }
 0x6c5   :  { %8325 = vmatmul.mubr.f32.gmra.mrb[190].mxu1 %v11589_v42 }
 0x6c6   :  { %8359 = vmatprep.mubr.f32.mxu1 %v11488_v3 }
 0x6c9   :  { %8360 = vmatmul.mubr.f32.vlgmr.msra.gmra.mrb[160].mxu1 %v11490_v36 }
 0x6ca   :  { %8362 = vmatprep.mubr.f32.mxu1 %v11500_v55 }
 0x6cd   :  { %8363 = vmatmul.mubr.f32.gmra.mrb[162].mxu1 %v11502_v45  ;;  %v11706_v45 = vld [vmem:[#allocation12 + $0x2] ss:$0 sm:$0xff] }
 0x6ce   :  { %8365 = vmatprep.mubr.f32.mxu1 %v11514_v30  ;;  %v2725_v36 = vadd.f32 %v11706_v45, %v11340_v54  ;;  %v2750_v22 = vadd.f32 %v11346_v8, %v11706_v45  ;;  %v2760_v21 = vadd.f32 %v11350_v11, %v11706_v45  ;;  %v2755_v8 = vadd.f32 %v11706_v45, %v11352_v14 }
 0x6cf   :  { %v2765_v11 = vadd.f32 %v11706_v45, %v11356_v52 }
 0x6d1   :  { %8366 = vmatmul.mubr.f32.gmra.mrb[164].mxu1 %v11516_v16 }
 0x6d2   :  { %8368 = vmatprep.mubr.f32.mxu1 %v11523_v48 }
 0x6d5   :  { %8369 = vmatmul.mubr.f32.gmra.mrb[166].mxu1 %v11525_v32 }
 0x6d6   :  { %8371 = vmatprep.mubr.f32.mxu1 %v11531_v7  ;;  %v11704_v7 = vld [vmem:[#allocation12 + $0x1] ss:$0 sm:$0xff] }
 0x6d9   :  { %8372 = vmatmul.mubr.f32.gmra.mrb[168].mxu1 %v11533_v18 }
 0x6da   :  { %8374 = vmatprep.mubr.f32.mxu1 %v11539_v41  ;;  %v13413_v41 = vmax.f32 %v11606_v44, 0.0 }
 0x6dd   :  { %8375 = vmatmul.mubr.f32.gmra.mrb[170].mxu1 %v11541_v2 }
 0x6de   :  { %8377 = vmatprep.mubr.f32.mxu1 %v11547_v38  ;;  %v13411_v38 = vmax.f32 %v11594_v51, 0.0 }
 0x6e1   :  { %8378 = vmatmul.mubr.f32.gmra.mrb[172].mxu1 %v11549_v17  ;;  %v2740_v17 = vadd.f32 %v11342_v62, %v11706_v45  ;;  %v2745_v62 = vadd.f32 %v11706_v45, %v11348_v10 }
 0x6e2   :  { %8380 = vmatprep.mubr.f32.mxu1 %v11555_v5  ;;  %v13410_v5 = vmax.f32 %v11597_v63, 0.0  ;;  %v2730_v63 = vadd.f32 %v11338_v26, %v11706_v45  ;;  %v2735_v26 = vadd.f32 %v11706_v45, %v11344_v40 }
 0x6e5   :  { %8381 = vmatmul.mubr.f32.gmra.mrb[174].mxu1 %v11557_v28 }
 0x6e6   :  { %8383 = vmatprep.mubr.f32.mxu1 %v11563_v6  ;;  %v13412_v6 = vmax.f32 %v11609_v4, 0.0 }
 0x6e9   :  { %8384 = vmatmul.mubr.f32.gmra.mrb[176].mxu1 %v11565_v57 }
 0x6ea   :  { %8386 = vmatprep.mubr.f32.mxu1 %v11571_v19 }
 0x6ed   :  { %8387 = vmatmul.mubr.f32.gmra.mrb[178].mxu1 %v11573_v56 }
 0x6ee   :  { %8389 = vmatprep.mubr.f32.mxu1 %v11579_v33 }
 0x6f1   :  { %8390 = vmatmul.mubr.f32.gmra.mrb[180].mxu1 %v11581_v25 }
 0x6f2   :  { %8392 = vmatprep.mubr.f32.mxu1 %v11587_v20 }
 0x6f5   :  { %8393 = vmatmul.mubr.f32.gmra.mrb[182].mxu1 %v11589_v42 }
 0x6f6   :  { %8395 = vmatprep.mubr.f32.mxu1 %v13410_v5  ;;  %v2770_v5 = vadd.f32 %v11354_v15, %v11706_v45  ;;  %v2775_v15 = vadd.f32 %v11706_v45, %v11360_v0 }
 0x6f9   :  { %8396 = vmatmul.mubr.f32.gmra.mrb[184].mxu1 %v13411_v38 }
 0x6fa   :  { %8398 = vmatprep.mubr.f32.mxu1 %v13412_v6 }
 0x6fd   :  { %8399 = vmatmul.mubr.f32.gmra.mrb[186].mxu1 %v13413_v41 }
 0x6fe   :  { %8401 = vmatprep.mubr.f32.mxu1 %v13391_v9 }
 0x701   :  { %8402 = vmatmul.mubr.f32.gmra.mrb[188].mxu1 %v13391_v9 }
 0x702   :  { %8404 = vmatprep.mubr.f32.mxu1 %v13391_v9 }
 0x705   :  { %8405 = vmatmul.mubr.f32.gmra.mrb[190].mxu1 %v13391_v9 }
 0x79c   :  { %v8361_v3 = vpop.f32.mrb[160].mxu1 }
 0x79d   :  { %v4281_v19 = vadd.f32 %v8361_v3, %v11704_v7  ;;  %v4085_v33 = vpop.f32.mrb[161].mxu1 }
 0x79e   :  { %v4280_v20 = vadd.f32 %v11704_v7, %v4085_v33 }
 0x79f   :  { %v4313_v4 = vmax.f32 %v4281_v19, 0.0 }
 0x7a0   :  { %v4312_v55 = vmax.f32 %v4280_v20, 0.0  ;;  %v8364_v30 = vpop.f32.mrb[162].mxu1 }
 0x7a1   :  { %v11714_v16 = vadd.f32 %v4313_v4, %v2730_v63  ;;  %v4283_v48 = vadd.f32 %v8364_v30, %v11704_v7  ;;  %v4095_v32 = vpop.f32.mrb[163].mxu1  ;;  %v2780_v63 = vadd.f32 %v11358_v34, %v11706_v45  ;;  %v2785_v34 = vadd.f32 %v11706_v45, %v11364_v53 }
 0x7a2   :  { %v11717_v18 = vadd.f32 %v4312_v55, %v2725_v36  ;;  %v4282_v2 = vadd.f32 %v11704_v7, %v4095_v32 }
 0x7a3   :  { %v4315_v28 = vmax.f32 %v4283_v48, 0.0 }
 0x7a4   :  { %v4314_v57 = vmax.f32 %v4282_v2, 0.0  ;;  %v8367_v54 = vpop.f32.mrb[164].mxu1 }
 0x7a5   :  { %v11724_v56 = vadd.f32 %v4315_v28, %v2740_v17  ;;  %v4285_v25 = vadd.f32 %v8367_v54, %v11704_v7  ;;  %v4105_v42 = vpop.f32.mrb[165].mxu1  ;;  %v2790_v17 = vadd.f32 %v11362_v49, %v11706_v45  ;;  %v2795_v49 = vadd.f32 %v11706_v45, %v11368_v43 }
 0x7a6   :  { %v11727_v51 = vadd.f32 %v4314_v57, %v2735_v26  ;;  %v4284_v44 = vadd.f32 %v11704_v7, %v4105_v42 }
 0x7a7   :  { %v4317_v1 = vmax.f32 %v4285_v25, 0.0 }
 0x7a8   :  { %v4316_v27 = vmax.f32 %v4284_v44, 0.0  ;;  %v8370_v40 = vpop.f32.mrb[166].mxu1 }
 0x7a9   :  { %v11734_v39 = vadd.f32 %v4317_v1, %v2750_v22  ;;  %v4287_v31 = vadd.f32 %v8370_v40, %v11704_v7  ;;  %v4115_v35 = vpop.f32.mrb[167].mxu1  ;;  %v2800_v22 = vadd.f32 %v11366_v29, %v11706_v45  ;;  %v2805_v29 = vadd.f32 %v11706_v45, %v11372_v61 }
 0x7aa   :  { %v11737_v60 = vadd.f32 %v4316_v27, %v2745_v62  ;;  %v4286_v37 = vadd.f32 %v11704_v7, %v4115_v35 }
 0x7ab   :  { %v4319_v12 = vmax.f32 %v4287_v31, 0.0 }
 0x7ac   :  { %v4318_v58 = vmax.f32 %v4286_v37, 0.0  ;;  %v8373_v10 = vpop.f32.mrb[168].mxu1 }
 0x7ad   :  { %v11744_v23 = vadd.f32 %v4319_v12, %v2760_v21  ;;  %v4289_v46 = vadd.f32 %v8373_v10, %v11704_v7  ;;  %v4125_v13 = vpop.f32.mrb[169].mxu1  ;;  %v2810_v21 = vadd.f32 %v11370_v59, %v11706_v45  ;;  %v13414_v59 = vld [vmem:[#allocation28_spill] sm:$0xff] }
 0x7ae   :  { %v11747_v47 = vadd.f32 %v4318_v58, %v2755_v8  ;;  %v4288_v24 = vadd.f32 %v11704_v7, %v4125_v13 }
 0x7af   :  { %v4321_v38 = vmax.f32 %v4289_v46, 0.0 }
 0x7b0   :  { %v4320_v6 = vmax.f32 %v4288_v24, 0.0  ;;  %v8376_v14 = vpop.f32.mrb[170].mxu1 }
 0x7b1   :  { %v11754_v41 = vadd.f32 %v4321_v38, %v2770_v5  ;;  %v4291_v3 = vadd.f32 %v8376_v14, %v11704_v7  ;;  %v4135_v19 = vpop.f32.mrb[171].mxu1  ;;  %v2820_v5 = vadd.f32 %v11374_v50, %v11706_v45  ;;  %v13416_v50 = vld [vmem:[#allocation30_spill] sm:$0xff] }
 0x7b2   :  { %v11757_v33 = vadd.f32 %v4320_v6, %v2765_v11  ;;  %v4290_v20 = vadd.f32 %v11704_v7, %v4135_v19  ;;  %v2815_v11 = vadd.f32 %v11706_v45, %v13414_v59 }
 0x7b3   :  { %v4323_v4 = vmax.f32 %v4291_v3, 0.0 }
 0x7b4   :  { %v4322_v36 = vmax.f32 %v4290_v20, 0.0  ;;  %v8379_v52 = vpop.f32.mrb[172].mxu1 }
 0x7b5   :  { %v11764_v55 = vadd.f32 %v4323_v4, %v2780_v63  ;;  %v4293_v30 = vadd.f32 %v8379_v52, %v11704_v7  ;;  %v4145_v48 = vpop.f32.mrb[173].mxu1  ;;  %v13415_v4 = vld [vmem:[#allocation29_spill] sm:$0xff]  ;;  %v2825_v52 = vadd.f32 %v11706_v45, %v13416_v50 }
 0x7b6   :  { %v11767_v32 = vadd.f32 %v4322_v36, %v2775_v15  ;;  %v4292_v2 = vadd.f32 %v11704_v7, %v4145_v48  ;;  %v2830_v15 = vadd.f32 %v13415_v4, %v11706_v45 }
 0x7b7   :  { %v4325_v28 = vmax.f32 %v4293_v30, 0.0 }
 0x7b8   :  { %v4324_v26 = vmax.f32 %v4292_v2, 0.0  ;;  %v8382_v0 = vpop.f32.mrb[174].mxu1 }
 0x7b9   :  { %v11774_v57 = vadd.f32 %v4325_v28, %v2790_v17  ;;  %v4295_v54 = vadd.f32 %v8382_v0, %v11704_v7  ;;  %v4155_v25 = vpop.f32.mrb[175].mxu1  ;;  %v13417_v0 = vld [vmem:[#allocation31_spill] sm:$0xff] }
 0x7ba   :  { %v11777_v42 = vadd.f32 %v4324_v26, %v2785_v34  ;;  %v4294_v44 = vadd.f32 %v11704_v7, %v4155_v25 }
 0x7bb   :  { %v4327_v1 = vmax.f32 %v4295_v54, 0.0  ;;  %v2840_v54 = vadd.f32 %v13417_v0, %v11706_v45  ;;  %v13424_v0 = vld [vmem:[#allocation150_spill] sm:$0xff] }
 0x7bc   :  { %v4326_v62 = vmax.f32 %v4294_v44, 0.0  ;;  %v8385_v53 = vpop.f32.mrb[176].mxu1  ;;  %v13418_v44 = vld [vmem:[#allocation32_spill] sm:$0xff] }
 0x7bd   :  { %v11784_v27 = vadd.f32 %v4327_v1, %v2800_v22  ;;  %v4297_v40 = vadd.f32 %v8385_v53, %v11704_v7  ;;  %v4165_v31 = vpop.f32.mrb[177].mxu1  ;;  %v2835_v22 = vadd.f32 %v11706_v45, %v13418_v44 }
 0x7be   :  { %v11787_v35 = vadd.f32 %v4326_v62, %v2795_v49  ;;  %v4296_v37 = vadd.f32 %v11704_v7, %v4165_v31 }
 0x7bf   :  { %v4329_v12 = vmax.f32 %v4297_v40, 0.0 }
 0x7c0   :  { %v4328_v8 = vmax.f32 %v4296_v37, 0.0  ;;  %v8388_v43 = vpop.f32.mrb[178].mxu1 }
 0x7c1   :  { %v11794_v58 = vadd.f32 %v4329_v12, %v2810_v21  ;;  %v4299_v10 = vadd.f32 %v8388_v43, %v11704_v7  ;;  %v4175_v46 = vpop.f32.mrb[179].mxu1  ;;  %v13419_v21 = vld [vmem:[#allocation33_spill] sm:$0xff] }
 0x7c2   :  { %v11797_v13 = vadd.f32 %v4328_v8, %v2805_v29  ;;  %v4298_v24 = vadd.f32 %v11704_v7, %v4175_v46  ;;  %v2850_v12 = vadd.f32 %v13419_v21, %v11706_v45  ;;  %v13420_v8 = vld [vmem:[#allocation34_spill] sm:$0xff] }
 0x7c3   :  { %v4331_v38 = vmax.f32 %v4299_v10, 0.0  ;;  %v2845_v43 = vadd.f32 %v11706_v45, %v13420_v8 }
 0x7c4   :  { %v4330_v6 = vmax.f32 %v4298_v24, 0.0  ;;  %v8391_v61 = vpop.f32.mrb[180].mxu1 }
 0x7c5   :  { %v11804_v14 = vadd.f32 %v4331_v38, %v2820_v5  ;;  %v4301_v3 = vadd.f32 %v8391_v61, %v11704_v7  ;;  %v4185_v19 = vpop.f32.mrb[181].mxu1 }
 0x7c6   :  { %v11807_v20 = vadd.f32 %v4330_v6, %v2815_v11  ;;  %v4300_v63 = vadd.f32 %v11704_v7, %v4185_v19  ;;  %v13421_v6 = vld [vmem:[#allocation35_spill] sm:$0xff]  ;;  %v13422_v19 = vld [vmem:[#allocation148_spill] sm:$0xff] }
 0x7c7   :  { %v4333_v36 = vmax.f32 %v4301_v3, 0.0  ;;  %v2860_v61 = vadd.f32 %v13421_v6, %v11706_v45 }
 0x7c8   :  { %v4332_v30 = vmax.f32 %v4300_v63, 0.0  ;;  %v8394_v48 = vpop.f32.mrb[182].mxu1  ;;  %v2855_v63 = vadd.f32 %v11706_v45, %v13422_v19 }
 0x7c9   :  { %v11814_v2 = vadd.f32 %v4333_v36, %v2830_v15  ;;  %v4303_v17 = vadd.f32 %v8394_v48, %v11704_v7  ;;  %v4195_v28 = vpop.f32.mrb[183].mxu1 }
 0x7ca   :  { %v11817_v34 = vadd.f32 %v4332_v30, %v2825_v52  ;;  %v4302_v26 = vadd.f32 %v11704_v7, %v4195_v28 }
 0x7cb   :  { %v4335_v25 = vmax.f32 %v4303_v17, 0.0  ;;  %v13423_v17 = vld [vmem:[#allocation149_spill] sm:$0xff] }
 0x7cc   :  { %v4334_v1 = vmax.f32 %v4302_v26, 0.0  ;;  %v8397_v49 = vpop.f32.mrb[184].mxu1  ;;  %v2870_v28 = vadd.f32 %v13423_v17, %v11706_v45 }
 0x7cd   :  { %v11824_v62 = vadd.f32 %v4335_v25, %v2840_v54  ;;  %v4305_v53 = vadd.f32 %v8397_v49, %v11704_v7  ;;  %v4205_v40 = vpop.f32.mrb[185].mxu1  ;;  %v2865_v54 = vadd.f32 %v11706_v45, %v13424_v0 }
 0x7ce   :  { %v11827_v31 = vadd.f32 %v4334_v1, %v2835_v22  ;;  %v4304_v37 = vadd.f32 %v11704_v7, %v4205_v40 }
 0x7cf   :  { %v4337_v29 = vmax.f32 %v4305_v53, 0.0 }
 0x7d0   :  { %v4336_v10 = vmax.f32 %v4304_v37, 0.0  ;;  %v8400_v46 = vpop.f32.mrb[186].mxu1  ;;  %v13425_v37 = vld [vmem:[#allocation151_spill] sm:$0xff] }
 0x7d1   :  { %v11834_v24 = vadd.f32 %v4337_v29, %v2850_v12  ;;  %v4307_v5 = vadd.f32 %v8400_v46, %v11704_v7  ;;  %v4215_v38 = vpop.f32.mrb[187].mxu1  ;;  %v2880_v21 = vadd.f32 %v13425_v37, %v11706_v45  ;;  %v13426_v29 = vld [vmem:[#allocation152_spill] sm:$0xff] }
 0x7d2   :  { %v11837_v59 = vadd.f32 %v4336_v10, %v2845_v43  ;;  %v4306_v11 = vadd.f32 %v11704_v7, %v4215_v38  ;;  %v2875_v8 = vadd.f32 %v11706_v45, %v13426_v29  ;;  %v8747_v38 = vpack.c.bf16 %v11714_v16, %v11717_v18 }
 0x7d3   :  { %v4339_v3 = vmax.f32 %v4307_v5, 0.0  ;;  %v13427_v5 = vmov 0.0|0.0  }
 0x7d4   :  { %v4338_v4 = vmax.f32 %v4306_v11, 0.0  ;;  %v8403_v15 = vpop.f32.mrb[188].mxu1  ;;  %8746 = vmatprep.subr.bf16.mxu0 %v13427_v5 }
 0x7d5   :  { %v11844_v36 = vadd.f32 %v4339_v3, %v2860_v61  ;;  %v4309_v50 = vadd.f32 %v8403_v15, %v11704_v7  ;;  %v4225_v52 = vpop.f32.mrb[189].mxu1 }
 0x7d6   :  { %v11847_v30 = vadd.f32 %v4338_v4, %v2855_v63  ;;  %v4308_v48 = vadd.f32 %v11704_v7, %v4225_v52 }
 0x7d7   :  { %v4341_v26 = vmax.f32 %v4309_v50, 0.0 }
 0x7d8   :  { %v4340_v25 = vmax.f32 %v4308_v48, 0.0  ;;  %v8406_v44 = vpop.f32.mrb[190].mxu1 }
 0x7d9   :  { %v11854_v22 = vadd.f32 %v4341_v26, %v2870_v28  ;;  %v4311_v1 = vadd.f32 %v8406_v44, %v11704_v7  ;;  %v4235_v49 = vpop.f32.mrb[191].mxu1 }
 0x7da   :  { %v11857_v53 = vadd.f32 %v4340_v25, %v2865_v54  ;;  %v4310_v40 = vadd.f32 %v11704_v7, %v4235_v49 }
 0x7db   :  { %v4343_v12 = vmax.f32 %v4311_v1, 0.0 }
 0x7dc   :  { %v4342_v43 = vmax.f32 %v4310_v40, 0.0 }
 0x7dd   :  { %v11864_v10 = vadd.f32 %v4343_v12, %v2880_v21 }
 0x7de   :  { %v11866_v46 = vadd.f32 %v4342_v43, %v2875_v8 }
 0x7df   :  { %9518 = dma.done.wait [#allocation8 + $0x1], 32768 }
 0x7e0   :  { %9519 = vsyncadd [#allocation8 + $0x1], 4294934528  ;;  %v13428_v7 = vld [vmem:[#allocation84_spill] sm:$0xff]  ;;  %8748 = vmatpush1.bf16.msra.mxu0 %v8747_v38  ;;  %v8750_v11 = vpack.c.bf16 %v11724_v56, %v11727_v51  ;;  %4716 = vmatprep.mubr.f32.mxu1 %v13391_v9  ;;  %v8753_v45 = vpack.c.bf16 %v11734_v39, %v11737_v60  ;;  %v4415_v61 = vld [vmem:[#allocation3 + $0x118] sm:$0xff]  ;;  %v8756_v26 = vpack.c.bf16 %v11744_v23, %v11747_v47 }
 0x7e1   :  { %4973 = vmatprep.mubr.f32.mxu0 %v13428_v7  ;;  %8749 = vmatprep.subr.bf16.mxu0 %v13427_v5  ;;  %v4413_v6 = vld [vmem:[#allocation3 + $0x108] sm:$0xff]  ;;  %v4412_v3 = vld [vmem:[#allocation3 + $0x100] sm:$0xff]  ;;  %v4414_v63 = vld [vmem:[#allocation3 + $0x110] sm:$0xff]  ;;  %v8759_v37 = vpack.c.bf16 %v11754_v41, %v11757_v33  ;;  %v8762_v7 = vpack.c.bf16 %v11764_v55, %v11767_v32 }
 0x7e2   :  { %v8714_v19 = vpack.c.bf16 %v4415_v61, %v4413_v6  ;;  %v4417_v4 = vld [vmem:[#allocation3 + $0x128] sm:$0xff]  ;;  %v4419_v15 = vld [vmem:[#allocation3 + $0x138] sm:$0xff]  ;;  %v8716_v50 = vpack.c.bf16 %v4414_v63, %v4412_v3  ;;  %v4416_v48 = vld [vmem:[#allocation3 + $0x120] sm:$0xff]  ;;  %v8765_v63 = vpack.c.bf16 %v11774_v57, %v11777_v42 }
 0x7e3   :  { %v8718_v52 = vpack.c.bf16 %v4419_v15, %v4417_v4  ;;  %v4418_v17 = vld [vmem:[#allocation3 + $0x130] sm:$0xff]  ;;  %v4421_v28 = vld [vmem:[#allocation3 + $0x148] sm:$0xff]  ;;  %v4423_v0 = vld [vmem:[#allocation3 + $0x158] sm:$0xff] }
 0x7e4   :  { %8751 = vmatpush1.bf16.msra.mxu0 %v8750_v11  ;;  %8715 = vmatprep.subr.bf16.mxu1 %v8714_v19  ;;  %v8720_v54 = vpack.c.bf16 %v4418_v17, %v4416_v48  ;;  %v8722_v25 = vpack.c.bf16 %v4423_v0, %v4421_v28  ;;  %v4420_v44 = vld [vmem:[#allocation3 + $0x140] sm:$0xff]  ;;  %v4422_v1 = vld [vmem:[#allocation3 + $0x150] sm:$0xff]  ;;  %v4425_v49 = vld [vmem:[#allocation3 + $0x168] sm:$0xff]  ;;  %v8768_v28 = vpack.c.bf16 %v11784_v27, %v11787_v35 }
 0x7e5   :  { %8752 = vmatprep.subr.bf16.mxu0 %v13427_v5  ;;  %8717 = vmatpush1.bf16.msra.mxu1 %v8716_v50  ;;  %v4427_v40 = vld [vmem:[#allocation3 + $0x178] sm:$0xff]  ;;  %v8724_v21 = vpack.c.bf16 %v4422_v1, %v4420_v44  ;;  %v4424_v29 = vld [vmem:[#allocation3 + $0x160] sm:$0xff]  ;;  %v4426_v8 = vld [vmem:[#allocation3 + $0x170] sm:$0xff] }
 0x7e6   :  { %8719 = vmatprep.subr.bf16.mxu1 %v8718_v52  ;;  %v8726_v12 = vpack.c.bf16 %v4427_v40, %v4425_v49  ;;  %v4429_v43 = vld [vmem:[#allocation3 + $0x188] sm:$0xff]  ;;  %v4431_v38 = vld [vmem:[#allocation3 + $0x198] sm:$0xff]  ;;  %v8728_v11 = vpack.c.bf16 %v4426_v8, %v4424_v29  ;;  %v4428_v6 = vld [vmem:[#allocation3 + $0x180] sm:$0xff]  ;;  %v8771_v49 = vpack.c.bf16 %v11794_v58, %v11797_v13 }
 0x7e7   :  { %v4430_v61 = vld [vmem:[#allocation3 + $0x190] sm:$0xff]  ;;  %v4433_v3 = vld [vmem:[#allocation3 + $0x1a8] sm:$0xff]  ;;  %v4435_v19 = vld [vmem:[#allocation3 + $0x1b8] sm:$0xff] }
 0x7e8   :  { %8754 = vmatpush1.bf16.msra.mxu0 %v8753_v45  ;;  %v8730_v45 = vpack.c.bf16 %v4431_v38, %v4429_v43  ;;  %v8732_v4 = vpack.c.bf16 %v4430_v61, %v4428_v6  ;;  %v8734_v15 = vpack.c.bf16 %v4435_v19, %v4433_v3  ;;  %v4432_v50 = vld [vmem:[#allocation3 + $0x1a0] sm:$0xff]  ;;  %v4434_v52 = vld [vmem:[#allocation3 + $0x1b0] sm:$0xff]  ;;  %v4437_v48 = vld [vmem:[#allocation3 + $0x1c8] sm:$0xff]  ;;  %v8774_v43 = vpack.c.bf16 %v11804_v14, %v11807_v20 }
 0x7e9   :  { %8755 = vmatprep.subr.bf16.mxu0 %v13427_v5  ;;  %8721 = vmatpush1.bf16.msra.mxu1 %v8720_v54  ;;  %v4439_v17 = vld [vmem:[#allocation3 + $0x1d8] sm:$0xff]  ;;  %v4436_v54 = vld [vmem:[#allocation3 + $0x1c0] sm:$0xff]  ;;  %v4441_v44 = vld [vmem:[#allocation3 + $0x1e8] sm:$0xff]  ;;  %v8777_v6 = vpack.c.bf16 %v11814_v2, %v11817_v34 }
 0x7ea   :  { %8723 = vmatprep.subr.bf16.mxu1 %v8722_v25  ;;  %v8738_v0 = vpack.c.bf16 %v4439_v17, %v4437_v48  ;;  %v4438_v25 = vld [vmem:[#allocation3 + $0x1d0] sm:$0xff]  ;;  %v4443_v1 = vld [vmem:[#allocation3 + $0x1f8] sm:$0xff]  ;;  %v4381_v29 = vld [vmem:[#allocation3 + $0x8] sm:$0xff]  ;;  %v8783_v48 = vpack.c.bf16 %v11834_v24, %v11837_v59  ;;  %v8789_v17 = vpack.c.bf16 %v11854_v22, %v11857_v53 }
 0x7eb   :  { %v8740_v40 = vpack.c.bf16 %v4438_v25, %v4436_v54  ;;  %v4383_v8 = vld [vmem:[#allocation3 + $0x18] sm:$0xff]  ;;  %v4385_v3 = vld [vmem:[#allocation3 + $0x28] sm:$0xff]  ;;  %v4390_v54 = vld [vmem:[#allocation3 + $0x50] sm:$0xff] }
 0x7ec   :  { %8757 = vmatpush1.bf16.msra.mxu0 %v8756_v26  ;;  %v8736_v26 = vpack.c.bf16 %v4434_v52, %v4432_v50  ;;  %v4387_v19 = vld [vmem:[#allocation3 + $0x38] sm:$0xff]  ;;  %v4386_v50 = vld [vmem:[#allocation3 + $0x30] sm:$0xff]  ;;  %v4393_v25 = vld [vmem:[#allocation3 + $0x68] sm:$0xff] }
 0x7ed   :  { %8758 = vmatprep.subr.bf16.mxu0 %v13427_v5  ;;  %8725 = vmatpush1.bf16.msra.mxu1 %v8724_v21  ;;  %v4440_v21 = vld [vmem:[#allocation3 + $0x1e0] sm:$0xff] }
 0x7ee   :  { %8727 = vmatprep.subr.bf16.mxu1 %v8726_v12  ;;  %v4442_v12 = vld [vmem:[#allocation3 + $0x1f0] sm:$0xff] }
 0x7ef   :  { %v8744_v38 = vpack.c.bf16 %v4442_v12, %v4440_v21  ;;  %v4399_v21 = vld [vmem:[#allocation3 + $0x98] sm:$0xff] }
 0x7f0   :  { %8760 = vmatpush1.bf16.msra.mxu0 %v8759_v37  ;;  %v8742_v37 = vpack.c.bf16 %v4443_v1, %v4441_v44  ;;  %v4395_v44 = vld [vmem:[#allocation3 + $0x78] sm:$0xff]  ;;  %v4392_v1 = vld [vmem:[#allocation3 + $0x60] sm:$0xff] }
 0x7f1   :  { %8761 = vmatprep.subr.bf16.mxu0 %v13427_v5  ;;  %8729 = vmatpush1.bf16.msra.mxu1 %v8728_v11  ;;  %v4380_v11 = vld [vmem:[#allocation3] sm:$0xff] }
 0x7f2   :  { %8731 = vmatprep.subr.bf16.mxu1 %v8730_v45  ;;  %v4382_v45 = vld [vmem:[#allocation3 + $0x10] sm:$0xff] }
 0x7f3   :  { %v8796_v61 = vpack.c.bf16 %v4382_v45, %v4380_v11  ;;  %v13430_v45 = vld [vmem:[#allocation86_spill] sm:$0xff] }
 0x7f4   :  { %8763 = vmatpush1.bf16.msra.mxu0 %v8762_v7  ;;  %v8794_v7 = vpack.c.bf16 %v4383_v8, %v4381_v29  ;;  %v4396_v29 = vld [vmem:[#allocation3 + $0x80] sm:$0xff]  ;;  %v4398_v8 = vld [vmem:[#allocation3 + $0x90] sm:$0xff] }
 0x7f5   :  { %8764 = vmatprep.subr.bf16.mxu0 %v13427_v5  ;;  %8733 = vmatpush1.bf16.msra.mxu1 %v8732_v4  ;;  %v8780_v4 = vpack.c.bf16 %v11824_v62, %v11827_v31  ;;  %v8812_v11 = vpack.c.bf16 %v4398_v8, %v4396_v29  ;;  %v13453_v29 = vld [vmem:[#allocation109_spill] sm:$0xff]  ;;  %v13455_v8 = vld [vmem:[#allocation111_spill] sm:$0xff] }
 0x7f6   :  { %8735 = vmatprep.subr.bf16.mxu1 %v8734_v15  ;;  %v8798_v15 = vpack.c.bf16 %v4387_v19, %v4385_v3  ;;  %v4405_v3 = vld [vmem:[#allocation3 + $0xc8] sm:$0xff]  ;;  %v4407_v19 = vld [vmem:[#allocation3 + $0xd8] sm:$0xff] }
 0x7f8   :  { %8766 = vmatpush1.bf16.msra.mxu0 %v8765_v63  ;;  %v4384_v63 = vld [vmem:[#allocation3 + $0x20] sm:$0xff] }
 0x7f9   :  { %8767 = vmatprep.subr.bf16.mxu0 %v13427_v5  ;;  %8737 = vmatpush1.bf16.msra.mxu1 %v8736_v26  ;;  %v8800_v52 = vpack.c.bf16 %v4386_v50, %v4384_v63  ;;  %v4388_v26 = vld [vmem:[#allocation3 + $0x40] sm:$0xff] }
 0x7fa   :  { %8739 = vmatprep.subr.bf16.mxu1 %v8738_v0  ;;  %v13431_v63 = vld [vmem:[#allocation87_spill] sm:$0xff] }
 0x7fb   :  { %v4404_v50 = vld [vmem:[#allocation3 + $0xc0] sm:$0xff] }
 0x7fc   :  { %8769 = vmatpush1.bf16.msra.mxu0 %v8768_v28  ;;  %v4391_v28 = vld [vmem:[#allocation3 + $0x58] sm:$0xff] }
 0x7fd   :  { %8770 = vmatprep.subr.bf16.mxu0 %v13427_v5  ;;  %8741 = vmatpush1.bf16.msra.mxu1 %v8740_v40  ;;  %v4394_v40 = vld [vmem:[#allocation3 + $0x70] sm:$0xff] }
 0x7fe   :  { %8743 = vmatprep.subr.bf16.mxu1 %v8742_v37  ;;  %v4397_v37 = vld [vmem:[#allocation3 + $0x88] sm:$0xff] }
 0x7ff   :  { %v8810_v12 = vpack.c.bf16 %v4399_v21, %v4397_v37  ;;  %v13445_v37 = vld [vmem:[#allocation101_spill] sm:$0xff]  ;;  %v13447_v21 = vld [vmem:[#allocation103_spill] sm:$0xff] }
 0x800   :  { %8772 = vmatpush1.bf16.msra.mxu0 %v8771_v49  ;;  %v8806_v49 = vpack.c.bf16 %v4395_v44, %v4393_v25  ;;  %v13437_v25 = vld [vmem:[#allocation93_spill] sm:$0xff]  ;;  %v13439_v44 = vld [vmem:[#allocation95_spill] sm:$0xff] }
 0x801   :  { %8773 = vmatprep.subr.bf16.mxu0 %v13427_v5  ;;  %8745 = vmatpush1.bf16.msra.mxu1 %v8744_v38  ;;  %v4403_v38 = vld [vmem:[#allocation3 + $0xb8] sm:$0xff] }
 0x802   :  { %8795 = vmatprep.subr.bf16.mxu1 %v8794_v7  ;;  %v13429_v7 = vld [vmem:[#allocation85_spill] sm:$0xff] }
 0x804   :  { %8775 = vmatpush1.bf16.msra.mxu0 %v8774_v43  ;;  %4717 = vmatmul.mubr.f32.vlgmr.msra.gmra.mrb[192].mxu1 %v11717_v18  ;;  %v8786_v18 = vpack.c.bf16 %v11844_v36, %v11847_v30  ;;  %v4401_v43 = vld [vmem:[#allocation3 + $0xa8] sm:$0xff] }
 0x805   :  { %8776 = vmatprep.subr.bf16.mxu0 %v13427_v5  ;;  %4722 = vmatprep.mubr.f32.mxu1 %v13391_v9 }
 0x806   :  { %8797 = vmatpush1.bf16.msra.mxu1 %v8796_v61  ;;  %v8814_v61 = vpack.c.bf16 %v4403_v38, %v4401_v43  ;;  %v13457_v43 = vld [vmem:[#allocation113_spill] sm:$0xff]  ;;  %v13459_v38 = vld [vmem:[#allocation115_spill] sm:$0xff] }
 0x807   :  { %8799 = vmatprep.subr.bf16.mxu1 %v8798_v15  ;;  %v13432_v15 = vld [vmem:[#allocation88_spill] sm:$0xff] }
 0x808   :  { %8778 = vmatpush1.bf16.msra.mxu0 %v8777_v6  ;;  %4723 = vmatmul.mubr.f32.gmra.mrb[194].mxu1 %v11714_v16  ;;  %v4389_v16 = vld [vmem:[#allocation3 + $0x48] sm:$0xff]  ;;  %v4402_v6 = vld [vmem:[#allocation3 + $0xb0] sm:$0xff] }
 0x809   :  { %8779 = vmatprep.subr.bf16.mxu0 %v13427_v5  ;;  %4728 = vmatprep.mubr.f32.mxu1 %v13391_v9  ;;  %v8802_v0 = vpack.c.bf16 %v4391_v28, %v4389_v16  ;;  %v13434_v28 = vld [vmem:[#allocation90_spill] sm:$0xff] }
 0x80a   :  { %8801 = vmatpush1.bf16.msra.mxu1 %v8800_v52  ;;  %v4406_v52 = vld [vmem:[#allocation3 + $0xd0] sm:$0xff] }
 0x80b   :  { %8803 = vmatprep.subr.bf16.mxu1 %v8802_v0  ;;  %v8820_v16 = vpack.c.bf16 %v4406_v52, %v4404_v50  ;;  %v13435_v0 = vld [vmem:[#allocation91_spill] sm:$0xff]  ;;  %v13484_v52 = vld [vmem:[#allocation140_spill] sm:$0xff] }
 0x80c   :  { %8781 = vmatpush1.bf16.msra.mxu0 %v8780_v4  ;;  %4729 = vmatmul.mubr.f32.gmra.mrb[196].mxu1 %v11727_v51  ;;  %v8792_v51 = vpack.c.bf16 %v11864_v10, %v11866_v46  ;;  %v13483_v50 = vld [vmem:[#allocation139_spill] sm:$0xff] }
 0x80d   :  { %8782 = vmatprep.subr.bf16.mxu0 %v13427_v5  ;;  %4734 = vmatprep.mubr.f32.mxu1 %v13391_v9 }
 0x810   :  { %8784 = vmatpush1.bf16.msra.mxu0 %v8783_v48  ;;  %4735 = vmatmul.mubr.f32.gmra.mrb[198].mxu1 %v11724_v56  ;;  %v8804_v56 = vpack.c.bf16 %v4390_v54, %v4388_v26  ;;  %v4409_v48 = vld [vmem:[#allocation3 + $0xe8] sm:$0xff]  ;;  %v4408_v26 = vld [vmem:[#allocation3 + $0xe0] sm:$0xff] }
 0x811   :  { %8785 = vmatprep.subr.bf16.mxu0 %v13427_v5  ;;  %4740 = vmatprep.mubr.f32.mxu1 %v13391_v9 }
 0x812   :  { %8805 = vmatpush1.bf16.msra.mxu1 %v8804_v56  ;;  %v13436_v56 = vld [vmem:[#allocation92_spill] sm:$0xff] }
 0x813   :  { %8807 = vmatprep.subr.bf16.mxu1 %v8806_v49  ;;  %v13442_v49 = vld [vmem:[#allocation98_spill] sm:$0xff] }
 0x814   :  { %8787 = vmatpush1.bf16.msra.mxu0 %v8786_v18  ;;  %4741 = vmatmul.mubr.f32.gmra.mrb[200].mxu1 %v11737_v60  ;;  %v8808_v60 = vpack.c.bf16 %v4394_v40, %v4392_v1  ;;  %v4411_v18 = vld [vmem:[#allocation3 + $0xf8] sm:$0xff]  ;;  %v13440_v1 = vld [vmem:[#allocation96_spill] sm:$0xff]  ;;  %v13443_v40 = vld [vmem:[#allocation99_spill] sm:$0xff] }
 0x815   :  { %8788 = vmatprep.subr.bf16.mxu0 %v13427_v5  ;;  %4746 = vmatprep.mubr.f32.mxu1 %v13391_v9 }
 0x816   :  { %8809 = vmatpush1.bf16.msra.mxu1 %v8808_v60  ;;  %v13449_v60 = vld [vmem:[#allocation105_spill] sm:$0xff] }
 0x817   :  { %8811 = vmatprep.subr.bf16.mxu1 %v8810_v12  ;;  %v13451_v12 = vld [vmem:[#allocation107_spill] sm:$0xff] }
 0x818   :  { %8790 = vmatpush1.bf16.msra.mxu0 %v8789_v17  ;;  %4747 = vmatmul.mubr.f32.gmra.mrb[202].mxu1 %v11734_v39  ;;  %v4400_v39 = vld [vmem:[#allocation3 + $0xa0] sm:$0xff]  ;;  %v13433_v17 = vld [vmem:[#allocation89_spill] sm:$0xff] }
 0x819   :  { %8791 = vmatprep.subr.bf16.mxu0 %v13427_v5  ;;  %4752 = vmatprep.mubr.f32.mxu1 %v13391_v9  ;;  %v8816_v4 = vpack.c.bf16 %v4402_v6, %v4400_v39  ;;  %v13467_v39 = vld [vmem:[#allocation123_spill] sm:$0xff]  ;;  %v13469_v6 = vld [vmem:[#allocation125_spill] sm:$0xff] }
 0x81a   :  { %8813 = vmatpush1.bf16.msra.mxu1 %v8812_v11  ;;  %v13463_v11 = vld [vmem:[#allocation119_spill] sm:$0xff] }
 0x81b   :  { %8815 = vmatprep.subr.bf16.mxu1 %v8814_v61  ;;  %v13471_v61 = vld [vmem:[#allocation127_spill] sm:$0xff] }
 0x81c   :  { %8793 = vmatpush1.bf16.msra.mxu0 %v8792_v51  ;;  %4753 = vmatmul.mubr.f32.gmra.mrb[204].mxu1 %v11747_v47  ;;  %v8818_v47 = vpack.c.bf16 %v4407_v19, %v4405_v3  ;;  %v4410_v51 = vld [vmem:[#allocation3 + $0xf0] sm:$0xff]  ;;  %v13475_v19 = vld [vmem:[#allocation131_spill] sm:$0xff] }
 0x81d   :  { %4758 = vmatprep.mubr.f32.mxu1 %v13391_v9  ;;  %v8824_v54 = vpack.c.bf16 %v4410_v51, %v4408_v26  ;;  %v13473_v3 = vld [vmem:[#allocation129_spill] sm:$0xff]  ;;  %v4568_v5 = vld [vmem:[#allocation3 + $0x5e0] sm:$0xff] }
 0x81e   :  { %8817 = vmatpush1.bf16.msra.mxu1 %v8816_v4  ;;  %v13479_v4 = vld [vmem:[#allocation135_spill] sm:$0xff]  ;;  %v4511_v26 = vld [vmem:[#allocation3 + $0x418] sm:$0xff] }
 0x81f   :  { %4974 = vmatmul.mubr.f32.vlgmr.msra.gmra.mrb[128].mxu0 %v13429_v7  ;;  %8819 = vmatprep.subr.bf16.mxu1 %v8818_v47  ;;  %v13461_v7 = vld [vmem:[#allocation117_spill] sm:$0xff] }
 0x820   :  { %4978 = vmatprep.mubr.f32.mxu0 %v13430_v45  ;;  %4759 = vmatmul.mubr.f32.gmra.mrb[206].mxu1 %v11744_v23  ;;  %v8822_v23 = vpack.c.bf16 %v4411_v18, %v4409_v48  ;;  %v13465_v45 = vld [vmem:[#allocation121_spill] sm:$0xff]  ;;  %v13487_v48 = vld [vmem:[#allocation143_spill] sm:$0xff]  ;;  %v13488_v18 = vld [vmem:[#allocation144_spill] sm:$0xff] }
 0x821   :  { %4764 = vmatprep.mubr.f32.mxu1 %v13391_v9  ;;  %v13485_v47 = vld [vmem:[#allocation141_spill] sm:$0xff] }
 0x822   :  { %8821 = vmatpush1.bf16.msra.mxu1 %v8820_v16  ;;  %v13491_v16 = vld [vmem:[#allocation147_spill] sm:$0xff] }
 0x823   :  { %4979 = vmatmul.mubr.f32.gmra.mrb[130].mxu0 %v13431_v63  ;;  %8823 = vmatprep.subr.bf16.mxu1 %v8822_v23  ;;  %v13477_v63 = vld [vmem:[#allocation133_spill] sm:$0xff]  ;;  %v4508_v23 = vld [vmem:[#allocation3 + $0x400] sm:$0xff] }
 0x824   :  { %4983 = vmatprep.mubr.f32.mxu0 %v13432_v15  ;;  %4765 = vmatmul.mubr.f32.gmra.mrb[208].mxu1 %v11757_v33  ;;  %v13438_v33 = vld [vmem:[#allocation94_spill] sm:$0xff]  ;;  %v13481_v15 = vld [vmem:[#allocation137_spill] sm:$0xff] }
 0x825   :  { %4770 = vmatprep.mubr.f32.mxu1 %v13391_v9 }
 0x826   :  { %8825 = vmatpush1.bf16.msra.mxu1 %v8824_v54 }
 0x827   :  { %4984 = vmatmul.mubr.f32.gmra.mrb[132].mxu0 %v13433_v17  ;;  %v13489_v17 = vld [vmem:[#allocation145_spill] sm:$0xff] }
 0x828   :  { %4988 = vmatprep.mubr.f32.mxu0 %v13434_v28  ;;  %4771 = vmatmul.mubr.f32.gmra.mrb[210].mxu1 %v11754_v41  ;;  %v13441_v41 = vld [vmem:[#allocation97_spill] sm:$0xff]  ;;  %v4509_v28 = vld [vmem:[#allocation3 + $0x408] sm:$0xff] }
 0x829   :  { %4776 = vmatprep.mubr.f32.mxu1 %v13391_v9  ;;  %v8826_v51 = vpack.c.bf16 %v4511_v26, %v4509_v28 }
 0x82b   :  { %4989 = vmatmul.mubr.f32.gmra.mrb[134].mxu0 %v13435_v0  ;;  %8827 = vmatprep.subr.bf16.mxu0 %v8826_v51  ;;  %v4510_v0 = vld [vmem:[#allocation3 + $0x410] sm:$0xff] }
 0x82c   :  { %4993 = vmatprep.mubr.f32.mxu0 %v13436_v56  ;;  %4777 = vmatmul.mubr.f32.gmra.mrb[212].mxu1 %v11767_v32  ;;  %v13444_v32 = vld [vmem:[#allocation100_spill] sm:$0xff]  ;;  %v8828_v54 = vpack.c.bf16 %v4510_v0, %v4508_v23  ;;  %v4536_v23 = vld [vmem:[#allocation3 + $0x4e0] sm:$0xff] }
 0x82d   :  { %4782 = vmatprep.mubr.f32.mxu1 %v13391_v9  ;;  %v4513_v56 = vld [vmem:[#allocation3 + $0x428] sm:$0xff]  ;;  %v4538_v0 = vld [vmem:[#allocation3 + $0x4f0] sm:$0xff] }
 0x82e   :  { %8829 = vmatpush1.bf16.msra.mxu0 %v8828_v54  ;;  %v4541_v54 = vld [vmem:[#allocation3 + $0x508] sm:$0xff] }
 0x82f   :  { %4994 = vmatmul.mubr.f32.gmra.mrb[136].mxu0 %v13437_v25  ;;  %v4515_v25 = vld [vmem:[#allocation3 + $0x438] sm:$0xff] }
 0x830   :  { %4998 = vmatprep.mubr.f32.mxu0 %v13438_v33  ;;  %4783 = vmatmul.mubr.f32.gmra.mrb[214].mxu1 %v11764_v55  ;;  %v13446_v55 = vld [vmem:[#allocation102_spill] sm:$0xff]  ;;  %v8830_v33 = vpack.c.bf16 %v4515_v25, %v4513_v56 }
 0x831   :  { %4788 = vmatprep.mubr.f32.mxu1 %v13391_v9  ;;  %v4543_v56 = vld [vmem:[#allocation3 + $0x518] sm:$0xff] }
 0x832   :  { %8831 = vmatprep.subr.bf16.mxu0 %v8830_v33 }
 0x833   :  { %4999 = vmatmul.mubr.f32.gmra.mrb[138].mxu0 %v13439_v44  ;;  %v4512_v44 = vld [vmem:[#allocation3 + $0x420] sm:$0xff] }
 0x834   :  { %5003 = vmatprep.mubr.f32.mxu0 %v13440_v1  ;;  %4789 = vmatmul.mubr.f32.gmra.mrb[216].mxu1 %v11777_v42  ;;  %v13448_v42 = vld [vmem:[#allocation104_spill] sm:$0xff] }
 0x835   :  { %4794 = vmatprep.mubr.f32.mxu1 %v13391_v9  ;;  %v4514_v1 = vld [vmem:[#allocation3 + $0x430] sm:$0xff] }
 0x837   :  { %5004 = vmatmul.mubr.f32.gmra.mrb[140].mxu0 %v13441_v41 }
 0x838   :  { %5008 = vmatprep.mubr.f32.mxu0 %v13442_v49  ;;  %4795 = vmatmul.mubr.f32.gmra.mrb[218].mxu1 %v11774_v57  ;;  %v13450_v57 = vld [vmem:[#allocation106_spill] sm:$0xff]  ;;  %v8832_v49 = vpack.c.bf16 %v4514_v1, %v4512_v44  ;;  %v8856_v1 = vpack.c.bf16 %v4538_v0, %v4536_v23 }
 0x839   :  { %4800 = vmatprep.mubr.f32.mxu1 %v13391_v9 }
 0x83a   :  { %8833 = vmatpush1.bf16.msra.mxu0 %v8832_v49 }
 0x83b   :  { %5009 = vmatmul.mubr.f32.gmra.mrb[142].mxu0 %v13443_v40 }
 0x83c   :  { %5013 = vmatprep.mubr.f32.mxu0 %v13444_v32  ;;  %4801 = vmatmul.mubr.f32.gmra.mrb[220].mxu1 %v11787_v35  ;;  %v13452_v35 = vld [vmem:[#allocation108_spill] sm:$0xff] }
 0x83d   :  { %4806 = vmatprep.mubr.f32.mxu1 %v13391_v9 }
 0x83f   :  { %5014 = vmatmul.mubr.f32.gmra.mrb[144].mxu0 %v13445_v37  ;;  %v4517_v37 = vld [vmem:[#allocation3 + $0x448] sm:$0xff] }
 0x840   :  { %5018 = vmatprep.mubr.f32.mxu0 %v13446_v55  ;;  %4807 = vmatmul.mubr.f32.gmra.mrb[222].mxu1 %v11784_v27  ;;  %v13454_v27 = vld [vmem:[#allocation110_spill] sm:$0xff] }
 0x841   :  { %4812 = vmatprep.mubr.f32.mxu1 %v13391_v9  ;;  %v4519_v55 = vld [vmem:[#allocation3 + $0x458] sm:$0xff] }
 0x843   :  { %5019 = vmatmul.mubr.f32.gmra.mrb[146].mxu0 %v13447_v21 }
 0x844   :  { %5023 = vmatprep.mubr.f32.mxu0 %v13448_v42  ;;  %4813 = vmatmul.mubr.f32.gmra.mrb[224].mxu1 %v11797_v13  ;;  %v13456_v13 = vld [vmem:[#allocation112_spill] sm:$0xff]  ;;  %v8834_v42 = vpack.c.bf16 %v4519_v55, %v4517_v37  ;;  %v8858_v37 = vpack.c.bf16 %v4543_v56, %v4541_v54  ;;  %v4540_v55 = vld [vmem:[#allocation3 + $0x500] sm:$0xff] }
 0x845   :  { %4818 = vmatprep.mubr.f32.mxu1 %v13391_v9 }
 0x846   :  { %8835 = vmatprep.subr.bf16.mxu0 %v8834_v42  ;;  %v4542_v42 = vld [vmem:[#allocation3 + $0x510] sm:$0xff] }
 0x847   :  { %5024 = vmatmul.mubr.f32.gmra.mrb[148].mxu0 %v13449_v60  ;;  %v4516_v60 = vld [vmem:[#allocation3 + $0x440] sm:$0xff] }
 0x848   :  { %5028 = vmatprep.mubr.f32.mxu0 %v13450_v57  ;;  %4819 = vmatmul.mubr.f32.gmra.mrb[226].mxu1 %v11794_v58  ;;  %v13458_v58 = vld [vmem:[#allocation114_spill] sm:$0xff]  ;;  %v4518_v57 = vld [vmem:[#allocation3 + $0x450] sm:$0xff] }
 0x849   :  { %4824 = vmatprep.mubr.f32.mxu1 %v13391_v9 }
 0x84b   :  { %5029 = vmatmul.mubr.f32.gmra.mrb[150].mxu0 %v13451_v12 }
 0x84c   :  { %5033 = vmatprep.mubr.f32.mxu0 %v13452_v35  ;;  %4825 = vmatmul.mubr.f32.gmra.mrb[228].mxu1 %v11807_v20  ;;  %v13460_v20 = vld [vmem:[#allocation116_spill] sm:$0xff]  ;;  %v8836_v35 = vpack.c.bf16 %v4518_v57, %v4516_v60  ;;  %v4547_v57 = vld [vmem:[#allocation3 + $0x538] sm:$0xff] }
 0x84d   :  { %4830 = vmatprep.mubr.f32.mxu1 %v13391_v9  ;;  %v4545_v60 = vld [vmem:[#allocation3 + $0x528] sm:$0xff] }
 0x84e   :  { %8837 = vmatpush1.bf16.msra.mxu0 %v8836_v35 }
 0x84f   :  { %5034 = vmatmul.mubr.f32.gmra.mrb[152].mxu0 %v13453_v29 }
 0x850   :  { %5038 = vmatprep.mubr.f32.mxu0 %v13454_v27  ;;  %4831 = vmatmul.mubr.f32.gmra.mrb[230].mxu1 %v11804_v14  ;;  %v13462_v14 = vld [vmem:[#allocation118_spill] sm:$0xff] }
 0x851   :  { %4836 = vmatprep.mubr.f32.mxu1 %v13391_v9 }
 0x853   :  { %5039 = vmatmul.mubr.f32.gmra.mrb[154].mxu0 %v13455_v8  ;;  %v4521_v8 = vld [vmem:[#allocation3 + $0x468] sm:$0xff] }
 0x854   :  { %5043 = vmatprep.mubr.f32.mxu0 %v13456_v13  ;;  %4837 = vmatmul.mubr.f32.gmra.mrb[232].mxu1 %v11817_v34  ;;  %v13464_v34 = vld [vmem:[#allocation120_spill] sm:$0xff]  ;;  %v4523_v13 = vld [vmem:[#allocation3 + $0x478] sm:$0xff] }
 0x855   :  { %4842 = vmatprep.mubr.f32.mxu1 %v13391_v9 }
 0x857   :  { %5044 = vmatmul.mubr.f32.gmra.mrb[156].mxu0 %v13457_v43 }
 0x858   :  { %5048 = vmatprep.mubr.f32.mxu0 %v13458_v58  ;;  %4843 = vmatmul.mubr.f32.gmra.mrb[234].mxu1 %v11814_v2  ;;  %v13466_v2 = vld [vmem:[#allocation122_spill] sm:$0xff]  ;;  %v8838_v58 = vpack.c.bf16 %v4523_v13, %v4521_v8 }
 0x859   :  { %4848 = vmatprep.mubr.f32.mxu1 %v13391_v9 }
 0x85a   :  { %8839 = vmatprep.subr.bf16.mxu0 %v8838_v58  ;;  %v8860_v58 = vpack.c.bf16 %v4542_v42, %v4540_v55 }
 0x85b   :  { %5049 = vmatmul.mubr.f32.gmra.mrb[158].mxu0 %v13459_v38  ;;  %v4520_v38 = vld [vmem:[#allocation3 + $0x460] sm:$0xff] }
 0x85c   :  { %5053 = vmatprep.mubr.f32.mxu0 %v13460_v20  ;;  %4849 = vmatmul.mubr.f32.gmra.mrb[236].mxu1 %v11827_v31  ;;  %v13468_v31 = vld [vmem:[#allocation124_spill] sm:$0xff] }
 0x85d   :  { %4854 = vmatprep.mubr.f32.mxu1 %v13391_v9  ;;  %v4522_v20 = vld [vmem:[#allocation3 + $0x470] sm:$0xff] }
 0x85f   :  { %5054 = vmatmul.mubr.f32.gmra.mrb[160].mxu0 %v13461_v7 }
 0x860   :  { %5058 = vmatprep.mubr.f32.mxu0 %v13462_v14  ;;  %4855 = vmatmul.mubr.f32.gmra.mrb[238].mxu1 %v11824_v62  ;;  %v13470_v62 = vld [vmem:[#allocation126_spill] sm:$0xff]  ;;  %v8840_v14 = vpack.c.bf16 %v4522_v20, %v4520_v38  ;;  %v8862_v20 = vpack.c.bf16 %v4547_v57, %v4545_v60 }
 0x861   :  { %4860 = vmatprep.mubr.f32.mxu1 %v13391_v9 }
 0x862   :  { %8841 = vmatpush1.bf16.msra.mxu0 %v8840_v14  ;;  %v4544_v14 = vld [vmem:[#allocation3 + $0x520] sm:$0xff] }
 0x863   :  { %5059 = vmatmul.mubr.f32.gmra.mrb[162].mxu0 %v13463_v11 }
 0x864   :  { %5063 = vmatprep.mubr.f32.mxu0 %v13464_v34  ;;  %4861 = vmatmul.mubr.f32.gmra.mrb[240].mxu1 %v11837_v59  ;;  %v13472_v59 = vld [vmem:[#allocation128_spill] sm:$0xff] }
 0x865   :  { %4866 = vmatprep.mubr.f32.mxu1 %v13391_v9 }
 0x867   :  { %5064 = vmatmul.mubr.f32.gmra.mrb[164].mxu0 %v13465_v45  ;;  %v4525_v45 = vld [vmem:[#allocation3 + $0x488] sm:$0xff] }
 0x868   :  { %5068 = vmatprep.mubr.f32.mxu0 %v13466_v2  ;;  %4867 = vmatmul.mubr.f32.gmra.mrb[242].mxu1 %v11834_v24  ;;  %v13474_v24 = vld [vmem:[#allocation130_spill] sm:$0xff] }
 0x869   :  { %4872 = vmatprep.mubr.f32.mxu1 %v13391_v9  ;;  %v4527_v2 = vld [vmem:[#allocation3 + $0x498] sm:$0xff] }
 0x86b   :  { %5069 = vmatmul.mubr.f32.gmra.mrb[166].mxu0 %v13467_v39  ;;  %v4524_v39 = vld [vmem:[#allocation3 + $0x480] sm:$0xff] }
 0x86c   :  { %5073 = vmatprep.mubr.f32.mxu0 %v13468_v31  ;;  %4873 = vmatmul.mubr.f32.gmra.mrb[244].mxu1 %v11847_v30  ;;  %v13476_v30 = vld [vmem:[#allocation132_spill] sm:$0xff] }
 0x86d   :  { %4878 = vmatprep.mubr.f32.mxu1 %v13391_v9 }
 0x86f   :  { %5074 = vmatmul.mubr.f32.gmra.mrb[168].mxu0 %v13469_v6  ;;  %v8842_v6 = vpack.c.bf16 %v4527_v2, %v4525_v45  ;;  %v4546_v45 = vld [vmem:[#allocation3 + $0x530] sm:$0xff]  ;;  %v4549_v2 = vld [vmem:[#allocation3 + $0x548] sm:$0xff] }
 0x870   :  { %5078 = vmatprep.mubr.f32.mxu0 %v13470_v62  ;;  %4879 = vmatmul.mubr.f32.gmra.mrb[246].mxu1 %v11844_v36  ;;  %v13478_v36 = vld [vmem:[#allocation134_spill] sm:$0xff]  ;;  %v4526_v62 = vld [vmem:[#allocation3 + $0x490] sm:$0xff] }
 0x871   :  { %4884 = vmatprep.mubr.f32.mxu1 %v13391_v9  ;;  %8843 = vmatprep.subr.bf16.mxu0 %v8842_v6 }
 0x873   :  { %5079 = vmatmul.mubr.f32.gmra.mrb[170].mxu0 %v13471_v61  ;;  %v4529_v61 = vld [vmem:[#allocation3 + $0x4a8] sm:$0xff] }
 0x874   :  { %5083 = vmatprep.mubr.f32.mxu0 %v13472_v59  ;;  %4885 = vmatmul.mubr.f32.gmra.mrb[248].mxu1 %v11857_v53  ;;  %v13480_v53 = vld [vmem:[#allocation136_spill] sm:$0xff]  ;;  %v4531_v59 = vld [vmem:[#allocation3 + $0x4b8] sm:$0xff] }
 0x875   :  { %4890 = vmatprep.mubr.f32.mxu1 %v13391_v9 }
 0x877   :  { %5084 = vmatmul.mubr.f32.gmra.mrb[172].mxu0 %v13473_v3  ;;  %v8844_v3 = vpack.c.bf16 %v4526_v62, %v4524_v39  ;;  %v4551_v39 = vld [vmem:[#allocation3 + $0x558] sm:$0xff] }
 0x878   :  { %5088 = vmatprep.mubr.f32.mxu0 %v13474_v24  ;;  %4891 = vmatmul.mubr.f32.gmra.mrb[250].mxu1 %v11854_v22  ;;  %v13482_v22 = vld [vmem:[#allocation138_spill] sm:$0xff]  ;;  %v8846_v24 = vpack.c.bf16 %v4531_v59, %v4529_v61  ;;  %v8864_v59 = vpack.c.bf16 %v4546_v45, %v4544_v14  ;;  %v4565_v14 = vld [vmem:[#allocation3 + $0x5c8] sm:$0xff] }
 0x879   :  { %4896 = vmatprep.mubr.f32.mxu1 %v13391_v9  ;;  %8845 = vmatpush1.bf16.msra.mxu0 %v8844_v3  ;;  %v4567_v45 = vld [vmem:[#allocation3 + $0x5d8] sm:$0xff] }
 0x87a   :  { %8847 = vmatprep.subr.bf16.mxu0 %v8846_v24  ;;  %v8866_v24 = vpack.c.bf16 %v4551_v39, %v4549_v2 }
 0x87b   :  { %5089 = vmatmul.mubr.f32.gmra.mrb[174].mxu0 %v13475_v19  ;;  %v4528_v19 = vld [vmem:[#allocation3 + $0x4a0] sm:$0xff] }
 0x87c   :  { %5093 = vmatprep.mubr.f32.mxu0 %v13476_v30  ;;  %4897 = vmatmul.mubr.f32.gmra.mrb[252].mxu1 %v11866_v46  ;;  %v13486_v46 = vld [vmem:[#allocation142_spill] sm:$0xff]  ;;  %v4530_v30 = vld [vmem:[#allocation3 + $0x4b0] sm:$0xff] }
 0x87d   :  { %4902 = vmatprep.mubr.f32.mxu1 %v13391_v9 }
 0x87f   :  { %5094 = vmatmul.mubr.f32.gmra.mrb[176].mxu0 %v13477_v63  ;;  %v4533_v63 = vld [vmem:[#allocation3 + $0x4c8] sm:$0xff] }
 0x880   :  { %5098 = vmatprep.mubr.f32.mxu0 %v13478_v36  ;;  %4903 = vmatmul.mubr.f32.gmra.mrb[254].mxu1 %v11864_v10  ;;  %v13490_v10 = vld [vmem:[#allocation146_spill] sm:$0xff] }
 0x881   :  { %5209 = vmatprep.mubr.f32.mxu1 %v13391_v9 }
 0x883   :  { %5099 = vmatmul.mubr.f32.gmra.mrb[178].mxu0 %v13479_v4  ;;  %v4535_v4 = vld [vmem:[#allocation3 + $0x4d8] sm:$0xff] }
 0x884   :  { %5103 = vmatprep.mubr.f32.mxu0 %v13480_v53 }
 0x887   :  { %5104 = vmatmul.mubr.f32.gmra.mrb[180].mxu0 %v13481_v15 }
 0x888   :  { %5108 = vmatprep.mubr.f32.mxu0 %v13482_v22  ;;  %v8848_v22 = vpack.c.bf16 %v4530_v30, %v4528_v19  ;;  %v4548_v19 = vld [vmem:[#allocation3 + $0x540] sm:$0xff]  ;;  %v4550_v30 = vld [vmem:[#allocation3 + $0x550] sm:$0xff] }
 0x88a   :  { %8849 = vmatpush1.bf16.msra.mxu0 %v8848_v22 }
 0x88b   :  { %5109 = vmatmul.mubr.f32.gmra.mrb[182].mxu0 %v13483_v50 }
 0x88c   :  { %5113 = vmatprep.mubr.f32.mxu0 %v13484_v52  ;;  %v8850_v52 = vpack.c.bf16 %v4535_v4, %v4533_v63  ;;  %v4553_v63 = vld [vmem:[#allocation3 + $0x568] sm:$0xff] }
 0x88e   :  { %8851 = vmatprep.subr.bf16.mxu0 %v8850_v52  ;;  %v8868_v52 = vpack.c.bf16 %v4550_v30, %v4548_v19  ;;  %v4564_v19 = vld [vmem:[#allocation3 + $0x5c0] sm:$0xff]  ;;  %v4566_v30 = vld [vmem:[#allocation3 + $0x5d0] sm:$0xff] }
 0x88f   :  { %5114 = vmatmul.mubr.f32.gmra.mrb[184].mxu0 %v13485_v47  ;;  %v4532_v47 = vld [vmem:[#allocation3 + $0x4c0] sm:$0xff] }
 0x890   :  { %5118 = vmatprep.mubr.f32.mxu0 %v13486_v46  ;;  %v4534_v46 = vld [vmem:[#allocation3 + $0x4d0] sm:$0xff] }
 0x891   :  { %v8852_v28 = vpack.c.bf16 %v4534_v46, %v4532_v47 }
 0x893   :  { %5119 = vmatmul.mubr.f32.gmra.mrb[186].mxu0 %v13487_v48  ;;  %v4537_v48 = vld [vmem:[#allocation3 + $0x4e8] sm:$0xff] }
 0x894   :  { %5123 = vmatprep.mubr.f32.mxu0 %v13488_v18  ;;  %v4539_v18 = vld [vmem:[#allocation3 + $0x4f8] sm:$0xff]  ;;  %8853 = vmatpush1.bf16.msra.mxu0 %v8852_v28 }
 0x895   :  { %v8854_v51 = vpack.c.bf16 %v4539_v18, %v4537_v48  ;;  %v4552_v48 = vld [vmem:[#allocation3 + $0x560] sm:$0xff]  ;;  %v4554_v18 = vld [vmem:[#allocation3 + $0x570] sm:$0xff] }
 0x896   :  { %v8872_v0 = vpack.c.bf16 %v4554_v18, %v4552_v48 }
 0x897   :  { %5124 = vmatmul.mubr.f32.gmra.mrb[188].mxu0 %v13489_v17  ;;  %8855 = vmatprep.subr.bf16.mxu0 %v8854_v51 }
 0x898   :  { %5128 = vmatprep.mubr.f32.mxu0 %v13490_v10  ;;  %8857 = vmatpush1.bf16.msra.mxu0 %v8856_v1  ;;  %v4561_v1 = vld [vmem:[#allocation3 + $0x5a8] sm:$0xff] }
 0x899   :  { %8859 = vmatprep.subr.bf16.mxu0 %v8858_v37  ;;  %v4563_v37 = vld [vmem:[#allocation3 + $0x5b8] sm:$0xff] }
 0x89b   :  { %5129 = vmatmul.mubr.f32.gmra.mrb[190].mxu0 %v13491_v16 }
 0x89c   :  { %8861 = vmatpush1.bf16.msra.mxu0 %v8860_v58  ;;  %v4560_v58 = vld [vmem:[#allocation3 + $0x5a0] sm:$0xff] }
 0x89d   :  { %8863 = vmatprep.subr.bf16.mxu0 %v8862_v20  ;;  %v4562_v20 = vld [vmem:[#allocation3 + $0x5b0] sm:$0xff] }
 0x8a0   :  { %8865 = vmatpush1.bf16.msra.mxu0 %v8864_v59 }
 0x8a1   :  { %8867 = vmatprep.subr.bf16.mxu0 %v8866_v24  ;;  %v8882_v24 = vpack.c.bf16 %v4567_v45, %v4565_v14 }
 0x8a4   :  { %8869 = vmatpush1.bf16.msra.mxu0 %v8868_v52 }
 0x8d7   :  { %v12045_v41 = vpop.f32.mrb[192].mxu1 }
 0x8d8   :  { %13492 = vst [vmem:[#allocation52_spill] sm:$0xff] %v12045_v41  ;;  %v12047_v40 = vpop.f32.mrb[193].mxu1 }
 0x8d9   :  { %13493 = vst [vmem:[#allocation53_spill] sm:$0xff] %v12047_v40 }
 0x8db   :  { %v12049_v32 = vpop.f32.mrb[194].mxu1 }
 0x8dc   :  { %13494 = vst [vmem:[#allocation54_spill] sm:$0xff] %v12049_v32  ;;  %v12051_v21 = vpop.f32.mrb[195].mxu1 }
 0x8dd   :  { %13495 = vst [vmem:[#allocation55_spill] sm:$0xff] %v12051_v21 }
 0x8df   :  { %v12053_v12 = vpop.f32.mrb[196].mxu1 }
 0x8e0   :  { %13496 = vst [vmem:[#allocation56_spill] sm:$0xff] %v12053_v12  ;;  %v12055_v29 = vpop.f32.mrb[197].mxu1 }
 0x8e1   :  { %13497 = vst [vmem:[#allocation57_spill] sm:$0xff] %v12055_v29 }
 0x8e3   :  { %v12057_v27 = vpop.f32.mrb[198].mxu1 }
 0x8e4   :  { %13498 = vst [vmem:[#allocation58_spill] sm:$0xff] %v12057_v27  ;;  %v12059_v43 = vpop.f32.mrb[199].mxu1 }
 0x8e5   :  { %13499 = vst [vmem:[#allocation59_spill] sm:$0xff] %v12059_v43 }
 0x8e7   :  { %v12061_v7 = vpop.f32.mrb[200].mxu1 }
 0x8e8   :  { %13500 = vst [vmem:[#allocation60_spill] sm:$0xff] %v12061_v7  ;;  %v12063_v11 = vpop.f32.mrb[201].mxu1 }
 0x8e9   :  { %13501 = vst [vmem:[#allocation61_spill] sm:$0xff] %v12063_v11 }
 0x8eb   :  { %v12065_v34 = vpop.f32.mrb[202].mxu1 }
 0x8ec   :  { %13502 = vst [vmem:[#allocation62_spill] sm:$0xff] %v12065_v34  ;;  %v12067_v31 = vpop.f32.mrb[203].mxu1 }
 0x8ed   :  { %13503 = vst [vmem:[#allocation63_spill] sm:$0xff] %v12067_v31  ;;  %v4575_v31 = vld [vmem:[#allocation3 + $0x618] sm:$0xff] }
 0x8ef   :  { %v12069_v15 = vpop.f32.mrb[204].mxu1 }
 0x8f0   :  { %13504 = vst [vmem:[#allocation64_spill] sm:$0xff] %v12069_v15  ;;  %v12072_v50 = vpop.f32.mrb[205].mxu1  ;;  %v4573_v15 = vld [vmem:[#allocation3 + $0x608] sm:$0xff] }
 0x8f1   :  { %13505 = vst [vmem:[#allocation65_spill] sm:$0xff] %v12072_v50  ;;  %v4507_v50 = vld [vmem:[#allocation3 + $0x3f8] sm:$0xff] }
 0x8f2   :  { %v4975_v36 = vpop.f32.mrb[128].mxu0 }
 0x8f3   :  { %v4977_v53 = vpop.f32.mrb[129].mxu0  ;;  %5210 = vmatmul.mubr.f32.vlgmr.msra.gmra.mrb[0].mxu1 %v4975_v36  ;;  %v12074_v16 = vpop.f32.mrb[206].mxu1  ;;  %v4555_v36 = vld [vmem:[#allocation3 + $0x578] sm:$0xff] }
 0x8f4   :  { %5215 = vmatprep.mubr.f32.mxu1 %v13391_v9  ;;  %13506 = vst [vmem:[#allocation66_spill] sm:$0xff] %v12074_v16  ;;  %v12077_v26 = vpop.f32.mrb[207].mxu1  ;;  %v8870_v46 = vpack.c.bf16 %v4555_v36, %v4553_v63  ;;  %v4505_v16 = vld [vmem:[#allocation3 + $0x3e8] sm:$0xff] }
 0x8f5   :  { %13507 = vst [vmem:[#allocation67_spill] sm:$0xff] %v12077_v26  ;;  %v4503_v26 = vld [vmem:[#allocation3 + $0x3d8] sm:$0xff] }
 0x8f6   :  { %v4980_v17 = vpop.f32.mrb[130].mxu0  ;;  %8871 = vmatprep.subr.bf16.mxu0 %v8870_v46 }
 0x8f7   :  { %v4982_v10 = vpop.f32.mrb[131].mxu0  ;;  %5216 = vmatmul.mubr.f32.gmra.mrb[2].mxu1 %v4980_v17  ;;  %v12079_v44 = vpop.f32.mrb[208].mxu1  ;;  %v4557_v17 = vld [vmem:[#allocation3 + $0x588] sm:$0xff]  ;;  %8873 = vmatpush1.bf16.msra.mxu0 %v8872_v0 }
 0x8f8   :  { %5221 = vmatprep.mubr.f32.mxu1 %v13391_v9  ;;  %13508 = vst [vmem:[#allocation36_spill] sm:$0xff] %v12079_v44  ;;  %v12082_v49 = vpop.f32.mrb[209].mxu1  ;;  %v4559_v10 = vld [vmem:[#allocation3 + $0x598] sm:$0xff]  ;;  %v4501_v44 = vld [vmem:[#allocation3 + $0x3c8] sm:$0xff] }
 0x8f9   :  { %13509 = vst [vmem:[#allocation37_spill] sm:$0xff] %v12082_v49  ;;  %v8874_v56 = vpack.c.bf16 %v4559_v10, %v4557_v17  ;;  %v4499_v49 = vld [vmem:[#allocation3 + $0x3b8] sm:$0xff] }
 0x8fa   :  { %v4985_v25 = vpop.f32.mrb[132].mxu0 }
 0x8fb   :  { %v4987_v33 = vpop.f32.mrb[133].mxu0  ;;  %5222 = vmatmul.mubr.f32.gmra.mrb[4].mxu1 %v4985_v25  ;;  %v12084_v13 = vpop.f32.mrb[210].mxu1  ;;  %v4556_v25 = vld [vmem:[#allocation3 + $0x580] sm:$0xff]  ;;  %8875 = vmatprep.subr.bf16.mxu0 %v8874_v56 }
 0x8fc   :  { %5227 = vmatprep.mubr.f32.mxu1 %v13391_v9  ;;  %13510 = vst [vmem:[#allocation38_spill] sm:$0xff] %v12084_v13  ;;  %v12087_v38 = vpop.f32.mrb[211].mxu1  ;;  %v4558_v33 = vld [vmem:[#allocation3 + $0x590] sm:$0xff]  ;;  %v4497_v13 = vld [vmem:[#allocation3 + $0x3a8] sm:$0xff] }
 0x8fd   :  { %13511 = vst [vmem:[#allocation39_spill] sm:$0xff] %v12087_v38  ;;  %v8876_v57 = vpack.c.bf16 %v4558_v33, %v4556_v25  ;;  %v4495_v38 = vld [vmem:[#allocation3 + $0x398] sm:$0xff] }
 0x8fe   :  { %v4990_v35 = vpop.f32.mrb[134].mxu0 }
 0x8ff   :  { %v4992_v8 = vpop.f32.mrb[135].mxu0  ;;  %5228 = vmatmul.mubr.f32.gmra.mrb[6].mxu1 %v4990_v35  ;;  %v12089_v61 = vpop.f32.mrb[212].mxu1  ;;  %8877 = vmatpush1.bf16.msra.mxu0 %v8876_v57 }
 0x900   :  { %5233 = vmatprep.mubr.f32.mxu1 %v13391_v9  ;;  %13512 = vst [vmem:[#allocation40_spill] sm:$0xff] %v12089_v61  ;;  %v12092_v3 = vpop.f32.mrb[213].mxu1  ;;  %v8878_v8 = vpack.c.bf16 %v4563_v37, %v4561_v1  ;;  %v4493_v61 = vld [vmem:[#allocation3 + $0x388] sm:$0xff] }
 0x901   :  { %13513 = vst [vmem:[#allocation41_spill] sm:$0xff] %v12092_v3  ;;  %v4491_v3 = vld [vmem:[#allocation3 + $0x378] sm:$0xff] }
 0x902   :  { %v4995_v6 = vpop.f32.mrb[136].mxu0  ;;  %8879 = vmatprep.subr.bf16.mxu0 %v8878_v8 }
 0x903   :  { %v4997_v62 = vpop.f32.mrb[137].mxu0  ;;  %5234 = vmatmul.mubr.f32.gmra.mrb[8].mxu1 %v4995_v6  ;;  %v12094_v22 = vpop.f32.mrb[214].mxu1 }
 0x904   :  { %5239 = vmatprep.mubr.f32.mxu1 %v13391_v9  ;;  %13514 = vst [vmem:[#allocation42_spill] sm:$0xff] %v12094_v22  ;;  %v12097_v47 = vpop.f32.mrb[215].mxu1  ;;  %v8880_v62 = vpack.c.bf16 %v4562_v20, %v4560_v58  ;;  %v4489_v22 = vld [vmem:[#allocation3 + $0x368] sm:$0xff] }
 0x905   :  { %13515 = vst [vmem:[#allocation43_spill] sm:$0xff] %v12097_v47  ;;  %v4487_v47 = vld [vmem:[#allocation3 + $0x358] sm:$0xff] }
 0x906   :  { %v5000_v4 = vpop.f32.mrb[138].mxu0  ;;  %8881 = vmatpush1.bf16.msra.mxu0 %v8880_v62 }
 0x907   :  { %v5002_v53 = vpop.f32.mrb[139].mxu0  ;;  %5240 = vmatmul.mubr.f32.gmra.mrb[10].mxu1 %v5000_v4  ;;  %v12099_v23 = vpop.f32.mrb[216].mxu1  ;;  %8883 = vmatprep.subr.bf16.mxu0 %v8882_v24 }
 0x908   :  { %5245 = vmatprep.mubr.f32.mxu1 %v13391_v9  ;;  %13516 = vst [vmem:[#allocation44_spill] sm:$0xff] %v12099_v23  ;;  %v12102_v54 = vpop.f32.mrb[217].mxu1  ;;  %v8884_v53 = vpack.c.bf16 %v4566_v30, %v4564_v19  ;;  %v4485_v23 = vld [vmem:[#allocation3 + $0x348] sm:$0xff] }
 0x909   :  { %13517 = vst [vmem:[#allocation45_spill] sm:$0xff] %v12102_v54  ;;  %v4483_v54 = vld [vmem:[#allocation3 + $0x338] sm:$0xff] }
 0x90a   :  { %v5005_v28 = vpop.f32.mrb[140].mxu0  ;;  %8885 = vmatpush1.bf16.msra.mxu0 %v8884_v53 }
 0x90b   :  { %v5007_v51 = vpop.f32.mrb[141].mxu0  ;;  %5246 = vmatmul.mubr.f32.gmra.mrb[12].mxu1 %v5005_v28  ;;  %v12104_v60 = vpop.f32.mrb[218].mxu1 }
 0x90c   :  { %5251 = vmatprep.mubr.f32.mxu1 %v13391_v9  ;;  %13518 = vst [vmem:[#allocation46_spill] sm:$0xff] %v12104_v60  ;;  %v12107_v35 = vpop.f32.mrb[219].mxu1  ;;  %v4481_v60 = vld [vmem:[#allocation3 + $0x328] sm:$0xff] }
 0x90d   :  { %13519 = vst [vmem:[#allocation47_spill] sm:$0xff] %v12107_v35  ;;  %v4479_v35 = vld [vmem:[#allocation3 + $0x318] sm:$0xff] }
 0x90e   :  { %v5010_v55 = vpop.f32.mrb[142].mxu0 }
 0x90f   :  { %v5012_v42 = vpop.f32.mrb[143].mxu0  ;;  %5252 = vmatmul.mubr.f32.gmra.mrb[14].mxu1 %v5010_v55  ;;  %v12109_v6 = vpop.f32.mrb[220].mxu1 }
 0x910   :  { %5257 = vmatprep.mubr.f32.mxu1 %v13391_v9  ;;  %13520 = vst [vmem:[#allocation48_spill] sm:$0xff] %v12109_v6  ;;  %v12112_v59 = vpop.f32.mrb[221].mxu1  ;;  %v4477_v6 = vld [vmem:[#allocation3 + $0x308] sm:$0xff] }
 0x911   :  { %13521 = vst [vmem:[#allocation49_spill] sm:$0xff] %v12112_v59  ;;  %v4475_v59 = vld [vmem:[#allocation3 + $0x2f8] sm:$0xff] }
 0x912   :  { %v5015_v2 = vpop.f32.mrb[144].mxu0 }
 0x913   :  { %v5017_v39 = vpop.f32.mrb[145].mxu0  ;;  %5258 = vmatmul.mubr.f32.gmra.mrb[16].mxu1 %v5015_v2  ;;  %v12114_v4 = vpop.f32.mrb[222].mxu1 }
 0x914   :  { %5263 = vmatprep.mubr.f32.mxu1 %v13391_v9  ;;  %13522 = vst [vmem:[#allocation50_spill] sm:$0xff] %v12114_v4  ;;  %v12117_v52 = vpop.f32.mrb[223].mxu1  ;;  %v4473_v4 = vld [vmem:[#allocation3 + $0x2e8] sm:$0xff] }
 0x915   :  { %13523 = vst [vmem:[#allocation51_spill] sm:$0xff] %v12117_v52  ;;  %v4469_v52 = vld [vmem:[#allocation3 + $0x2c8] sm:$0xff] }
 0x916   :  { %v5020_v63 = vpop.f32.mrb[146].mxu0 }
 0x917   :  { %v5022_v36 = vpop.f32.mrb[147].mxu0  ;;  %5264 = vmatmul.mubr.f32.gmra.mrb[18].mxu1 %v5020_v63  ;;  %v12119_v18 = vpop.f32.mrb[224].mxu1 }
 0x918   :  { %5269 = vmatprep.mubr.f32.mxu1 %v13391_v9  ;;  %13524 = vst [vmem:[#allocation68_spill] sm:$0xff] %v12119_v18  ;;  %v12122_v17 = vpop.f32.mrb[225].mxu1  ;;  %v4466_v18 = vld [vmem:[#allocation3 + $0x2b0] sm:$0xff] }
 0x919   :  { %13525 = vst [vmem:[#allocation69_spill] sm:$0xff] %v12122_v17  ;;  %v4467_v17 = vld [vmem:[#allocation3 + $0x2b8] sm:$0xff] }
 0x91a   :  { %v5025_v46 = vpop.f32.mrb[148].mxu0 }
 0x91b   :  { %v5027_v48 = vpop.f32.mrb[149].mxu0  ;;  %5270 = vmatmul.mubr.f32.gmra.mrb[20].mxu1 %v5025_v46  ;;  %v12124_v51 = vpop.f32.mrb[226].mxu1 }
 0x91c   :  { %5275 = vmatprep.mubr.f32.mxu1 %v13391_v9  ;;  %13526 = vst [vmem:[#allocation70_spill] sm:$0xff] %v12124_v51  ;;  %v12127_v0 = vpop.f32.mrb[227].mxu1  ;;  %v4462_v51 = vld [vmem:[#allocation3 + $0x290] sm:$0xff] }
 0x91d   :  { %13527 = vst [vmem:[#allocation71_spill] sm:$0xff] %v12127_v0  ;;  %v4463_v0 = vld [vmem:[#allocation3 + $0x298] sm:$0xff] }
 0x91e   :  { %v5030_v10 = vpop.f32.mrb[150].mxu0 }
 0x91f   :  { %v5032_v28 = vpop.f32.mrb[151].mxu0  ;;  %5276 = vmatmul.mubr.f32.gmra.mrb[22].mxu1 %v5030_v10  ;;  %v12129_v33 = vpop.f32.mrb[228].mxu1 }
 0x920   :  { %5281 = vmatprep.mubr.f32.mxu1 %v13391_v9  ;;  %13528 = vst [vmem:[#allocation72_spill] sm:$0xff] %v12129_v33  ;;  %v12132_v1 = vpop.f32.mrb[229].mxu1 }
 0x921   :  { %13529 = vst [vmem:[#allocation73_spill] sm:$0xff] %v12132_v1  ;;  %v4459_v1 = vld [vmem:[#allocation3 + $0x278] sm:$0xff] }
 0x922   :  { %v5035_v56 = vpop.f32.mrb[152].mxu0 }
 0x923   :  { %v5037_v25 = vpop.f32.mrb[153].mxu0  ;;  %5282 = vmatmul.mubr.f32.gmra.mrb[24].mxu1 %v5035_v56  ;;  %v12134_v42 = vpop.f32.mrb[230].mxu1 }
 0x924   :  { %5287 = vmatprep.mubr.f32.mxu1 %v13391_v9  ;;  %13530 = vst [vmem:[#allocation74_spill] sm:$0xff] %v12134_v42  ;;  %v12137_v57 = vpop.f32.mrb[231].mxu1 }
 0x925   :  { %13531 = vst [vmem:[#allocation75_spill] sm:$0xff] %v12137_v57  ;;  %v4452_v57 = vld [vmem:[#allocation3 + $0x240] sm:$0xff] }
 0x926   :  { %v5040_v37 = vpop.f32.mrb[154].mxu0 }
 0x927   :  { %v5042_v55 = vpop.f32.mrb[155].mxu0  ;;  %5288 = vmatmul.mubr.f32.gmra.mrb[26].mxu1 %v5040_v37  ;;  %v12139_v20 = vpop.f32.mrb[232].mxu1 }
 0x928   :  { %5293 = vmatprep.mubr.f32.mxu1 %v13391_v9  ;;  %13532 = vst [vmem:[#allocation76_spill] sm:$0xff] %v12139_v20  ;;  %v12142_v14 = vpop.f32.mrb[233].mxu1 }
 0x929   :  { %13533 = vst [vmem:[#allocation77_spill] sm:$0xff] %v12142_v14  ;;  %v4455_v14 = vld [vmem:[#allocation3 + $0x258] sm:$0xff] }
 0x92a   :  { %v5045_v8 = vpop.f32.mrb[156].mxu0 }
 0x92b   :  { %v5047_v58 = vpop.f32.mrb[157].mxu0  ;;  %5294 = vmatmul.mubr.f32.gmra.mrb[28].mxu1 %v5045_v8  ;;  %v12144_v39 = vpop.f32.mrb[234].mxu1 }
 0x92c   :  { %5299 = vmatprep.mubr.f32.mxu1 %v13391_v9  ;;  %13534 = vst [vmem:[#allocation78_spill] sm:$0xff] %v12144_v39  ;;  %v12147_v62 = vpop.f32.mrb[235].mxu1 }
 0x92d   :  { %13535 = vst [vmem:[#allocation79_spill] sm:$0xff] %v12147_v62  ;;  %v4450_v62 = vld [vmem:[#allocation3 + $0x230] sm:$0xff] }
 0x92e   :  { %v5050_v45 = vpop.f32.mrb[158].mxu0 }
 0x92f   :  { %v5052_v2 = vpop.f32.mrb[159].mxu0  ;;  %5300 = vmatmul.mubr.f32.gmra.mrb[30].mxu1 %v5050_v45  ;;  %v12149_v30 = vpop.f32.mrb[236].mxu1 }
 0x930   :  { %5305 = vmatprep.mubr.f32.mxu1 %v13391_v9  ;;  %13536 = vst [vmem:[#allocation80_spill] sm:$0xff] %v12149_v30  ;;  %v12152_v63 = vpop.f32.mrb[237].mxu1  ;;  %v4448_v30 = vld [vmem:[#allocation3 + $0x220] sm:$0xff] }
 0x931   :  { %13537 = vst [vmem:[#allocation81_spill] sm:$0xff] %v12152_v63 }
 0x932   :  { %v5055_v24 = vpop.f32.mrb[160].mxu0 }
 0x933   :  { %v5057_v19 = vpop.f32.mrb[161].mxu0  ;;  %5306 = vmatmul.mubr.f32.gmra.mrb[32].mxu1 %v5055_v24  ;;  %v12154_v46 = vpop.f32.mrb[238].mxu1 }
 0x934   :  { %5311 = vmatprep.mubr.f32.mxu1 %v13391_v9  ;;  %13538 = vst [vmem:[#allocation82_spill] sm:$0xff] %v12154_v46  ;;  %v12157_v48 = vpop.f32.mrb[239].mxu1 }
 0x935   :  { %13539 = vst [vmem:[#allocation83_spill] sm:$0xff] %v12157_v48 }
 0x936   :  { %v5060_v36 = vpop.f32.mrb[162].mxu0 }
 0x937   :  { %v5062_v53 = vpop.f32.mrb[163].mxu0  ;;  %5312 = vmatmul.mubr.f32.gmra.mrb[34].mxu1 %v5060_v36  ;;  %v12159_v56 = vpop.f32.mrb[240].mxu1 }
 0x938   :  { %5317 = vmatprep.mubr.f32.mxu1 %v13391_v9  ;;  %13540 = vst [vmem:[#allocation28_spill] sm:$0xff] %v12159_v56  ;;  %v12162_v25 = vpop.f32.mrb[241].mxu1  ;;  %v4569_v53 = vld [vmem:[#allocation3 + $0x5e8] sm:$0xff] }
 0x939   :  { %13541 = vst [vmem:[#allocation29_spill] sm:$0xff] %v12162_v25  ;;  %v4451_v25 = vld [vmem:[#allocation3 + $0x238] sm:$0xff] }
 0x93a   :  { %v5065_v10 = vpop.f32.mrb[164].mxu0 }
 0x93b   :  { %v5067_v28 = vpop.f32.mrb[165].mxu0  ;;  %5318 = vmatmul.mubr.f32.gmra.mrb[36].mxu1 %v5065_v10  ;;  %v12164_v8 = vpop.f32.mrb[242].mxu1  ;;  %v4571_v10 = vld [vmem:[#allocation3 + $0x5f8] sm:$0xff] }
 0x93c   :  { %5323 = vmatprep.mubr.f32.mxu1 %v13391_v9  ;;  %13542 = vst [vmem:[#allocation30_spill] sm:$0xff] %v12164_v8  ;;  %v12167_v58 = vpop.f32.mrb[243].mxu1  ;;  %v4570_v8 = vld [vmem:[#allocation3 + $0x5f0] sm:$0xff] }
 0x93d   :  { %13543 = vst [vmem:[#allocation31_spill] sm:$0xff] %v12167_v58 }
 0x93e   :  { %v5070_v37 = vpop.f32.mrb[166].mxu0 }
 0x93f   :  { %v5072_v55 = vpop.f32.mrb[167].mxu0  ;;  %5324 = vmatmul.mubr.f32.gmra.mrb[38].mxu1 %v5070_v37  ;;  %v12169_v24 = vpop.f32.mrb[244].mxu1 }
 0x940   :  { %5329 = vmatprep.mubr.f32.mxu1 %v13391_v9  ;;  %13544 = vst [vmem:[#allocation32_spill] sm:$0xff] %v12169_v24  ;;  %v12172_v19 = vpop.f32.mrb[245].mxu1  ;;  %v8886_v55 = vpack.c.bf16 %v4571_v10, %v4569_v53 }
 0x941   :  { %13545 = vst [vmem:[#allocation33_spill] sm:$0xff] %v12172_v19 }
 0x942   :  { %v5075_v45 = vpop.f32.mrb[168].mxu0  ;;  %8887 = vmatprep.subr.bf16.mxu0 %v8886_v55  ;;  %v4447_v55 = vld [vmem:[#allocation3 + $0x218] sm:$0xff] }
 0x943   :  { %v5077_v2 = vpop.f32.mrb[169].mxu0  ;;  %5330 = vmatmul.mubr.f32.gmra.mrb[40].mxu1 %v5075_v45  ;;  %v12174_v37 = vpop.f32.mrb[246].mxu1  ;;  %v8888_v45 = vpack.c.bf16 %v4570_v8, %v4568_v5  ;;  %v4445_v8 = vld [vmem:[#allocation3 + $0x208] sm:$0xff] }
 0x944   :  { %5335 = vmatprep.mubr.f32.mxu1 %v13391_v9  ;;  %13546 = vst [vmem:[#allocation34_spill] sm:$0xff] %v12174_v37  ;;  %v12177_v2 = vpop.f32.mrb[247].mxu1  ;;  %v4449_v37 = vld [vmem:[#allocation3 + $0x228] sm:$0xff] }
 0x945   :  { %13547 = vst [vmem:[#allocation35_spill] sm:$0xff] %v12177_v2  ;;  %8889 = vmatpush1.bf16.msra.mxu0 %v8888_v45  ;;  %v8890_v45 = vpack.c.bf16 %v4447_v55, %v4445_v8 }
 0x946   :  { %v5080_v36 = vpop.f32.mrb[170].mxu0 }
 0x947   :  { %v5082_v28 = vpop.f32.mrb[171].mxu0  ;;  %5336 = vmatmul.mubr.f32.gmra.mrb[42].mxu1 %v5080_v36  ;;  %v12179_v19 = vpop.f32.mrb[248].mxu1  ;;  %8891 = vmatprep.subr.bf16.mxu0 %v8890_v45 }
 0x948   :  { %5341 = vmatprep.mubr.f32.mxu1 %v13391_v9  ;;  %13548 = vst [vmem:[#allocation148_spill] sm:$0xff] %v12179_v19  ;;  %v12182_v36 = vpop.f32.mrb[249].mxu1 }
 0x949   :  { %13549 = vst [vmem:[#allocation149_spill] sm:$0xff] %v12182_v36 }
 0x94a   :  { %v5085_v24 = vpop.f32.mrb[172].mxu0 }
 0x94b   :  { %v5087_v58 = vpop.f32.mrb[173].mxu0  ;;  %5342 = vmatmul.mubr.f32.gmra.mrb[44].mxu1 %v5085_v24  ;;  %v12184_v10 = vpop.f32.mrb[250].mxu1 }
 0x94c   :  { %5347 = vmatprep.mubr.f32.mxu1 %v13391_v9  ;;  %13550 = vst [vmem:[#allocation150_spill] sm:$0xff] %v12184_v10  ;;  %v12187_v2 = vpop.f32.mrb[251].mxu1 }
 0x94d   :  { %13551 = vst [vmem:[#allocation151_spill] sm:$0xff] %v12187_v2 }
 0x94e   :  { %v5090_v28 = vpop.f32.mrb[174].mxu0 }
 0x94f   :  { %v5092_v53 = vpop.f32.mrb[175].mxu0  ;;  %5348 = vmatmul.mubr.f32.gmra.mrb[46].mxu1 %v5090_v28  ;;  %v12189_v24 = vpop.f32.mrb[252].mxu1 }
 0x950   :  { %5353 = vmatprep.mubr.f32.mxu1 %v13391_v9  ;;  %13552 = vst [vmem:[#allocation152_spill] sm:$0xff] %v12189_v24  ;;  %v12192_v36 = vpop.f32.mrb[253].mxu1 }
 0x951   :  { %13553 = vst [vmem:[#allocation84_spill] sm:$0xff] %v12192_v36  ;;  %v4446_v36 = vld [vmem:[#allocation3 + $0x210] sm:$0xff] }
 0x952   :  { %v5095_v5 = vpop.f32.mrb[176].mxu0 }
 0x953   :  { %v5097_v58 = vpop.f32.mrb[177].mxu0  ;;  %5354 = vmatmul.mubr.f32.gmra.mrb[48].mxu1 %v5095_v5  ;;  %v12194_v10 = vpop.f32.mrb[254].mxu1 }
 0x954   :  { %5359 = vmatprep.mubr.f32.mxu1 %v13391_v9  ;;  %13554 = vst [vmem:[#allocation85_spill] sm:$0xff] %v12194_v10  ;;  %v12197_v2 = vpop.f32.mrb[255].mxu1 }
 0x955   :  { %13555 = vst [vmem:[#allocation86_spill] sm:$0xff] %v12197_v2 }
 0x956   :  { %v5100_v28 = vpop.f32.mrb[178].mxu0 }
 0x957   :  { %v5102_v53 = vpop.f32.mrb[179].mxu0  ;;  %5360 = vmatmul.mubr.f32.gmra.mrb[50].mxu1 %v5100_v28 }
 0x958   :  { %5365 = vmatprep.mubr.f32.mxu1 %v13391_v9 }
 0x95a   :  { %v5105_v19 = vpop.f32.mrb[180].mxu0 }
 0x95b   :  { %v5107_v58 = vpop.f32.mrb[181].mxu0  ;;  %5366 = vmatmul.mubr.f32.gmra.mrb[52].mxu1 %v5105_v19 }
 0x95c   :  { %5371 = vmatprep.mubr.f32.mxu1 %v13391_v9 }
 0x95e   :  { %v5110_v5 = vpop.f32.mrb[182].mxu0 }
 0x95f   :  { %v5112_v8 = vpop.f32.mrb[183].mxu0  ;;  %5372 = vmatmul.mubr.f32.gmra.mrb[54].mxu1 %v5110_v5  ;;  %v4642_v5 = vlaneseq }
 0x960   :  { %5377 = vmatprep.mubr.f32.mxu1 %v13391_v9 }
 0x961   :  { %v4643_v10 = vshrl.u32 %v4642_v5, 7  ;;  %v4444_v5 = vld [vmem:[#allocation3 + $0x200] sm:$0xff] }
 0x962   :  { %v5115_v55 = vpop.f32.mrb[184].mxu0  ;;  %v8892_v48 = vpack.c.bf16 %v4446_v36, %v4444_v5 }
 0x963   :  { %v5117_v45 = vpop.f32.mrb[185].mxu0  ;;  %5378 = vmatmul.mubr.f32.gmra.mrb[56].mxu1 %v5115_v55  ;;  %v4636_v55 = vld [vmem:[%s12953_s8] ss:$4 sm:$0x3] }
 0x964   :  { %5383 = vmatprep.mubr.f32.mxu1 %v13391_v9  ;;  %v12207_v45 = vsub.s32 0, %v4643_v10 }
 0x966   :  { %v5120_v28 = vpop.f32.mrb[186].mxu0  ;;  %13556 = vst [vmem:[#allocation87_spill] sm:$0xff] %v12207_v45 }
 0x967   :  { %v5122_v53 = vpop.f32.mrb[187].mxu0  ;;  %5384 = vmatmul.mubr.f32.gmra.mrb[58].mxu1 %v5120_v28  ;;  %v12212_v28 = vrot.slane %v4636_v55, %v12207_v45 }
 0x968   :  { %5389 = vmatprep.mubr.f32.mxu1 %v13391_v9  ;;  %v12209_v53 = vsub.s32 1, %v4643_v10 }
 0x96a   :  { %v5125_v2 = vpop.f32.mrb[188].mxu0  ;;  %13557 = vst [vmem:[#allocation88_spill] sm:$0xff] %v12209_v53 }
 0x96b   :  { %v5127_v58 = vpop.f32.mrb[189].mxu0  ;;  %5390 = vmatmul.mubr.f32.gmra.mrb[60].mxu1 %v5125_v2  ;;  %v12215_v2 = vrot.slane %v4636_v55, %v12209_v53 }
 0x96c   :  { %5395 = vmatprep.mubr.f32.mxu1 %v13391_v9 }
 0x96e   :  { %v5130_v19 = vpop.f32.mrb[190].mxu0 }
 0x96f   :  { %v5132_v8 = vpop.f32.mrb[191].mxu0  ;;  %5396 = vmatmul.mubr.f32.gmra.mrb[62].mxu1 %v5130_v19 }
 0x9c6   :  { %v5211_v58 = vpop.f32.mrb[0].mxu1 }
 0x9c7   :  { %v12218_v8 = vadd.f32 %v5211_v58, %v12212_v28  ;;  %v5213_v19 = vpop.f32.mrb[1].mxu1  ;;  %v8894_v58 = vpack.c.bf16 %v4451_v25, %v4449_v37 }
 0x9c8   :  { %v12221_v24 = vadd.f32 %v5213_v19, %v12215_v2  ;;  %v4453_v19 = vld [vmem:[#allocation3 + $0x248] sm:$0xff] }
 0x9c9   :  { %v13102_v46 = vmax.f32 %v12218_v8, 0.0  ;;  %v8898_v20 = vpack.c.bf16 %v4455_v14, %v4453_v19 }
 0x9ca   :  { %v13101_v10 = vmax.f32 %v12221_v24, 0.0  ;;  %v5217_v56 = vpop.f32.mrb[2].mxu1 }
 0x9cb   :  { %v12226_v55 = vadd.f32 %v5217_v56, %v12212_v28  ;;  %v5219_v63 = vpop.f32.mrb[3].mxu1  ;;  %v8896_v56 = vpack.c.bf16 %v4450_v62, %v4448_v30 }
 0x9cc   :  { %v12229_v39 = vadd.f32 %v5219_v63, %v12215_v2  ;;  %5674 = vmatprep.mubr.f32.mxu0 %v13101_v10  ;;  %v4454_v10 = vld [vmem:[#allocation3 + $0x250] sm:$0xff] }
 0x9cd   :  { %5675 = vmatmul.mubr.f32.vlgmr.msra.gmra.mrb[192].mxu0 %v13102_v46  ;;  %v13104_v25 = vmax.f32 %v12226_v55, 0.0  ;;  %v4457_v46 = vld [vmem:[#allocation3 + $0x268] sm:$0xff] }
 0x9ce   :  { %v13103_v36 = vmax.f32 %v12229_v39, 0.0  ;;  %v5223_v5 = vpop.f32.mrb[4].mxu1  ;;  %8893 = vmatpush1.bf16.msra.mxu0 %v8892_v48  ;;  %v8900_v48 = vpack.c.bf16 %v4454_v10, %v4452_v57 }
 0x9cf   :  { %v12238_v37 = vadd.f32 %v5223_v5, %v12212_v28  ;;  %v5225_v63 = vpop.f32.mrb[5].mxu1  ;;  %8895 = vmatprep.subr.bf16.mxu0 %v8894_v58  ;;  %v8902_v5 = vpack.c.bf16 %v4459_v1, %v4457_v46 }
 0x9d0   :  { %v12241_v42 = vadd.f32 %v5225_v63, %v12215_v2  ;;  %5680 = vmatprep.mubr.f32.mxu0 %v13103_v36  ;;  %v4456_v63 = vld [vmem:[#allocation3 + $0x260] sm:$0xff]  ;;  %v4458_v36 = vld [vmem:[#allocation3 + $0x270] sm:$0xff] }
 0x9d1   :  { %5681 = vmatmul.mubr.f32.gmra.mrb[194].mxu0 %v13104_v25  ;;  %v13106_v14 = vmax.f32 %v12238_v37, 0.0  ;;  %v4461_v25 = vld [vmem:[#allocation3 + $0x288] sm:$0xff] }
 0x9d2   :  { %v13105_v62 = vmax.f32 %v12241_v42, 0.0  ;;  %v5229_v30 = vpop.f32.mrb[6].mxu1  ;;  %8897 = vmatpush1.bf16.msra.mxu0 %v8896_v56  ;;  %v8904_v56 = vpack.c.bf16 %v4458_v36, %v4456_v63 }
 0x9d3   :  { %v12250_v58 = vadd.f32 %v5229_v30, %v12212_v28  ;;  %v5231_v19 = vpop.f32.mrb[7].mxu1  ;;  %8899 = vmatprep.subr.bf16.mxu0 %v8898_v20  ;;  %v8906_v30 = vpack.c.bf16 %v4463_v0, %v4461_v25 }
 0x9d4   :  { %v12253_v33 = vadd.f32 %v5231_v19, %v12215_v2  ;;  %5686 = vmatprep.mubr.f32.mxu0 %v13105_v62  ;;  %v4460_v19 = vld [vmem:[#allocation3 + $0x280] sm:$0xff] }
 0x9d5   :  { %5687 = vmatmul.mubr.f32.gmra.mrb[196].mxu0 %v13106_v14  ;;  %v13108_v1 = vmax.f32 %v12250_v58, 0.0  ;;  %v4465_v14 = vld [vmem:[#allocation3 + $0x2a8] sm:$0xff]  ;;  %v8908_v63 = vpack.c.bf16 %v4462_v51, %v4460_v19  ;;  %v4468_v19 = vld [vmem:[#allocation3 + $0x2c0] sm:$0xff] }
 0x9d6   :  { %v13107_v57 = vmax.f32 %v12253_v33, 0.0  ;;  %v5235_v10 = vpop.f32.mrb[8].mxu1  ;;  %8901 = vmatpush1.bf16.msra.mxu0 %v8900_v48 }
 0x9d7   :  { %v5236_v20 = vadd.f32 %v5235_v10, %v12212_v28  ;;  %v5237_v46 = vpop.f32.mrb[9].mxu1  ;;  %8903 = vmatprep.subr.bf16.mxu0 %v8902_v5  ;;  %v8910_v5 = vpack.c.bf16 %v4467_v17, %v4465_v14 }
 0x9d8   :  { %v5238_v62 = vadd.f32 %v5237_v46, %v12215_v2  ;;  %5692 = vmatprep.mubr.f32.mxu0 %v13107_v57  ;;  %v4464_v46 = vld [vmem:[#allocation3 + $0x2a0] sm:$0xff] }
 0x9d9   :  { %5693 = vmatmul.mubr.f32.gmra.mrb[198].mxu0 %v13108_v1  ;;  %v12269_v10 = vmax.f32 %v5236_v20, 0.0  ;;  %v4471_v1 = vld [vmem:[#allocation3 + $0x2d8] sm:$0xff] }
 0x9da   :  { %v12267_v36 = vmax.f32 %v5238_v62, 0.0  ;;  %v5241_v48 = vpop.f32.mrb[10].mxu1  ;;  %8905 = vmatpush1.bf16.msra.mxu0 %v8904_v56  ;;  %v8912_v56 = vpack.c.bf16 %v4466_v18, %v4464_v46  ;;  %v8914_v14 = vpack.c.bf16 %v4471_v1, %v4469_v52  ;;  %v8918_v1 = vpack.c.bf16 %v4475_v59, %v4473_v4  ;;  %v4472_v46 = vld [vmem:[#allocation3 + $0x2e0] sm:$0xff] }
 0x9db   :  { %v5242_v0 = vadd.f32 %v5241_v48, %v12212_v28  ;;  %v5243_v25 = vpop.f32.mrb[11].mxu1  ;;  %8907 = vmatprep.subr.bf16.mxu0 %v8906_v30  ;;  %v4470_v48 = vld [vmem:[#allocation3 + $0x2d0] sm:$0xff]  ;;  %v8922_v4 = vpack.c.bf16 %v4479_v35, %v4477_v6  ;;  %v8926_v6 = vpack.c.bf16 %v4483_v54, %v4481_v60  ;;  %v8930_v60 = vpack.c.bf16 %v4487_v47, %v4485_v23 }
 0x9dc   :  { %v5244_v57 = vadd.f32 %v5243_v25, %v12215_v2  ;;  %5698 = vmatprep.mubr.f32.mxu0 %v12267_v36  ;;  %v8934_v23 = vpack.c.bf16 %v4491_v3, %v4489_v22  ;;  %v8938_v22 = vpack.c.bf16 %v4495_v38, %v4493_v61  ;;  %v8942_v61 = vpack.c.bf16 %v4499_v49, %v4497_v13 }
 0x9dd   :  { %5699 = vmatmul.mubr.f32.gmra.mrb[200].mxu0 %v12269_v10  ;;  %v12277_v20 = vmax.f32 %v5242_v0, 0.0  ;;  %v8946_v13 = vpack.c.bf16 %v4503_v26, %v4501_v44  ;;  %v8950_v44 = vpack.c.bf16 %v4507_v50, %v4505_v16  ;;  %v8954_v16 = vpack.c.bf16 %v4575_v31, %v4573_v15 }
 0x9de   :  { %v12275_v62 = vmax.f32 %v5244_v57, 0.0  ;;  %v5247_v51 = vpop.f32.mrb[12].mxu1  ;;  %8909 = vmatpush1.bf16.msra.mxu0 %v8908_v63  ;;  %v8916_v63 = vpack.c.bf16 %v4470_v48, %v4468_v19  ;;  %v4476_v48 = vld [vmem:[#allocation3 + $0x300] sm:$0xff] }
 0x9df   :  { %v5248_v30 = vadd.f32 %v5247_v51, %v12212_v28  ;;  %v5249_v17 = vpop.f32.mrb[13].mxu1  ;;  %8911 = vmatprep.subr.bf16.mxu0 %v8910_v5  ;;  %v4474_v51 = vld [vmem:[#allocation3 + $0x2f0] sm:$0xff] }
 0x9e0   :  { %v5250_v25 = vadd.f32 %v5249_v17, %v12215_v2  ;;  %5704 = vmatprep.mubr.f32.mxu0 %v12275_v62 }
 0x9e1   :  { %5705 = vmatmul.mubr.f32.gmra.mrb[202].mxu0 %v12277_v20  ;;  %v12285_v0 = vmax.f32 %v5248_v30, 0.0  ;;  %v8920_v30 = vpack.c.bf16 %v4474_v51, %v4472_v46  ;;  %v4480_v51 = vld [vmem:[#allocation3 + $0x320] sm:$0xff] }
 0x9e2   :  { %v12283_v57 = vmax.f32 %v5250_v25, 0.0  ;;  %v5253_v18 = vpop.f32.mrb[14].mxu1  ;;  %8913 = vmatpush1.bf16.msra.mxu0 %v8912_v56 }
 0x9e3   :  { %v5254_v5 = vadd.f32 %v5253_v18, %v12212_v28  ;;  %v5255_v52 = vpop.f32.mrb[15].mxu1  ;;  %8915 = vmatprep.subr.bf16.mxu0 %v8914_v14  ;;  %v4478_v18 = vld [vmem:[#allocation3 + $0x310] sm:$0xff] }
 0x9e4   :  { %v5256_v17 = vadd.f32 %v5255_v52, %v12215_v2  ;;  %5710 = vmatprep.mubr.f32.mxu0 %v12283_v57 }
 0x9e5   :  { %5711 = vmatmul.mubr.f32.gmra.mrb[204].mxu0 %v12285_v0  ;;  %v12293_v19 = vmax.f32 %v5254_v5, 0.0  ;;  %v8924_v5 = vpack.c.bf16 %v4478_v18, %v4476_v48  ;;  %v4484_v18 = vld [vmem:[#allocation3 + $0x340] sm:$0xff] }
 0x9e6   :  { %v12291_v25 = vmax.f32 %v5256_v17, 0.0  ;;  %v5259_v56 = vpop.f32.mrb[16].mxu1  ;;  %8917 = vmatpush1.bf16.msra.mxu0 %v8916_v63 }
 0x9e7   :  { %v5260_v14 = vadd.f32 %v5259_v56, %v12212_v28  ;;  %v5261_v59 = vpop.f32.mrb[17].mxu1  ;;  %8919 = vmatprep.subr.bf16.mxu0 %v8918_v1  ;;  %v4482_v56 = vld [vmem:[#allocation3 + $0x330] sm:$0xff] }
 0x9e8   :  { %v5262_v52 = vadd.f32 %v5261_v59, %v12215_v2  ;;  %5716 = vmatprep.mubr.f32.mxu0 %v12291_v25 }
 0x9e9   :  { %5717 = vmatmul.mubr.f32.gmra.mrb[206].mxu0 %v12293_v19  ;;  %v12301_v46 = vmax.f32 %v5260_v14, 0.0  ;;  %v8928_v14 = vpack.c.bf16 %v4482_v56, %v4480_v51  ;;  %v4488_v56 = vld [vmem:[#allocation3 + $0x360] sm:$0xff] }
 0x9ea   :  { %v12299_v17 = vmax.f32 %v5262_v52, 0.0  ;;  %v5265_v63 = vpop.f32.mrb[18].mxu1  ;;  %8921 = vmatpush1.bf16.msra.mxu0 %v8920_v30 }
 0x9eb   :  { %v5266_v1 = vadd.f32 %v5265_v63, %v12212_v28  ;;  %v5267_v35 = vpop.f32.mrb[19].mxu1  ;;  %8923 = vmatprep.subr.bf16.mxu0 %v8922_v4  ;;  %v4486_v63 = vld [vmem:[#allocation3 + $0x350] sm:$0xff] }
 0x9ec   :  { %v5268_v59 = vadd.f32 %v5267_v35, %v12215_v2  ;;  %5722 = vmatprep.mubr.f32.mxu0 %v12299_v17 }
 0x9ed   :  { %5723 = vmatmul.mubr.f32.gmra.mrb[208].mxu0 %v12301_v46  ;;  %v12309_v48 = vmax.f32 %v5266_v1, 0.0  ;;  %v8932_v1 = vpack.c.bf16 %v4486_v63, %v4484_v18  ;;  %v4492_v63 = vld [vmem:[#allocation3 + $0x380] sm:$0xff] }
 0x9ee   :  { %v12307_v52 = vmax.f32 %v5268_v59, 0.0  ;;  %v5271_v30 = vpop.f32.mrb[20].mxu1  ;;  %8925 = vmatpush1.bf16.msra.mxu0 %v8924_v5 }
 0x9ef   :  { %v5272_v4 = vadd.f32 %v5271_v30, %v12212_v28  ;;  %v5273_v54 = vpop.f32.mrb[21].mxu1  ;;  %8927 = vmatprep.subr.bf16.mxu0 %v8926_v6  ;;  %v4490_v30 = vld [vmem:[#allocation3 + $0x370] sm:$0xff] }
 0x9f0   :  { %v5274_v35 = vadd.f32 %v5273_v54, %v12215_v2  ;;  %5728 = vmatprep.mubr.f32.mxu0 %v12307_v52 }
 0x9f1   :  { %5729 = vmatmul.mubr.f32.gmra.mrb[210].mxu0 %v12309_v48  ;;  %v12317_v51 = vmax.f32 %v5272_v4, 0.0  ;;  %v8936_v4 = vpack.c.bf16 %v4490_v30, %v4488_v56  ;;  %v4496_v30 = vld [vmem:[#allocation3 + $0x3a0] sm:$0xff] }
 0x9f2   :  { %v12315_v59 = vmax.f32 %v5274_v35, 0.0  ;;  %v5277_v5 = vpop.f32.mrb[22].mxu1  ;;  %8929 = vmatpush1.bf16.msra.mxu0 %v8928_v14 }
 0x9f3   :  { %v5278_v6 = vadd.f32 %v5277_v5, %v12212_v28  ;;  %v5279_v47 = vpop.f32.mrb[23].mxu1  ;;  %8931 = vmatprep.subr.bf16.mxu0 %v8930_v60  ;;  %v4494_v5 = vld [vmem:[#allocation3 + $0x390] sm:$0xff] }
 0x9f4   :  { %v5280_v54 = vadd.f32 %v5279_v47, %v12215_v2  ;;  %5734 = vmatprep.mubr.f32.mxu0 %v12315_v59 }
 0x9f5   :  { %5735 = vmatmul.mubr.f32.gmra.mrb[212].mxu0 %v12317_v51  ;;  %v12325_v18 = vmax.f32 %v5278_v6, 0.0  ;;  %v8940_v6 = vpack.c.bf16 %v4494_v5, %v4492_v63  ;;  %v4500_v5 = vld [vmem:[#allocation3 + $0x3c0] sm:$0xff] }
 0x9f6   :  { %v12323_v35 = vmax.f32 %v5280_v54, 0.0  ;;  %v5283_v14 = vpop.f32.mrb[24].mxu1  ;;  %8933 = vmatpush1.bf16.msra.mxu0 %v8932_v1 }
 0x9f7   :  { %v5284_v60 = vadd.f32 %v5283_v14, %v12212_v28  ;;  %v5285_v3 = vpop.f32.mrb[25].mxu1  ;;  %8935 = vmatprep.subr.bf16.mxu0 %v8934_v23  ;;  %v4498_v14 = vld [vmem:[#allocation3 + $0x3b0] sm:$0xff] }
 0x9f8   :  { %v5286_v47 = vadd.f32 %v5285_v3, %v12215_v2  ;;  %5740 = vmatprep.mubr.f32.mxu0 %v12323_v35 }
 0x9f9   :  { %5741 = vmatmul.mubr.f32.gmra.mrb[214].mxu0 %v12325_v18  ;;  %v12333_v56 = vmax.f32 %v5284_v60, 0.0  ;;  %v8944_v60 = vpack.c.bf16 %v4498_v14, %v4496_v30  ;;  %v4504_v14 = vld [vmem:[#allocation3 + $0x3e0] sm:$0xff] }
 0x9fa   :  { %v12331_v54 = vmax.f32 %v5286_v47, 0.0  ;;  %v5289_v1 = vpop.f32.mrb[26].mxu1  ;;  %8937 = vmatpush1.bf16.msra.mxu0 %v8936_v4 }
 0x9fb   :  { %v5290_v23 = vadd.f32 %v5289_v1, %v12212_v28  ;;  %v5291_v38 = vpop.f32.mrb[27].mxu1  ;;  %8939 = vmatprep.subr.bf16.mxu0 %v8938_v22  ;;  %v4502_v1 = vld [vmem:[#allocation3 + $0x3d0] sm:$0xff] }
 0x9fc   :  { %v5292_v3 = vadd.f32 %v5291_v38, %v12215_v2  ;;  %5746 = vmatprep.mubr.f32.mxu0 %v12331_v54 }
 0x9fd   :  { %5747 = vmatmul.mubr.f32.gmra.mrb[216].mxu0 %v12333_v56  ;;  %v12341_v63 = vmax.f32 %v5290_v23, 0.0  ;;  %v8948_v23 = vpack.c.bf16 %v4502_v1, %v4500_v5 }
 0x9fe   :  { %v12339_v47 = vmax.f32 %v5292_v3, 0.0  ;;  %v5295_v4 = vpop.f32.mrb[28].mxu1  ;;  %8941 = vmatpush1.bf16.msra.mxu0 %v8940_v6 }
 0x9ff   :  { %v5296_v22 = vadd.f32 %v5295_v4, %v12212_v28  ;;  %v5297_v49 = vpop.f32.mrb[29].mxu1  ;;  %8943 = vmatprep.subr.bf16.mxu0 %v8942_v61  ;;  %v4506_v4 = vld [vmem:[#allocation3 + $0x3f0] sm:$0xff] }
 0xa00   :  { %v5298_v38 = vadd.f32 %v5297_v49, %v12215_v2  ;;  %5752 = vmatprep.mubr.f32.mxu0 %v12339_v47 }
 0xa01   :  { %5753 = vmatmul.mubr.f32.gmra.mrb[218].mxu0 %v12341_v63  ;;  %v12349_v30 = vmax.f32 %v5296_v22, 0.0  ;;  %v8952_v22 = vpack.c.bf16 %v4506_v4, %v4504_v14 }
 0xa02   :  { %v12347_v3 = vmax.f32 %v5298_v38, 0.0  ;;  %v5301_v6 = vpop.f32.mrb[30].mxu1  ;;  %8945 = vmatpush1.bf16.msra.mxu0 %v8944_v60 }
 0xa03   :  { %v5302_v61 = vadd.f32 %v5301_v6, %v12212_v28  ;;  %v5303_v26 = vpop.f32.mrb[31].mxu1  ;;  %8947 = vmatprep.subr.bf16.mxu0 %v8946_v13 }
 0xa04   :  { %v5304_v49 = vadd.f32 %v5303_v26, %v12215_v2  ;;  %5758 = vmatprep.mubr.f32.mxu0 %v12347_v3 }
 0xa05   :  { %5759 = vmatmul.mubr.f32.gmra.mrb[220].mxu0 %v12349_v30  ;;  %v12357_v5 = vmax.f32 %v5302_v61, 0.0 }
 0xa06   :  { %v12355_v38 = vmax.f32 %v5304_v49, 0.0  ;;  %v5307_v60 = vpop.f32.mrb[32].mxu1  ;;  %8949 = vmatpush1.bf16.msra.mxu0 %v8948_v23 }
 0xa07   :  { %v5308_v13 = vadd.f32 %v5307_v60, %v12212_v28  ;;  %v5309_v50 = vpop.f32.mrb[33].mxu1  ;;  %8951 = vmatprep.subr.bf16.mxu0 %v8950_v44 }
 0xa08   :  { %v5310_v1 = vadd.f32 %v5309_v50, %v12215_v2  ;;  %5764 = vmatprep.mubr.f32.mxu0 %v12355_v38 }
 0xa09   :  { %5765 = vmatmul.mubr.f32.gmra.mrb[222].mxu0 %v12357_v5  ;;  %v12365_v49 = vmax.f32 %v5308_v13, 0.0 }
 0xa0a   :  { %v12363_v6 = vmax.f32 %v5310_v1, 0.0  ;;  %v5313_v26 = vpop.f32.mrb[34].mxu1  ;;  %8953 = vmatpush1.bf16.msra.mxu0 %v8952_v22 }
 0xa0b   :  { %v5314_v23 = vadd.f32 %v5313_v26, %v12212_v28  ;;  %v5315_v61 = vpop.f32.mrb[35].mxu1  ;;  %8955 = vmatprep.subr.bf16.mxu0 %v8954_v16 }
 0xa0c   :  { %v5316_v14 = vadd.f32 %v5315_v61, %v12215_v2  ;;  %5770 = vmatprep.mubr.f32.mxu0 %v12363_v6 }
 0xa0d   :  { %5771 = vmatmul.mubr.f32.gmra.mrb[224].mxu0 %v12365_v49  ;;  %v12373_v44 = vmax.f32 %v5314_v23, 0.0 }
 0xa0e   :  { %v12371_v31 = vmax.f32 %v5316_v14, 0.0  ;;  %v5319_v15 = vpop.f32.mrb[36].mxu1 }
 0xa0f   :  { %v5320_v4 = vadd.f32 %v5319_v15, %v12212_v28  ;;  %v5321_v60 = vpop.f32.mrb[37].mxu1 }
 0xa10   :  { %v5322_v22 = vadd.f32 %v5321_v60, %v12215_v2  ;;  %5776 = vmatprep.mubr.f32.mxu0 %v12371_v31 }
 0xa11   :  { %5777 = vmatmul.mubr.f32.gmra.mrb[226].mxu0 %v12373_v44  ;;  %v12381_v16 = vmax.f32 %v5320_v4, 0.0 }
 0xa12   :  { %v12379_v13 = vmax.f32 %v5322_v22, 0.0  ;;  %v5325_v50 = vpop.f32.mrb[38].mxu1 }
 0xa13   :  { %v5326_v1 = vadd.f32 %v5325_v50, %v12212_v28  ;;  %v5327_v26 = vpop.f32.mrb[39].mxu1 }
 0xa14   :  { %v5328_v23 = vadd.f32 %v5327_v26, %v12215_v2  ;;  %5782 = vmatprep.mubr.f32.mxu0 %v12379_v13 }
 0xa15   :  { %5783 = vmatmul.mubr.f32.gmra.mrb[228].mxu0 %v12381_v16  ;;  %v12389_v15 = vmax.f32 %v5326_v1, 0.0 }
 0xa16   :  { %v12387_v61 = vmax.f32 %v5328_v23, 0.0  ;;  %v5331_v14 = vpop.f32.mrb[40].mxu1 }
 0xa17   :  { %v5332_v60 = vadd.f32 %v5331_v14, %v12212_v28  ;;  %v5333_v22 = vpop.f32.mrb[41].mxu1 }
 0xa18   :  { %v5334_v4 = vadd.f32 %v5333_v22, %v12215_v2  ;;  %5788 = vmatprep.mubr.f32.mxu0 %v12387_v61 }
 0xa19   :  { %5789 = vmatmul.mubr.f32.gmra.mrb[230].mxu0 %v12389_v15  ;;  %v12397_v34 = vmax.f32 %v5332_v60, 0.0 }
 0xa1a   :  { %v12395_v50 = vmax.f32 %v5334_v4, 0.0  ;;  %v5337_v26 = vpop.f32.mrb[42].mxu1 }
 0xa1b   :  { %v5338_v23 = vadd.f32 %v5337_v26, %v12212_v28  ;;  %v5339_v11 = vpop.f32.mrb[43].mxu1 }
 0xa1c   :  { %v5340_v1 = vadd.f32 %v5339_v11, %v12215_v2  ;;  %5794 = vmatprep.mubr.f32.mxu0 %v12395_v50 }
 0xa1d   :  { %5795 = vmatmul.mubr.f32.gmra.mrb[232].mxu0 %v12397_v34  ;;  %v12405_v7 = vmax.f32 %v5338_v23, 0.0 }
 0xa1e   :  { %v12403_v14 = vmax.f32 %v5340_v1, 0.0  ;;  %v5343_v22 = vpop.f32.mrb[44].mxu1 }
 0xa1f   :  { %v5344_v4 = vadd.f32 %v5343_v22, %v12212_v28  ;;  %v5345_v43 = vpop.f32.mrb[45].mxu1 }
 0xa20   :  { %v5346_v60 = vadd.f32 %v5345_v43, %v12215_v2  ;;  %5800 = vmatprep.mubr.f32.mxu0 %v12403_v14 }
 0xa21   :  { %5801 = vmatmul.mubr.f32.gmra.mrb[234].mxu0 %v12405_v7  ;;  %v12413_v27 = vmax.f32 %v5344_v4, 0.0 }
 0xa22   :  { %v12411_v26 = vmax.f32 %v5346_v60, 0.0  ;;  %v5349_v11 = vpop.f32.mrb[46].mxu1 }
 0xa23   :  { %13558 = vst [vmem:[#allocation89_spill] sm:$0xff] %v12413_v27  ;;  %v5350_v1 = vadd.f32 %v5349_v11, %v12212_v28  ;;  %v5351_v29 = vpop.f32.mrb[47].mxu1 }
 0xa24   :  { %v5352_v23 = vadd.f32 %v5351_v29, %v12215_v2  ;;  %5806 = vmatprep.mubr.f32.mxu0 %v12411_v26 }
 0xa25   :  { %5807 = vmatmul.mubr.f32.gmra.mrb[236].mxu0 %v12413_v27  ;;  %v12421_v12 = vmax.f32 %v5350_v1, 0.0  ;;  %v4591_v27 = vld [vmem:[#allocation3 + $0x698] sm:$0xff] }
 0xa26   :  { %v12419_v22 = vmax.f32 %v5352_v23, 0.0  ;;  %v5355_v43 = vpop.f32.mrb[48].mxu1 }
 0xa27   :  { %13560 = vst [vmem:[#allocation91_spill] sm:$0xff] %v12421_v12  ;;  %v5356_v60 = vadd.f32 %v5355_v43, %v12212_v28  ;;  %v5357_v21 = vpop.f32.mrb[49].mxu1 }
 0xa28   :  { %13559 = vst [vmem:[#allocation90_spill] sm:$0xff] %v12419_v22  ;;  %v5358_v4 = vadd.f32 %v5357_v21, %v12215_v2  ;;  %5812 = vmatprep.mubr.f32.mxu0 %v12419_v22  ;;  %v4589_v22 = vld [vmem:[#allocation3 + $0x688] sm:$0xff] }
 0xa29   :  { %5813 = vmatmul.mubr.f32.gmra.mrb[238].mxu0 %v12421_v12  ;;  %v12429_v32 = vmax.f32 %v5356_v60, 0.0  ;;  %v4582_v12 = vld [vmem:[#allocation3 + $0x650] sm:$0xff] }
 0xa2a   :  { %v12427_v11 = vmax.f32 %v5358_v4, 0.0  ;;  %v5361_v29 = vpop.f32.mrb[50].mxu1 }
 0xa2b   :  { %13562 = vst [vmem:[#allocation93_spill] sm:$0xff] %v12429_v32  ;;  %v5362_v23 = vadd.f32 %v5361_v29, %v12212_v28  ;;  %v5363_v40 = vpop.f32.mrb[51].mxu1 }
 0xa2c   :  { %13561 = vst [vmem:[#allocation92_spill] sm:$0xff] %v12427_v11  ;;  %v5364_v1 = vadd.f32 %v5363_v40, %v12215_v2  ;;  %5818 = vmatprep.mubr.f32.mxu0 %v12427_v11 }
 0xa2d   :  { %5819 = vmatmul.mubr.f32.gmra.mrb[240].mxu0 %v12429_v32  ;;  %v12437_v41 = vmax.f32 %v5362_v23, 0.0 }
 0xa2e   :  { %v12435_v43 = vmax.f32 %v5364_v1, 0.0  ;;  %v5367_v21 = vpop.f32.mrb[52].mxu1 }
 0xa2f   :  { %13564 = vst [vmem:[#allocation95_spill] sm:$0xff] %v12437_v41  ;;  %v5368_v4 = vadd.f32 %v5367_v21, %v12212_v28  ;;  %v5369_v53 = vpop.f32.mrb[53].mxu1 }
 0xa30   :  { %13563 = vst [vmem:[#allocation94_spill] sm:$0xff] %v12435_v43  ;;  %v5370_v60 = vadd.f32 %v5369_v53, %v12215_v2  ;;  %5824 = vmatprep.mubr.f32.mxu0 %v12435_v43 }
 0xa31   :  { %5825 = vmatmul.mubr.f32.gmra.mrb[242].mxu0 %v12437_v41  ;;  %v12445_v45 = vmax.f32 %v5368_v4, 0.0 }
 0xa32   :  { %v12443_v29 = vmax.f32 %v5370_v60, 0.0  ;;  %v5373_v40 = vpop.f32.mrb[54].mxu1 }
 0xa33   :  { %13566 = vst [vmem:[#allocation97_spill] sm:$0xff] %v12445_v45  ;;  %v5374_v1 = vadd.f32 %v5373_v40, %v12212_v28  ;;  %v5375_v32 = vpop.f32.mrb[55].mxu1 }
 0xa34   :  { %13565 = vst [vmem:[#allocation96_spill] sm:$0xff] %v12443_v29  ;;  %v5376_v23 = vadd.f32 %v5375_v32, %v12215_v2  ;;  %5830 = vmatprep.mubr.f32.mxu0 %v12443_v29 }
 0xa35   :  { %5831 = vmatmul.mubr.f32.gmra.mrb[244].mxu0 %v12445_v45  ;;  %v12453_v43 = vmax.f32 %v5374_v1, 0.0 }
 0xa36   :  { %v12451_v21 = vmax.f32 %v5376_v23, 0.0  ;;  %v5379_v53 = vpop.f32.mrb[56].mxu1 }
 0xa37   :  { %13568 = vst [vmem:[#allocation99_spill] sm:$0xff] %v12453_v43  ;;  %v12456_v60 = vadd.f32 %v5379_v53, %v12212_v28  ;;  %v5381_v41 = vpop.f32.mrb[57].mxu1 }
 0xa38   :  { %13567 = vst [vmem:[#allocation98_spill] sm:$0xff] %v12451_v21  ;;  %v12459_v4 = vadd.f32 %v5381_v41, %v12215_v2  ;;  %5836 = vmatprep.mubr.f32.mxu0 %v12451_v21 }
 0xa39   :  { %13569 = vst [vmem:[#allocation100_spill] sm:$0xff] %v12456_v60  ;;  %5837 = vmatmul.mubr.f32.gmra.mrb[246].mxu0 %v12453_v43  ;;  %v13129_v23 = vmax.f32 %v12456_v60, 0.0 }
 0xa3a   :  { %13570 = vst [vmem:[#allocation101_spill] sm:$0xff] %v12459_v4  ;;  %v13130_v32 = vmax.f32 %v12459_v4, 0.0  ;;  %v5385_v40 = vpop.f32.mrb[58].mxu1 }
 0xa3b   :  { %v12466_v45 = vadd.f32 %v5385_v40, %v12212_v28  ;;  %v5387_v1 = vpop.f32.mrb[59].mxu1 }
 0xa3c   :  { %v12469_v53 = vadd.f32 %v5387_v1, %v12215_v2  ;;  %5842 = vmatprep.mubr.f32.mxu0 %v13130_v32 }
 0xa3d   :  { %13571 = vst [vmem:[#allocation102_spill] sm:$0xff] %v12466_v45  ;;  %5843 = vmatmul.mubr.f32.gmra.mrb[248].mxu0 %v13129_v23  ;;  %v13133_v21 = vmax.f32 %v12466_v45, 0.0  ;;  %v4574_v45 = vld [vmem:[#allocation3 + $0x610] sm:$0xff] }
 0xa3e   :  { %13572 = vst [vmem:[#allocation103_spill] sm:$0xff] %v12469_v53  ;;  %v13134_v41 = vmax.f32 %v12469_v53, 0.0  ;;  %v5391_v43 = vpop.f32.mrb[60].mxu1  ;;  %v4580_v53 = vld [vmem:[#allocation3 + $0x640] sm:$0xff] }
 0xa3f   :  { %v12478_v29 = vadd.f32 %v5391_v43, %v12212_v28  ;;  %v5393_v40 = vpop.f32.mrb[61].mxu1 }
 0xa40   :  { %v12481_v11 = vadd.f32 %v5393_v40, %v12215_v2  ;;  %5848 = vmatprep.mubr.f32.mxu0 %v13134_v41  ;;  %v4572_v41 = vld [vmem:[#allocation3 + $0x600] sm:$0xff] }
 0xa41   :  { %13573 = vst [vmem:[#allocation104_spill] sm:$0xff] %v12478_v29  ;;  %5849 = vmatmul.mubr.f32.gmra.mrb[250].mxu0 %v13133_v21  ;;  %v13137_v32 = vmax.f32 %v12478_v29, 0.0  ;;  %v4581_v29 = vld [vmem:[#allocation3 + $0x648] sm:$0xff] }
 0xa42   :  { %13574 = vst [vmem:[#allocation105_spill] sm:$0xff] %v12481_v11  ;;  %v13136_v1 = vmax.f32 %v12481_v11, 0.0  ;;  %v5397_v23 = vpop.f32.mrb[62].mxu1  ;;  %v4583_v11 = vld [vmem:[#allocation3 + $0x658] sm:$0xff] }
 0xa43   :  { %v12490_v60 = vadd.f32 %v5397_v23, %v12212_v28  ;;  %v5399_v43 = vpop.f32.mrb[63].mxu1  ;;  %v4577_v28 = vld [vmem:[#allocation3 + $0x628] sm:$0xff]  ;;  %v4579_v23 = vld [vmem:[#allocation3 + $0x638] sm:$0xff] }
 0xa44   :  { %v12493_v4 = vadd.f32 %v5399_v43, %v12215_v2  ;;  %5854 = vmatprep.mubr.f32.mxu0 %v13136_v1  ;;  %v8956_v2 = vpack.c.bf16 %v4574_v45, %v4572_v41  ;;  %v8958_v43 = vpack.c.bf16 %v4579_v23, %v4577_v28  ;;  %v4576_v1 = vld [vmem:[#allocation3 + $0x620] sm:$0xff]  ;;  %v8964_v45 = vpack.c.bf16 %v4582_v12, %v4580_v53  ;;  %v4586_v23 = vld [vmem:[#allocation3 + $0x670] sm:$0xff] }
 0xa45   :  { %13575 = vst [vmem:[#allocation106_spill] sm:$0xff] %v12490_v60  ;;  %5855 = vmatmul.mubr.f32.gmra.mrb[252].mxu0 %v13137_v32  ;;  %v13146_v21 = vmax.f32 %v12490_v60, 0.0  ;;  %v4578_v32 = vld [vmem:[#allocation3 + $0x630] sm:$0xff]  ;;  %v4585_v60 = vld [vmem:[#allocation3 + $0x668] sm:$0xff]  ;;  %v4584_v28 = vld [vmem:[#allocation3 + $0x660] sm:$0xff]  ;;  %v13577_v12 = vmax.f32 %v12221_v24, 0.0 }
 0xa46   :  { %13576 = vst [vmem:[#allocation107_spill] sm:$0xff] %v12493_v4  ;;  %v13141_v40 = vmax.f32 %v12493_v4, 0.0  ;;  %v8960_v4 = vpack.c.bf16 %v4578_v32, %v4576_v1  ;;  %v4588_v32 = vld [vmem:[#allocation3 + $0x680] sm:$0xff]  ;;  %v4590_v1 = vld [vmem:[#allocation3 + $0x690] sm:$0xff] }
 0xa47   :  { %v4594_v53 = vld [vmem:[#allocation3 + $0x6b0] sm:$0xff]  ;;  %v4596_v24 = vld [vmem:[#allocation3 + $0x6c0] sm:$0xff] }
 0xa48   :  { %5860 = vmatprep.mubr.f32.mxu0 %v13141_v40  ;;  %v8962_v40 = vpack.c.bf16 %v4583_v11, %v4581_v29  ;;  %v8968_v11 = vpack.c.bf16 %v4586_v23, %v4584_v28  ;;  %v8970_v29 = vpack.c.bf16 %v4591_v27, %v4589_v22  ;;  %v13579_v27 = vmax.f32 %v12229_v39, 0.0  ;;  %v4598_v23 = vld [vmem:[#allocation3 + $0x6d0] sm:$0xff]  ;;  %v4600_v39 = vld [vmem:[#allocation3 + $0x6e0] sm:$0xff] }
 0xa49   :  { %5861 = vmatmul.mubr.f32.gmra.mrb[254].mxu0 %v13146_v21  ;;  %v4587_v21 = vld [vmem:[#allocation3 + $0x678] sm:$0xff] }
 0xa4a   :  { %5931 = vmatprep.mubr.f32.mxu0 %v13391_v9  ;;  %v8966_v41 = vpack.c.bf16 %v4587_v21, %v4585_v60  ;;  %v8972_v21 = vpack.c.bf16 %v4590_v1, %v4588_v32  ;;  %v4603_v32 = vld [vmem:[#allocation3 + $0x6f8] sm:$0xff]  ;;  %v13581_v1 = vmax.f32 %v12241_v42, 0.0  ;;  %v4604_v42 = vld [vmem:[#allocation3 + $0x700] sm:$0xff] }
 0xa4d   :  { %5932 = vmatmul.mubr.f32.vlgmr.msra.gmra.mrb[192].mxu0 %v13391_v9 }
 0xa4e   :  { %5937 = vmatprep.mubr.f32.mxu0 %v13391_v9  ;;  %8957 = vmatpush1.bf16.msra.mxu0 %v8956_v2  ;;  %v4593_v2 = vld [vmem:[#allocation3 + $0x6a8] sm:$0xff] }
 0xa4f   :  { %8959 = vmatprep.subr.bf16.mxu0 %v8958_v43  ;;  %v4595_v43 = vld [vmem:[#allocation3 + $0x6b8] sm:$0xff] }
 0xa50   :  { %v8974_v60 = vpack.c.bf16 %v4595_v43, %v4593_v2  ;;  %v4602_v43 = vld [vmem:[#allocation3 + $0x6f0] sm:$0xff] }
 0xa51   :  { %5938 = vmatmul.mubr.f32.gmra.mrb[194].mxu0 %v13391_v9 }
 0xa52   :  { %5943 = vmatprep.mubr.f32.mxu0 %v13391_v9  ;;  %8961 = vmatpush1.bf16.msra.mxu0 %v8960_v4  ;;  %v4592_v4 = vld [vmem:[#allocation3 + $0x6a0] sm:$0xff] }
 0xa53   :  { %8963 = vmatprep.subr.bf16.mxu0 %v8962_v40  ;;  %v4597_v40 = vld [vmem:[#allocation3 + $0x6c8] sm:$0xff]  ;;  %v8976_v22 = vpack.c.bf16 %v4594_v53, %v4592_v4  ;;  %v13583_v4 = vmax.f32 %v12253_v33, 0.0  ;;  %v4610_v33 = vld [vmem:[#allocation3 + $0x730] sm:$0xff] }
 0xa55   :  { %5944 = vmatmul.mubr.f32.gmra.mrb[196].mxu0 %v13391_v9 }
 0xa56   :  { %5949 = vmatprep.mubr.f32.mxu0 %v13391_v9  ;;  %8965 = vmatpush1.bf16.msra.mxu0 %v8964_v45  ;;  %v4599_v45 = vld [vmem:[#allocation3 + $0x6d8] sm:$0xff] }
 0xa57   :  { %8967 = vmatprep.subr.bf16.mxu0 %v8966_v41  ;;  %v13578_v41 = vmax.f32 %v12218_v8, 0.0  ;;  %v8978_v28 = vpack.c.bf16 %v4599_v45, %v4597_v40  ;;  %v8980_v8 = vpack.c.bf16 %v4598_v23, %v4596_v24  ;;  %v4606_v40 = vld [vmem:[#allocation3 + $0x710] sm:$0xff]  ;;  %v4609_v45 = vld [vmem:[#allocation3 + $0x728] sm:$0xff]  ;;  %v4615_v23 = vld [vmem:[#allocation3 + $0x758] sm:$0xff] }
 0xa58   :  { %v4613_v24 = vld [vmem:[#allocation3 + $0x748] sm:$0xff] }
 0xa59   :  { %5950 = vmatmul.mubr.f32.gmra.mrb[198].mxu0 %v13391_v9 }
 0xa5a   :  { %5955 = vmatprep.mubr.f32.mxu0 %v13577_v12  ;;  %8969 = vmatpush1.bf16.msra.mxu0 %v8968_v11  ;;  %v4601_v11 = vld [vmem:[#allocation3 + $0x6e8] sm:$0xff] }
 0xa5b   :  { %8971 = vmatprep.subr.bf16.mxu0 %v8970_v29  ;;  %v13580_v29 = vmax.f32 %v12226_v55, 0.0  ;;  %v8982_v2 = vpack.c.bf16 %v4603_v32, %v4601_v11  ;;  %v4605_v12 = vld [vmem:[#allocation3 + $0x708] sm:$0xff]  ;;  %v8984_v55 = vpack.c.bf16 %v4602_v43, %v4600_v39  ;;  %v8994_v32 = vpack.c.bf16 %v4615_v23, %v4613_v24  ;;  %v4616_v43 = vld [vmem:[#allocation3 + $0x760] sm:$0xff] }
 0xa5d   :  { %5956 = vmatmul.mubr.f32.gmra.mrb[200].mxu0 %v13578_v41  ;;  %v4611_v41 = vld [vmem:[#allocation3 + $0x738] sm:$0xff] }
 0xa5e   :  { %5961 = vmatprep.mubr.f32.mxu0 %v13579_v27  ;;  %8973 = vmatpush1.bf16.msra.mxu0 %v8972_v21  ;;  %v4607_v21 = vld [vmem:[#allocation3 + $0x718] sm:$0xff]  ;;  %v13584_v27 = vmax.f32 %v12250_v58, 0.0  ;;  %v4612_v58 = vld [vmem:[#allocation3 + $0x740] sm:$0xff] }
 0xa5f   :  { %8975 = vmatprep.subr.bf16.mxu0 %v8974_v60  ;;  %v13582_v60 = vmax.f32 %v12238_v37, 0.0  ;;  %v8986_v53 = vpack.c.bf16 %v4607_v21, %v4605_v12  ;;  %v8990_v37 = vpack.c.bf16 %v4611_v41, %v4609_v45  ;;  %v4618_v12 = vld [vmem:[#allocation3 + $0x770] sm:$0xff]  ;;  %v4621_v21 = vld [vmem:[#allocation3 + $0x788] sm:$0xff]  ;;  %v4627_v45 = vld [vmem:[#allocation3 + $0x7b8] sm:$0xff] }
 0xa61   :  { %5962 = vmatmul.mubr.f32.gmra.mrb[202].mxu0 %v13580_v29  ;;  %v4614_v29 = vld [vmem:[#allocation3 + $0x750] sm:$0xff] }
 0xa62   :  { %5967 = vmatprep.mubr.f32.mxu0 %v13581_v1  ;;  %8977 = vmatpush1.bf16.msra.mxu0 %v8976_v22  ;;  %v8988_v22 = vpack.c.bf16 %v4606_v40, %v4604_v42  ;;  %v4617_v1 = vld [vmem:[#allocation3 + $0x768] sm:$0xff]  ;;  %v4622_v42 = vld [vmem:[#allocation3 + $0x790] sm:$0xff] }
 0xa63   :  { %8979 = vmatprep.subr.bf16.mxu0 %v8978_v28  ;;  %v4608_v28 = vld [vmem:[#allocation3 + $0x720] sm:$0xff]  ;;  %v4625_v40 = vld [vmem:[#allocation3 + $0x7a8] sm:$0xff] }
 0xa64   :  { %v8992_v11 = vpack.c.bf16 %v4610_v33, %v4608_v28  ;;  %v4629_v28 = vld [vmem:[#allocation3 + $0x7c8] sm:$0xff]  ;;  %v4631_v33 = vld [vmem:[#allocation3 + $0x7d8] sm:$0xff] }
 0xa65   :  { %5968 = vmatmul.mubr.f32.gmra.mrb[204].mxu0 %v13582_v60  ;;  %v4623_v60 = vld [vmem:[#allocation3 + $0x798] sm:$0xff]  ;;  %v9010_v23 = vpack.c.bf16 %v4631_v33, %v4629_v28  ;;  %v12678_v33 = vld.sshfl [vmem:[%s12947_s2] sm:$0x33 pattern:$0x76325410] }
 0xa66   :  { %5973 = vmatprep.mubr.f32.mxu0 %v13583_v4  ;;  %8981 = vmatpush1.bf16.msra.mxu0 %v8980_v8  ;;  %v4619_v8 = vld [vmem:[#allocation3 + $0x778] sm:$0xff]  ;;  %v9000_v4 = vpack.c.bf16 %v4618_v12, %v4616_v43 }
 0xa67   :  { %8983 = vmatprep.subr.bf16.mxu0 %v8982_v2  ;;  %v8996_v2 = vpack.c.bf16 %v4614_v29, %v4612_v58  ;;  %v8998_v39 = vpack.c.bf16 %v4619_v8, %v4617_v1  ;;  %v4633_v58 = vld [vmem:[#allocation3 + $0x7e8] sm:$0xff]  ;;  %v4635_v29 = vld [vmem:[#allocation3 + $0x7f8] sm:$0xff] }
 0xa68   :  { %v9014_v8 = vpack.c.bf16 %v4635_v29, %v4633_v58  ;;  %v13585_v12 = vld [vmem:[#allocation89_spill] sm:$0xff]  ;;  %v13617_v58 = vld [vmem:[#allocation55_spill] sm:$0xff] }
 0xa69   :  { %5974 = vmatmul.mubr.f32.gmra.mrb[206].mxu0 %v13584_v27  ;;  %v9006_v27 = vpack.c.bf16 %v4627_v45, %v4625_v40  ;;  %v13592_v40 = vld [vmem:[#allocation96_spill] sm:$0xff]  ;;  %v13593_v45 = vld [vmem:[#allocation97_spill] sm:$0xff] }
 0xa6a   :  { %5979 = vmatprep.mubr.f32.mxu0 %v12267_v36  ;;  %8985 = vmatpush1.bf16.msra.mxu0 %v8984_v55  ;;  %v9002_v55 = vpack.c.bf16 %v4623_v60, %v4621_v21  ;;  %v13586_v21 = vld [vmem:[#allocation90_spill] sm:$0xff]  ;;  %v13587_v60 = vld [vmem:[#allocation91_spill] sm:$0xff] }
 0xa6b   :  { %8987 = vmatprep.subr.bf16.mxu0 %v8986_v53  ;;  %v4620_v53 = vld [vmem:[#allocation3 + $0x780] sm:$0xff] }
 0xa6c   :  { %v9004_v41 = vpack.c.bf16 %v4622_v42, %v4620_v53  ;;  %v13590_v53 = vld [vmem:[#allocation94_spill] sm:$0xff]  ;;  %v13591_v42 = vld [vmem:[#allocation95_spill] sm:$0xff] }
 0xa6d   :  { %5980 = vmatmul.mubr.f32.gmra.mrb[208].mxu0 %v12269_v10 }
 0xa6e   :  { %5985 = vmatprep.mubr.f32.mxu0 %v12275_v62  ;;  %8989 = vmatpush1.bf16.msra.mxu0 %v8988_v22  ;;  %v4624_v22 = vld [vmem:[#allocation3 + $0x7a0] sm:$0xff] }
 0xa6f   :  { %8991 = vmatprep.subr.bf16.mxu0 %v8990_v37  ;;  %v4626_v37 = vld [vmem:[#allocation3 + $0x7b0] sm:$0xff] }
 0xa70   :  { %v9008_v24 = vpack.c.bf16 %v4626_v37, %v4624_v22 }
 0xa71   :  { %5986 = vmatmul.mubr.f32.gmra.mrb[210].mxu0 %v12277_v20 }
 0xa72   :  { %5991 = vmatprep.mubr.f32.mxu0 %v12283_v57  ;;  %8993 = vmatpush1.bf16.msra.mxu0 %v8992_v11  ;;  %v4628_v11 = vld [vmem:[#allocation3 + $0x7c0] sm:$0xff] }
 0xa73   :  { %8995 = vmatprep.subr.bf16.mxu0 %v8994_v32  ;;  %v4630_v32 = vld [vmem:[#allocation3 + $0x7d0] sm:$0xff] }
 0xa74   :  { %v9012_v1 = vpack.c.bf16 %v4630_v32, %v4628_v11  ;;  %v6721_v32 = vcombine.high %v12678_v33, %v12678_v33 }
 0xa75   :  { %5992 = vmatmul.mubr.f32.gmra.mrb[212].mxu0 %v12285_v0 }
 0xa76   :  { %5997 = vmatprep.mubr.f32.mxu0 %v12291_v25  ;;  %8997 = vmatpush1.bf16.msra.mxu0 %v8996_v2  ;;  %v4632_v2 = vld [vmem:[#allocation3 + $0x7e0] sm:$0xff] }
 0xa77   :  { %8999 = vmatprep.subr.bf16.mxu0 %v8998_v39  ;;  %v4634_v39 = vld [vmem:[#allocation3 + $0x7f0] sm:$0xff]  ;;  %6788 = vmatprep.mubr.f32.mxu1 %v6721_v32 }
 0xa78   :  { %v9016_v43 = vpack.c.bf16 %v4634_v39, %v4632_v2 }
 0xa79   :  { %5998 = vmatmul.mubr.f32.gmra.mrb[214].mxu0 %v12293_v19 }
 0xa7a   :  { %6003 = vmatprep.mubr.f32.mxu0 %v12299_v17  ;;  %9001 = vmatpush1.bf16.msra.mxu0 %v9000_v4  ;;  %v13588_v4 = vld [vmem:[#allocation92_spill] sm:$0xff] }
 0xa7b   :  { %9003 = vmatprep.subr.bf16.mxu0 %v9002_v55  ;;  %v13589_v55 = vld [vmem:[#allocation93_spill] sm:$0xff] }
 0xa7d   :  { %6004 = vmatmul.mubr.f32.gmra.mrb[216].mxu0 %v12301_v46 }
 0xa7e   :  { %6009 = vmatprep.mubr.f32.mxu0 %v12307_v52  ;;  %9005 = vmatpush1.bf16.msra.mxu0 %v9004_v41  ;;  %v13594_v41 = vld [vmem:[#allocation98_spill] sm:$0xff] }
 0xa7f   :  { %9007 = vmatprep.subr.bf16.mxu0 %v9006_v27  ;;  %v13595_v27 = vld [vmem:[#allocation99_spill] sm:$0xff] }
 0xa81   :  { %6010 = vmatmul.mubr.f32.gmra.mrb[218].mxu0 %v12309_v48 }
 0xa82   :  { %6015 = vmatprep.mubr.f32.mxu0 %v12315_v59  ;;  %9009 = vmatpush1.bf16.msra.mxu0 %v9008_v24  ;;  %v13616_v24 = vld [vmem:[#allocation54_spill] sm:$0xff] }
 0xa83   :  { %9011 = vmatprep.subr.bf16.mxu0 %v9010_v23 }
 0xa85   :  { %6016 = vmatmul.mubr.f32.gmra.mrb[220].mxu0 %v12317_v51 }
 0xa86   :  { %6021 = vmatprep.mubr.f32.mxu0 %v12323_v35  ;;  %9013 = vmatpush1.bf16.msra.mxu0 %v9012_v1 }
 0xa87   :  { %9015 = vmatprep.subr.bf16.mxu0 %v9014_v8 }
 0xa89   :  { %6022 = vmatmul.mubr.f32.gmra.mrb[222].mxu0 %v12325_v18 }
 0xa8a   :  { %6027 = vmatprep.mubr.f32.mxu0 %v12331_v54  ;;  %9017 = vmatpush1.bf16.msra.mxu0 %v9016_v43 }
 0xa8d   :  { %6028 = vmatmul.mubr.f32.gmra.mrb[224].mxu0 %v12333_v56 }
 0xa8e   :  { %6033 = vmatprep.mubr.f32.mxu0 %v12339_v47 }
 0xa91   :  { %6034 = vmatmul.mubr.f32.gmra.mrb[226].mxu0 %v12341_v63 }
 0xa92   :  { %6039 = vmatprep.mubr.f32.mxu0 %v12347_v3 }
 0xa95   :  { %6040 = vmatmul.mubr.f32.gmra.mrb[228].mxu0 %v12349_v30 }
 0xa96   :  { %6045 = vmatprep.mubr.f32.mxu0 %v12355_v38 }
 0xa99   :  { %6046 = vmatmul.mubr.f32.gmra.mrb[230].mxu0 %v12357_v5 }
 0xa9a   :  { %6051 = vmatprep.mubr.f32.mxu0 %v12363_v6 }
 0xa9d   :  { %6052 = vmatmul.mubr.f32.gmra.mrb[232].mxu0 %v12365_v49 }
 0xa9e   :  { %6057 = vmatprep.mubr.f32.mxu0 %v12371_v31 }
 0xaa1   :  { %6058 = vmatmul.mubr.f32.gmra.mrb[234].mxu0 %v12373_v44 }
 0xaa2   :  { %6063 = vmatprep.mubr.f32.mxu0 %v12379_v13 }
 0xaa5   :  { %6064 = vmatmul.mubr.f32.gmra.mrb[236].mxu0 %v12381_v16 }
 0xaa6   :  { %6069 = vmatprep.mubr.f32.mxu0 %v12387_v61 }
 0xaa9   :  { %6070 = vmatmul.mubr.f32.gmra.mrb[238].mxu0 %v12389_v15 }
 0xaaa   :  { %6075 = vmatprep.mubr.f32.mxu0 %v12395_v50 }
 0xaad   :  { %6076 = vmatmul.mubr.f32.gmra.mrb[240].mxu0 %v12397_v34 }
 0xaae   :  { %6081 = vmatprep.mubr.f32.mxu0 %v12403_v14 }
 0xab1   :  { %6082 = vmatmul.mubr.f32.gmra.mrb[242].mxu0 %v12405_v7 }
 0xab2   :  { %6087 = vmatprep.mubr.f32.mxu0 %v12411_v26 }
 0xab5   :  { %6088 = vmatmul.mubr.f32.gmra.mrb[244].mxu0 %v13585_v12 }
 0xab6   :  { %6093 = vmatprep.mubr.f32.mxu0 %v13586_v21 }
 0xab9   :  { %6094 = vmatmul.mubr.f32.gmra.mrb[246].mxu0 %v13587_v60 }
 0xaba   :  { %6099 = vmatprep.mubr.f32.mxu0 %v13588_v4 }
 0xabd   :  { %6100 = vmatmul.mubr.f32.gmra.mrb[248].mxu0 %v13589_v55 }
 0xabe   :  { %6105 = vmatprep.mubr.f32.mxu0 %v13590_v53 }
 0xac1   :  { %6106 = vmatmul.mubr.f32.gmra.mrb[250].mxu0 %v13591_v42 }
 0xac2   :  { %6111 = vmatprep.mubr.f32.mxu0 %v13592_v40 }
 0xac5   :  { %6112 = vmatmul.mubr.f32.gmra.mrb[252].mxu0 %v13593_v45 }
 0xac6   :  { %6117 = vmatprep.mubr.f32.mxu0 %v13594_v41 }
 0xac9   :  { %6118 = vmatmul.mubr.f32.gmra.mrb[254].mxu0 %v13595_v27 }
 0xaca   :  { %6252 = vmatprep.mubr.f32.mxu0 %v12267_v36  ;;  %v13598_v36 = vld [vmem:[#allocation100_spill] sm:$0xff] }
 0xacd   :  { %6253 = vmatmul.mubr.f32.vlgmr.msra.gmra.mrb[192].mxu0 %v12269_v10  ;;  %v13599_v10 = vmax.f32 %v13598_v36, 0.0 }
 0xace   :  { %6258 = vmatprep.mubr.f32.mxu0 %v12275_v62  ;;  %v13600_v62 = vld [vmem:[#allocation103_spill] sm:$0xff] }
 0xad1   :  { %6259 = vmatmul.mubr.f32.gmra.mrb[194].mxu0 %v12277_v20  ;;  %v13601_v20 = vmax.f32 %v13600_v62, 0.0 }
 0xad2   :  { %6264 = vmatprep.mubr.f32.mxu0 %v12283_v57  ;;  %v13602_v57 = vld [vmem:[#allocation102_spill] sm:$0xff] }
 0xad5   :  { %6265 = vmatmul.mubr.f32.gmra.mrb[196].mxu0 %v12285_v0  ;;  %v13603_v0 = vmax.f32 %v13602_v57, 0.0 }
 0xad6   :  { %6270 = vmatprep.mubr.f32.mxu0 %v12291_v25  ;;  %v13604_v25 = vld [vmem:[#allocation105_spill] sm:$0xff] }
 0xad9   :  { %6271 = vmatmul.mubr.f32.gmra.mrb[198].mxu0 %v12293_v19  ;;  %v13605_v19 = vmax.f32 %v13604_v25, 0.0  ;;  %v13621_v25 = vld [vmem:[#allocation59_spill] sm:$0xff] }
 0xada   :  { %6276 = vmatprep.mubr.f32.mxu0 %v12299_v17  ;;  %v13606_v17 = vld [vmem:[#allocation104_spill] sm:$0xff] }
 0xadd   :  { %6277 = vmatmul.mubr.f32.gmra.mrb[200].mxu0 %v12301_v46  ;;  %v13607_v46 = vmax.f32 %v13606_v17, 0.0 }
 0xade   :  { %6282 = vmatprep.mubr.f32.mxu0 %v12307_v52  ;;  %v13608_v52 = vld [vmem:[#allocation107_spill] sm:$0xff] }
 0xae1   :  { %6283 = vmatmul.mubr.f32.gmra.mrb[202].mxu0 %v12309_v48  ;;  %v13609_v48 = vmax.f32 %v13608_v52, 0.0 }
 0xae2   :  { %6288 = vmatprep.mubr.f32.mxu0 %v12315_v59  ;;  %v13610_v59 = vld [vmem:[#allocation106_spill] sm:$0xff] }
 0xae5   :  { %6289 = vmatmul.mubr.f32.gmra.mrb[204].mxu0 %v12317_v51  ;;  %v13611_v51 = vmax.f32 %v13610_v59, 0.0 }
 0xae6   :  { %6294 = vmatprep.mubr.f32.mxu0 %v12323_v35  ;;  %v7277_v35 = vld [vmem:[%s12953_s8 + $0x1] ss:$4 sm:$0x3] }
 0xae9   :  { %6295 = vmatmul.mubr.f32.gmra.mrb[206].mxu0 %v12325_v18  ;;  %v7278_v18 = vld [vmem:[%s12953_s8 + $0x2] ss:$4 sm:$0x3] }
 0xaea   :  { %6300 = vmatprep.mubr.f32.mxu0 %v12331_v54  ;;  %v13612_v54 = vld [vmem:[#allocation87_spill] sm:$0xff] }
 0xaed   :  { %6301 = vmatmul.mubr.f32.gmra.mrb[208].mxu0 %v12333_v56  ;;  %v12656_v56 = vrot.slane %v7277_v35, %v13612_v54 }
 0xaee   :  { %6306 = vmatprep.mubr.f32.mxu0 %v12339_v47  ;;  %v13613_v47 = vld [vmem:[#allocation88_spill] sm:$0xff] }
 0xaf1   :  { %6307 = vmatmul.mubr.f32.gmra.mrb[210].mxu0 %v12341_v63  ;;  %v12659_v63 = vrot.slane %v7277_v35, %v13613_v47 }
 0xaf2   :  { %6312 = vmatprep.mubr.f32.mxu0 %v12347_v3  ;;  %v12662_v3 = vrot.slane %v7278_v18, %v13612_v54 }
 0xaf4   :  { %v4725_v23 = vadd.f32 %v13616_v24, %v12662_v3 }
 0xaf5   :  { %6313 = vmatmul.mubr.f32.gmra.mrb[212].mxu0 %v12349_v30  ;;  %v12665_v30 = vrot.slane %v7278_v18, %v13613_v47  ;;  %v13622_v18 = vld [vmem:[#allocation60_spill] sm:$0xff] }
 0xaf6   :  { %6318 = vmatprep.mubr.f32.mxu0 %v12355_v38  ;;  %v4743_v54 = vadd.f32 %v13622_v18, %v12662_v3 }
 0xaf7   :  { %v4727_v29 = vadd.f32 %v13617_v58, %v12665_v30 }
 0xaf9   :  { %6319 = vmatmul.mubr.f32.gmra.mrb[214].mxu0 %v12357_v5 }
 0xafa   :  { %6324 = vmatprep.mubr.f32.mxu0 %v12363_v6 }
 0xafd   :  { %6325 = vmatmul.mubr.f32.gmra.mrb[216].mxu0 %v12365_v49 }
 0xafe   :  { %6330 = vmatprep.mubr.f32.mxu0 %v12371_v31  ;;  %v13614_v31 = vld [vmem:[#allocation52_spill] sm:$0xff] }
 0xb01   :  { %6331 = vmatmul.mubr.f32.gmra.mrb[218].mxu0 %v12373_v44  ;;  %v4719_v44 = vadd.f32 %v13614_v31, %v12662_v3 }
 0xb02   :  { %6336 = vmatprep.mubr.f32.mxu0 %v12379_v13 }
 0xb05   :  { %6337 = vmatmul.mubr.f32.gmra.mrb[220].mxu0 %v12381_v16  ;;  %v13615_v16 = vld [vmem:[#allocation53_spill] sm:$0xff] }
 0xb06   :  { %6342 = vmatprep.mubr.f32.mxu0 %v12387_v61  ;;  %v4721_v61 = vadd.f32 %v13615_v16, %v12665_v30 }
 0xb09   :  { %6343 = vmatmul.mubr.f32.gmra.mrb[222].mxu0 %v12389_v15 }
 0xb0a   :  { %6348 = vmatprep.mubr.f32.mxu0 %v12395_v50 }
 0xb0d   :  { %6349 = vmatmul.mubr.f32.gmra.mrb[224].mxu0 %v12397_v34 }
 0xb0e   :  { %6354 = vmatprep.mubr.f32.mxu0 %v12403_v14 }
 0xb11   :  { %6355 = vmatmul.mubr.f32.gmra.mrb[226].mxu0 %v12405_v7  ;;  %v13596_v7 = vld [vmem:[#allocation101_spill] sm:$0xff] }
 0xb12   :  { %6360 = vmatprep.mubr.f32.mxu0 %v12411_v26  ;;  %v13597_v34 = vmax.f32 %v13596_v7, 0.0 }
 0xb15   :  { %6361 = vmatmul.mubr.f32.gmra.mrb[228].mxu0 %v13585_v12 }
 0xb16   :  { %6366 = vmatprep.mubr.f32.mxu0 %v13586_v21 }
 0xb19   :  { %6367 = vmatmul.mubr.f32.gmra.mrb[230].mxu0 %v13587_v60  ;;  %v13618_v60 = vld [vmem:[#allocation56_spill] sm:$0xff] }
 0xb1a   :  { %6372 = vmatprep.mubr.f32.mxu0 %v13588_v4  ;;  %v4731_v4 = vadd.f32 %v13618_v60, %v12662_v3 }
 0xb1d   :  { %6373 = vmatmul.mubr.f32.gmra.mrb[232].mxu0 %v13589_v55 }
 0xb1e   :  { %6378 = vmatprep.mubr.f32.mxu0 %v13590_v53 }
 0xb21   :  { %6379 = vmatmul.mubr.f32.gmra.mrb[234].mxu0 %v13591_v42  ;;  %v13619_v42 = vld [vmem:[#allocation57_spill] sm:$0xff] }
 0xb22   :  { %6384 = vmatprep.mubr.f32.mxu0 %v13592_v40  ;;  %v4733_v40 = vadd.f32 %v13619_v42, %v12665_v30 }
 0xb25   :  { %6385 = vmatmul.mubr.f32.gmra.mrb[236].mxu0 %v13593_v45 }
 0xb26   :  { %6390 = vmatprep.mubr.f32.mxu0 %v13594_v41 }
 0xb29   :  { %6391 = vmatmul.mubr.f32.gmra.mrb[238].mxu0 %v13595_v27 }
 0xb2a   :  { %6396 = vmatprep.mubr.f32.mxu0 %v13597_v34 }
 0xb2d   :  { %6397 = vmatmul.mubr.f32.gmra.mrb[240].mxu0 %v13599_v10 }
 0xb2e   :  { %6402 = vmatprep.mubr.f32.mxu0 %v13601_v20  ;;  %v13620_v20 = vld [vmem:[#allocation58_spill] sm:$0xff] }
 0xb2f   :  { %v4737_v57 = vadd.f32 %v13620_v20, %v12662_v3 }
 0xb31   :  { %6403 = vmatmul.mubr.f32.gmra.mrb[242].mxu0 %v13603_v0 }
 0xb32   :  { %6408 = vmatprep.mubr.f32.mxu0 %v13605_v19  ;;  %v4739_v19 = vadd.f32 %v13621_v25, %v12665_v30 }
 0xb35   :  { %6409 = vmatmul.mubr.f32.gmra.mrb[244].mxu0 %v13607_v46 }
 0xb36   :  { %6414 = vmatprep.mubr.f32.mxu0 %v13609_v48 }
 0xb39   :  { %6415 = vmatmul.mubr.f32.gmra.mrb[246].mxu0 %v13611_v51 }
 0xb3a   :  { %6420 = vmatprep.mubr.f32.mxu0 %v13391_v9 }
 0xb3d   :  { %6421 = vmatmul.mubr.f32.gmra.mrb[248].mxu0 %v13391_v9 }
 0xb3e   :  { %6426 = vmatprep.mubr.f32.mxu0 %v13391_v9 }
 0xb41   :  { %6427 = vmatmul.mubr.f32.gmra.mrb[250].mxu0 %v13391_v9 }
 0xb42   :  { %6432 = vmatprep.mubr.f32.mxu0 %v13391_v9 }
 0xb45   :  { %6433 = vmatmul.mubr.f32.gmra.mrb[252].mxu0 %v13391_v9 }
 0xb46   :  { %6438 = vmatprep.mubr.f32.mxu0 %v13391_v9 }
 0xb49   :  { %6439 = vmatmul.mubr.f32.gmra.mrb[254].mxu0 %v13391_v9 }
 0xba0   :  { %v6254_v38 = vpop.f32.mrb[192].mxu0 }
 0xba1   :  { %v6520_v5 = vadd.f32 %v12656_v56, %v6254_v38  ;;  %v6256_v6 = vpop.f32.mrb[193].mxu0 }
 0xba2   :  { %v6521_v49 = vadd.f32 %v12659_v63, %v6256_v6 }
 0xba3   :  { %v6584_v13 = vmax.f32 %v6520_v5, 0.0  ;;  %v13623_v5 = vld [vmem:[#allocation61_spill] sm:$0xff] }
 0xba4   :  { %v6585_v15 = vmax.f32 %v6521_v49, 0.0  ;;  %v6260_v50 = vpop.f32.mrb[194].mxu0  ;;  %v4745_v6 = vadd.f32 %v13623_v5, %v12665_v30 }
 0xba5   :  { %v6648_v14 = vadd.f32 %v6584_v13, %v4719_v44  ;;  %v6522_v26 = vadd.f32 %v12656_v56, %v6260_v50  ;;  %v6262_v22 = vpop.f32.mrb[195].mxu0 }
 0xba6   :  { %v6649_v37 = vadd.f32 %v6585_v15, %v4721_v61  ;;  %v6523_v28 = vadd.f32 %v12659_v63, %v6262_v22 }
 0xba7   :  { %v6586_v11 = vmax.f32 %v6522_v26, 0.0 }
 0xba8   :  { %v6587_v1 = vmax.f32 %v6523_v28, 0.0  ;;  %v6266_v8 = vpop.f32.mrb[196].mxu0 }
 0xba9   :  { %v6650_v2 = vadd.f32 %v6586_v11, %v4725_v23  ;;  %v6524_v39 = vadd.f32 %v12656_v56, %v6266_v8  ;;  %v6268_v43 = vpop.f32.mrb[197].mxu0  ;;  %v13626_v8 = vld [vmem:[#allocation64_spill] sm:$0xff] }
 0xbaa   :  { %v6651_v12 = vadd.f32 %v6587_v1, %v4727_v29  ;;  %v6525_v21 = vadd.f32 %v12659_v63, %v6268_v43 }
 0xbab   :  { %v9020_v55 = vpack.c.bf16 %v6650_v2, %v6648_v14  ;;  %v6588_v53 = vmax.f32 %v6524_v39, 0.0  ;;  %v13624_v14 = vld [vmem:[#allocation62_spill] sm:$0xff]  ;;  %v4755_v2 = vadd.f32 %v13626_v8, %v12662_v3 }
 0xbac   :  { %v6589_v45 = vmax.f32 %v6525_v21, 0.0  ;;  %v6272_v41 = vpop.f32.mrb[198].mxu0  ;;  %v9018_v27 = vpack.c.bf16 %v6651_v12, %v6649_v37  ;;  %v4749_v26 = vadd.f32 %v13624_v14, %v12662_v3  ;;  %v13625_v37 = vld [vmem:[#allocation63_spill] sm:$0xff]  ;;  %v13627_v12 = vld [vmem:[#allocation65_spill] sm:$0xff] }
 0xbad   :  { %v6652_v7 = vadd.f32 %v6588_v53, %v4731_v4  ;;  %v6526_v34 = vadd.f32 %v12656_v56, %v6272_v41  ;;  %v6274_v36 = vpop.f32.mrb[199].mxu0  ;;  %v4751_v28 = vadd.f32 %v13625_v37, %v12665_v30  ;;  %v4757_v21 = vadd.f32 %v13627_v12, %v12665_v30 }
 0xbae   :  { %v6653_v10 = vadd.f32 %v6589_v45, %v4733_v40  ;;  %v6527_v62 = vadd.f32 %v12659_v63, %v6274_v36  ;;  %9019 = vmatprep.subr.bf16.mxu1 %v9018_v27  ;;  %v13628_v27 = vld [vmem:[#allocation66_spill] sm:$0xff]  ;;  %v13629_v36 = vld [vmem:[#allocation67_spill] sm:$0xff] }
 0xbaf   :  { %v6590_v0 = vmax.f32 %v6526_v34, 0.0  ;;  %9021 = vmatpush1.bf16.msra.mxu1 %v9020_v55 }
 0xbb0   :  { %v6591_v17 = vmax.f32 %v6527_v62, 0.0  ;;  %v6278_v46 = vpop.f32.mrb[200].mxu0 }
 0xbb1   :  { %v6654_v52 = vadd.f32 %v6590_v0, %v4737_v57  ;;  %v6528_v48 = vadd.f32 %v12656_v56, %v6278_v46  ;;  %v6280_v59 = vpop.f32.mrb[201].mxu0  ;;  %v13630_v46 = vld [vmem:[#allocation36_spill] sm:$0xff] }
 0xbb2   :  { %v6655_v51 = vadd.f32 %v6591_v17, %v4739_v19  ;;  %v6529_v35 = vadd.f32 %v12659_v63, %v6280_v59 }
 0xbb3   :  { %v9024_v47 = vpack.c.bf16 %v6654_v52, %v6652_v7  ;;  %v6592_v38 = vmax.f32 %v6528_v48, 0.0  ;;  %v4761_v7 = vadd.f32 %v13628_v27, %v12662_v3  ;;  %v4767_v52 = vadd.f32 %v13630_v46, %v12662_v3 }
 0xbb4   :  { %v6593_v49 = vmax.f32 %v6529_v35, 0.0  ;;  %v6284_v31 = vpop.f32.mrb[202].mxu0  ;;  %v9022_v44 = vpack.c.bf16 %v6655_v51, %v6653_v10  ;;  %v4763_v10 = vadd.f32 %v13629_v36, %v12665_v30  ;;  %v13631_v51 = vld [vmem:[#allocation37_spill] sm:$0xff] }
 0xbb5   :  { %v6656_v13 = vadd.f32 %v6592_v38, %v4743_v54  ;;  %v6530_v16 = vadd.f32 %v12656_v56, %v6284_v31  ;;  %v6286_v61 = vpop.f32.mrb[203].mxu0  ;;  %v4769_v35 = vadd.f32 %v13631_v51, %v12665_v30 }
 0xbb6   :  { %v6657_v15 = vadd.f32 %v6593_v49, %v4745_v6  ;;  %v6531_v50 = vadd.f32 %v12659_v63, %v6286_v61  ;;  %9023 = vmatprep.subr.bf16.mxu1 %v9022_v44  ;;  %v13632_v44 = vld [vmem:[#allocation38_spill] sm:$0xff]  ;;  %v13633_v61 = vld [vmem:[#allocation39_spill] sm:$0xff] }
 0xbb7   :  { %v6594_v22 = vmax.f32 %v6530_v16, 0.0  ;;  %9025 = vmatpush1.bf16.msra.mxu1 %v9024_v47 }
 0xbb8   :  { %v6595_v24 = vmax.f32 %v6531_v50, 0.0  ;;  %v6290_v23 = vpop.f32.mrb[204].mxu0 }
 0xbb9   :  { %v6658_v11 = vadd.f32 %v6594_v22, %v4749_v26  ;;  %v6532_v32 = vadd.f32 %v12656_v56, %v6290_v23  ;;  %v6292_v58 = vpop.f32.mrb[205].mxu0  ;;  %v13634_v23 = vld [vmem:[#allocation40_spill] sm:$0xff] }
 0xbba   :  { %v6659_v29 = vadd.f32 %v6595_v24, %v4751_v28  ;;  %v6533_v1 = vadd.f32 %v12659_v63, %v6292_v58 }
 0xbbb   :  { %v9028_v39 = vpack.c.bf16 %v6658_v11, %v6656_v13  ;;  %v6596_v43 = vmax.f32 %v6532_v32, 0.0  ;;  %v4773_v13 = vadd.f32 %v13632_v44, %v12662_v3  ;;  %v4779_v11 = vadd.f32 %v13634_v23, %v12662_v3 }
 0xbbc   :  { %v6597_v60 = vmax.f32 %v6533_v1, 0.0  ;;  %v6296_v4 = vpop.f32.mrb[206].mxu0  ;;  %v9026_v55 = vpack.c.bf16 %v6659_v29, %v6657_v15  ;;  %v4775_v15 = vadd.f32 %v13633_v61, %v12665_v30  ;;  %v13635_v29 = vld [vmem:[#allocation41_spill] sm:$0xff] }
 0xbbd   :  { %v6660_v53 = vadd.f32 %v6596_v43, %v4755_v2  ;;  %v6534_v42 = vadd.f32 %v12656_v56, %v6296_v4  ;;  %v6298_v40 = vpop.f32.mrb[207].mxu0  ;;  %v4781_v1 = vadd.f32 %v13635_v29, %v12665_v30 }
 0xbbe   :  { %v6661_v45 = vadd.f32 %v6597_v60, %v4757_v21  ;;  %v6535_v41 = vadd.f32 %v12659_v63, %v6298_v40  ;;  %9027 = vmatprep.subr.bf16.mxu1 %v9026_v55  ;;  %v13636_v55 = vld [vmem:[#allocation42_spill] sm:$0xff]  ;;  %v13637_v40 = vld [vmem:[#allocation43_spill] sm:$0xff] }
 0xbbf   :  { %v6598_v34 = vmax.f32 %v6534_v42, 0.0  ;;  %9029 = vmatpush1.bf16.msra.mxu1 %v9028_v39 }
 0xbc0   :  { %v6599_v62 = vmax.f32 %v6535_v41, 0.0  ;;  %v6302_v20 = vpop.f32.mrb[208].mxu0 }
 0xbc1   :  { %v6662_v57 = vadd.f32 %v6598_v34, %v4761_v7  ;;  %v6536_v0 = vadd.f32 %v12656_v56, %v6302_v20  ;;  %v6304_v25 = vpop.f32.mrb[209].mxu0  ;;  %v13638_v20 = vld [vmem:[#allocation44_spill] sm:$0xff] }
 0xbc2   :  { %v6663_v19 = vadd.f32 %v6599_v62, %v4763_v10  ;;  %v6537_v17 = vadd.f32 %v12659_v63, %v6304_v25 }
 0xbc3   :  { %v9032_v48 = vpack.c.bf16 %v6662_v57, %v6660_v53  ;;  %v6600_v59 = vmax.f32 %v6536_v0, 0.0  ;;  %v4785_v53 = vadd.f32 %v13636_v55, %v12662_v3  ;;  %v4791_v57 = vadd.f32 %v13638_v20, %v12662_v3 }
 0xbc4   :  { %v6601_v18 = vmax.f32 %v6537_v17, 0.0  ;;  %v6308_v54 = vpop.f32.mrb[210].mxu0  ;;  %v9030_v47 = vpack.c.bf16 %v6663_v19, %v6661_v45  ;;  %v4787_v45 = vadd.f32 %v13637_v40, %v12665_v30  ;;  %v13639_v19 = vld [vmem:[#allocation45_spill] sm:$0xff] }
 0xbc5   :  { %v6664_v38 = vadd.f32 %v6600_v59, %v4767_v52  ;;  %v6538_v5 = vadd.f32 %v12656_v56, %v6308_v54  ;;  %v6310_v6 = vpop.f32.mrb[211].mxu0  ;;  %v4793_v17 = vadd.f32 %v13639_v19, %v12665_v30 }
 0xbc6   :  { %v6665_v49 = vadd.f32 %v6601_v18, %v4769_v35  ;;  %v6539_v31 = vadd.f32 %v12659_v63, %v6310_v6  ;;  %9031 = vmatprep.subr.bf16.mxu1 %v9030_v47  ;;  %v13640_v47 = vld [vmem:[#allocation46_spill] sm:$0xff]  ;;  %v13641_v6 = vld [vmem:[#allocation47_spill] sm:$0xff] }
 0xbc7   :  { %v6602_v16 = vmax.f32 %v6538_v5, 0.0  ;;  %9033 = vmatpush1.bf16.msra.mxu1 %v9032_v48 }
 0xbc8   :  { %v6603_v50 = vmax.f32 %v6539_v31, 0.0  ;;  %v6314_v14 = vpop.f32.mrb[212].mxu0 }
 0xbc9   :  { %v6666_v26 = vadd.f32 %v6602_v16, %v4773_v13  ;;  %v6540_v22 = vadd.f32 %v12656_v56, %v6314_v14  ;;  %v6316_v37 = vpop.f32.mrb[213].mxu0  ;;  %v13642_v14 = vld [vmem:[#allocation48_spill] sm:$0xff] }
 0xbca   :  { %v6667_v28 = vadd.f32 %v6603_v50, %v4775_v15  ;;  %v6541_v24 = vadd.f32 %v12659_v63, %v6316_v37 }
 0xbcb   :  { %v9036_v32 = vpack.c.bf16 %v6666_v26, %v6664_v38  ;;  %v6604_v58 = vmax.f32 %v6540_v22, 0.0  ;;  %v4797_v38 = vadd.f32 %v13640_v47, %v12662_v3  ;;  %v4803_v26 = vadd.f32 %v13642_v14, %v12662_v3 }
 0xbcc   :  { %v6605_v8 = vmax.f32 %v6541_v24, 0.0  ;;  %v6320_v2 = vpop.f32.mrb[214].mxu0  ;;  %v9034_v39 = vpack.c.bf16 %v6667_v28, %v6665_v49  ;;  %v4799_v49 = vadd.f32 %v13641_v6, %v12665_v30  ;;  %v13643_v28 = vld [vmem:[#allocation49_spill] sm:$0xff] }
 0xbcd   :  { %v6668_v43 = vadd.f32 %v6604_v58, %v4779_v11  ;;  %v6542_v12 = vadd.f32 %v12656_v56, %v6320_v2  ;;  %v6322_v21 = vpop.f32.mrb[215].mxu0  ;;  %v4805_v24 = vadd.f32 %v13643_v28, %v12665_v30 }
 0xbce   :  { %v6669_v60 = vadd.f32 %v6605_v8, %v4781_v1  ;;  %v6543_v4 = vadd.f32 %v12659_v63, %v6322_v21  ;;  %9035 = vmatprep.subr.bf16.mxu1 %v9034_v39  ;;  %v13644_v39 = vld [vmem:[#allocation50_spill] sm:$0xff]  ;;  %v13645_v21 = vld [vmem:[#allocation51_spill] sm:$0xff] }
 0xbcf   :  { %v6606_v42 = vmax.f32 %v6542_v12, 0.0  ;;  %9037 = vmatpush1.bf16.msra.mxu1 %v9036_v32 }
 0xbd0   :  { %v6607_v41 = vmax.f32 %v6543_v4, 0.0  ;;  %v6326_v27 = vpop.f32.mrb[216].mxu0 }
 0xbd1   :  { %v6670_v7 = vadd.f32 %v6606_v42, %v4785_v53  ;;  %v6544_v34 = vadd.f32 %v12656_v56, %v6326_v27  ;;  %v6328_v36 = vpop.f32.mrb[217].mxu0  ;;  %v13646_v27 = vld [vmem:[#allocation68_spill] sm:$0xff] }
 0xbd2   :  { %v6671_v10 = vadd.f32 %v6607_v41, %v4787_v45  ;;  %v6545_v62 = vadd.f32 %v12659_v63, %v6328_v36 }
 0xbd3   :  { %v9040_v0 = vpack.c.bf16 %v6670_v7, %v6668_v43  ;;  %v6608_v25 = vmax.f32 %v6544_v34, 0.0  ;;  %v4809_v43 = vadd.f32 %v13644_v39, %v12662_v3  ;;  %v4815_v7 = vadd.f32 %v13646_v27, %v12662_v3 }
 0xbd4   :  { %v6609_v46 = vmax.f32 %v6545_v62, 0.0  ;;  %v6332_v52 = vpop.f32.mrb[218].mxu0  ;;  %v9038_v48 = vpack.c.bf16 %v6671_v10, %v6669_v60  ;;  %v4811_v60 = vadd.f32 %v13645_v21, %v12665_v30  ;;  %v13647_v10 = vld [vmem:[#allocation69_spill] sm:$0xff] }
 0xbd5   :  { %v6672_v59 = vadd.f32 %v6608_v25, %v4791_v57  ;;  %v6546_v51 = vadd.f32 %v12656_v56, %v6332_v52  ;;  %v6334_v35 = vpop.f32.mrb[219].mxu0  ;;  %v4817_v62 = vadd.f32 %v13647_v10, %v12665_v30 }
 0xbd6   :  { %v6673_v18 = vadd.f32 %v6609_v46, %v4793_v17  ;;  %v6547_v54 = vadd.f32 %v12659_v63, %v6334_v35  ;;  %9039 = vmatprep.subr.bf16.mxu1 %v9038_v48  ;;  %v13648_v48 = vld [vmem:[#allocation70_spill] sm:$0xff]  ;;  %v13649_v35 = vld [vmem:[#allocation71_spill] sm:$0xff] }
 0xbd7   :  { %v6610_v5 = vmax.f32 %v6546_v51, 0.0  ;;  %9041 = vmatpush1.bf16.msra.mxu1 %v9040_v0 }
 0xbd8   :  { %v6611_v31 = vmax.f32 %v6547_v54, 0.0  ;;  %v6338_v44 = vpop.f32.mrb[220].mxu0 }
 0xbd9   :  { %v6674_v13 = vadd.f32 %v6610_v5, %v4797_v38  ;;  %v6548_v16 = vadd.f32 %v12656_v56, %v6338_v44  ;;  %v6340_v61 = vpop.f32.mrb[221].mxu0  ;;  %v13650_v44 = vld [vmem:[#allocation72_spill] sm:$0xff] }
 0xbda   :  { %v6675_v15 = vadd.f32 %v6611_v31, %v4799_v49  ;;  %v6549_v50 = vadd.f32 %v12659_v63, %v6340_v61 }
 0xbdb   :  { %v9044_v22 = vpack.c.bf16 %v6674_v13, %v6672_v59  ;;  %v6612_v37 = vmax.f32 %v6548_v16, 0.0  ;;  %v4821_v59 = vadd.f32 %v13648_v48, %v12662_v3  ;;  %v4827_v13 = vadd.f32 %v13650_v44, %v12662_v3 }
 0xbdc   :  { %v6613_v23 = vmax.f32 %v6549_v50, 0.0  ;;  %v6344_v11 = vpop.f32.mrb[222].mxu0  ;;  %v9042_v32 = vpack.c.bf16 %v6675_v15, %v6673_v18  ;;  %v4823_v18 = vadd.f32 %v13649_v35, %v12665_v30  ;;  %v13651_v15 = vld [vmem:[#allocation73_spill] sm:$0xff] }
 0xbdd   :  { %v6676_v58 = vadd.f32 %v6612_v37, %v4803_v26  ;;  %v6550_v29 = vadd.f32 %v12656_v56, %v6344_v11  ;;  %v6346_v1 = vpop.f32.mrb[223].mxu0  ;;  %v4829_v50 = vadd.f32 %v13651_v15, %v12665_v30 }
 0xbde   :  { %v6677_v8 = vadd.f32 %v6613_v23, %v4805_v24  ;;  %v6551_v2 = vadd.f32 %v12659_v63, %v6346_v1  ;;  %9043 = vmatprep.subr.bf16.mxu1 %v9042_v32  ;;  %v13652_v32 = vld [vmem:[#allocation74_spill] sm:$0xff]  ;;  %v13653_v1 = vld [vmem:[#allocation75_spill] sm:$0xff] }
 0xbdf   :  { %v6614_v12 = vmax.f32 %v6550_v29, 0.0  ;;  %9045 = vmatpush1.bf16.msra.mxu1 %v9044_v22 }
 0xbe0   :  { %v6615_v4 = vmax.f32 %v6551_v2, 0.0  ;;  %v6350_v55 = vpop.f32.mrb[224].mxu0 }
 0xbe1   :  { %v6678_v53 = vadd.f32 %v6614_v12, %v4809_v43  ;;  %v6552_v42 = vadd.f32 %v12656_v56, %v6350_v55  ;;  %v6352_v40 = vpop.f32.mrb[225].mxu0  ;;  %v13654_v55 = vld [vmem:[#allocation76_spill] sm:$0xff] }
 0xbe2   :  { %v6679_v45 = vadd.f32 %v6615_v4, %v4811_v60  ;;  %v6553_v41 = vadd.f32 %v12659_v63, %v6352_v40 }
 0xbe3   :  { %v9048_v34 = vpack.c.bf16 %v6678_v53, %v6676_v58  ;;  %v6616_v36 = vmax.f32 %v6552_v42, 0.0  ;;  %v4833_v58 = vadd.f32 %v13652_v32, %v12662_v3  ;;  %v4839_v53 = vadd.f32 %v13654_v55, %v12662_v3 }
 0xbe4   :  { %v6617_v20 = vmax.f32 %v6553_v41, 0.0  ;;  %v6356_v57 = vpop.f32.mrb[226].mxu0  ;;  %v9046_v0 = vpack.c.bf16 %v6679_v45, %v6677_v8  ;;  %v4835_v8 = vadd.f32 %v13653_v1, %v12665_v30  ;;  %v13655_v45 = vld [vmem:[#allocation77_spill] sm:$0xff] }
 0xbe5   :  { %v6680_v25 = vadd.f32 %v6616_v36, %v4815_v7  ;;  %v6554_v19 = vadd.f32 %v12656_v56, %v6356_v57  ;;  %v6358_v17 = vpop.f32.mrb[227].mxu0  ;;  %v4841_v41 = vadd.f32 %v13655_v45, %v12665_v30 }
 0xbe6   :  { %v6681_v46 = vadd.f32 %v6617_v20, %v4817_v62  ;;  %v6555_v52 = vadd.f32 %v12659_v63, %v6358_v17  ;;  %9047 = vmatprep.subr.bf16.mxu1 %v9046_v0  ;;  %v13656_v0 = vld [vmem:[#allocation78_spill] sm:$0xff]  ;;  %v13657_v17 = vld [vmem:[#allocation79_spill] sm:$0xff] }
 0xbe7   :  { %v6618_v51 = vmax.f32 %v6554_v19, 0.0  ;;  %9049 = vmatpush1.bf16.msra.mxu1 %v9048_v34 }
 0xbe8   :  { %v6619_v54 = vmax.f32 %v6555_v52, 0.0  ;;  %v6362_v47 = vpop.f32.mrb[228].mxu0 }
 0xbe9   :  { %v6682_v38 = vadd.f32 %v6618_v51, %v4821_v59  ;;  %v6556_v5 = vadd.f32 %v12656_v56, %v6362_v47  ;;  %v6364_v6 = vpop.f32.mrb[229].mxu0  ;;  %v13658_v47 = vld [vmem:[#allocation80_spill] sm:$0xff] }
 0xbea   :  { %v6683_v49 = vadd.f32 %v6619_v54, %v4823_v18  ;;  %v6557_v31 = vadd.f32 %v12659_v63, %v6364_v6 }
 0xbeb   :  { %v9052_v16 = vpack.c.bf16 %v6682_v38, %v6680_v25  ;;  %v6620_v61 = vmax.f32 %v6556_v5, 0.0  ;;  %v4845_v25 = vadd.f32 %v13656_v0, %v12662_v3  ;;  %v4851_v38 = vadd.f32 %v13658_v47, %v12662_v3 }
 0xbec   :  { %v6621_v14 = vmax.f32 %v6557_v31, 0.0  ;;  %v6368_v26 = vpop.f32.mrb[230].mxu0  ;;  %v9050_v22 = vpack.c.bf16 %v6683_v49, %v6681_v46  ;;  %v4847_v46 = vadd.f32 %v13657_v17, %v12665_v30  ;;  %v13659_v49 = vld [vmem:[#allocation81_spill] sm:$0xff] }
 0xbed   :  { %v6684_v37 = vadd.f32 %v6620_v61, %v4827_v13  ;;  %v6558_v28 = vadd.f32 %v12656_v56, %v6368_v26  ;;  %v6370_v24 = vpop.f32.mrb[231].mxu0  ;;  %v4853_v31 = vadd.f32 %v13659_v49, %v12665_v30 }
 0xbee   :  { %v6685_v23 = vadd.f32 %v6621_v14, %v4829_v50  ;;  %v6559_v11 = vadd.f32 %v12659_v63, %v6370_v24  ;;  %9051 = vmatprep.subr.bf16.mxu1 %v9050_v22  ;;  %v13660_v22 = vld [vmem:[#allocation82_spill] sm:$0xff]  ;;  %v13661_v24 = vld [vmem:[#allocation83_spill] sm:$0xff] }
 0xbef   :  { %v6622_v29 = vmax.f32 %v6558_v28, 0.0  ;;  %9053 = vmatpush1.bf16.msra.mxu1 %v9052_v16 }
 0xbf0   :  { %v6623_v2 = vmax.f32 %v6559_v11, 0.0  ;;  %v6374_v39 = vpop.f32.mrb[232].mxu0 }
 0xbf1   :  { %v6686_v43 = vadd.f32 %v6622_v29, %v4833_v58  ;;  %v6560_v12 = vadd.f32 %v12656_v56, %v6374_v39  ;;  %v6376_v21 = vpop.f32.mrb[233].mxu0  ;;  %v13662_v39 = vld [vmem:[#allocation28_spill] sm:$0xff] }
 0xbf2   :  { %v6687_v60 = vadd.f32 %v6623_v2, %v4835_v8  ;;  %v6561_v4 = vadd.f32 %v12659_v63, %v6376_v21 }
 0xbf3   :  { %v9056_v42 = vpack.c.bf16 %v6686_v43, %v6684_v37  ;;  %v6624_v40 = vmax.f32 %v6560_v12, 0.0  ;;  %v4857_v37 = vadd.f32 %v13660_v22, %v12662_v3  ;;  %v4863_v43 = vadd.f32 %v13662_v39, %v12662_v3 }
 0xbf4   :  { %v6625_v27 = vmax.f32 %v6561_v4, 0.0  ;;  %v6380_v7 = vpop.f32.mrb[234].mxu0  ;;  %v9054_v34 = vpack.c.bf16 %v6687_v60, %v6685_v23  ;;  %v4859_v23 = vadd.f32 %v13661_v24, %v12665_v30  ;;  %v13663_v60 = vld [vmem:[#allocation29_spill] sm:$0xff] }
 0xbf5   :  { %v6688_v36 = vadd.f32 %v6624_v40, %v4839_v53  ;;  %v6562_v10 = vadd.f32 %v12656_v56, %v6380_v7  ;;  %v6382_v62 = vpop.f32.mrb[235].mxu0  ;;  %v4865_v4 = vadd.f32 %v13663_v60, %v12665_v30 }
 0xbf6   :  { %v6689_v20 = vadd.f32 %v6625_v27, %v4841_v41  ;;  %v6563_v57 = vadd.f32 %v12659_v63, %v6382_v62  ;;  %9055 = vmatprep.subr.bf16.mxu1 %v9054_v34  ;;  %v13664_v34 = vld [vmem:[#allocation30_spill] sm:$0xff]  ;;  %v13665_v62 = vld [vmem:[#allocation31_spill] sm:$0xff] }
 0xbf7   :  { %v6626_v19 = vmax.f32 %v6562_v10, 0.0  ;;  %9057 = vmatpush1.bf16.msra.mxu1 %v9056_v42 }
 0xbf8   :  { %v6627_v52 = vmax.f32 %v6563_v57, 0.0  ;;  %v6386_v48 = vpop.f32.mrb[236].mxu0 }
 0xbf9   :  { %v6690_v59 = vadd.f32 %v6626_v19, %v4845_v25  ;;  %v6564_v51 = vadd.f32 %v12656_v56, %v6386_v48  ;;  %v6388_v35 = vpop.f32.mrb[237].mxu0  ;;  %v13666_v48 = vld [vmem:[#allocation32_spill] sm:$0xff] }
 0xbfa   :  { %v6691_v18 = vadd.f32 %v6627_v52, %v4847_v46  ;;  %v6565_v54 = vadd.f32 %v12659_v63, %v6388_v35 }
 0xbfb   :  { %v9060_v5 = vpack.c.bf16 %v6690_v59, %v6688_v36  ;;  %v6628_v6 = vmax.f32 %v6564_v51, 0.0  ;;  %v4869_v36 = vadd.f32 %v13664_v34, %v12662_v3  ;;  %v4875_v59 = vadd.f32 %v13666_v48, %v12662_v3 }
 0xbfc   :  { %v6629_v44 = vmax.f32 %v6565_v54, 0.0  ;;  %v6392_v13 = vpop.f32.mrb[238].mxu0  ;;  %v9058_v16 = vpack.c.bf16 %v6691_v18, %v6689_v20  ;;  %v4871_v20 = vadd.f32 %v13665_v62, %v12665_v30  ;;  %v13667_v18 = vld [vmem:[#allocation33_spill] sm:$0xff] }
 0xbfd   :  { %v6692_v61 = vadd.f32 %v6628_v6, %v4851_v38  ;;  %v6566_v15 = vadd.f32 %v12656_v56, %v6392_v13  ;;  %v6394_v50 = vpop.f32.mrb[239].mxu0  ;;  %v4877_v54 = vadd.f32 %v13667_v18, %v12665_v30 }
 0xbfe   :  { %v6693_v14 = vadd.f32 %v6629_v44, %v4853_v31  ;;  %v6567_v26 = vadd.f32 %v12659_v63, %v6394_v50  ;;  %9059 = vmatprep.subr.bf16.mxu1 %v9058_v16  ;;  %v13668_v16 = vld [vmem:[#allocation34_spill] sm:$0xff]  ;;  %v13669_v50 = vld [vmem:[#allocation35_spill] sm:$0xff] }
 0xbff   :  { %v6630_v28 = vmax.f32 %v6566_v15, 0.0  ;;  %9061 = vmatpush1.bf16.msra.mxu1 %v9060_v5 }
 0xc00   :  { %v6631_v11 = vmax.f32 %v6567_v26, 0.0  ;;  %v6398_v32 = vpop.f32.mrb[240].mxu0 }
 0xc01   :  { %v6694_v58 = vadd.f32 %v6630_v28, %v4857_v37  ;;  %v6568_v29 = vadd.f32 %v12656_v56, %v6398_v32  ;;  %v6400_v1 = vpop.f32.mrb[241].mxu0  ;;  %v13670_v32 = vld [vmem:[#allocation148_spill] sm:$0xff] }
 0xc02   :  { %v6695_v8 = vadd.f32 %v6631_v11, %v4859_v23  ;;  %v6569_v2 = vadd.f32 %v12659_v63, %v6400_v1 }
 0xc03   :  { %v9064_v12 = vpack.c.bf16 %v6694_v58, %v6692_v61  ;;  %v6632_v21 = vmax.f32 %v6568_v29, 0.0  ;;  %v4881_v61 = vadd.f32 %v13668_v16, %v12662_v3  ;;  %v4887_v58 = vadd.f32 %v13670_v32, %v12662_v3 }
 0xc04   :  { %v6633_v55 = vmax.f32 %v6569_v2, 0.0  ;;  %v6404_v53 = vpop.f32.mrb[242].mxu0  ;;  %v9062_v42 = vpack.c.bf16 %v6695_v8, %v6693_v14  ;;  %v4883_v14 = vadd.f32 %v13669_v50, %v12665_v30  ;;  %v13671_v8 = vld [vmem:[#allocation149_spill] sm:$0xff] }
 0xc05   :  { %v6696_v40 = vadd.f32 %v6632_v21, %v4863_v43  ;;  %v6570_v45 = vadd.f32 %v12656_v56, %v6404_v53  ;;  %v6406_v41 = vpop.f32.mrb[243].mxu0  ;;  %v4889_v2 = vadd.f32 %v13671_v8, %v12665_v30 }
 0xc06   :  { %v6697_v27 = vadd.f32 %v6633_v55, %v4865_v4  ;;  %v6571_v7 = vadd.f32 %v12659_v63, %v6406_v41  ;;  %9063 = vmatprep.subr.bf16.mxu1 %v9062_v42  ;;  %v13672_v42 = vld [vmem:[#allocation150_spill] sm:$0xff]  ;;  %v13673_v41 = vld [vmem:[#allocation151_spill] sm:$0xff] }
 0xc07   :  { %v6634_v10 = vmax.f32 %v6570_v45, 0.0  ;;  %9065 = vmatpush1.bf16.msra.mxu1 %v9064_v12 }
 0xc08   :  { %v6635_v57 = vmax.f32 %v6571_v7, 0.0  ;;  %v6410_v0 = vpop.f32.mrb[244].mxu0 }
 0xc09   :  { %v6698_v25 = vadd.f32 %v6634_v10, %v4869_v36  ;;  %v6572_v19 = vadd.f32 %v12656_v56, %v6410_v0  ;;  %v6412_v17 = vpop.f32.mrb[245].mxu0  ;;  %v13674_v0 = vld [vmem:[#allocation152_spill] sm:$0xff] }
 0xc0a   :  { %v6699_v46 = vadd.f32 %v6635_v57, %v4871_v20  ;;  %v6573_v52 = vadd.f32 %v12659_v63, %v6412_v17 }
 0xc0b   :  { %v9068_v51 = vpack.c.bf16 %v6698_v25, %v6696_v40  ;;  %v6636_v35 = vmax.f32 %v6572_v19, 0.0  ;;  %v4893_v40 = vadd.f32 %v13672_v42, %v12662_v3  ;;  %v4899_v25 = vadd.f32 %v13674_v0, %v12662_v3 }
 0xc0c   :  { %v6637_v47 = vmax.f32 %v6573_v52, 0.0  ;;  %v6416_v38 = vpop.f32.mrb[246].mxu0  ;;  %v9066_v5 = vpack.c.bf16 %v6699_v46, %v6697_v27  ;;  %v4895_v27 = vadd.f32 %v13673_v41, %v12665_v30  ;;  %v13675_v46 = vld [vmem:[#allocation84_spill] sm:$0xff] }
 0xc0d   :  { %v6700_v6 = vadd.f32 %v6636_v35, %v4875_v59  ;;  %v6574_v49 = vadd.f32 %v12656_v56, %v6416_v38  ;;  %v6418_v31 = vpop.f32.mrb[247].mxu0  ;;  %v4901_v52 = vadd.f32 %v13675_v46, %v12665_v30 }
 0xc0e   :  { %v6701_v44 = vadd.f32 %v6637_v47, %v4877_v54  ;;  %v6575_v13 = vadd.f32 %v12659_v63, %v6418_v31  ;;  %9067 = vmatprep.subr.bf16.mxu1 %v9066_v5  ;;  %v13676_v5 = vld [vmem:[#allocation85_spill] sm:$0xff]  ;;  %v13677_v31 = vld [vmem:[#allocation86_spill] sm:$0xff] }
 0xc0f   :  { %v6638_v15 = vmax.f32 %v6574_v49, 0.0  ;;  %9069 = vmatpush1.bf16.msra.mxu1 %v9068_v51 }
 0xc10   :  { %v6639_v26 = vmax.f32 %v6575_v13, 0.0  ;;  %v6422_v22 = vpop.f32.mrb[248].mxu0 }
 0xc11   :  { %v6702_v37 = vadd.f32 %v6638_v15, %v4881_v61  ;;  %v6576_v28 = vadd.f32 %v12656_v56, %v6422_v22  ;;  %v6424_v24 = vpop.f32.mrb[249].mxu0 }
 0xc12   :  { %v6703_v23 = vadd.f32 %v6639_v26, %v4883_v14  ;;  %v6577_v11 = vadd.f32 %v12659_v63, %v6424_v24 }
 0xc13   :  { %v9072_v29 = vpack.c.bf16 %v6702_v37, %v6700_v6  ;;  %v6640_v1 = vmax.f32 %v6576_v28, 0.0  ;;  %v4905_v6 = vadd.f32 %v13676_v5, %v12662_v3 }
 0xc14   :  { %v6641_v39 = vmax.f32 %v6577_v11, 0.0  ;;  %v6428_v43 = vpop.f32.mrb[250].mxu0  ;;  %v9070_v12 = vpack.c.bf16 %v6703_v23, %v6701_v44  ;;  %v4907_v44 = vadd.f32 %v13677_v31, %v12665_v30 }
 0xc15   :  { %v6704_v21 = vadd.f32 %v6640_v1, %v4887_v58  ;;  %v6578_v60 = vadd.f32 %v12656_v56, %v6428_v43  ;;  %v6430_v4 = vpop.f32.mrb[251].mxu0 }
 0xc16   :  { %v6705_v55 = vadd.f32 %v6641_v39, %v4889_v2  ;;  %v6579_v53 = vadd.f32 %v12659_v63, %v6430_v4  ;;  %9071 = vmatprep.subr.bf16.mxu1 %v9070_v12 }
 0xc17   :  { %v6642_v45 = vmax.f32 %v6578_v60, 0.0  ;;  %9073 = vmatpush1.bf16.msra.mxu1 %v9072_v29 }
 0xc18   :  { %v6643_v7 = vmax.f32 %v6579_v53, 0.0  ;;  %v6434_v34 = vpop.f32.mrb[252].mxu0 }
 0xc19   :  { %v6706_v36 = vadd.f32 %v6642_v45, %v4893_v40  ;;  %v6580_v10 = vadd.f32 %v12656_v56, %v6434_v34  ;;  %v6436_v62 = vpop.f32.mrb[253].mxu0 }
 0xc1a   :  { %v6707_v20 = vadd.f32 %v6643_v7, %v4895_v27  ;;  %v6581_v57 = vadd.f32 %v12659_v63, %v6436_v62 }
 0xc1b   :  { %v9076_v19 = vpack.c.bf16 %v6706_v36, %v6704_v21  ;;  %v6644_v17 = vmax.f32 %v6580_v10, 0.0 }
 0xc1c   :  { %v6645_v48 = vmax.f32 %v6581_v57, 0.0  ;;  %v6440_v59 = vpop.f32.mrb[254].mxu0  ;;  %v9074_v51 = vpack.c.bf16 %v6707_v20, %v6705_v55 }
 0xc1d   :  { %v6708_v35 = vadd.f32 %v6644_v17, %v4899_v25  ;;  %v6582_v18 = vadd.f32 %v12656_v56, %v6440_v59  ;;  %v6442_v54 = vpop.f32.mrb[255].mxu0 }
 0xc1e   :  { %v6709_v47 = vadd.f32 %v6645_v48, %v4901_v52  ;;  %v6583_v38 = vadd.f32 %v12659_v63, %v6442_v54  ;;  %9075 = vmatprep.subr.bf16.mxu1 %v9074_v51 }
 0xc1f   :  { %v6646_v49 = vmax.f32 %v6582_v18, 0.0  ;;  %9077 = vmatpush1.bf16.msra.mxu1 %v9076_v19 }
 0xc20   :  { %v6647_v13 = vmax.f32 %v6583_v38, 0.0 }
 0xc21   :  { %v6710_v16 = vadd.f32 %v6646_v49, %v4905_v6 }
 0xc22   :  { %v6711_v61 = vadd.f32 %v6647_v13, %v4907_v44 }
 0xc23   :  { %v9080_v15 = vpack.c.bf16 %v6710_v16, %v6708_v35 }
 0xc24   :  { %v9078_v50 = vpack.c.bf16 %v6711_v61, %v6709_v47 }
 0xc26   :  { %9079 = vmatprep.subr.bf16.mxu1 %v9078_v50 }
 0xc27   :  { %9081 = vmatpush1.bf16.msra.mxu1 %v9080_v15 }
 0xc2a   :  { %6789 = vmatmul.mubr.f32.vlgmr.msra.gmra.mrb[64].mxu1 %v12678_v33 }
 0xcfd   :  { %v12867_v56 = vpop.f32.mrb[64].mxu1 }
 0xcfe   :  { %v6792_v63 = vpop.f32.mrb[65].mxu1 }
 0xcff   :  { %9520 = dma.done.wait [#allocation8 + $0x2], 4096 }
 0xd00   :  { %9521 = vsyncadd [#allocation8 + $0x2], 4294963200  ;;  %6901 = vmatprep.mubr.f32.mxu1 %v6792_v63  ;;  %v6814_v3 = vld [vmem:[#allocation4 + $0x80] sm:$0xff]  ;;  %v6815_v14 = vld [vmem:[#allocation4 + $0x88] sm:$0xff]  ;;  %v13678_v5 = vmov 0.0|0.0   ;;  %vm9530_vm2 = vmmov 0  }
 0xd01   :  { %v6798_v26 = vld [vmem:[#allocation4] sm:$0xff]  ;;  %v9082_v22 = vpack.c.bf16 %v6815_v14, %v6814_v3  ;;  %v6799_v30 = vld [vmem:[#allocation4 + $0x8] sm:$0xff]  ;;  %v6816_v37 = vld [vmem:[#allocation4 + $0x90] sm:$0xff]  ;;  %vm7001_vm3 = vcmask 156672  }
 0xd02   :  { %v6817_v28 = vld [vmem:[#allocation4 + $0x98] sm:$0xff]  ;;  %v9084_v24 = vpack.c.bf16 %v6799_v30, %v6798_v26  ;;  %v6800_v11 = vld [vmem:[#allocation4 + $0x10] sm:$0xff]  ;;  %v6818_v58 = vld [vmem:[#allocation4 + $0xa0] sm:$0xff] }
 0xd03   :  { %v9086_v23 = vpack.c.bf16 %v6817_v28, %v6816_v37  ;;  %v6801_v32 = vld [vmem:[#allocation4 + $0x18] sm:$0xff]  ;;  %9083 = vmatprep.subr.bf16.mxu1 %v9082_v22  ;;  %v6819_v33 = vld [vmem:[#allocation4 + $0xa8] sm:$0xff]  ;;  %v6802_v8 = vld [vmem:[#allocation4 + $0x20] sm:$0xff] }
 0xd04   :  { %9085 = vmatpush3.bf16.msra.mxu1 %v9084_v24  ;;  %v9088_v29 = vpack.c.bf16 %v6801_v32, %v6800_v11  ;;  %v9090_v1 = vpack.c.bf16 %v6819_v33, %v6818_v58  ;;  %v6803_v2 = vld [vmem:[#allocation4 + $0x28] sm:$0xff]  ;;  %v6820_v39 = vld [vmem:[#allocation4 + $0xb0] sm:$0xff]  ;;  %v6821_v43 = vld [vmem:[#allocation4 + $0xb8] sm:$0xff] }
 0xd05   :  { %9087 = vmatprep.subr.bf16.mxu1 %v9086_v23  ;;  %v9092_v12 = vpack.c.bf16 %v6803_v2, %v6802_v8  ;;  %v9094_v21 = vpack.c.bf16 %v6821_v43, %v6820_v39  ;;  %v6804_v60 = vld [vmem:[#allocation4 + $0x30] sm:$0xff]  ;;  %v6805_v4 = vld [vmem:[#allocation4 + $0x38] sm:$0xff]  ;;  %v6822_v55 = vld [vmem:[#allocation4 + $0xc0] sm:$0xff] }
 0xd06   :  { %v6823_v53 = vld [vmem:[#allocation4 + $0xc8] sm:$0xff]  ;;  %v9096_v42 = vpack.c.bf16 %v6805_v4, %v6804_v60  ;;  %v6806_v45 = vld [vmem:[#allocation4 + $0x40] sm:$0xff]  ;;  %v6824_v27 = vld [vmem:[#allocation4 + $0xd0] sm:$0xff] }
 0xd07   :  { %v9098_v40 = vpack.c.bf16 %v6823_v53, %v6822_v55  ;;  %v6807_v41 = vld [vmem:[#allocation4 + $0x48] sm:$0xff]  ;;  %v6825_v7 = vld [vmem:[#allocation4 + $0xd8] sm:$0xff]  ;;  %v6808_v10 = vld [vmem:[#allocation4 + $0x50] sm:$0xff] }
 0xd08   :  { %9089 = vmatpush3.bf16.msra.mxu1 %v9088_v29  ;;  %v9100_v34 = vpack.c.bf16 %v6807_v41, %v6806_v45  ;;  %v9102_v36 = vpack.c.bf16 %v6825_v7, %v6824_v27  ;;  %v6809_v62 = vld [vmem:[#allocation4 + $0x58] sm:$0xff]  ;;  %v6826_v20 = vld [vmem:[#allocation4 + $0xe0] sm:$0xff]  ;;  %v6827_v57 = vld [vmem:[#allocation4 + $0xe8] sm:$0xff] }
 0xd09   :  { %9091 = vmatprep.subr.bf16.mxu1 %v9090_v1  ;;  %v9104_v0 = vpack.c.bf16 %v6809_v62, %v6808_v10  ;;  %v9106_v25 = vpack.c.bf16 %v6827_v57, %v6826_v20  ;;  %v6810_v19 = vld [vmem:[#allocation4 + $0x60] sm:$0xff]  ;;  %v6811_v17 = vld [vmem:[#allocation4 + $0x68] sm:$0xff]  ;;  %v6828_v46 = vld [vmem:[#allocation4 + $0xf0] sm:$0xff] }
 0xd0a   :  { %v6829_v52 = vld [vmem:[#allocation4 + $0xf8] sm:$0xff]  ;;  %v9108_v48 = vpack.c.bf16 %v6811_v17, %v6810_v19  ;;  %v6812_v51 = vld [vmem:[#allocation4 + $0x70] sm:$0xff]  ;;  %v6908_v54 = vld [vmem:[%s12956_s11] sm:$0xff] }
 0xd0b   :  { %v9110_v59 = vpack.c.bf16 %v6829_v52, %v6828_v46  ;;  %v6813_v35 = vld [vmem:[#allocation4 + $0x78] sm:$0xff]  ;;  %v6909_v47 = vld [vmem:[%s12956_s11 + $0x8] sm:$0xff]  ;;  %v6910_v6 = vld [vmem:[%s12956_s11 + $0x10] sm:$0xff] }
 0xd0c   :  { %9093 = vmatpush3.bf16.msra.mxu1 %v9092_v12  ;;  %v9112_v18 = vpack.c.bf16 %v6813_v35, %v6812_v51  ;;  %v9115_v38 = vpack.c.bf16 %v6909_v47, %v6908_v54  ;;  %v6911_v49 = vld [vmem:[%s12956_s11 + $0x18] sm:$0xff]  ;;  %v6912_v44 = vld [vmem:[%s12956_s11 + $0x20] sm:$0xff]  ;;  %v6913_v13 = vld [vmem:[%s12956_s11 + $0x28] sm:$0xff] }
 0xd0d   :  { %9095 = vmatprep.subr.bf16.mxu1 %v9094_v21  ;;  %v9118_v31 = vpack.c.bf16 %v6911_v49, %v6910_v6  ;;  %v9121_v16 = vpack.c.bf16 %v6913_v13, %v6912_v44  ;;  %v6914_v61 = vld [vmem:[%s12956_s11 + $0x30] sm:$0xff]  ;;  %v6915_v15 = vld [vmem:[%s12956_s11 + $0x38] sm:$0xff]  ;;  %v6917_v63 = vld [vmem:[%s12956_s11 + $0x48] sm:$0xff] }
 0xd0e   :  { %v9124_v50 = vpack.c.bf16 %v6915_v15, %v6914_v61  ;;  %v6918_v14 = vld [vmem:[%s12956_s11 + $0x50] sm:$0xff]  ;;  %v6919_v26 = vld [vmem:[%s12956_s11 + $0x58] sm:$0xff]  ;;  %v6920_v30 = vld [vmem:[%s12956_s11 + $0x60] sm:$0xff] }
 0xd0f   :  { %v9130_v22 = vpack.c.bf16 %v6919_v26, %v6918_v14  ;;  %v6921_v37 = vld [vmem:[%s12956_s11 + $0x68] sm:$0xff]  ;;  %v6922_v24 = vld [vmem:[%s12956_s11 + $0x70] sm:$0xff]  ;;  %v6923_v23 = vld [vmem:[%s12956_s11 + $0x78] sm:$0xff] }
 0xd10   :  { %9097 = vmatpush3.bf16.msra.mxu1 %v9096_v42  ;;  %v9133_v28 = vpack.c.bf16 %v6921_v37, %v6920_v30  ;;  %v9136_v11 = vpack.c.bf16 %v6923_v23, %v6922_v24  ;;  %v7280_v58 = vld [vmem:[%s12955_s10] ss:$0 sm:$0xff] }
 0xd11   :  { %9099 = vmatprep.subr.bf16.mxu1 %v9098_v40  ;;  %v7281_v2 = vld [vmem:[%s12957_s12] ss:$0 sm:$0xff] }
 0xd14   :  { %9101 = vmatpush3.bf16.msra.mxu1 %v9100_v34 }
 0xd15   :  { %9103 = vmatprep.subr.bf16.mxu1 %v9102_v36 }
 0xd18   :  { %9105 = vmatpush3.bf16.msra.mxu1 %v9104_v0 }
 0xd19   :  { %9107 = vmatprep.subr.bf16.mxu1 %v9106_v25 }
 0xd1c   :  { %9109 = vmatpush3.bf16.msra.mxu1 %v9108_v48 }
 0xd1d   :  { %9111 = vmatprep.subr.bf16.mxu1 %v9110_v59 }
 0xd20   :  { %9113 = vmatpush3.bf16.msra.mxu1 %v9112_v18 }
 0xd21   :  { %9114 = vmatprep.subr.bf16.mxu1 %v13678_v5 }
 0xd23   :  { %6902 = vmatmul.mubr.f32.vlgmr.msra.gmra.mrb[66].mxu1 %v12867_v56  ;;  %v6916_v56 = vld [vmem:[%s12956_s11 + $0x40] sm:$0xff]  ;;  %s9531_s11 = smov [#allocation14]  }
 0xd24   :  { %9116 = vmatpush3.bf16.msra.mxu1 %v9115_v38  ;;  %v9127_v3 = vpack.c.bf16 %v6917_v63, %v6916_v56  ;;  %8439 = vmatprep.mubr.msk.f32.mxu1 %vm9530_vm2, %v13391_v9  ;;  %s7009_s15 = sshll.u32 %s9531_s11, 4  ;;  %s7010_s15 = int_to_ptr.vmem [resolvable:$true] %s7009_s15 }
 0xd25   :  { %9117 = vmatprep.subr.bf16.mxu1 %v13678_v5  ;;  %s9490_s5 = scalar_lea.vmem %s7010_s15, 32  ;;  %p9495_p5 = scmp.lt.s32.totalorder %s7010_s15, %s7010_s15 }
 0xd26   :  { %p9491_p4 = scmp.ne.s32.totalorder %s7010_s15, %s9490_s5  ;;  %p9496_p6 = scmp.lt.s32.totalorder %s9490_s5, %s9490_s5 }
 0xd28   :  { %9119 = vmatpush3.bf16.msra.mxu1 %v9118_v31  ;;  %p9497_p7 = por %p9496_p6, %p9495_p5 }
 0xd29   :  { %9120 = vmatprep.subr.bf16.mxu1 %v13678_v5 }
 0xd2a   :  { %p9498_p8 = pnand %p9497_p7, %p9491_p4 }
 0xd2c   :  { %9122 = vmatpush3.bf16.msra.mxu1 %v9121_v16 }
 0xd2d   :  { %9123 = vmatprep.subr.bf16.mxu1 %v13678_v5 }
 0xd30   :  { %9125 = vmatpush3.bf16.msra.mxu1 %v9124_v50 }
 0xd31   :  { %9126 = vmatprep.subr.bf16.mxu1 %v13678_v5 }
 0xd34   :  { %9128 = vmatpush3.bf16.msra.mxu1 %v9127_v3 }
 0xd35   :  { %9129 = vmatprep.subr.bf16.mxu1 %v13678_v5 }
 0xd38   :  { %9131 = vmatpush3.bf16.msra.mxu1 %v9130_v22 }
 0xd39   :  { %9132 = vmatprep.subr.bf16.mxu1 %v13678_v5 }
 0xd3c   :  { %9134 = vmatpush3.bf16.msra.mxu1 %v9133_v28 }
 0xd3d   :  { %9135 = vmatprep.subr.bf16.mxu1 %v13678_v5 }
 0xd40   :  { %9137 = vmatpush3.bf16.msra.mxu1 %v9136_v11 }
 0xdf6   :  { %v7727_v32 = vpop.f32.mrb[66].mxu1 }
 0xdf7   :  { %v7728_v33 = vpop.f32.mrb[67].mxu1 }
 0xdf8   :  { %v7729_v29 = vadd.f32 %v7728_v33, %v7727_v32 }
 0xdfa   :  { %v6904_v1 = vadd.f32 %v7729_v29, %v7280_v58 }
 0xdfc   :  { %v6907_v8 = vmax.f32 %v6904_v1, 0.0 }
 0xdfe   :  { %8440 = vmatmul.mubr.f32.vlgmr.msra.gmra.mrb[68].mxu1 %v6907_v8 }
 0xed1   :  { %v6997_v39 = vpop.f32.mrb[68].mxu1 }
 0xed2   :  { %v6998_v43 = vadd.f32 %v7281_v2, %v6997_v39  ;;  %v8441_v9 = vpop.f32.mrb[69].mxu1 }
 0xed4   :  { %7002 = vst.msk [vmem:[#allocation14] sm:$0x3] %vm7001_vm3, %v6998_v43 }
 0xed5   :  { %9501 = shalt.err (!%p9498_p8)
}
 0xed6   :  { %s9502_s17 = scalar_lea.hbm %s12958_s13, 32 }
 0xed7   :  { %p9503_p9 = scmp.ne.s32.totalorder %s12958_s13, %s9502_s17  ;;  %p9506_p10 = scmp.lt.u32.totalorder %s9502_s17, %s12958_s13 }
 0xed9   :  { %p9508_p11 = pnand %p9506_p10, %p9503_p9 }
 0xedb   :  { %9511 = shalt.err (!%p9508_p11)
}
 0xedc   :  { %7012 = dma.vmem_to_hbm [thread:$0]  %s7010_s15, 32, %s12958_s13, [#allocation11]  }
 0xedd   :  { %9522 = dma.done.wait [#allocation11], 32  }
 0xede   :  { %9523 = vsyncadd [#allocation11], 4294967264 }
 0xedf   :  { %7016 = vsyncpa [#allocation10], 1 }
 0xee0   :  { %7017 = vsyncpa [#allocation13], 1 }
 0xee1   :  { %7018 = vsyncpa [#allocation11], 1 }
 0xee2   :  { %7019 = vsyncmov [#allocation8] }
 0xee5   :  { %s7020_s6 = vpop.sfrf %7019 }
 0xee6   :  { %p7282_p12 = scmp.ne.s32.totalorder %s7020_s6, 0 }
 0xee8   :  { %7024 = shalt.err (%p7282_p12)  }
 0xee9   :  { %7026 = vsyncmov [#allocation8 + $0x1] }
 0xeec   :  { %s7027_s9 = vpop.sfrf %7026 }
 0xeed   :  { %p7283_p13 = scmp.ne.s32.totalorder %s7027_s9, 0 }
 0xeef   :  { %7031 = shalt.err (%p7283_p13)  }
 0xef0   :  { %7033 = vsyncmov [#allocation8 + $0x2] }
 0xef3   :  { %s7034_s3 = vpop.sfrf %7033 }
 0xef4   :  { %p7284_p0 = scmp.ne.s32.totalorder %s7034_s3, 0 }
 0xef6   :  { %7038 = shalt.err (%p7284_p0)  }

</bundles_post_ra>
